<compile_context>
chip_gen: v6e
topology: v6e:2x2x1
jax: 0.10.0
libtpu: 0.0.40
codegen_flags: <defaults>
</compile_context>

<pallas_src>
import functools
import math

import jax
import jax.numpy as jnp
from jax import lax
from jax.experimental import pallas as pl
from jax.experimental.pallas import tpu as pltpu

EPS = 1e-5  # PyTorch BatchNorm2d default eps
HIGHEST = lax.Precision.HIGHEST


def _sigmoid(v):
    # tanh goes to the EUP (its own VLIW slot) and avoids the full-tensor VALU divide
    # of 1/(1+exp(-v)); mathematically identical to the logistic function.
    return 0.5 * (jnp.tanh(0.5 * v) + 1.0)


def _silu(v):
    return v * _sigmoid(v)


# --------------------------------------------------------------------------
# Fused Pallas kernel: the whole MBConv stack for one batch element.
# --------------------------------------------------------------------------
def fused_mbconv_kernel(x_ref, smat_ref, dw_w_ref, dw_sh_ref,
                        se_w1t_ref, se_b1_ref, se_w2_ref, se_b2_ref,
                        pw_w_ref, pw_sh_ref, out_ref, *, cfgs):
    """cfgs: tuple of (out_channels, skip) per block (static)."""
    act = x_ref[0]                                   # (C, HW), lane-dense

    for l, (co, skip) in enumerate(cfgs):            # static unroll over blocks
        res = act

        # ---- depthwise 3x3 conv (BN + bias folded) via 9 shift-matrix matmuls ----
        acc = jnp.zeros(act.shape, jnp.float32)
        for t in range(9):
            xt = act * dw_w_ref[l * 9 + t]           # (C,1) per-channel tap weight
            acc = acc + jnp.dot(xt, smat_ref[t],
                                preferred_element_type=jnp.float32)
        y = acc + dw_sh_ref[l]                       # folded bias + BN shift
        y = _silu(y)

        # ---- Squeeze-Excitation -------------------------------------------------
        pooled = jnp.mean(y, axis=1, keepdims=True)                       # (C, 1)
        z1 = (jnp.sum(se_w1t_ref[l] * pooled, axis=0, keepdims=True)
              + se_b1_ref[l])                                             # (1, Cr)
        z1 = _silu(z1)
        z2 = (jnp.sum(se_w2_ref[l] * z1, axis=1, keepdims=True)
              + se_b2_ref[l])                                             # (C, 1)
        y = y * _sigmoid(z2)

        # ---- 1x1 projection conv + folded BatchNorm (MXU matmul) ----------------
        out = jnp.dot(pw_w_ref[l, :co, :], y,
                      preferred_element_type=jnp.float32) + pw_sh_ref[l, :co]
        if skip:                                     # StochasticDepth == identity (eval)
            out = out + res
        act = out

    out_ref[0] = act.astype(out_ref.dtype)


# --------------------------------------------------------------------------
# Parameter construction, BN folding and packing (plain-JAX glue)
# --------------------------------------------------------------------------
def make_shift_mats(H, W):
    """(9, HW, HW) 0/1 matrices: S_t[j, i] = 1 iff j is tap t's (zero-padded) neighbor
    of output position i.  Folds both the neighbor gather and the zero padding of the
    3x3 / stride-1 / pad-1 depthwise conv into MXU matmuls."""
    HW = H * W
    idx = jnp.arange(HW)
    yy, xx = idx // W, idx % W
    mats = []
    for dy in (-1, 0, 1):
        for dx in (-1, 0, 1):
            ny, nx = yy + dy, xx + dx
            valid = (ny >= 0) & (ny < H) & (nx >= 0) & (nx < W)
            src = ny * W + nx
            S = (jnp.arange(HW)[:, None] == src[None, :]) & valid[None, :]
            mats.append(S.astype(jnp.float32))
    return jnp.stack(mats)                            # (9, HW, HW)


def make_raw_params(key, ci, co):
    cr = int(ci // 4)
    ks = jax.random.split(key, 16)

    def n(k, shape, scale=1.0):
        return scale * jax.random.normal(k, shape, jnp.float32)

    return dict(
        w_dw=n(ks[0], (ci, 3, 3), 0.3), b_dw=n(ks[1], (ci,), 0.1),
        g1=1.0 + n(ks[2], (ci,), 0.1), be1=n(ks[3], (ci,), 0.1),
        m1=n(ks[4], (ci,), 0.1), v1=0.5 + jax.random.uniform(ks[5], (ci,), jnp.float32),
        w1=n(ks[6], (cr, ci), 0.3), b1=n(ks[7], (cr,), 0.1),
        w2=n(ks[8], (ci, cr), 0.3), b2=n(ks[9], (ci,), 0.1),
        w_pw=n(ks[10], (co, ci), 0.3), b_pw=n(ks[11], (co,), 0.1),
        g2=1.0 + n(ks[12], (co,), 0.1), be2=n(ks[13], (co,), 0.1),
        m2=n(ks[14], (co,), 0.1), v2=0.5 + jax.random.uniform(ks[15], (co,), jnp.float32),
    )


def pack_block(p, co_max):
    """Fold BN(eval)+bias into the conv weights / per-channel shifts; pad pw to co_max."""
    ci = p["w_dw"].shape[0]
    co = p["w_pw"].shape[0]
    s1 = p["g1"] / jnp.sqrt(p["v1"] + EPS)
    sh1 = p["be1"] + (p["b_dw"] - p["m1"]) * s1
    s2 = p["g2"] / jnp.sqrt(p["v2"] + EPS)
    sh2 = p["be2"] + (p["b_pw"] - p["m2"]) * s2
    dw_w = (p["w_dw"].reshape(ci, 9) * s1[:, None]).T[..., None]        # (9, ci, 1), scaled
    pw_w = jnp.pad(p["w_pw"] * s2[:, None], ((0, co_max - co), (0, 0)))  # (co_max, ci)
    pw_sh = jnp.pad(sh2, (0, co_max - co))[:, None]                      # (co_max, 1)
    return dict(
        dw_w=dw_w, dw_shift=sh1[:, None],                                # (ci,1)
        se_w1t=p["w1"].T, se_b1=p["b1"][None, :],                        # (ci,cr), (1,cr)
        se_w2=p["w2"], se_b2=p["b2"][:, None],                           # (ci,cr), (ci,1)
        pw_w=pw_w, pw_shift=pw_sh,
    )


# --------------------------------------------------------------------------
# MBConv_Layers forward (Pallas) and pure-JAX reference
# --------------------------------------------------------------------------
def pallas_forward(x_seq, blocks):
    """x_seq: (B, N, C) tokens; blocks: list of (raw_params, skip)."""
    B, N, C = x_seq.shape
    H = W = int(math.isqrt(N))
    HW = H * W
    L = len(blocks)
    cfgs = tuple((int(raw["w_pw"].shape[0]), bool(skip)) for raw, skip in blocks)
    Cmax = max(co for co, _ in cfgs)
    Cout = cfgs[-1][0]
    Cr = int(blocks[0][0]["w1"].shape[0])

    packed = [pack_block(raw, Cmax) for raw, _ in blocks]
    stk = {k: jnp.stack([p[k] for p in packed]) for k in packed[0]}
    dw_w_flat = stk["dw_w"].reshape(L * 9, C, 1)      # rank-3 (L*9, C, 1)
    smat = make_shift_mats(H, W)

    # 'b (h w) c -> b c (h w)'  (lane-dense layout for the kernel)
    x = jnp.transpose(x_seq, (0, 2, 1))

    const3 = lambda b: (0, 0, 0)
    kernel = functools.partial(fused_mbconv_kernel, cfgs=cfgs)
    out = pl.pallas_call(
        kernel,
        out_shape=jax.ShapeDtypeStruct((B, Cout, HW), jnp.float32),
        grid=(B,),
        in_specs=[
            pl.BlockSpec((1, C, HW), lambda b: (b, 0, 0)),        # x
            pl.BlockSpec((9, HW, HW), const3),                    # shift matrices
            pl.BlockSpec((L * 9, C, 1), const3),                  # dw weights (scaled)
            pl.BlockSpec((L, C, 1), const3),                      # dw shift
            pl.BlockSpec((L, C, Cr), const3),                     # SE w1^T
            pl.BlockSpec((L, 1, Cr), const3),                     # SE b1
            pl.BlockSpec((L, C, Cr), const3),                     # SE w2
            pl.BlockSpec((L, C, 1), const3),                      # SE b2
            pl.BlockSpec((L, Cmax, C), const3),                   # pw weights (scaled, padded)
            pl.BlockSpec((L, Cmax, 1), const3),                   # pw shift (padded)
        ],
        out_specs=pl.BlockSpec((1, Cout, HW), lambda b: (b, 0, 0)),
        compiler_params=pltpu.CompilerParams(
            dimension_semantics=("parallel",)),                   # batch across cores
    )(x, smat, dw_w_flat, stk["dw_shift"], stk["se_w1t"], stk["se_b1"],
      stk["se_w2"], stk["se_b2"], stk["pw_w"], stk["pw_shift"])

    # 'b c (h w) -> b (h w) c'
    return jnp.transpose(out, (0, 2, 1))


def ref_mbconv(x, p, skip):
    ci = p["w_dw"].shape[0]
    y = lax.conv_general_dilated(
        x, p["w_dw"][:, None, :, :], (1, 1), ((1, 1), (1, 1)),
        feature_group_count=ci,
        dimension_numbers=("NCHW", "OIHW", "NCHW"),
        precision=HIGHEST) + p["b_dw"][None, :, None, None]
    y = ((y - p["m1"][None, :, None, None]) / jnp.sqrt(p["v1"] + EPS)[None, :, None, None]
         * p["g1"][None, :, None, None] + p["be1"][None, :, None, None])
    y = y * (1.0 / (1.0 + jnp.exp(-y)))
    s = jnp.mean(y, axis=(2, 3), keepdims=True)
    z1 = jnp.einsum("rc,bcij->brij", p["w1"], s,
                    precision=HIGHEST) + p["b1"][None, :, None, None]
    z1 = z1 * (1.0 / (1.0 + jnp.exp(-z1)))
    z2 = jnp.einsum("cr,brij->bcij", p["w2"], z1,
                    precision=HIGHEST) + p["b2"][None, :, None, None]
    y = y * (1.0 / (1.0 + jnp.exp(-z2)))
    o = jnp.einsum("oc,bchw->bohw", p["w_pw"], y,
                   precision=HIGHEST) + p["b_pw"][None, :, None, None]
    o = ((o - p["m2"][None, :, None, None]) / jnp.sqrt(p["v2"] + EPS)[None, :, None, None]
         * p["g2"][None, :, None, None] + p["be2"][None, :, None, None])
    if skip:
        o = o + x
    return o


def ref_forward(x_seq, blocks):
    B, N, C = x_seq.shape
    H = W = int(math.isqrt(N))
    x = jnp.transpose(x_seq, (0, 2, 1)).reshape(B, C, H, W)
    for raw, skip in blocks:
        x = ref_mbconv(x, raw, skip)
    B2, C2, H2, W2 = x.shape
    return jnp.transpose(x.reshape(B2, C2, H2 * W2), (0, 2, 1))


# --------------------------------------------------------------------------
if __name__ == "__main__":
    # MBConv_Layers(in_chan=4, out_chan=8, kernel_size=3, stride=1, padding=1,
    #               expansion=1, jumlah=2), eval mode.
    B, C_in, H, W = 2, 4, 16, 16
    N = H * W
    jumlah, out_chan = 2, 8

    key = jax.random.PRNGKey(0)
    kx, kparam = jax.random.split(key)
    x_seq = jax.random.normal(kx, (B, N, C_in), jnp.float32)   # token input (B, N, C)

    keys = jax.random.split(kparam, jumlah + 1)
    blocks = []
    for i in range(jumlah):
        blocks.append((make_raw_params(keys[i], C_in, C_in), True))   # skip: in==out, stride==1
    blocks.append((make_raw_params(keys[jumlah], C_in, out_chan), False))  # up_chan MBConv

    out = pallas_forward(x_seq, blocks)
    jax.block_until_ready(out)

    ref = ref_forward(x_seq, blocks)
    jax.block_until_ready(ref)
    assert out.shape == (B, N, out_chan), out.shape
    err = float(jnp.max(jnp.abs(out - ref)))
    assert err < 5e-3, f"max abs err {err}"
    print("KERNEL_OK")
</pallas_src>

<mosaic_0001>
module attributes {stable_mosaic.version = 11 : i64} {
  func.func @fused_mbconv_kernel(%arg0: i32, %arg1: memref<1x4x256xf32, #tpu.memory_space<vmem>>, %arg2: memref<9x256x256xf32, #tpu.memory_space<vmem>>, %arg3: memref<27x4x1xf32, #tpu.memory_space<vmem>>, %arg4: memref<3x4x1xf32, #tpu.memory_space<vmem>>, %arg5: memref<3x4x1xf32, #tpu.memory_space<vmem>>, %arg6: memref<3x1x1xf32, #tpu.memory_space<vmem>>, %arg7: memref<3x4x1xf32, #tpu.memory_space<vmem>>, %arg8: memref<3x4x1xf32, #tpu.memory_space<vmem>>, %arg9: memref<3x8x4xf32, #tpu.memory_space<vmem>>, %arg10: memref<3x8x1xf32, #tpu.memory_space<vmem>>, %arg11: memref<1x8x256xf32, #tpu.memory_space<vmem>>) attributes {dimension_semantics = [#tpu.dimension_semantics<parallel>], iteration_bounds = array<i64: 2>, scalar_prefetch = 0 : i64, scratch_operands = 0 : i64, tpu.core_type = #tpu.core_type<tc>, window_params = [{transform_indices = @transform_0, window_bounds = array<i64: 1, 4, 256>}, {pipeline_mode = #tpu.pipeline_mode<synchronous>, transform_indices = @transform_1, window_bounds = array<i64: 9, 256, 256>}, {pipeline_mode = #tpu.pipeline_mode<synchronous>, transform_indices = @transform_2, window_bounds = array<i64: 27, 4, 1>}, {pipeline_mode = #tpu.pipeline_mode<synchronous>, transform_indices = @transform_3, window_bounds = array<i64: 3, 4, 1>}, {pipeline_mode = #tpu.pipeline_mode<synchronous>, transform_indices = @transform_4, window_bounds = array<i64: 3, 4, 1>}, {pipeline_mode = #tpu.pipeline_mode<synchronous>, transform_indices = @transform_5, window_bounds = array<i64: 3, 1, 1>}, {pipeline_mode = #tpu.pipeline_mode<synchronous>, transform_indices = @transform_6, window_bounds = array<i64: 3, 4, 1>}, {pipeline_mode = #tpu.pipeline_mode<synchronous>, transform_indices = @transform_7, window_bounds = array<i64: 3, 4, 1>}, {pipeline_mode = #tpu.pipeline_mode<synchronous>, transform_indices = @transform_8, window_bounds = array<i64: 3, 8, 4>}, {pipeline_mode = #tpu.pipeline_mode<synchronous>, transform_indices = @transform_9, window_bounds = array<i64: 3, 8, 1>}, {transform_indices = @transform_10, window_bounds = array<i64: 1, 8, 256>}]} {
    %c0 = arith.constant 0 : index
    %c0_0 = arith.constant 0 : index
    %c0_1 = arith.constant 0 : index
    %0 = vector.load %arg1[%c0, %c0_0, %c0_1] : memref<1x4x256xf32, #tpu.memory_space<vmem>>, vector<1x4x256xf32>
    %1 = vector.shape_cast %0 : vector<1x4x256xf32> to vector<4x256xf32>
    %cst = arith.constant 0.000000e+00 : f32
    %2 = vector.broadcast %cst : f32 to vector<4x256xf32>
    %c0_2 = arith.constant 0 : index
    %c0_3 = arith.constant 0 : index
    %c0_4 = arith.constant 0 : index
    %3 = vector.load %arg3[%c0_2, %c0_3, %c0_4] : memref<27x4x1xf32, #tpu.memory_space<vmem>>, vector<1x4x1xf32>
    %4 = vector.shape_cast %3 : vector<1x4x1xf32> to vector<4x1xf32>
    %5 = vector.broadcast %4 : vector<4x1xf32> to vector<4x256xf32>
    %6 = arith.mulf %1, %5 : vector<4x256xf32>
    %c0_5 = arith.constant 0 : index
    %c0_6 = arith.constant 0 : index
    %c0_7 = arith.constant 0 : index
    %7 = vector.load %arg2[%c0_5, %c0_6, %c0_7] : memref<9x256x256xf32, #tpu.memory_space<vmem>>, vector<1x256x256xf32>
    %8 = vector.shape_cast %7 : vector<1x256x256xf32> to vector<256x256xf32>
    %cst_8 = arith.constant dense<0.000000e+00> : vector<4x256xf32>
    %9 = tpu.matmul %6, %8, %cst_8 {dimension_numbers = #tpu.dot_dimension_numbers<[1], [0], [0], [1], [0, 0, 1, 1], [], []>} : vector<4x256xf32>, vector<256x256xf32>, vector<4x256xf32> -> vector<4x256xf32>
    %10 = arith.addf %2, %9 : vector<4x256xf32>
    %c1 = arith.constant 1 : index
    %c0_9 = arith.constant 0 : index
    %c0_10 = arith.constant 0 : index
    %11 = vector.load %arg3[%c1, %c0_9, %c0_10] : memref<27x4x1xf32, #tpu.memory_space<vmem>>, vector<1x4x1xf32>
    %12 = vector.shape_cast %11 : vector<1x4x1xf32> to vector<4x1xf32>
    %13 = vector.broadcast %12 : vector<4x1xf32> to vector<4x256xf32>
    %14 = arith.mulf %1, %13 : vector<4x256xf32>
    %c1_11 = arith.constant 1 : index
    %c0_12 = arith.constant 0 : index
    %c0_13 = arith.constant 0 : index
    %15 = vector.load %arg2[%c1_11, %c0_12, %c0_13] : memref<9x256x256xf32, #tpu.memory_space<vmem>>, vector<1x256x256xf32>
    %16 = vector.shape_cast %15 : vector<1x256x256xf32> to vector<256x256xf32>
    %cst_14 = arith.constant dense<0.000000e+00> : vector<4x256xf32>
    %17 = tpu.matmul %14, %16, %cst_14 {dimension_numbers = #tpu.dot_dimension_numbers<[1], [0], [0], [1], [0, 0, 1, 1], [], []>} : vector<4x256xf32>, vector<256x256xf32>, vector<4x256xf32> -> vector<4x256xf32>
    %18 = arith.addf %10, %17 : vector<4x256xf32>
    %c2 = arith.constant 2 : index
    %c0_15 = arith.constant 0 : index
    %c0_16 = arith.constant 0 : index
    %19 = vector.load %arg3[%c2, %c0_15, %c0_16] : memref<27x4x1xf32, #tpu.memory_space<vmem>>, vector<1x4x1xf32>
    %20 = vector.shape_cast %19 : vector<1x4x1xf32> to vector<4x1xf32>
    %21 = vector.broadcast %20 : vector<4x1xf32> to vector<4x256xf32>
    %22 = arith.mulf %1, %21 : vector<4x256xf32>
    %c2_17 = arith.constant 2 : index
    %c0_18 = arith.constant 0 : index
    %c0_19 = arith.constant 0 : index
    %23 = vector.load %arg2[%c2_17, %c0_18, %c0_19] : memref<9x256x256xf32, #tpu.memory_space<vmem>>, vector<1x256x256xf32>
    %24 = vector.shape_cast %23 : vector<1x256x256xf32> to vector<256x256xf32>
    %cst_20 = arith.constant dense<0.000000e+00> : vector<4x256xf32>
    %25 = tpu.matmul %22, %24, %cst_20 {dimension_numbers = #tpu.dot_dimension_numbers<[1], [0], [0], [1], [0, 0, 1, 1], [], []>} : vector<4x256xf32>, vector<256x256xf32>, vector<4x256xf32> -> vector<4x256xf32>
    %26 = arith.addf %18, %25 : vector<4x256xf32>
    %c3 = arith.constant 3 : index
    %c0_21 = arith.constant 0 : index
    %c0_22 = arith.constant 0 : index
    %27 = vector.load %arg3[%c3, %c0_21, %c0_22] : memref<27x4x1xf32, #tpu.memory_space<vmem>>, vector<1x4x1xf32>
    %28 = vector.shape_cast %27 : vector<1x4x1xf32> to vector<4x1xf32>
    %29 = vector.broadcast %28 : vector<4x1xf32> to vector<4x256xf32>
    %30 = arith.mulf %1, %29 : vector<4x256xf32>
    %c3_23 = arith.constant 3 : index
    %c0_24 = arith.constant 0 : index
    %c0_25 = arith.constant 0 : index
    %31 = vector.load %arg2[%c3_23, %c0_24, %c0_25] : memref<9x256x256xf32, #tpu.memory_space<vmem>>, vector<1x256x256xf32>
    %32 = vector.shape_cast %31 : vector<1x256x256xf32> to vector<256x256xf32>
    %cst_26 = arith.constant dense<0.000000e+00> : vector<4x256xf32>
    %33 = tpu.matmul %30, %32, %cst_26 {dimension_numbers = #tpu.dot_dimension_numbers<[1], [0], [0], [1], [0, 0, 1, 1], [], []>} : vector<4x256xf32>, vector<256x256xf32>, vector<4x256xf32> -> vector<4x256xf32>
    %34 = arith.addf %26, %33 : vector<4x256xf32>
    %c4 = arith.constant 4 : index
    %c0_27 = arith.constant 0 : index
    %c0_28 = arith.constant 0 : index
    %35 = vector.load %arg3[%c4, %c0_27, %c0_28] : memref<27x4x1xf32, #tpu.memory_space<vmem>>, vector<1x4x1xf32>
    %36 = vector.shape_cast %35 : vector<1x4x1xf32> to vector<4x1xf32>
    %37 = vector.broadcast %36 : vector<4x1xf32> to vector<4x256xf32>
    %38 = arith.mulf %1, %37 : vector<4x256xf32>
    %c4_29 = arith.constant 4 : index
    %c0_30 = arith.constant 0 : index
    %c0_31 = arith.constant 0 : index
    %39 = vector.load %arg2[%c4_29, %c0_30, %c0_31] : memref<9x256x256xf32, #tpu.memory_space<vmem>>, vector<1x256x256xf32>
    %40 = vector.shape_cast %39 : vector<1x256x256xf32> to vector<256x256xf32>
    %cst_32 = arith.constant dense<0.000000e+00> : vector<4x256xf32>
    %41 = tpu.matmul %38, %40, %cst_32 {dimension_numbers = #tpu.dot_dimension_numbers<[1], [0], [0], [1], [0, 0, 1, 1], [], []>} : vector<4x256xf32>, vector<256x256xf32>, vector<4x256xf32> -> vector<4x256xf32>
    %42 = arith.addf %34, %41 : vector<4x256xf32>
    %c5 = arith.constant 5 : index
    %c0_33 = arith.constant 0 : index
    %c0_34 = arith.constant 0 : index
    %43 = vector.load %arg3[%c5, %c0_33, %c0_34] : memref<27x4x1xf32, #tpu.memory_space<vmem>>, vector<1x4x1xf32>
    %44 = vector.shape_cast %43 : vector<1x4x1xf32> to vector<4x1xf32>
    %45 = vector.broadcast %44 : vector<4x1xf32> to vector<4x256xf32>
    %46 = arith.mulf %1, %45 : vector<4x256xf32>
    %c5_35 = arith.constant 5 : index
    %c0_36 = arith.constant 0 : index
    %c0_37 = arith.constant 0 : index
    %47 = vector.load %arg2[%c5_35, %c0_36, %c0_37] : memref<9x256x256xf32, #tpu.memory_space<vmem>>, vector<1x256x256xf32>
    %48 = vector.shape_cast %47 : vector<1x256x256xf32> to vector<256x256xf32>
    %cst_38 = arith.constant dense<0.000000e+00> : vector<4x256xf32>
    %49 = tpu.matmul %46, %48, %cst_38 {dimension_numbers = #tpu.dot_dimension_numbers<[1], [0], [0], [1], [0, 0, 1, 1], [], []>} : vector<4x256xf32>, vector<256x256xf32>, vector<4x256xf32> -> vector<4x256xf32>
    %50 = arith.addf %42, %49 : vector<4x256xf32>
    %c6 = arith.constant 6 : index
    %c0_39 = arith.constant 0 : index
    %c0_40 = arith.constant 0 : index
    %51 = vector.load %arg3[%c6, %c0_39, %c0_40] : memref<27x4x1xf32, #tpu.memory_space<vmem>>, vector<1x4x1xf32>
    %52 = vector.shape_cast %51 : vector<1x4x1xf32> to vector<4x1xf32>
    %53 = vector.broadcast %52 : vector<4x1xf32> to vector<4x256xf32>
    %54 = arith.mulf %1, %53 : vector<4x256xf32>
    %c6_41 = arith.constant 6 : index
    %c0_42 = arith.constant 0 : index
    %c0_43 = arith.constant 0 : index
    %55 = vector.load %arg2[%c6_41, %c0_42, %c0_43] : memref<9x256x256xf32, #tpu.memory_space<vmem>>, vector<1x256x256xf32>
    %56 = vector.shape_cast %55 : vector<1x256x256xf32> to vector<256x256xf32>
    %cst_44 = arith.constant dense<0.000000e+00> : vector<4x256xf32>
    %57 = tpu.matmul %54, %56, %cst_44 {dimension_numbers = #tpu.dot_dimension_numbers<[1], [0], [0], [1], [0, 0, 1, 1], [], []>} : vector<4x256xf32>, vector<256x256xf32>, vector<4x256xf32> -> vector<4x256xf32>
    %58 = arith.addf %50, %57 : vector<4x256xf32>
    %c7 = arith.constant 7 : index
    %c0_45 = arith.constant 0 : index
    %c0_46 = arith.constant 0 : index
    %59 = vector.load %arg3[%c7, %c0_45, %c0_46] : memref<27x4x1xf32, #tpu.memory_space<vmem>>, vector<1x4x1xf32>
    %60 = vector.shape_cast %59 : vector<1x4x1xf32> to vector<4x1xf32>
    %61 = vector.broadcast %60 : vector<4x1xf32> to vector<4x256xf32>
    %62 = arith.mulf %1, %61 : vector<4x256xf32>
    %c7_47 = arith.constant 7 : index
    %c0_48 = arith.constant 0 : index
    %c0_49 = arith.constant 0 : index
    %63 = vector.load %arg2[%c7_47, %c0_48, %c0_49] : memref<9x256x256xf32, #tpu.memory_space<vmem>>, vector<1x256x256xf32>
    %64 = vector.shape_cast %63 : vector<1x256x256xf32> to vector<256x256xf32>
    %cst_50 = arith.constant dense<0.000000e+00> : vector<4x256xf32>
    %65 = tpu.matmul %62, %64, %cst_50 {dimension_numbers = #tpu.dot_dimension_numbers<[1], [0], [0], [1], [0, 0, 1, 1], [], []>} : vector<4x256xf32>, vector<256x256xf32>, vector<4x256xf32> -> vector<4x256xf32>
    %66 = arith.addf %58, %65 : vector<4x256xf32>
    %c8 = arith.constant 8 : index
    %c0_51 = arith.constant 0 : index
    %c0_52 = arith.constant 0 : index
    %67 = vector.load %arg3[%c8, %c0_51, %c0_52] : memref<27x4x1xf32, #tpu.memory_space<vmem>>, vector<1x4x1xf32>
    %68 = vector.shape_cast %67 : vector<1x4x1xf32> to vector<4x1xf32>
    %69 = vector.broadcast %68 : vector<4x1xf32> to vector<4x256xf32>
    %70 = arith.mulf %1, %69 : vector<4x256xf32>
    %c8_53 = arith.constant 8 : index
    %c0_54 = arith.constant 0 : index
    %c0_55 = arith.constant 0 : index
    %71 = vector.load %arg2[%c8_53, %c0_54, %c0_55] : memref<9x256x256xf32, #tpu.memory_space<vmem>>, vector<1x256x256xf32>
    %72 = vector.shape_cast %71 : vector<1x256x256xf32> to vector<256x256xf32>
    %cst_56 = arith.constant dense<0.000000e+00> : vector<4x256xf32>
    %73 = tpu.matmul %70, %72, %cst_56 {dimension_numbers = #tpu.dot_dimension_numbers<[1], [0], [0], [1], [0, 0, 1, 1], [], []>} : vector<4x256xf32>, vector<256x256xf32>, vector<4x256xf32> -> vector<4x256xf32>
    %74 = arith.addf %66, %73 : vector<4x256xf32>
    %c0_57 = arith.constant 0 : index
    %c0_58 = arith.constant 0 : index
    %c0_59 = arith.constant 0 : index
    %75 = vector.load %arg4[%c0_57, %c0_58, %c0_59] : memref<3x4x1xf32, #tpu.memory_space<vmem>>, vector<1x4x1xf32>
    %76 = vector.shape_cast %75 : vector<1x4x1xf32> to vector<4x1xf32>
    %77 = vector.broadcast %76 : vector<4x1xf32> to vector<4x256xf32>
    %78 = arith.addf %74, %77 : vector<4x256xf32>
    %cst_60 = arith.constant 5.000000e-01 : f32
    %79 = vector.broadcast %cst_60 : f32 to vector<4x256xf32>
    %80 = arith.mulf %79, %78 : vector<4x256xf32>
    %81 = math.tanh %80 : vector<4x256xf32>
    %cst_61 = arith.constant 1.000000e+00 : f32
    %82 = vector.broadcast %cst_61 : f32 to vector<4x256xf32>
    %83 = arith.addf %81, %82 : vector<4x256xf32>
    %cst_62 = arith.constant 5.000000e-01 : f32
    %84 = vector.broadcast %cst_62 : f32 to vector<4x256xf32>
    %85 = arith.mulf %84, %83 : vector<4x256xf32>
    %86 = arith.mulf %78, %85 : vector<4x256xf32>
    %cst_63 = arith.constant dense<0.000000e+00> : vector<4xf32>
    %87 = vector.multi_reduction <add>, %86, %cst_63 [1] : vector<4x256xf32> to vector<4xf32>
    %88 = vector.shape_cast %87 : vector<4xf32> to vector<4x1xf32>
    %cst_64 = arith.constant 2.560000e+02 : f32
    %89 = vector.broadcast %cst_64 : f32 to vector<4x1xf32>
    %90 = arith.divf %88, %89 : vector<4x1xf32>
    %c0_65 = arith.constant 0 : index
    %c0_66 = arith.constant 0 : index
    %c0_67 = arith.constant 0 : index
    %91 = vector.load %arg5[%c0_65, %c0_66, %c0_67] : memref<3x4x1xf32, #tpu.memory_space<vmem>>, vector<1x4x1xf32>
    %92 = vector.shape_cast %91 : vector<1x4x1xf32> to vector<4x1xf32>
    %93 = arith.mulf %92, %90 : vector<4x1xf32>
    %cst_68 = arith.constant dense<0.000000e+00> : vector<1xf32>
    %94 = vector.multi_reduction <add>, %93, %cst_68 [0] : vector<4x1xf32> to vector<1xf32>
    %95 = vector.shape_cast %94 : vector<1xf32> to vector<1x1xf32>
    %c0_69 = arith.constant 0 : index
    %c0_70 = arith.constant 0 : index
    %c0_71 = arith.constant 0 : index
    %96 = vector.load %arg6[%c0_69, %c0_70, %c0_71] : memref<3x1x1xf32, #tpu.memory_space<vmem>>, vector<1x1x1xf32>
    %97 = vector.shape_cast %96 : vector<1x1x1xf32> to vector<1x1xf32>
    %98 = arith.addf %95, %97 : vector<1x1xf32>
    %cst_72 = arith.constant 5.000000e-01 : f32
    %99 = vector.broadcast %cst_72 : f32 to vector<1x1xf32>
    %100 = arith.mulf %99, %98 : vector<1x1xf32>
    %101 = math.tanh %100 : vector<1x1xf32>
    %cst_73 = arith.constant 1.000000e+00 : f32
    %102 = vector.broadcast %cst_73 : f32 to vector<1x1xf32>
    %103 = arith.addf %101, %102 : vector<1x1xf32>
    %cst_74 = arith.constant 5.000000e-01 : f32
    %104 = vector.broadcast %cst_74 : f32 to vector<1x1xf32>
    %105 = arith.mulf %104, %103 : vector<1x1xf32>
    %106 = arith.mulf %98, %105 : vector<1x1xf32>
    %c0_75 = arith.constant 0 : index
    %c0_76 = arith.constant 0 : index
    %c0_77 = arith.constant 0 : index
    %107 = vector.load %arg7[%c0_75, %c0_76, %c0_77] : memref<3x4x1xf32, #tpu.memory_space<vmem>>, vector<1x4x1xf32>
    %108 = vector.shape_cast %107 : vector<1x4x1xf32> to vector<4x1xf32>
    %109 = vector.broadcast %106 : vector<1x1xf32> to vector<4x1xf32>
    %110 = arith.mulf %108, %109 : vector<4x1xf32>
    %cst_78 = arith.constant dense<0.000000e+00> : vector<4xf32>
    %111 = vector.multi_reduction <add>, %110, %cst_78 [1] : vector<4x1xf32> to vector<4xf32>
    %112 = vector.shape_cast %111 : vector<4xf32> to vector<4x1xf32>
    %c0_79 = arith.constant 0 : index
    %c0_80 = arith.constant 0 : index
    %c0_81 = arith.constant 0 : index
    %113 = vector.load %arg8[%c0_79, %c0_80, %c0_81] : memref<3x4x1xf32, #tpu.memory_space<vmem>>, vector<1x4x1xf32>
    %114 = vector.shape_cast %113 : vector<1x4x1xf32> to vector<4x1xf32>
    %115 = arith.addf %112, %114 : vector<4x1xf32>
    %cst_82 = arith.constant 5.000000e-01 : f32
    %116 = vector.broadcast %cst_82 : f32 to vector<4x1xf32>
    %117 = arith.mulf %116, %115 : vector<4x1xf32>
    %118 = math.tanh %117 : vector<4x1xf32>
    %cst_83 = arith.constant 1.000000e+00 : f32
    %119 = vector.broadcast %cst_83 : f32 to vector<4x1xf32>
    %120 = arith.addf %118, %119 : vector<4x1xf32>
    %cst_84 = arith.constant 5.000000e-01 : f32
    %121 = vector.broadcast %cst_84 : f32 to vector<4x1xf32>
    %122 = arith.mulf %121, %120 : vector<4x1xf32>
    %123 = vector.broadcast %122 : vector<4x1xf32> to vector<4x256xf32>
    %124 = arith.mulf %86, %123 : vector<4x256xf32>
    %c0_85 = arith.constant 0 : index
    %c0_86 = arith.constant 0 : index
    %c0_87 = arith.constant 0 : index
    %125 = vector.load %arg9[%c0_85, %c0_86, %c0_87] : memref<3x8x4xf32, #tpu.memory_space<vmem>>, vector<1x4x4xf32>
    %126 = vector.shape_cast %125 : vector<1x4x4xf32> to vector<4x4xf32>
    %cst_88 = arith.constant dense<0.000000e+00> : vector<4x256xf32>
    %127 = tpu.matmul %126, %124, %cst_88 {dimension_numbers = #tpu.dot_dimension_numbers<[1], [0], [0], [1], [0, 0, 1, 1], [], []>} : vector<4x4xf32>, vector<4x256xf32>, vector<4x256xf32> -> vector<4x256xf32>
    %c0_89 = arith.constant 0 : index
    %c0_90 = arith.constant 0 : index
    %c0_91 = arith.constant 0 : index
    %128 = vector.load %arg10[%c0_89, %c0_90, %c0_91] : memref<3x8x1xf32, #tpu.memory_space<vmem>>, vector<1x4x1xf32>
    %129 = vector.shape_cast %128 : vector<1x4x1xf32> to vector<4x1xf32>
    %130 = vector.broadcast %129 : vector<4x1xf32> to vector<4x256xf32>
    %131 = arith.addf %127, %130 : vector<4x256xf32>
    %132 = arith.addf %131, %1 : vector<4x256xf32>
    %cst_92 = arith.constant 0.000000e+00 : f32
    %133 = vector.broadcast %cst_92 : f32 to vector<4x256xf32>
    %c9 = arith.constant 9 : index
    %c0_93 = arith.constant 0 : index
    %c0_94 = arith.constant 0 : index
    %134 = vector.load %arg3[%c9, %c0_93, %c0_94] : memref<27x4x1xf32, #tpu.memory_space<vmem>>, vector<1x4x1xf32>
    %135 = vector.shape_cast %134 : vector<1x4x1xf32> to vector<4x1xf32>
    %136 = vector.broadcast %135 : vector<4x1xf32> to vector<4x256xf32>
    %137 = arith.mulf %132, %136 : vector<4x256xf32>
    %c0_95 = arith.constant 0 : index
    %c0_96 = arith.constant 0 : index
    %c0_97 = arith.constant 0 : index
    %138 = vector.load %arg2[%c0_95, %c0_96, %c0_97] : memref<9x256x256xf32, #tpu.memory_space<vmem>>, vector<1x256x256xf32>
    %139 = vector.shape_cast %138 : vector<1x256x256xf32> to vector<256x256xf32>
    %cst_98 = arith.constant dense<0.000000e+00> : vector<4x256xf32>
    %140 = tpu.matmul %137, %139, %cst_98 {dimension_numbers = #tpu.dot_dimension_numbers<[1], [0], [0], [1], [0, 0, 1, 1], [], []>} : vector<4x256xf32>, vector<256x256xf32>, vector<4x256xf32> -> vector<4x256xf32>
    %141 = arith.addf %133, %140 : vector<4x256xf32>
    %c10 = arith.constant 10 : index
    %c0_99 = arith.constant 0 : index
    %c0_100 = arith.constant 0 : index
    %142 = vector.load %arg3[%c10, %c0_99, %c0_100] : memref<27x4x1xf32, #tpu.memory_space<vmem>>, vector<1x4x1xf32>
    %143 = vector.shape_cast %142 : vector<1x4x1xf32> to vector<4x1xf32>
    %144 = vector.broadcast %143 : vector<4x1xf32> to vector<4x256xf32>
    %145 = arith.mulf %132, %144 : vector<4x256xf32>
    %c1_101 = arith.constant 1 : index
    %c0_102 = arith.constant 0 : index
    %c0_103 = arith.constant 0 : index
    %146 = vector.load %arg2[%c1_101, %c0_102, %c0_103] : memref<9x256x256xf32, #tpu.memory_space<vmem>>, vector<1x256x256xf32>
    %147 = vector.shape_cast %146 : vector<1x256x256xf32> to vector<256x256xf32>
    %cst_104 = arith.constant dense<0.000000e+00> : vector<4x256xf32>
    %148 = tpu.matmul %145, %147, %cst_104 {dimension_numbers = #tpu.dot_dimension_numbers<[1], [0], [0], [1], [0, 0, 1, 1], [], []>} : vector<4x256xf32>, vector<256x256xf32>, vector<4x256xf32> -> vector<4x256xf32>
    %149 = arith.addf %141, %148 : vector<4x256xf32>
    %c11 = arith.constant 11 : index
    %c0_105 = arith.constant 0 : index
    %c0_106 = arith.constant 0 : index
    %150 = vector.load %arg3[%c11, %c0_105, %c0_106] : memref<27x4x1xf32, #tpu.memory_space<vmem>>, vector<1x4x1xf32>
    %151 = vector.shape_cast %150 : vector<1x4x1xf32> to vector<4x1xf32>
    %152 = vector.broadcast %151 : vector<4x1xf32> to vector<4x256xf32>
    %153 = arith.mulf %132, %152 : vector<4x256xf32>
    %c2_107 = arith.constant 2 : index
    %c0_108 = arith.constant 0 : index
    %c0_109 = arith.constant 0 : index
    %154 = vector.load %arg2[%c2_107, %c0_108, %c0_109] : memref<9x256x256xf32, #tpu.memory_space<vmem>>, vector<1x256x256xf32>
    %155 = vector.shape_cast %154 : vector<1x256x256xf32> to vector<256x256xf32>
    %cst_110 = arith.constant dense<0.000000e+00> : vector<4x256xf32>
    %156 = tpu.matmul %153, %155, %cst_110 {dimension_numbers = #tpu.dot_dimension_numbers<[1], [0], [0], [1], [0, 0, 1, 1], [], []>} : vector<4x256xf32>, vector<256x256xf32>, vector<4x256xf32> -> vector<4x256xf32>
    %157 = arith.addf %149, %156 : vector<4x256xf32>
    %c12 = arith.constant 12 : index
    %c0_111 = arith.constant 0 : index
    %c0_112 = arith.constant 0 : index
    %158 = vector.load %arg3[%c12, %c0_111, %c0_112] : memref<27x4x1xf32, #tpu.memory_space<vmem>>, vector<1x4x1xf32>
    %159 = vector.shape_cast %158 : vector<1x4x1xf32> to vector<4x1xf32>
    %160 = vector.broadcast %159 : vector<4x1xf32> to vector<4x256xf32>
    %161 = arith.mulf %132, %160 : vector<4x256xf32>
    %c3_113 = arith.constant 3 : index
    %c0_114 = arith.constant 0 : index
    %c0_115 = arith.constant 0 : index
    %162 = vector.load %arg2[%c3_113, %c0_114, %c0_115] : memref<9x256x256xf32, #tpu.memory_space<vmem>>, vector<1x256x256xf32>
    %163 = vector.shape_cast %162 : vector<1x256x256xf32> to vector<256x256xf32>
    %cst_116 = arith.constant dense<0.000000e+00> : vector<4x256xf32>
    %164 = tpu.matmul %161, %163, %cst_116 {dimension_numbers = #tpu.dot_dimension_numbers<[1], [0], [0], [1], [0, 0, 1, 1], [], []>} : vector<4x256xf32>, vector<256x256xf32>, vector<4x256xf32> -> vector<4x256xf32>
    %165 = arith.addf %157, %164 : vector<4x256xf32>
    %c13 = arith.constant 13 : index
    %c0_117 = arith.constant 0 : index
    %c0_118 = arith.constant 0 : index
    %166 = vector.load %arg3[%c13, %c0_117, %c0_118] : memref<27x4x1xf32, #tpu.memory_space<vmem>>, vector<1x4x1xf32>
    %167 = vector.shape_cast %166 : vector<1x4x1xf32> to vector<4x1xf32>
    %168 = vector.broadcast %167 : vector<4x1xf32> to vector<4x256xf32>
    %169 = arith.mulf %132, %168 : vector<4x256xf32>
    %c4_119 = arith.constant 4 : index
    %c0_120 = arith.constant 0 : index
    %c0_121 = arith.constant 0 : index
    %170 = vector.load %arg2[%c4_119, %c0_120, %c0_121] : memref<9x256x256xf32, #tpu.memory_space<vmem>>, vector<1x256x256xf32>
    %171 = vector.shape_cast %170 : vector<1x256x256xf32> to vector<256x256xf32>
    %cst_122 = arith.constant dense<0.000000e+00> : vector<4x256xf32>
    %172 = tpu.matmul %169, %171, %cst_122 {dimension_numbers = #tpu.dot_dimension_numbers<[1], [0], [0], [1], [0, 0, 1, 1], [], []>} : vector<4x256xf32>, vector<256x256xf32>, vector<4x256xf32> -> vector<4x256xf32>
    %173 = arith.addf %165, %172 : vector<4x256xf32>
    %c14 = arith.constant 14 : index
    %c0_123 = arith.constant 0 : index
    %c0_124 = arith.constant 0 : index
    %174 = vector.load %arg3[%c14, %c0_123, %c0_124] : memref<27x4x1xf32, #tpu.memory_space<vmem>>, vector<1x4x1xf32>
    %175 = vector.shape_cast %174 : vector<1x4x1xf32> to vector<4x1xf32>
    %176 = vector.broadcast %175 : vector<4x1xf32> to vector<4x256xf32>
    %177 = arith.mulf %132, %176 : vector<4x256xf32>
    %c5_125 = arith.constant 5 : index
    %c0_126 = arith.constant 0 : index
    %c0_127 = arith.constant 0 : index
    %178 = vector.load %arg2[%c5_125, %c0_126, %c0_127] : memref<9x256x256xf32, #tpu.memory_space<vmem>>, vector<1x256x256xf32>
    %179 = vector.shape_cast %178 : vector<1x256x256xf32> to vector<256x256xf32>
    %cst_128 = arith.constant dense<0.000000e+00> : vector<4x256xf32>
    %180 = tpu.matmul %177, %179, %cst_128 {dimension_numbers = #tpu.dot_dimension_numbers<[1], [0], [0], [1], [0, 0, 1, 1], [], []>} : vector<4x256xf32>, vector<256x256xf32>, vector<4x256xf32> -> vector<4x256xf32>
    %181 = arith.addf %173, %180 : vector<4x256xf32>
    %c15 = arith.constant 15 : index
    %c0_129 = arith.constant 0 : index
    %c0_130 = arith.constant 0 : index
    %182 = vector.load %arg3[%c15, %c0_129, %c0_130] : memref<27x4x1xf32, #tpu.memory_space<vmem>>, vector<1x4x1xf32>
    %183 = vector.shape_cast %182 : vector<1x4x1xf32> to vector<4x1xf32>
    %184 = vector.broadcast %183 : vector<4x1xf32> to vector<4x256xf32>
    %185 = arith.mulf %132, %184 : vector<4x256xf32>
    %c6_131 = arith.constant 6 : index
    %c0_132 = arith.constant 0 : index
    %c0_133 = arith.constant 0 : index
    %186 = vector.load %arg2[%c6_131, %c0_132, %c0_133] : memref<9x256x256xf32, #tpu.memory_space<vmem>>, vector<1x256x256xf32>
    %187 = vector.shape_cast %186 : vector<1x256x256xf32> to vector<256x256xf32>
    %cst_134 = arith.constant dense<0.000000e+00> : vector<4x256xf32>
    %188 = tpu.matmul %185, %187, %cst_134 {dimension_numbers = #tpu.dot_dimension_numbers<[1], [0], [0], [1], [0, 0, 1, 1], [], []>} : vector<4x256xf32>, vector<256x256xf32>, vector<4x256xf32> -> vector<4x256xf32>
    %189 = arith.addf %181, %188 : vector<4x256xf32>
    %c16 = arith.constant 16 : index
    %c0_135 = arith.constant 0 : index
    %c0_136 = arith.constant 0 : index
    %190 = vector.load %arg3[%c16, %c0_135, %c0_136] : memref<27x4x1xf32, #tpu.memory_space<vmem>>, vector<1x4x1xf32>
    %191 = vector.shape_cast %190 : vector<1x4x1xf32> to vector<4x1xf32>
    %192 = vector.broadcast %191 : vector<4x1xf32> to vector<4x256xf32>
    %193 = arith.mulf %132, %192 : vector<4x256xf32>
    %c7_137 = arith.constant 7 : index
    %c0_138 = arith.constant 0 : index
    %c0_139 = arith.constant 0 : index
    %194 = vector.load %arg2[%c7_137, %c0_138, %c0_139] : memref<9x256x256xf32, #tpu.memory_space<vmem>>, vector<1x256x256xf32>
    %195 = vector.shape_cast %194 : vector<1x256x256xf32> to vector<256x256xf32>
    %cst_140 = arith.constant dense<0.000000e+00> : vector<4x256xf32>
    %196 = tpu.matmul %193, %195, %cst_140 {dimension_numbers = #tpu.dot_dimension_numbers<[1], [0], [0], [1], [0, 0, 1, 1], [], []>} : vector<4x256xf32>, vector<256x256xf32>, vector<4x256xf32> -> vector<4x256xf32>
    %197 = arith.addf %189, %196 : vector<4x256xf32>
    %c17 = arith.constant 17 : index
    %c0_141 = arith.constant 0 : index
    %c0_142 = arith.constant 0 : index
    %198 = vector.load %arg3[%c17, %c0_141, %c0_142] : memref<27x4x1xf32, #tpu.memory_space<vmem>>, vector<1x4x1xf32>
    %199 = vector.shape_cast %198 : vector<1x4x1xf32> to vector<4x1xf32>
    %200 = vector.broadcast %199 : vector<4x1xf32> to vector<4x256xf32>
    %201 = arith.mulf %132, %200 : vector<4x256xf32>
    %c8_143 = arith.constant 8 : index
    %c0_144 = arith.constant 0 : index
    %c0_145 = arith.constant 0 : index
    %202 = vector.load %arg2[%c8_143, %c0_144, %c0_145] : memref<9x256x256xf32, #tpu.memory_space<vmem>>, vector<1x256x256xf32>
    %203 = vector.shape_cast %202 : vector<1x256x256xf32> to vector<256x256xf32>
    %cst_146 = arith.constant dense<0.000000e+00> : vector<4x256xf32>
    %204 = tpu.matmul %201, %203, %cst_146 {dimension_numbers = #tpu.dot_dimension_numbers<[1], [0], [0], [1], [0, 0, 1, 1], [], []>} : vector<4x256xf32>, vector<256x256xf32>, vector<4x256xf32> -> vector<4x256xf32>
    %205 = arith.addf %197, %204 : vector<4x256xf32>
    %c1_147 = arith.constant 1 : index
    %c0_148 = arith.constant 0 : index
    %c0_149 = arith.constant 0 : index
    %206 = vector.load %arg4[%c1_147, %c0_148, %c0_149] : memref<3x4x1xf32, #tpu.memory_space<vmem>>, vector<1x4x1xf32>
    %207 = vector.shape_cast %206 : vector<1x4x1xf32> to vector<4x1xf32>
    %208 = vector.broadcast %207 : vector<4x1xf32> to vector<4x256xf32>
    %209 = arith.addf %205, %208 : vector<4x256xf32>
    %cst_150 = arith.constant 5.000000e-01 : f32
    %210 = vector.broadcast %cst_150 : f32 to vector<4x256xf32>
    %211 = arith.mulf %210, %209 : vector<4x256xf32>
    %212 = math.tanh %211 : vector<4x256xf32>
    %cst_151 = arith.constant 1.000000e+00 : f32
    %213 = vector.broadcast %cst_151 : f32 to vector<4x256xf32>
    %214 = arith.addf %212, %213 : vector<4x256xf32>
    %cst_152 = arith.constant 5.000000e-01 : f32
    %215 = vector.broadcast %cst_152 : f32 to vector<4x256xf32>
    %216 = arith.mulf %215, %214 : vector<4x256xf32>
    %217 = arith.mulf %209, %216 : vector<4x256xf32>
    %cst_153 = arith.constant dense<0.000000e+00> : vector<4xf32>
    %218 = vector.multi_reduction <add>, %217, %cst_153 [1] : vector<4x256xf32> to vector<4xf32>
    %219 = vector.shape_cast %218 : vector<4xf32> to vector<4x1xf32>
    %cst_154 = arith.constant 2.560000e+02 : f32
    %220 = vector.broadcast %cst_154 : f32 to vector<4x1xf32>
    %221 = arith.divf %219, %220 : vector<4x1xf32>
    %c1_155 = arith.constant 1 : index
    %c0_156 = arith.constant 0 : index
    %c0_157 = arith.constant 0 : index
    %222 = vector.load %arg5[%c1_155, %c0_156, %c0_157] : memref<3x4x1xf32, #tpu.memory_space<vmem>>, vector<1x4x1xf32>
    %223 = vector.shape_cast %222 : vector<1x4x1xf32> to vector<4x1xf32>
    %224 = arith.mulf %223, %221 : vector<4x1xf32>
    %cst_158 = arith.constant dense<0.000000e+00> : vector<1xf32>
    %225 = vector.multi_reduction <add>, %224, %cst_158 [0] : vector<4x1xf32> to vector<1xf32>
    %226 = vector.shape_cast %225 : vector<1xf32> to vector<1x1xf32>
    %c1_159 = arith.constant 1 : index
    %c0_160 = arith.constant 0 : index
    %c0_161 = arith.constant 0 : index
    %227 = vector.load %arg6[%c1_159, %c0_160, %c0_161] : memref<3x1x1xf32, #tpu.memory_space<vmem>>, vector<1x1x1xf32>
    %228 = vector.shape_cast %227 : vector<1x1x1xf32> to vector<1x1xf32>
    %229 = arith.addf %226, %228 : vector<1x1xf32>
    %cst_162 = arith.constant 5.000000e-01 : f32
    %230 = vector.broadcast %cst_162 : f32 to vector<1x1xf32>
    %231 = arith.mulf %230, %229 : vector<1x1xf32>
    %232 = math.tanh %231 : vector<1x1xf32>
    %cst_163 = arith.constant 1.000000e+00 : f32
    %233 = vector.broadcast %cst_163 : f32 to vector<1x1xf32>
    %234 = arith.addf %232, %233 : vector<1x1xf32>
    %cst_164 = arith.constant 5.000000e-01 : f32
    %235 = vector.broadcast %cst_164 : f32 to vector<1x1xf32>
    %236 = arith.mulf %235, %234 : vector<1x1xf32>
    %237 = arith.mulf %229, %236 : vector<1x1xf32>
    %c1_165 = arith.constant 1 : index
    %c0_166 = arith.constant 0 : index
    %c0_167 = arith.constant 0 : index
    %238 = vector.load %arg7[%c1_165, %c0_166, %c0_167] : memref<3x4x1xf32, #tpu.memory_space<vmem>>, vector<1x4x1xf32>
    %239 = vector.shape_cast %238 : vector<1x4x1xf32> to vector<4x1xf32>
    %240 = vector.broadcast %237 : vector<1x1xf32> to vector<4x1xf32>
    %241 = arith.mulf %239, %240 : vector<4x1xf32>
    %cst_168 = arith.constant dense<0.000000e+00> : vector<4xf32>
    %242 = vector.multi_reduction <add>, %241, %cst_168 [1] : vector<4x1xf32> to vector<4xf32>
    %243 = vector.shape_cast %242 : vector<4xf32> to vector<4x1xf32>
    %c1_169 = arith.constant 1 : index
    %c0_170 = arith.constant 0 : index
    %c0_171 = arith.constant 0 : index
    %244 = vector.load %arg8[%c1_169, %c0_170, %c0_171] : memref<3x4x1xf32, #tpu.memory_space<vmem>>, vector<1x4x1xf32>
    %245 = vector.shape_cast %244 : vector<1x4x1xf32> to vector<4x1xf32>
    %246 = arith.addf %243, %245 : vector<4x1xf32>
    %cst_172 = arith.constant 5.000000e-01 : f32
    %247 = vector.broadcast %cst_172 : f32 to vector<4x1xf32>
    %248 = arith.mulf %247, %246 : vector<4x1xf32>
    %249 = math.tanh %248 : vector<4x1xf32>
    %cst_173 = arith.constant 1.000000e+00 : f32
    %250 = vector.broadcast %cst_173 : f32 to vector<4x1xf32>
    %251 = arith.addf %249, %250 : vector<4x1xf32>
    %cst_174 = arith.constant 5.000000e-01 : f32
    %252 = vector.broadcast %cst_174 : f32 to vector<4x1xf32>
    %253 = arith.mulf %252, %251 : vector<4x1xf32>
    %254 = vector.broadcast %253 : vector<4x1xf32> to vector<4x256xf32>
    %255 = arith.mulf %217, %254 : vector<4x256xf32>
    %c1_175 = arith.constant 1 : index
    %c0_176 = arith.constant 0 : index
    %c0_177 = arith.constant 0 : index
    %256 = vector.load %arg9[%c1_175, %c0_176, %c0_177] : memref<3x8x4xf32, #tpu.memory_space<vmem>>, vector<1x4x4xf32>
    %257 = vector.shape_cast %256 : vector<1x4x4xf32> to vector<4x4xf32>
    %cst_178 = arith.constant dense<0.000000e+00> : vector<4x256xf32>
    %258 = tpu.matmul %257, %255, %cst_178 {dimension_numbers = #tpu.dot_dimension_numbers<[1], [0], [0], [1], [0, 0, 1, 1], [], []>} : vector<4x4xf32>, vector<4x256xf32>, vector<4x256xf32> -> vector<4x256xf32>
    %c1_179 = arith.constant 1 : index
    %c0_180 = arith.constant 0 : index
    %c0_181 = arith.constant 0 : index
    %259 = vector.load %arg10[%c1_179, %c0_180, %c0_181] : memref<3x8x1xf32, #tpu.memory_space<vmem>>, vector<1x4x1xf32>
    %260 = vector.shape_cast %259 : vector<1x4x1xf32> to vector<4x1xf32>
    %261 = vector.broadcast %260 : vector<4x1xf32> to vector<4x256xf32>
    %262 = arith.addf %258, %261 : vector<4x256xf32>
    %263 = arith.addf %262, %132 : vector<4x256xf32>
    %cst_182 = arith.constant 0.000000e+00 : f32
    %264 = vector.broadcast %cst_182 : f32 to vector<4x256xf32>
    %c18 = arith.constant 18 : index
    %c0_183 = arith.constant 0 : index
    %c0_184 = arith.constant 0 : index
    %265 = vector.load %arg3[%c18, %c0_183, %c0_184] : memref<27x4x1xf32, #tpu.memory_space<vmem>>, vector<1x4x1xf32>
    %266 = vector.shape_cast %265 : vector<1x4x1xf32> to vector<4x1xf32>
    %267 = vector.broadcast %266 : vector<4x1xf32> to vector<4x256xf32>
    %268 = arith.mulf %263, %267 : vector<4x256xf32>
    %c0_185 = arith.constant 0 : index
    %c0_186 = arith.constant 0 : index
    %c0_187 = arith.constant 0 : index
    %269 = vector.load %arg2[%c0_185, %c0_186, %c0_187] : memref<9x256x256xf32, #tpu.memory_space<vmem>>, vector<1x256x256xf32>
    %270 = vector.shape_cast %269 : vector<1x256x256xf32> to vector<256x256xf32>
    %cst_188 = arith.constant dense<0.000000e+00> : vector<4x256xf32>
    %271 = tpu.matmul %268, %270, %cst_188 {dimension_numbers = #tpu.dot_dimension_numbers<[1], [0], [0], [1], [0, 0, 1, 1], [], []>} : vector<4x256xf32>, vector<256x256xf32>, vector<4x256xf32> -> vector<4x256xf32>
    %272 = arith.addf %264, %271 : vector<4x256xf32>
    %c19 = arith.constant 19 : index
    %c0_189 = arith.constant 0 : index
    %c0_190 = arith.constant 0 : index
    %273 = vector.load %arg3[%c19, %c0_189, %c0_190] : memref<27x4x1xf32, #tpu.memory_space<vmem>>, vector<1x4x1xf32>
    %274 = vector.shape_cast %273 : vector<1x4x1xf32> to vector<4x1xf32>
    %275 = vector.broadcast %274 : vector<4x1xf32> to vector<4x256xf32>
    %276 = arith.mulf %263, %275 : vector<4x256xf32>
    %c1_191 = arith.constant 1 : index
    %c0_192 = arith.constant 0 : index
    %c0_193 = arith.constant 0 : index
    %277 = vector.load %arg2[%c1_191, %c0_192, %c0_193] : memref<9x256x256xf32, #tpu.memory_space<vmem>>, vector<1x256x256xf32>
    %278 = vector.shape_cast %277 : vector<1x256x256xf32> to vector<256x256xf32>
    %cst_194 = arith.constant dense<0.000000e+00> : vector<4x256xf32>
    %279 = tpu.matmul %276, %278, %cst_194 {dimension_numbers = #tpu.dot_dimension_numbers<[1], [0], [0], [1], [0, 0, 1, 1], [], []>} : vector<4x256xf32>, vector<256x256xf32>, vector<4x256xf32> -> vector<4x256xf32>
    %280 = arith.addf %272, %279 : vector<4x256xf32>
    %c20 = arith.constant 20 : index
    %c0_195 = arith.constant 0 : index
    %c0_196 = arith.constant 0 : index
    %281 = vector.load %arg3[%c20, %c0_195, %c0_196] : memref<27x4x1xf32, #tpu.memory_space<vmem>>, vector<1x4x1xf32>
    %282 = vector.shape_cast %281 : vector<1x4x1xf32> to vector<4x1xf32>
    %283 = vector.broadcast %282 : vector<4x1xf32> to vector<4x256xf32>
    %284 = arith.mulf %263, %283 : vector<4x256xf32>
    %c2_197 = arith.constant 2 : index
    %c0_198 = arith.constant 0 : index
    %c0_199 = arith.constant 0 : index
    %285 = vector.load %arg2[%c2_197, %c0_198, %c0_199] : memref<9x256x256xf32, #tpu.memory_space<vmem>>, vector<1x256x256xf32>
    %286 = vector.shape_cast %285 : vector<1x256x256xf32> to vector<256x256xf32>
    %cst_200 = arith.constant dense<0.000000e+00> : vector<4x256xf32>
    %287 = tpu.matmul %284, %286, %cst_200 {dimension_numbers = #tpu.dot_dimension_numbers<[1], [0], [0], [1], [0, 0, 1, 1], [], []>} : vector<4x256xf32>, vector<256x256xf32>, vector<4x256xf32> -> vector<4x256xf32>
    %288 = arith.addf %280, %287 : vector<4x256xf32>
    %c21 = arith.constant 21 : index
    %c0_201 = arith.constant 0 : index
    %c0_202 = arith.constant 0 : index
    %289 = vector.load %arg3[%c21, %c0_201, %c0_202] : memref<27x4x1xf32, #tpu.memory_space<vmem>>, vector<1x4x1xf32>
    %290 = vector.shape_cast %289 : vector<1x4x1xf32> to vector<4x1xf32>
    %291 = vector.broadcast %290 : vector<4x1xf32> to vector<4x256xf32>
    %292 = arith.mulf %263, %291 : vector<4x256xf32>
    %c3_203 = arith.constant 3 : index
    %c0_204 = arith.constant 0 : index
    %c0_205 = arith.constant 0 : index
    %293 = vector.load %arg2[%c3_203, %c0_204, %c0_205] : memref<9x256x256xf32, #tpu.memory_space<vmem>>, vector<1x256x256xf32>
    %294 = vector.shape_cast %293 : vector<1x256x256xf32> to vector<256x256xf32>
    %cst_206 = arith.constant dense<0.000000e+00> : vector<4x256xf32>
    %295 = tpu.matmul %292, %294, %cst_206 {dimension_numbers = #tpu.dot_dimension_numbers<[1], [0], [0], [1], [0, 0, 1, 1], [], []>} : vector<4x256xf32>, vector<256x256xf32>, vector<4x256xf32> -> vector<4x256xf32>
    %296 = arith.addf %288, %295 : vector<4x256xf32>
    %c22 = arith.constant 22 : index
    %c0_207 = arith.constant 0 : index
    %c0_208 = arith.constant 0 : index
    %297 = vector.load %arg3[%c22, %c0_207, %c0_208] : memref<27x4x1xf32, #tpu.memory_space<vmem>>, vector<1x4x1xf32>
    %298 = vector.shape_cast %297 : vector<1x4x1xf32> to vector<4x1xf32>
    %299 = vector.broadcast %298 : vector<4x1xf32> to vector<4x256xf32>
    %300 = arith.mulf %263, %299 : vector<4x256xf32>
    %c4_209 = arith.constant 4 : index
    %c0_210 = arith.constant 0 : index
    %c0_211 = arith.constant 0 : index
    %301 = vector.load %arg2[%c4_209, %c0_210, %c0_211] : memref<9x256x256xf32, #tpu.memory_space<vmem>>, vector<1x256x256xf32>
    %302 = vector.shape_cast %301 : vector<1x256x256xf32> to vector<256x256xf32>
    %cst_212 = arith.constant dense<0.000000e+00> : vector<4x256xf32>
    %303 = tpu.matmul %300, %302, %cst_212 {dimension_numbers = #tpu.dot_dimension_numbers<[1], [0], [0], [1], [0, 0, 1, 1], [], []>} : vector<4x256xf32>, vector<256x256xf32>, vector<4x256xf32> -> vector<4x256xf32>
    %304 = arith.addf %296, %303 : vector<4x256xf32>
    %c23 = arith.constant 23 : index
    %c0_213 = arith.constant 0 : index
    %c0_214 = arith.constant 0 : index
    %305 = vector.load %arg3[%c23, %c0_213, %c0_214] : memref<27x4x1xf32, #tpu.memory_space<vmem>>, vector<1x4x1xf32>
    %306 = vector.shape_cast %305 : vector<1x4x1xf32> to vector<4x1xf32>
    %307 = vector.broadcast %306 : vector<4x1xf32> to vector<4x256xf32>
    %308 = arith.mulf %263, %307 : vector<4x256xf32>
    %c5_215 = arith.constant 5 : index
    %c0_216 = arith.constant 0 : index
    %c0_217 = arith.constant 0 : index
    %309 = vector.load %arg2[%c5_215, %c0_216, %c0_217] : memref<9x256x256xf32, #tpu.memory_space<vmem>>, vector<1x256x256xf32>
    %310 = vector.shape_cast %309 : vector<1x256x256xf32> to vector<256x256xf32>
    %cst_218 = arith.constant dense<0.000000e+00> : vector<4x256xf32>
    %311 = tpu.matmul %308, %310, %cst_218 {dimension_numbers = #tpu.dot_dimension_numbers<[1], [0], [0], [1], [0, 0, 1, 1], [], []>} : vector<4x256xf32>, vector<256x256xf32>, vector<4x256xf32> -> vector<4x256xf32>
    %312 = arith.addf %304, %311 : vector<4x256xf32>
    %c24 = arith.constant 24 : index
    %c0_219 = arith.constant 0 : index
    %c0_220 = arith.constant 0 : index
    %313 = vector.load %arg3[%c24, %c0_219, %c0_220] : memref<27x4x1xf32, #tpu.memory_space<vmem>>, vector<1x4x1xf32>
    %314 = vector.shape_cast %313 : vector<1x4x1xf32> to vector<4x1xf32>
    %315 = vector.broadcast %314 : vector<4x1xf32> to vector<4x256xf32>
    %316 = arith.mulf %263, %315 : vector<4x256xf32>
    %c6_221 = arith.constant 6 : index
    %c0_222 = arith.constant 0 : index
    %c0_223 = arith.constant 0 : index
    %317 = vector.load %arg2[%c6_221, %c0_222, %c0_223] : memref<9x256x256xf32, #tpu.memory_space<vmem>>, vector<1x256x256xf32>
    %318 = vector.shape_cast %317 : vector<1x256x256xf32> to vector<256x256xf32>
    %cst_224 = arith.constant dense<0.000000e+00> : vector<4x256xf32>
    %319 = tpu.matmul %316, %318, %cst_224 {dimension_numbers = #tpu.dot_dimension_numbers<[1], [0], [0], [1], [0, 0, 1, 1], [], []>} : vector<4x256xf32>, vector<256x256xf32>, vector<4x256xf32> -> vector<4x256xf32>
    %320 = arith.addf %312, %319 : vector<4x256xf32>
    %c25 = arith.constant 25 : index
    %c0_225 = arith.constant 0 : index
    %c0_226 = arith.constant 0 : index
    %321 = vector.load %arg3[%c25, %c0_225, %c0_226] : memref<27x4x1xf32, #tpu.memory_space<vmem>>, vector<1x4x1xf32>
    %322 = vector.shape_cast %321 : vector<1x4x1xf32> to vector<4x1xf32>
    %323 = vector.broadcast %322 : vector<4x1xf32> to vector<4x256xf32>
    %324 = arith.mulf %263, %323 : vector<4x256xf32>
    %c7_227 = arith.constant 7 : index
    %c0_228 = arith.constant 0 : index
    %c0_229 = arith.constant 0 : index
    %325 = vector.load %arg2[%c7_227, %c0_228, %c0_229] : memref<9x256x256xf32, #tpu.memory_space<vmem>>, vector<1x256x256xf32>
    %326 = vector.shape_cast %325 : vector<1x256x256xf32> to vector<256x256xf32>
    %cst_230 = arith.constant dense<0.000000e+00> : vector<4x256xf32>
    %327 = tpu.matmul %324, %326, %cst_230 {dimension_numbers = #tpu.dot_dimension_numbers<[1], [0], [0], [1], [0, 0, 1, 1], [], []>} : vector<4x256xf32>, vector<256x256xf32>, vector<4x256xf32> -> vector<4x256xf32>
    %328 = arith.addf %320, %327 : vector<4x256xf32>
    %c26 = arith.constant 26 : index
    %c0_231 = arith.constant 0 : index
    %c0_232 = arith.constant 0 : index
    %329 = vector.load %arg3[%c26, %c0_231, %c0_232] : memref<27x4x1xf32, #tpu.memory_space<vmem>>, vector<1x4x1xf32>
    %330 = vector.shape_cast %329 : vector<1x4x1xf32> to vector<4x1xf32>
    %331 = vector.broadcast %330 : vector<4x1xf32> to vector<4x256xf32>
    %332 = arith.mulf %263, %331 : vector<4x256xf32>
    %c8_233 = arith.constant 8 : index
    %c0_234 = arith.constant 0 : index
    %c0_235 = arith.constant 0 : index
    %333 = vector.load %arg2[%c8_233, %c0_234, %c0_235] : memref<9x256x256xf32, #tpu.memory_space<vmem>>, vector<1x256x256xf32>
    %334 = vector.shape_cast %333 : vector<1x256x256xf32> to vector<256x256xf32>
    %cst_236 = arith.constant dense<0.000000e+00> : vector<4x256xf32>
    %335 = tpu.matmul %332, %334, %cst_236 {dimension_numbers = #tpu.dot_dimension_numbers<[1], [0], [0], [1], [0, 0, 1, 1], [], []>} : vector<4x256xf32>, vector<256x256xf32>, vector<4x256xf32> -> vector<4x256xf32>
    %336 = arith.addf %328, %335 : vector<4x256xf32>
    %c2_237 = arith.constant 2 : index
    %c0_238 = arith.constant 0 : index
    %c0_239 = arith.constant 0 : index
    %337 = vector.load %arg4[%c2_237, %c0_238, %c0_239] : memref<3x4x1xf32, #tpu.memory_space<vmem>>, vector<1x4x1xf32>
    %338 = vector.shape_cast %337 : vector<1x4x1xf32> to vector<4x1xf32>
    %339 = vector.broadcast %338 : vector<4x1xf32> to vector<4x256xf32>
    %340 = arith.addf %336, %339 : vector<4x256xf32>
    %cst_240 = arith.constant 5.000000e-01 : f32
    %341 = vector.broadcast %cst_240 : f32 to vector<4x256xf32>
    %342 = arith.mulf %341, %340 : vector<4x256xf32>
    %343 = math.tanh %342 : vector<4x256xf32>
    %cst_241 = arith.constant 1.000000e+00 : f32
    %344 = vector.broadcast %cst_241 : f32 to vector<4x256xf32>
    %345 = arith.addf %343, %344 : vector<4x256xf32>
    %cst_242 = arith.constant 5.000000e-01 : f32
    %346 = vector.broadcast %cst_242 : f32 to vector<4x256xf32>
    %347 = arith.mulf %346, %345 : vector<4x256xf32>
    %348 = arith.mulf %340, %347 : vector<4x256xf32>
    %cst_243 = arith.constant dense<0.000000e+00> : vector<4xf32>
    %349 = vector.multi_reduction <add>, %348, %cst_243 [1] : vector<4x256xf32> to vector<4xf32>
    %350 = vector.shape_cast %349 : vector<4xf32> to vector<4x1xf32>
    %cst_244 = arith.constant 2.560000e+02 : f32
    %351 = vector.broadcast %cst_244 : f32 to vector<4x1xf32>
    %352 = arith.divf %350, %351 : vector<4x1xf32>
    %c2_245 = arith.constant 2 : index
    %c0_246 = arith.constant 0 : index
    %c0_247 = arith.constant 0 : index
    %353 = vector.load %arg5[%c2_245, %c0_246, %c0_247] : memref<3x4x1xf32, #tpu.memory_space<vmem>>, vector<1x4x1xf32>
    %354 = vector.shape_cast %353 : vector<1x4x1xf32> to vector<4x1xf32>
    %355 = arith.mulf %354, %352 : vector<4x1xf32>
    %cst_248 = arith.constant dense<0.000000e+00> : vector<1xf32>
    %356 = vector.multi_reduction <add>, %355, %cst_248 [0] : vector<4x1xf32> to vector<1xf32>
    %357 = vector.shape_cast %356 : vector<1xf32> to vector<1x1xf32>
    %c2_249 = arith.constant 2 : index
    %c0_250 = arith.constant 0 : index
    %c0_251 = arith.constant 0 : index
    %358 = vector.load %arg6[%c2_249, %c0_250, %c0_251] : memref<3x1x1xf32, #tpu.memory_space<vmem>>, vector<1x1x1xf32>
    %359 = vector.shape_cast %358 : vector<1x1x1xf32> to vector<1x1xf32>
    %360 = arith.addf %357, %359 : vector<1x1xf32>
    %cst_252 = arith.constant 5.000000e-01 : f32
    %361 = vector.broadcast %cst_252 : f32 to vector<1x1xf32>
    %362 = arith.mulf %361, %360 : vector<1x1xf32>
    %363 = math.tanh %362 : vector<1x1xf32>
    %cst_253 = arith.constant 1.000000e+00 : f32
    %364 = vector.broadcast %cst_253 : f32 to vector<1x1xf32>
    %365 = arith.addf %363, %364 : vector<1x1xf32>
    %cst_254 = arith.constant 5.000000e-01 : f32
    %366 = vector.broadcast %cst_254 : f32 to vector<1x1xf32>
    %367 = arith.mulf %366, %365 : vector<1x1xf32>
    %368 = arith.mulf %360, %367 : vector<1x1xf32>
    %c2_255 = arith.constant 2 : index
    %c0_256 = arith.constant 0 : index
    %c0_257 = arith.constant 0 : index
    %369 = vector.load %arg7[%c2_255, %c0_256, %c0_257] : memref<3x4x1xf32, #tpu.memory_space<vmem>>, vector<1x4x1xf32>
    %370 = vector.shape_cast %369 : vector<1x4x1xf32> to vector<4x1xf32>
    %371 = vector.broadcast %368 : vector<1x1xf32> to vector<4x1xf32>
    %372 = arith.mulf %370, %371 : vector<4x1xf32>
    %cst_258 = arith.constant dense<0.000000e+00> : vector<4xf32>
    %373 = vector.multi_reduction <add>, %372, %cst_258 [1] : vector<4x1xf32> to vector<4xf32>
    %374 = vector.shape_cast %373 : vector<4xf32> to vector<4x1xf32>
    %c2_259 = arith.constant 2 : index
    %c0_260 = arith.constant 0 : index
    %c0_261 = arith.constant 0 : index
    %375 = vector.load %arg8[%c2_259, %c0_260, %c0_261] : memref<3x4x1xf32, #tpu.memory_space<vmem>>, vector<1x4x1xf32>
    %376 = vector.shape_cast %375 : vector<1x4x1xf32> to vector<4x1xf32>
    %377 = arith.addf %374, %376 : vector<4x1xf32>
    %cst_262 = arith.constant 5.000000e-01 : f32
    %378 = vector.broadcast %cst_262 : f32 to vector<4x1xf32>
    %379 = arith.mulf %378, %377 : vector<4x1xf32>
    %380 = math.tanh %379 : vector<4x1xf32>
    %cst_263 = arith.constant 1.000000e+00 : f32
    %381 = vector.broadcast %cst_263 : f32 to vector<4x1xf32>
    %382 = arith.addf %380, %381 : vector<4x1xf32>
    %cst_264 = arith.constant 5.000000e-01 : f32
    %383 = vector.broadcast %cst_264 : f32 to vector<4x1xf32>
    %384 = arith.mulf %383, %382 : vector<4x1xf32>
    %385 = vector.broadcast %384 : vector<4x1xf32> to vector<4x256xf32>
    %386 = arith.mulf %348, %385 : vector<4x256xf32>
    %c2_265 = arith.constant 2 : index
    %c0_266 = arith.constant 0 : index
    %c0_267 = arith.constant 0 : index
    %387 = vector.load %arg9[%c2_265, %c0_266, %c0_267] : memref<3x8x4xf32, #tpu.memory_space<vmem>>, vector<1x8x4xf32>
    %388 = vector.shape_cast %387 : vector<1x8x4xf32> to vector<8x4xf32>
    %cst_268 = arith.constant dense<0.000000e+00> : vector<8x256xf32>
    %389 = tpu.matmul %388, %386, %cst_268 {dimension_numbers = #tpu.dot_dimension_numbers<[1], [0], [0], [1], [0, 0, 1, 1], [], []>} : vector<8x4xf32>, vector<4x256xf32>, vector<8x256xf32> -> vector<8x256xf32>
    %c2_269 = arith.constant 2 : index
    %c0_270 = arith.constant 0 : index
    %c0_271 = arith.constant 0 : index
    %390 = vector.load %arg10[%c2_269, %c0_270, %c0_271] : memref<3x8x1xf32, #tpu.memory_space<vmem>>, vector<1x8x1xf32>
    %391 = vector.shape_cast %390 : vector<1x8x1xf32> to vector<8x1xf32>
    %392 = vector.broadcast %391 : vector<8x1xf32> to vector<8x256xf32>
    %393 = arith.addf %389, %392 : vector<8x256xf32>
    %c0_272 = arith.constant 0 : index
    %c0_273 = arith.constant 0 : index
    %c0_274 = arith.constant 0 : index
    %394 = vector.load %arg11[%c0_272, %c0_273, %c0_274] : memref<1x8x256xf32, #tpu.memory_space<vmem>>, vector<1x8x256xf32>
    %395 = vector.shape_cast %394 : vector<1x8x256xf32> to vector<8x256xf32>
    %396 = vector.shape_cast %393 : vector<8x256xf32> to vector<1x8x256xf32>
    tpu.vector_store %arg11[%c0_272, %c0_273, %c0_274], %396 {strides = array<i32>} : memref<1x8x256xf32, #tpu.memory_space<vmem>>, vector<1x8x256xf32>,
    return
  }
  func.func @transform_0(%arg0: i32) -> (i32, i32, i32) {
    %c0_i32 = arith.constant 0 : i32
    %c0_i32_0 = arith.constant 0 : i32
    %c0_i32_1 = arith.constant 0 : i32
    return %arg0, %c0_i32, %c0_i32_0 : i32, i32, i32
  }
  func.func @transform_1(%arg0: i32) -> (i32, i32, i32) {
    %c0_i32 = arith.constant 0 : i32
    %c0_i32_0 = arith.constant 0 : i32
    %c0_i32_1 = arith.constant 0 : i32
    %c0_i32_2 = arith.constant 0 : i32
    return %c0_i32, %c0_i32_0, %c0_i32_1 : i32, i32, i32
  }
  func.func @transform_2(%arg0: i32) -> (i32, i32, i32) {
    %c0_i32 = arith.constant 0 : i32
    %c0_i32_0 = arith.constant 0 : i32
    %c0_i32_1 = arith.constant 0 : i32
    %c0_i32_2 = arith.constant 0 : i32
    return %c0_i32, %c0_i32_0, %c0_i32_1 : i32, i32, i32
  }
  func.func @transform_3(%arg0: i32) -> (i32, i32, i32) {
    %c0_i32 = arith.constant 0 : i32
    %c0_i32_0 = arith.constant 0 : i32
    %c0_i32_1 = arith.constant 0 : i32
    %c0_i32_2 = arith.constant 0 : i32
    return %c0_i32, %c0_i32_0, %c0_i32_1 : i32, i32, i32
  }
  func.func @transform_4(%arg0: i32) -> (i32, i32, i32) {
    %c0_i32 = arith.constant 0 : i32
    %c0_i32_0 = arith.constant 0 : i32
    %c0_i32_1 = arith.constant 0 : i32
    %c0_i32_2 = arith.constant 0 : i32
    return %c0_i32, %c0_i32_0, %c0_i32_1 : i32, i32, i32
  }
  func.func @transform_5(%arg0: i32) -> (i32, i32, i32) {
    %c0_i32 = arith.constant 0 : i32
    %c0_i32_0 = arith.constant 0 : i32
    %c0_i32_1 = arith.constant 0 : i32
    %c0_i32_2 = arith.constant 0 : i32
    return %c0_i32, %c0_i32_0, %c0_i32_1 : i32, i32, i32
  }
  func.func @transform_6(%arg0: i32) -> (i32, i32, i32) {
    %c0_i32 = arith.constant 0 : i32
    %c0_i32_0 = arith.constant 0 : i32
    %c0_i32_1 = arith.constant 0 : i32
    %c0_i32_2 = arith.constant 0 : i32
    return %c0_i32, %c0_i32_0, %c0_i32_1 : i32, i32, i32
  }
  func.func @transform_7(%arg0: i32) -> (i32, i32, i32) {
    %c0_i32 = arith.constant 0 : i32
    %c0_i32_0 = arith.constant 0 : i32
    %c0_i32_1 = arith.constant 0 : i32
    %c0_i32_2 = arith.constant 0 : i32
    return %c0_i32, %c0_i32_0, %c0_i32_1 : i32, i32, i32
  }
  func.func @transform_8(%arg0: i32) -> (i32, i32, i32) {
    %c0_i32 = arith.constant 0 : i32
    %c0_i32_0 = arith.constant 0 : i32
    %c0_i32_1 = arith.constant 0 : i32
    %c0_i32_2 = arith.constant 0 : i32
    return %c0_i32, %c0_i32_0, %c0_i32_1 : i32, i32, i32
  }
  func.func @transform_9(%arg0: i32) -> (i32, i32, i32) {
    %c0_i32 = arith.constant 0 : i32
    %c0_i32_0 = arith.constant 0 : i32
    %c0_i32_1 = arith.constant 0 : i32
    %c0_i32_2 = arith.constant 0 : i32
    return %c0_i32, %c0_i32_0, %c0_i32_1 : i32, i32, i32
  }
  func.func @transform_10(%arg0: i32) -> (i32, i32, i32) {
    %c0_i32 = arith.constant 0 : i32
    %c0_i32_0 = arith.constant 0 : i32
    %c0_i32_1 = arith.constant 0 : i32
    return %arg0, %c0_i32, %c0_i32_0 : i32, i32, i32
  }
}

</mosaic_0001>

<bundles_post_ra>
// kernel: tpu_custom_call.1
= control target key start
LH: loop header
LB: loop body
LE: loop exit
PB: predicated region body
PF: predicated region fallthrough
CT: control target
= control target key end

     0   :  { %s5857_s0 = inlined_call_operand.hbm [shape: f32[2,4,256], index: 0, kind: input, shape index: {}]   ;;  %s5858_s1 = inlined_call_operand.hbm [shape: f32[9,256,256], index: 1, kind: input, shape index: {}]   ;;  %s5859_s2 = inlined_call_operand.vmem [shape: f32[27,4,1], index: 2, kind: input, shape index: {}]   ;;  %s5860_s3 = inlined_call_operand.vmem [shape: f32[3,4,1], index: 3, kind: input, shape index: {}]   ;;  %s5861_s4 = inlined_call_operand.vmem [shape: f32[3,4,1], index: 4, kind: input, shape index: {}]   ;;  %s5862_s5 = inlined_call_operand.vmem [shape: f32[3,1,1], index: 5, kind: input, shape index: {}]   ;;  %s5863_s6 = inlined_call_operand.vmem [shape: f32[3,4,1], index: 6, kind: input, shape index: {}]   ;;  %s5864_s7 = inlined_call_operand.vmem [shape: f32[3,4,1], index: 7, kind: input, shape index: {}]   ;;  %s5865_s8 = inlined_call_operand.vmem [shape: f32[3,8,4], index: 8, kind: input, shape index: {}]   ;;  %s5866_s9 = inlined_call_operand.vmem [shape: f32[3,8,1], index: 9, kind: input, shape index: {}]   ;;  %s5867_s10 = inlined_call_operand.hbm [shape: f32[2,8,256], index: 10, kind: output, shape index: {}]  }
   0x1   :  { %5876 = sst [smem:[#allocation15_spill]] %s5858_s1 }
   0x2   :  { %15 = vsyncpa [#allocation3], 0 }
   0x3   :  { %17 = vsyncpa [#allocation3 + $0x1], 0 }
   0x4   :  { %18 = vsyncpa [#allocation6], 0 }
   0x5   :  { %19 = vsyncpa [#allocation4], 0 }
   0x6   :  { %21 = vsyncpa [#allocation4 + $0x1], 0  ;;  %s5306_s13 = smov 0   ;;  %s5308_s14 = smov 0  }
   0x7   :  { %s5310_s15 = smov 0   ;;  %s5312_s16 = smov 0  }
   0x8 LB: > { %5877 = sst [smem:[#allocation11_spill]] %s5229_s13  ;;  %s5327_s17 = sadd.s32 4294967295, %s5241_s16   ;;  %s5241_s16 = sphi %s5312_s16, %s5898_s16   ;;  %s5237_s15 = sphi %s5310_s15, %s5902_s15   ;;  %s5233_s14 = sphi %s5308_s14, %s5901_s14   ;;  %s5229_s13 = sphi %s5306_s13, %s5900_s13  }
   0x9   : > { %s3821_s18 = sadd.s32 4294967294, %s5241_s16   ;;  %p47_p0 = scmp.ne.s32.totalorder %s5233_s14, %s5229_s13 }
   0xa   : > { %p5872_p1 = scmp.eq.s32.totalorder %s5327_s17, 0  ;;  %p266_p3 = scmp.eq.s32.totalorder %s3821_s18, 1 }
   0xb   : > { %p3822_p5 = scmp.ge.s32.totalorder %s5241_s16, 1  ;;  %p273_p7 = scmp.lt.s32.totalorder %s5241_s16, 3 }
   0xc   : > { %p5336_p4 = por %p5872_p1, %p47_p0  ;;  %p5341_p6 = por %p266_p3, %p47_p0 }
   0xd   : > { %p5346_p8 = pnand %p3822_p5, %p273_p7  ;;  %s5243_s22 = smov [#allocation5]  }
   0xe   : > { %s5878_s19 = scalar_select %p5336_p4, 1, 0 }
   0xf   : > { %s5879_s20 = scalar_select %p5341_p6, 1, 0 }
  0x10   : > { %s5881_s21 = scalar_select %p5346_p8, 1, 0 }
  0x11   : > { %5880 = sst [smem:[#allocation12_spill]] %s5879_s20  ;;  %s285_s23 = sshll.u32 %s5243_s22, 4  ;;  %s286_s23 = int_to_ptr.vmem [resolvable:$true] %s285_s23 }
  0x12   : > { %p3896_p9 = pneg %p5346_p8  ;;  %s5360_s25 = sadd.s32 1, %s5241_s16  }
  0x13   : > { %5883 = sst [smem:[#allocation13_spill]] %s5360_s25  ;;  %s34_s26 = sadd.s32 1, %s5237_s15 }
  0x14   : > { %p5355_p11 = pnand %p3896_p9, %p5872_p1  ;;  %s31_s27 = ssub.s32 %s5241_s16, %s5360_s25 }
  0x15   : > { %s5130_s28 = scalar_lea.vmem %s286_s23, 73728  ;;  %p5138_p5 = scmp.lt.s32.totalorder %s286_s23, %s286_s23 }
  0x16   : > { %p5121_p12 = pneg %p5355_p11  ;;  %p5131_p13 = scmp.ne.s32.totalorder %s286_s23, %s5130_s28 }
  0x17   : > { %p5139_p7 = scmp.lt.s32.totalorder %s5130_s28, %s5130_s28 }
  0x18   : > { %p5133_p0 = pnand %p5131_p13, %p5121_p12 }
  0x19   : > { %p5140_p10 = por %p5139_p7, %p5138_p5 }
  0x1a   : > { %p5134_p3 = pneg %p5133_p0 }
  0x1c   : > { %p5141_p2 = pnand %p5140_p10, %p5134_p3 }
  0x1e   : > { %5144 = shalt.err (!%p5141_p2)
}
  0x1f   : > { %s5244_s29 = smov 256   ;;  %s5245_s30 = smov 16  }
  0x20   : > { %s5884_s1 = sld [smem:[#allocation15_spill]]  ;;  %p32_p9 = scmp.eq.s32.totalorder %s31_s27, 0 }
  0x21   : > { %p41_p12 = scmp.ne.s32.totalorder %s5237_s15, %s5233_s14  ;;  %p42_p10 = scmp.eq.s32.totalorder %s5241_s16, 0 }
  0x22   : > { %p3909_p2 = scmp.lt.s32.totalorder %s5241_s16, 2  ;;  %p5886_p0 = scmp.eq.s32.totalorder %s5327_s17, 1 }
  0x23   : > { %s5377_s18 = scalar_select %p32_p9, %s5237_s15, %s34_s26  }
  0x24   : > { %p43_p13 = por %p42_p10, %p41_p12  ;;  %p5381_p3 = por %p5886_p0, %p41_p12 }
  0x25   : > { %5885 = sst [smem:[#allocation14_spill]] %s5377_s18  ;;  %s323_s28 = sand.u32 1, %s5237_s15  }
  0x26   : > { %3899 = dma.hbm_to_vmem [thread:$0]  (!%p5355_p11), %s5884_s1, 73728, %s286_s23, [#allocation6], %s5244_s29, %s5244_s29, %s5245_s30  }
  0x27   : > { %s5887_s22 = scalar_select %p5381_p3, 1, 0 }
  0x28   : > { %s3886_s25 = sshll.u32 %s5241_s16, 7  ;;  %s3825_s20 = sshll.u32 %s323_s28, 3 }
  0x29   : > { %s5390_s11 = scalar_lea.hbm %s5857_s0, %s3886_s25  ;;  %s327_s23 = scalar_lea.vmem [#allocation2], %s3825_s20 }
  0x2a   : > { %s335_s26 = sshll.u32 %s327_s23, 4  ;;  %p5392_p11 = pnand %p3909_p2, %p43_p13  ;;  %s336_s26 = int_to_ptr.vmem [resolvable:$true] %s335_s26 }
  0x2b   : > { %s324_s29 = scalar_lea.sflag [#allocation3], %s323_s28  ;;  %s5145_s30 = scalar_lea.hbm %s5390_s11, 128 }
  0x2c   : > { %p5146_p5 = scmp.ne.s32.totalorder %s5390_s11, %s5145_s30  ;;  %p5147_p7 = pneg %p5392_p11 }
  0x2d   : > { %s5150_s12 = scalar_lea.hbm %s5857_s0, 256  ;;  %p5151_p10 = scmp.lt.s32.totalorder %s5390_s11, %s5857_s0 }
  0x2e   : > { %p5148_p9 = pnand %p5147_p7, %p5146_p5  ;;  %p5152_p2 = scmp.lt.s32.totalorder %s5150_s12, %s5145_s30 }
  0x30   : > { %p5149_p12 = pneg %p5148_p9  ;;  %p5153_p13 = por %p5152_p2, %p5151_p10 }
  0x32   : > { %p5154_p0 = pnand %p5153_p13, %p5149_p12 }
  0x34   : > { %5157 = shalt.err (!%p5154_p0)
}
  0x35   : > { %s5158_s23 = scalar_lea.vmem %s336_s26, 128  ;;  %s5246_s28 = smov [#allocation2]  }
  0x36   : > { %p5159_p1 = scmp.ne.s32.totalorder %s336_s26, %s5158_s23  ;;  %s5163_s1 = sshll.u32 %s5246_s28, 4  ;;  %s5164_s1 = int_to_ptr.vmem [resolvable:$false] %s5163_s1 }
  0x37   : > { %s5165_s18 = scalar_lea.vmem %s5164_s1, 256  ;;  %p5166_p5 = scmp.lt.s32.totalorder %s336_s26, %s5164_s1 }
  0x38   : > { %p5161_p6 = pnand %p5159_p1, %p5147_p7  ;;  %p5167_p9 = scmp.lt.s32.totalorder %s5165_s18, %s5158_s23 }
  0x3a   : > { %p5162_p3 = pneg %p5161_p6  ;;  %p5168_p4 = por %p5167_p9, %p5166_p5 }
  0x3c   : > { %p5169_p8 = pnand %p5168_p4, %p5162_p3 }
  0x3e   : > { %5172 = shalt.err (!%p5169_p8)
}
  0x3f   : > { %3903 = dma.hbm_to_vmem [thread:$0]  (!%p5392_p11), %s5390_s11, 128, %s336_s26, %s324_s29  }
  0x40   : > { %p5889_p12 = scmp.ne.s32.totalorder %s5881_s21, 0 }
  0x41   : > { %s5413_s30 = sand.u32 (!%p5889_p12), 1, %s5233_s14   ;;  %p5890_p1 = scmp.ne.s32.totalorder (!%p5889_p12), %s5878_s19, 0 }
  0x42   : > { %344 = sbr.rel (%p5889_p12) target bundleno = 3279 (0xccf), region = 60  ;;  %s3829_s13 = sshll.u32 (!%p5889_p12), %s5413_s30, 3 }
  0x43   : > { %s347_s25 = scalar_lea.sflag (!%p5889_p12), [#allocation3], %s5413_s30  ;;  %s5417_s1 = scalar_lea.vmem (!%p5889_p12), [#allocation2], %s3829_s13 }
  0x47   : > { %5216 = dma.done.wait (%p5890_p1), %s347_s25, 128  }
  0x48   : > { %5218 = vsyncadd (%p5890_p1), %s347_s25, 4294967168  ;;  %p5891_p4 = scmp.eq.s32.totalorder %s5327_s17, 0 }
  0x4a   : > { %5220 = dma.done.wait (%p5891_p4), [#allocation6], 73728   ;;  %p5892_p6 = pmov %p5891_p4 }
  0x4b   : > { %v5247_v0 = vmov 0   ;;  %v3832_v1 = vld [vmem:[%s5859_s2 + $0x4] sm:$0xf]  ;;  %v3833_v2 = vld [vmem:[%s5859_s2 + $0x8] sm:$0xf]  ;;  %v515_v7 = vld [vmem:[#allocation5 + $0x2e8] sm:$0xff] }
  0x4c   : > { %5222 = vsyncadd (%p5892_p6), [#allocation6], 4294893568  ;;  %3950 = vset.pattern.permute.xlu0 %v5247_v0  ;;  %3951 = vset.pattern.permute.xlu1 %v5247_v0  ;;  %v392_v3 = vld [vmem:[%s5859_s2] sm:$0xf]  ;;  %v3834_v4 = vld [vmem:[%s5859_s2 + $0xc] sm:$0xf] }
  0x4d   : > { %474 = vperm.xlu0 %3950, %v3832_v1   ;;  %702 = vperm.xlu1 %3951, %v3833_v2   ;;  %v517_v5 = vld [vmem:[#allocation5 + $0x2f8] sm:$0xff]  ;;  %v516_v6 = vld [vmem:[#allocation5 + $0x2f0] sm:$0xff]  ;;  %v514_v8 = vld [vmem:[#allocation5 + $0x2e0] sm:$0xff]  ;;  %vm1808_vm0 = vcmask 1043456   ;;  %vm1818_vm1 = vcmask 3072   ;;  %vm1860_vm2 = vcmask 31744  }
  0x4e   : > { %553 = vmatprep.subr.mxu0 %v517_v5  ;;  %v513_v9 = vld [vmem:[#allocation5 + $0x2d8] sm:$0xff]  ;;  %v436_v11 = vld [vmem:[#allocation5 + $0xf0] sm:$0xff]  ;;  %v3835_v12 = vld [vmem:[%s5859_s2 + $0x10] sm:$0xf]  ;;  %s3831_s20 = sshll.u32 %s5413_s30, 4  ;;  %s3727_s18 = scalar_lea.sflag [#allocation4], %s5413_s30 }
  0x4f   : > { %554 = vmatpush1.msra.mxu0 %v516_v6  ;;  %v437_v10 = vld [vmem:[#allocation5 + $0xf8] sm:$0xff]  ;;  %v512_v13 = vld [vmem:[#allocation5 + $0x2d0] sm:$0xff]  ;;  %v3836_v14 = vld [vmem:[%s5859_s2 + $0x14] sm:$0xf]  ;;  %s390_s23 = scalar_lea.vmem [#allocation7], %s3831_s20  ;;  %p5893_p3 = scmp.ne.s32.totalorder %s5887_s22, 0 }
  0x50   : > { %555 = vmatprep.subr.mxu0 %v515_v7  ;;  %627 = vmatprep.subr.mxu1 %v437_v10  ;;  %v511_v15 = vld [vmem:[#allocation5 + $0x2c8] sm:$0xff]  ;;  %v510_v17 = vld [vmem:[#allocation5 + $0x2c0] sm:$0xff]  ;;  %v509_v19 = vld [vmem:[#allocation5 + $0x2b8] sm:$0xff]  ;;  %s3741_s28 = sshll.u32 %s390_s23, 4  ;;  %s5250_s26 = smov [#allocation7]   ;;  %s3742_s28 = int_to_ptr.vmem [resolvable:$true] %s3741_s28 }
  0x51   : > { %395 = vperm.xlu0 %3950, %v392_v3   ;;  %858 = vperm.xlu1 %3951, %v3834_v4   ;;  %v435_v16 = vld [vmem:[#allocation5 + $0xe8] sm:$0xff]  ;;  %v434_v18 = vld [vmem:[#allocation5 + $0xe0] sm:$0xff]  ;;  %v433_v21 = vld [vmem:[#allocation5 + $0xd8] sm:$0xff]  ;;  %s5173_s11 = scalar_lea.vmem %s3742_s28, 256 }
  0x52   : > { %556 = vmatpush1.msra.mxu0 %v514_v8  ;;  %628 = vmatpush1.msra.mxu1 %v436_v11  ;;  %v3837_v20 = vld [vmem:[%s5859_s2 + $0x18] sm:$0xf]  ;;  %v3838_v22 = vld [vmem:[%s5859_s2 + $0x1c] sm:$0xf]  ;;  %v508_v23 = vld [vmem:[#allocation5 + $0x2b0] sm:$0xff]  ;;  %p5174_p8 = scmp.ne.s32.totalorder %s3742_s28, %s5173_s11 }
  0x53   : > { %557 = vmatprep.subr.mxu0 %v513_v9  ;;  %629 = vmatprep.subr.mxu1 %v435_v16  ;;  %v432_v24 = vld [vmem:[#allocation5 + $0xd0] sm:$0xff]  ;;  %v507_v25 = vld [vmem:[#allocation5 + $0x2a8] sm:$0xff]  ;;  %v506_v27 = vld [vmem:[#allocation5 + $0x2a0] sm:$0xff] }
  0x54   : > { %558 = vmatpush1.msra.mxu0 %v512_v13  ;;  %630 = vmatpush1.msra.mxu1 %v434_v18  ;;  %v431_v26 = vld [vmem:[#allocation5 + $0xc8] sm:$0xff]  ;;  %v3839_v28 = vld [vmem:[%s5859_s2 + $0x20] sm:$0xf]  ;;  %v430_v29 = vld [vmem:[#allocation5 + $0xc0] sm:$0xff]  ;;  %p5175_p11 = pnand %p5174_p8, %p5893_p3 }
  0x55   : > { %1014 = vperm.xlu0 %3950, %v3835_v12   ;;  %1170 = vperm.xlu1 %3951, %v3836_v14   ;;  %v1790_v30 = vld [vmem:[%s5860_s3] sm:$0xf]  ;;  %v505_v31 = vld [vmem:[#allocation5 + $0x298] sm:$0xff]  ;;  %v503_v35 = vld [vmem:[#allocation5 + $0x288] sm:$0xff] }
  0x56   : > { %559 = vmatprep.subr.mxu0 %v511_v15  ;;  %631 = vmatprep.subr.mxu1 %v433_v21  ;;  %v429_v32 = vld [vmem:[#allocation5 + $0xb8] sm:$0xff]  ;;  %v504_v33 = vld [vmem:[#allocation5 + $0x290] sm:$0xff]  ;;  %v427_v36 = vld [vmem:[#allocation5 + $0xa8] sm:$0xff]  ;;  %p5176_p7 = pneg %p5175_p11 }
  0x57   : > { %560 = vmatpush1.msra.mxu0 %v510_v17  ;;  %632 = vmatpush1.msra.mxu1 %v432_v24  ;;  %v428_v34 = vld [vmem:[#allocation5 + $0xb0] sm:$0xff]  ;;  %v502_v37 = vld [vmem:[#allocation5 + $0x280] sm:$0xff]  ;;  %v501_v39 = vld [vmem:[#allocation5 + $0x278] sm:$0xff] }
  0x58   : > { %561 = vmatprep.subr.mxu0 %v509_v19  ;;  %633 = vmatprep.subr.mxu1 %v431_v26  ;;  %v426_v38 = vld [vmem:[#allocation5 + $0xa0] sm:$0xff]  ;;  %v425_v40 = vld [vmem:[#allocation5 + $0x98] sm:$0xff]  ;;  %v500_v41 = vld [vmem:[#allocation5 + $0x270] sm:$0xff] }
  0x59   : > { %1326 = vperm.xlu0 %3950, %v3837_v20   ;;  %1482 = vperm.xlu1 %3951, %v3838_v22   ;;  %v424_v42 = vld [vmem:[#allocation5 + $0x90] sm:$0xff]  ;;  %v499_v43 = vld [vmem:[#allocation5 + $0x268] sm:$0xff]  ;;  %v498_v45 = vld [vmem:[#allocation5 + $0x260] sm:$0xff] }
  0x5a   : > { %562 = vmatpush1.msra.mxu0 %v508_v23  ;;  %634 = vmatpush1.msra.mxu1 %v430_v29  ;;  %v423_v44 = vld [vmem:[#allocation5 + $0x88] sm:$0xff]  ;;  %v422_v46 = vld [vmem:[#allocation5 + $0x80] sm:$0xff]  ;;  %v497_v47 = vld [vmem:[#allocation5 + $0x258] sm:$0xff] }
  0x5b   : > { %563 = vmatprep.subr.mxu0 %v507_v25  ;;  %635 = vmatprep.subr.mxu1 %v429_v32  ;;  %v421_v48 = vld [vmem:[#allocation5 + $0x78] sm:$0xff]  ;;  %v496_v49 = vld [vmem:[#allocation5 + $0x250] sm:$0xff]  ;;  %v495_v51 = vld [vmem:[#allocation5 + $0x248] sm:$0xff] }
  0x5c   : > { %564 = vmatpush1.msra.mxu0 %v506_v27  ;;  %636 = vmatpush1.msra.mxu1 %v428_v34  ;;  %v420_v50 = vld [vmem:[#allocation5 + $0x70] sm:$0xff]  ;;  %v419_v52 = vld [vmem:[#allocation5 + $0x68] sm:$0xff]  ;;  %v494_v53 = vld [vmem:[#allocation5 + $0x240] sm:$0xff] }
  0x5d   : > { %1638 = vperm.xlu0 %3950, %v3839_v28   ;;  %1793 = vperm.xlu1 %3951, %v1790_v30   ;;  %v418_v54 = vld [vmem:[#allocation5 + $0x60] sm:$0xff]  ;;  %v493_v55 = vld [vmem:[#allocation5 + $0x238] sm:$0xff]  ;;  %v492_v57 = vld [vmem:[#allocation5 + $0x230] sm:$0xff] }
  0x5e   : > { %565 = vmatprep.subr.mxu0 %v505_v31  ;;  %637 = vmatprep.subr.mxu1 %v427_v36  ;;  %v417_v56 = vld [vmem:[#allocation5 + $0x58] sm:$0xff]  ;;  %v416_v58 = vld [vmem:[#allocation5 + $0x50] sm:$0xff]  ;;  %v491_v59 = vld [vmem:[#allocation5 + $0x228] sm:$0xff] }
  0x5f   : > { %566 = vmatpush1.msra.mxu0 %v504_v33  ;;  %638 = vmatpush1.msra.mxu1 %v426_v38  ;;  %v415_v60 = vld [vmem:[#allocation5 + $0x48] sm:$0xff]  ;;  %v490_v61 = vld [vmem:[#allocation5 + $0x220] sm:$0xff]  ;;  %v489_v63 = vld [vmem:[#allocation5 + $0x218] sm:$0xff] }
  0x60   : > { %567 = vmatprep.subr.mxu0 %v503_v35  ;;  %639 = vmatprep.subr.mxu1 %v425_v40  ;;  %v414_v62 = vld [vmem:[#allocation5 + $0x40] sm:$0xff]  ;;  %v413_v0 = vld [vmem:[#allocation5 + $0x38] sm:$0xff]  ;;  %v488_v1 = vld [vmem:[#allocation5 + $0x210] sm:$0xff] }
  0x61   : > { %568 = vmatpush1.msra.mxu0 %v502_v37  ;;  %640 = vmatpush1.msra.mxu1 %v424_v42  ;;  %v412_v2 = vld [vmem:[#allocation5 + $0x30] sm:$0xff]  ;;  %v487_v3 = vld [vmem:[#allocation5 + $0x208] sm:$0xff]  ;;  %v486_v5 = vld [vmem:[#allocation5 + $0x200] sm:$0xff] }
  0x62   : > { %569 = vmatprep.subr.mxu0 %v501_v39  ;;  %641 = vmatprep.subr.mxu1 %v423_v44  ;;  %v411_v4 = vld [vmem:[#allocation5 + $0x28] sm:$0xff]  ;;  %v410_v6 = vld [vmem:[#allocation5 + $0x20] sm:$0xff]  ;;  %v549_v7 = vld [vmem:[#allocation5 + $0x3f8] sm:$0xff] }
  0x63   : > { %570 = vmatpush1.msra.mxu0 %v500_v41  ;;  %642 = vmatpush1.msra.mxu1 %v422_v46  ;;  %v409_v8 = vld [vmem:[#allocation5 + $0x18] sm:$0xff]  ;;  %v548_v9 = vld [vmem:[#allocation5 + $0x3f0] sm:$0xff]  ;;  %v547_v11 = vld [vmem:[#allocation5 + $0x3e8] sm:$0xff] }
  0x64   : > { %571 = vmatprep.subr.mxu0 %v499_v43  ;;  %643 = vmatprep.subr.mxu1 %v421_v48  ;;  %v408_v10 = vld [vmem:[#allocation5 + $0x10] sm:$0xff]  ;;  %v407_v12 = vld [vmem:[#allocation5 + $0x8] sm:$0xff]  ;;  %v546_v13 = vld [vmem:[#allocation5 + $0x3e0] sm:$0xff] }
  0x65   : > { %572 = vmatpush1.msra.mxu0 %v498_v45  ;;  %644 = vmatpush1.msra.mxu1 %v420_v50  ;;  %v406_v14 = vld [vmem:[#allocation5] sm:$0xff]  ;;  %v545_v15 = vld [vmem:[#allocation5 + $0x3d8] sm:$0xff]  ;;  %v544_v17 = vld [vmem:[#allocation5 + $0x3d0] sm:$0xff] }
  0x66   : > { %573 = vmatprep.subr.mxu0 %v497_v47  ;;  %645 = vmatprep.subr.mxu1 %v419_v52  ;;  %v469_v16 = vld [vmem:[#allocation5 + $0x1f8] sm:$0xff]  ;;  %v468_v18 = vld [vmem:[#allocation5 + $0x1f0] sm:$0xff]  ;;  %v543_v19 = vld [vmem:[#allocation5 + $0x3c8] sm:$0xff] }
  0x67   : > { %574 = vmatpush1.msra.mxu0 %v496_v49  ;;  %646 = vmatpush1.msra.mxu1 %v418_v54  ;;  %v467_v20 = vld [vmem:[#allocation5 + $0x1e8] sm:$0xff]  ;;  %v542_v21 = vld [vmem:[#allocation5 + $0x3c0] sm:$0xff]  ;;  %v541_v23 = vld [vmem:[#allocation5 + $0x3b8] sm:$0xff] }
  0x68   : > { %575 = vmatprep.subr.mxu0 %v495_v51  ;;  %647 = vmatprep.subr.mxu1 %v417_v56  ;;  %v466_v22 = vld [vmem:[#allocation5 + $0x1e0] sm:$0xff]  ;;  %v465_v24 = vld [vmem:[#allocation5 + $0x1d8] sm:$0xff]  ;;  %v540_v25 = vld [vmem:[#allocation5 + $0x3b0] sm:$0xff] }
  0x69   : > { %576 = vmatpush1.msra.mxu0 %v494_v53  ;;  %648 = vmatpush1.msra.mxu1 %v416_v58  ;;  %v464_v26 = vld [vmem:[#allocation5 + $0x1d0] sm:$0xff]  ;;  %v539_v27 = vld [vmem:[#allocation5 + $0x3a8] sm:$0xff]  ;;  %v538_v29 = vld [vmem:[#allocation5 + $0x3a0] sm:$0xff] }
  0x6a   : > { %577 = vmatprep.subr.mxu0 %v493_v55  ;;  %649 = vmatprep.subr.mxu1 %v415_v60  ;;  %v463_v28 = vld [vmem:[#allocation5 + $0x1c8] sm:$0xff]  ;;  %v462_v30 = vld [vmem:[#allocation5 + $0x1c0] sm:$0xff]  ;;  %v537_v31 = vld [vmem:[#allocation5 + $0x398] sm:$0xff] }
  0x6b   : > { %578 = vmatpush1.msra.mxu0 %v492_v57  ;;  %650 = vmatpush1.msra.mxu1 %v414_v62  ;;  %v461_v32 = vld [vmem:[#allocation5 + $0x1b8] sm:$0xff]  ;;  %v536_v33 = vld [vmem:[#allocation5 + $0x390] sm:$0xff]  ;;  %v535_v35 = vld [vmem:[#allocation5 + $0x388] sm:$0xff] }
  0x6c   : > { %579 = vmatprep.subr.mxu0 %v491_v59  ;;  %651 = vmatprep.subr.mxu1 %v413_v0  ;;  %v460_v34 = vld [vmem:[#allocation5 + $0x1b0] sm:$0xff]  ;;  %v459_v36 = vld [vmem:[#allocation5 + $0x1a8] sm:$0xff]  ;;  %v534_v37 = vld [vmem:[#allocation5 + $0x380] sm:$0xff] }
  0x6d   : > { %580 = vmatpush1.msra.mxu0 %v490_v61  ;;  %652 = vmatpush1.msra.mxu1 %v412_v2  ;;  %v458_v38 = vld [vmem:[#allocation5 + $0x1a0] sm:$0xff]  ;;  %v533_v39 = vld [vmem:[#allocation5 + $0x378] sm:$0xff]  ;;  %v532_v41 = vld [vmem:[#allocation5 + $0x370] sm:$0xff] }
  0x6e   : > { %581 = vmatprep.subr.mxu0 %v489_v63  ;;  %653 = vmatprep.subr.mxu1 %v411_v4  ;;  %v457_v40 = vld [vmem:[#allocation5 + $0x198] sm:$0xff]  ;;  %v456_v42 = vld [vmem:[#allocation5 + $0x190] sm:$0xff]  ;;  %v531_v43 = vld [vmem:[#allocation5 + $0x368] sm:$0xff] }
  0x6f   : > { %582 = vmatpush1.msra.mxu0 %v488_v1  ;;  %654 = vmatpush1.msra.mxu1 %v410_v6  ;;  %v455_v44 = vld [vmem:[#allocation5 + $0x188] sm:$0xff]  ;;  %v530_v45 = vld [vmem:[#allocation5 + $0x360] sm:$0xff]  ;;  %v529_v47 = vld [vmem:[#allocation5 + $0x358] sm:$0xff] }
  0x70   : > { %583 = vmatprep.subr.mxu0 %v487_v3  ;;  %655 = vmatprep.subr.mxu1 %v409_v8  ;;  %v454_v46 = vld [vmem:[#allocation5 + $0x180] sm:$0xff]  ;;  %v453_v48 = vld [vmem:[#allocation5 + $0x178] sm:$0xff]  ;;  %v528_v49 = vld [vmem:[#allocation5 + $0x350] sm:$0xff] }
  0x71   : > { %584 = vmatpush1.msra.mxu0 %v486_v5  ;;  %656 = vmatpush1.msra.mxu1 %v408_v10  ;;  %v452_v50 = vld [vmem:[#allocation5 + $0x170] sm:$0xff]  ;;  %v527_v51 = vld [vmem:[#allocation5 + $0x348] sm:$0xff]  ;;  %v526_v53 = vld [vmem:[#allocation5 + $0x340] sm:$0xff] }
  0x72   : > { %585 = vmatprep.subr.mxu0 %v549_v7  ;;  %657 = vmatprep.subr.mxu1 %v407_v12  ;;  %v451_v52 = vld [vmem:[#allocation5 + $0x168] sm:$0xff]  ;;  %v450_v54 = vld [vmem:[#allocation5 + $0x160] sm:$0xff]  ;;  %v525_v55 = vld [vmem:[#allocation5 + $0x338] sm:$0xff] }
  0x73   : > { %586 = vmatpush2.msra.mxu0 %v548_v9  ;;  %658 = vmatpush1.msra.mxu1 %v406_v14  ;;  %v449_v56 = vld [vmem:[#allocation5 + $0x158] sm:$0xff]  ;;  %v524_v57 = vld [vmem:[#allocation5 + $0x330] sm:$0xff]  ;;  %v523_v59 = vld [vmem:[#allocation5 + $0x328] sm:$0xff] }
  0x74   : > { %587 = vmatprep.subr.mxu0 %v547_v11  ;;  %659 = vmatprep.subr.mxu1 %v469_v16  ;;  %v448_v58 = vld [vmem:[#allocation5 + $0x150] sm:$0xff]  ;;  %v447_v60 = vld [vmem:[#allocation5 + $0x148] sm:$0xff]  ;;  %v522_v61 = vld [vmem:[#allocation5 + $0x320] sm:$0xff] }
  0x75   : > { %588 = vmatpush2.msra.mxu0 %v546_v13  ;;  %660 = vmatpush2.msra.mxu1 %v468_v18  ;;  %v446_v62 = vld [vmem:[#allocation5 + $0x140] sm:$0xff]  ;;  %v521_v63 = vld [vmem:[#allocation5 + $0x318] sm:$0xff]  ;;  %v520_v1 = vld [vmem:[#allocation5 + $0x310] sm:$0xff]  ;;  %v5248_v13 = vmov 839922192  }
  0x76   : > { %589 = vmatprep.subr.mxu0 %v545_v15  ;;  %661 = vmatprep.subr.mxu1 %v467_v20  ;;  %v445_v0 = vld [vmem:[#allocation5 + $0x138] sm:$0xff]  ;;  %v444_v2 = vld [vmem:[#allocation5 + $0x130] sm:$0xff]  ;;  %v519_v3 = vld [vmem:[#allocation5 + $0x308] sm:$0xff]  ;;  %v398_v14 = vunpack.c.l.s4 %v5248_v13  ;;  %v400_v15 = vlaneseq }
  0x77   : > { %590 = vmatpush2.msra.mxu0 %v544_v17  ;;  %662 = vmatpush2.msra.mxu1 %v466_v22  ;;  %v443_v4 = vld [vmem:[#allocation5 + $0x128] sm:$0xff]  ;;  %v518_v5 = vld [vmem:[#allocation5 + $0x300] sm:$0xff]  ;;  %v745_v7 = vld [vmem:[#allocation5 + $0x4f8] sm:$0xff] }
  0x78   : > { %591 = vmatprep.subr.mxu0 %v543_v19  ;;  %663 = vmatprep.subr.mxu1 %v465_v24  ;;  %v442_v6 = vld [vmem:[#allocation5 + $0x120] sm:$0xff]  ;;  %v441_v8 = vld [vmem:[#allocation5 + $0x118] sm:$0xff]  ;;  %v440_v9 = vld [vmem:[#allocation5 + $0x110] sm:$0xff]  ;;  %v399_v16 = vunpack.c.0.s8 %v398_v14  ;;  %v5457_v17 = vshrl.u32 %v400_v15, 7 }
  0x79   : > { %592 = vmatpush2.msra.mxu0 %v542_v21  ;;  %664 = vmatpush2.msra.mxu1 %v464_v26  ;;  %v439_v10 = vld [vmem:[#allocation5 + $0x108] sm:$0xff]  ;;  %v438_v11 = vld [vmem:[#allocation5 + $0x100] sm:$0xff]  ;;  %v901_v12 = vld [vmem:[#allocation5 + $0x6f8] sm:$0xff] }
  0x7a   : > { %593 = vmatprep.subr.mxu0 %v541_v23  ;;  %665 = vmatprep.subr.mxu1 %v463_v28  ;;  %v5460_v18 = vsub.s32 %v399_v16, %v5457_v17  ;;  %v5463_v20 = vld [vmem:[%s5417_s1] sm:$0xff]  ;;  %v719_v14 = vld [vmem:[#allocation5 + $0x428] sm:$0xff]  ;;  %v718_v16 = vld [vmem:[#allocation5 + $0x420] sm:$0xff] }
  0x7b   : > { %594 = vmatpush2.msra.mxu0 %v540_v25  ;;  %666 = vmatpush2.msra.mxu1 %v462_v30  ;;  %v880_v13 = vld [vmem:[#allocation5 + $0x650] sm:$0xff]  ;;  %v879_v15 = vld [vmem:[#allocation5 + $0x648] sm:$0xff] }
  0x7c   : > { %595 = vmatprep.subr.mxu0 %v539_v27  ;;  %667 = vmatprep.subr.mxu1 %v461_v32 }
  0x7d   : > { %596 = vmatpush2.msra.mxu0 %v538_v29  ;;  %668 = vmatpush2.msra.mxu1 %v460_v34  ;;  %v744_v29 = vld [vmem:[#allocation5 + $0x4f0] sm:$0xff] }
  0x7e   : > { %597 = vmatprep.subr.mxu0 %v537_v31  ;;  %669 = vmatprep.subr.mxu1 %v459_v36  ;;  %v743_v31 = vld [vmem:[#allocation5 + $0x4e8] sm:$0xff]  ;;  %v740_v36 = vld [vmem:[#allocation5 + $0x4d0] sm:$0xff] }
  0x7f   : > { %598 = vmatpush2.msra.mxu0 %v536_v33  ;;  %670 = vmatpush2.msra.mxu1 %v458_v38  ;;  %v742_v33 = vld [vmem:[#allocation5 + $0x4e0] sm:$0xff]  ;;  %v739_v38 = vld [vmem:[#allocation5 + $0x4c8] sm:$0xff] }
  0x80   : > { %599 = vmatprep.subr.mxu0 %v535_v35  ;;  %671 = vmatprep.subr.mxu1 %v457_v40  ;;  %v741_v35 = vld [vmem:[#allocation5 + $0x4d8] sm:$0xff]  ;;  %v738_v40 = vld [vmem:[#allocation5 + $0x4c0] sm:$0xff] }
  0x81   : > { %600 = vmatpush2.msra.mxu0 %v534_v37  ;;  %672 = vmatpush2.msra.mxu1 %v456_v42  ;;  %v900_v37 = vld [vmem:[#allocation5 + $0x6f0] sm:$0xff]  ;;  %v737_v42 = vld [vmem:[#allocation5 + $0x4b8] sm:$0xff] }
  0x82   : > { %601 = vmatprep.subr.mxu0 %v533_v39  ;;  %673 = vmatprep.subr.mxu1 %v455_v44  ;;  %v899_v39 = vld [vmem:[#allocation5 + $0x6e8] sm:$0xff]  ;;  %v736_v44 = vld [vmem:[#allocation5 + $0x4b0] sm:$0xff] }
  0x83   : > { %602 = vmatpush2.msra.mxu0 %v532_v41  ;;  %674 = vmatpush2.msra.mxu1 %v454_v46  ;;  %v898_v41 = vld [vmem:[#allocation5 + $0x6e0] sm:$0xff]  ;;  %v735_v46 = vld [vmem:[#allocation5 + $0x4a8] sm:$0xff] }
  0x84   : > { %603 = vmatprep.subr.mxu0 %v531_v43  ;;  %675 = vmatprep.subr.mxu1 %v453_v48  ;;  %v897_v43 = vld [vmem:[#allocation5 + $0x6d8] sm:$0xff]  ;;  %v734_v48 = vld [vmem:[#allocation5 + $0x4a0] sm:$0xff] }
  0x85   : > { %604 = vmatpush2.msra.mxu0 %v530_v45  ;;  %676 = vmatpush2.msra.mxu1 %v452_v50  ;;  %v896_v45 = vld [vmem:[#allocation5 + $0x6d0] sm:$0xff]  ;;  %v733_v50 = vld [vmem:[#allocation5 + $0x498] sm:$0xff] }
  0x86   : > { %605 = vmatprep.subr.mxu0 %v529_v47  ;;  %677 = vmatprep.subr.mxu1 %v451_v52  ;;  %v895_v47 = vld [vmem:[#allocation5 + $0x6c8] sm:$0xff]  ;;  %v732_v52 = vld [vmem:[#allocation5 + $0x490] sm:$0xff] }
  0x87   : > { %606 = vmatpush2.msra.mxu0 %v528_v49  ;;  %678 = vmatpush2.msra.mxu1 %v450_v54  ;;  %v894_v49 = vld [vmem:[#allocation5 + $0x6c0] sm:$0xff]  ;;  %v731_v54 = vld [vmem:[#allocation5 + $0x488] sm:$0xff] }
  0x88   : > { %607 = vmatprep.subr.mxu0 %v527_v51  ;;  %679 = vmatprep.subr.mxu1 %v449_v56  ;;  %v893_v51 = vld [vmem:[#allocation5 + $0x6b8] sm:$0xff]  ;;  %v730_v56 = vld [vmem:[#allocation5 + $0x480] sm:$0xff] }
  0x89   : > { %608 = vmatpush2.msra.mxu0 %v526_v53  ;;  %680 = vmatpush2.msra.mxu1 %v448_v58  ;;  %v892_v53 = vld [vmem:[#allocation5 + $0x6b0] sm:$0xff]  ;;  %v729_v58 = vld [vmem:[#allocation5 + $0x478] sm:$0xff] }
  0x8a   : > { %609 = vmatprep.subr.mxu0 %v525_v55  ;;  %681 = vmatprep.subr.mxu1 %v447_v60  ;;  %v891_v55 = vld [vmem:[#allocation5 + $0x6a8] sm:$0xff]  ;;  %v728_v60 = vld [vmem:[#allocation5 + $0x470] sm:$0xff] }
  0x8b   : > { %610 = vmatpush2.msra.mxu0 %v524_v57  ;;  %682 = vmatpush2.msra.mxu1 %v446_v62  ;;  %v890_v57 = vld [vmem:[#allocation5 + $0x6a0] sm:$0xff]  ;;  %v727_v62 = vld [vmem:[#allocation5 + $0x468] sm:$0xff] }
  0x8c   : > { %611 = vmatprep.subr.mxu0 %v523_v59  ;;  %683 = vmatprep.subr.mxu1 %v445_v0  ;;  %v889_v59 = vld [vmem:[#allocation5 + $0x698] sm:$0xff]  ;;  %v726_v0 = vld [vmem:[#allocation5 + $0x460] sm:$0xff] }
  0x8d   : > { %612 = vmatpush2.msra.mxu0 %v522_v61  ;;  %684 = vmatpush2.msra.mxu1 %v444_v2  ;;  %v888_v61 = vld [vmem:[#allocation5 + $0x690] sm:$0xff]  ;;  %v725_v2 = vld [vmem:[#allocation5 + $0x458] sm:$0xff] }
  0x8e   : > { %613 = vmatprep.subr.mxu0 %v521_v63  ;;  %685 = vmatprep.subr.mxu1 %v443_v4  ;;  %v887_v63 = vld [vmem:[#allocation5 + $0x688] sm:$0xff]  ;;  %v724_v4 = vld [vmem:[#allocation5 + $0x450] sm:$0xff] }
  0x8f   : > { %614 = vmatpush2.msra.mxu0 %v520_v1  ;;  %686 = vmatpush2.msra.mxu1 %v442_v6  ;;  %v886_v1 = vld [vmem:[#allocation5 + $0x680] sm:$0xff]  ;;  %v723_v6 = vld [vmem:[#allocation5 + $0x448] sm:$0xff] }
  0x90   : > { %615 = vmatprep.subr.mxu0 %v519_v3  ;;  %687 = vmatprep.subr.mxu1 %v441_v8  ;;  %v885_v3 = vld [vmem:[#allocation5 + $0x678] sm:$0xff]  ;;  %v722_v8 = vld [vmem:[#allocation5 + $0x440] sm:$0xff] }
  0x91   : > { %616 = vmatpush2.msra.mxu0 %v518_v5  ;;  %688 = vmatpush2.msra.mxu1 %v440_v9  ;;  %v884_v5 = vld [vmem:[#allocation5 + $0x670] sm:$0xff]  ;;  %v882_v9 = vld [vmem:[#allocation5 + $0x660] sm:$0xff] }
  0x92   : > { %781 = vmatprep.subr.mxu0 %v745_v7  ;;  %689 = vmatprep.subr.mxu1 %v439_v10  ;;  %v883_v7 = vld [vmem:[#allocation5 + $0x668] sm:$0xff]  ;;  %v721_v10 = vld [vmem:[#allocation5 + $0x438] sm:$0xff] }
  0x93   : > { %690 = vmatpush2.msra.mxu1 %v438_v11  ;;  %v881_v11 = vld [vmem:[#allocation5 + $0x658] sm:$0xff] }
  0x94   : > { %937 = vmatprep.subr.mxu1 %v901_v12  ;;  %v720_v12 = vld [vmem:[#allocation5 + $0x430] sm:$0xff] }
  0xc8   : > { %v475_v19 = vpop.permute.xlu0 %474  ;;  %v703_v22 = vpop.permute.xlu1 %702 }
  0xc9   : > { %v482_v21 = vrot.slane %v475_v19, %v5460_v18  ;;  %v710_v23 = vrot.slane %v703_v22, %v5460_v18  ;;  %v878_v19 = vld [vmem:[#allocation5 + $0x640] sm:$0xff]  ;;  %v877_v22 = vld [vmem:[#allocation5 + $0x638] sm:$0xff] }
  0xcb   : > { %v484_v24 = vmul.f32 %v482_v21, %v5463_v20  ;;  %v5469_v26 = vmul.f32 %v710_v23, %v5463_v20  ;;  %v717_v21 = vld [vmem:[#allocation5 + $0x418] sm:$0xff]  ;;  %v716_v23 = vld [vmem:[#allocation5 + $0x410] sm:$0xff] }
  0xcc   : > { %v396_v25 = vpop.permute.xlu0 %395 }
  0xcd   : > { %v403_v27 = vrot.slane %v396_v25, %v5460_v18  ;;  %v551_v28 = vcombine.high %v484_v24, %v484_v24  ;;  %v779_v30 = vcombine.high %v5469_v26, %v5469_v26  ;;  %v715_v25 = vld [vmem:[#allocation5 + $0x408] sm:$0xff] }
  0xcf   : > { %617 = vmatprep.mubr.f32.mxu0 %v551_v28  ;;  %v405_v32 = vmul.f32 %v403_v27, %v5463_v20  ;;  %v875_v27 = vld [vmem:[#allocation5 + $0x628] sm:$0xff]  ;;  %v714_v28 = vld [vmem:[#allocation5 + $0x400] sm:$0xff] }
  0xd0   : > { %618 = vmatmul.mubr.f32.vlgmr.msra.gmra.mxu0 %v484_v24  ;;  %v876_v24 = vld [vmem:[#allocation5 + $0x630] sm:$0xff] }
  0xd1   : > { %782 = vmatpush1.msra.mxu0 %v744_v29  ;;  %v625_v34 = vcombine.high %v405_v32, %v405_v32  ;;  %845 = vmatprep.mubr.f32.mxu0 %v779_v30  ;;  %v874_v29 = vld [vmem:[#allocation5 + $0x620] sm:$0xff]  ;;  %v777_v30 = vld [vmem:[#allocation5 + $0x5f8] sm:$0xff] }
  0xd2   : > { %783 = vmatprep.subr.mxu0 %v743_v31  ;;  %v873_v31 = vld [vmem:[#allocation5 + $0x618] sm:$0xff] }
  0xd3   : > { %784 = vmatpush1.msra.mxu0 %v742_v33  ;;  %691 = vmatprep.mubr.f32.mxu1 %v625_v34  ;;  %v872_v33 = vld [vmem:[#allocation5 + $0x610] sm:$0xff]  ;;  %v775_v34 = vld [vmem:[#allocation5 + $0x5e8] sm:$0xff] }
  0xd4   : > { %785 = vmatprep.subr.mxu0 %v741_v35  ;;  %692 = vmatmul.mubr.f32.vlgmr.msra.gmra.mxu1 %v405_v32  ;;  %v776_v32 = vld [vmem:[#allocation5 + $0x5f0] sm:$0xff]  ;;  %v871_v35 = vld [vmem:[#allocation5 + $0x608] sm:$0xff] }
  0xd5   : > { %786 = vmatpush1.msra.mxu0 %v740_v36  ;;  %938 = vmatpush1.msra.mxu1 %v900_v37  ;;  %v774_v36 = vld [vmem:[#allocation5 + $0x5e0] sm:$0xff] }
  0xd6   : > { %787 = vmatprep.subr.mxu0 %v739_v38  ;;  %939 = vmatprep.subr.mxu1 %v899_v39  ;;  %v870_v37 = vld [vmem:[#allocation5 + $0x600] sm:$0xff]  ;;  %v773_v38 = vld [vmem:[#allocation5 + $0x5d8] sm:$0xff] }
  0xd7   : > { %788 = vmatpush1.msra.mxu0 %v738_v40  ;;  %940 = vmatpush1.msra.mxu1 %v898_v41  ;;  %v933_v39 = vld [vmem:[#allocation5 + $0x7f8] sm:$0xff]  ;;  %v772_v40 = vld [vmem:[#allocation5 + $0x5d0] sm:$0xff] }
  0xd8   : > { %789 = vmatprep.subr.mxu0 %v737_v42  ;;  %941 = vmatprep.subr.mxu1 %v897_v43  ;;  %v932_v41 = vld [vmem:[#allocation5 + $0x7f0] sm:$0xff]  ;;  %v771_v42 = vld [vmem:[#allocation5 + $0x5c8] sm:$0xff] }
  0xd9   : > { %790 = vmatpush1.msra.mxu0 %v736_v44  ;;  %942 = vmatpush1.msra.mxu1 %v896_v45  ;;  %v931_v43 = vld [vmem:[#allocation5 + $0x7e8] sm:$0xff]  ;;  %v770_v44 = vld [vmem:[#allocation5 + $0x5c0] sm:$0xff] }
  0xda   : > { %791 = vmatprep.subr.mxu0 %v735_v46  ;;  %943 = vmatprep.subr.mxu1 %v895_v47  ;;  %v930_v45 = vld [vmem:[#allocation5 + $0x7e0] sm:$0xff]  ;;  %v769_v46 = vld [vmem:[#allocation5 + $0x5b8] sm:$0xff] }
  0xdb   : > { %792 = vmatpush1.msra.mxu0 %v734_v48  ;;  %944 = vmatpush1.msra.mxu1 %v894_v49  ;;  %v929_v47 = vld [vmem:[#allocation5 + $0x7d8] sm:$0xff]  ;;  %v768_v48 = vld [vmem:[#allocation5 + $0x5b0] sm:$0xff] }
  0xdc   : > { %793 = vmatprep.subr.mxu0 %v733_v50  ;;  %945 = vmatprep.subr.mxu1 %v893_v51  ;;  %v928_v49 = vld [vmem:[#allocation5 + $0x7d0] sm:$0xff]  ;;  %v767_v50 = vld [vmem:[#allocation5 + $0x5a8] sm:$0xff] }
  0xdd   : > { %794 = vmatpush1.msra.mxu0 %v732_v52  ;;  %946 = vmatpush1.msra.mxu1 %v892_v53  ;;  %v927_v51 = vld [vmem:[#allocation5 + $0x7c8] sm:$0xff]  ;;  %v766_v52 = vld [vmem:[#allocation5 + $0x5a0] sm:$0xff] }
  0xde   : > { %795 = vmatprep.subr.mxu0 %v731_v54  ;;  %947 = vmatprep.subr.mxu1 %v891_v55  ;;  %v926_v53 = vld [vmem:[#allocation5 + $0x7c0] sm:$0xff]  ;;  %v765_v54 = vld [vmem:[#allocation5 + $0x598] sm:$0xff] }
  0xdf   : > { %796 = vmatpush1.msra.mxu0 %v730_v56  ;;  %948 = vmatpush1.msra.mxu1 %v890_v57  ;;  %v925_v55 = vld [vmem:[#allocation5 + $0x7b8] sm:$0xff]  ;;  %v764_v56 = vld [vmem:[#allocation5 + $0x590] sm:$0xff] }
  0xe0   : > { %797 = vmatprep.subr.mxu0 %v729_v58  ;;  %949 = vmatprep.subr.mxu1 %v889_v59  ;;  %v924_v57 = vld [vmem:[#allocation5 + $0x7b0] sm:$0xff]  ;;  %v763_v58 = vld [vmem:[#allocation5 + $0x588] sm:$0xff] }
  0xe1   : > { %798 = vmatpush1.msra.mxu0 %v728_v60  ;;  %950 = vmatpush1.msra.mxu1 %v888_v61  ;;  %v923_v59 = vld [vmem:[#allocation5 + $0x7a8] sm:$0xff]  ;;  %v762_v60 = vld [vmem:[#allocation5 + $0x580] sm:$0xff] }
  0xe2   : > { %799 = vmatprep.subr.mxu0 %v727_v62  ;;  %951 = vmatprep.subr.mxu1 %v887_v63  ;;  %v922_v61 = vld [vmem:[#allocation5 + $0x7a0] sm:$0xff]  ;;  %v761_v62 = vld [vmem:[#allocation5 + $0x578] sm:$0xff] }
  0xe3   : > { %800 = vmatpush1.msra.mxu0 %v726_v0  ;;  %952 = vmatpush1.msra.mxu1 %v886_v1  ;;  %v921_v63 = vld [vmem:[#allocation5 + $0x798] sm:$0xff]  ;;  %v760_v0 = vld [vmem:[#allocation5 + $0x570] sm:$0xff] }
  0xe4   : > { %801 = vmatprep.subr.mxu0 %v725_v2  ;;  %953 = vmatprep.subr.mxu1 %v885_v3  ;;  %v920_v1 = vld [vmem:[#allocation5 + $0x790] sm:$0xff]  ;;  %v759_v2 = vld [vmem:[#allocation5 + $0x568] sm:$0xff] }
  0xe5   : > { %802 = vmatpush1.msra.mxu0 %v724_v4  ;;  %954 = vmatpush1.msra.mxu1 %v884_v5  ;;  %v919_v3 = vld [vmem:[#allocation5 + $0x788] sm:$0xff]  ;;  %v758_v4 = vld [vmem:[#allocation5 + $0x560] sm:$0xff] }
  0xe6   : > { %803 = vmatprep.subr.mxu0 %v723_v6  ;;  %955 = vmatprep.subr.mxu1 %v883_v7  ;;  %v918_v5 = vld [vmem:[#allocation5 + $0x780] sm:$0xff]  ;;  %v757_v6 = vld [vmem:[#allocation5 + $0x558] sm:$0xff] }
  0xe7   : > { %804 = vmatpush1.msra.mxu0 %v722_v8  ;;  %956 = vmatpush1.msra.mxu1 %v882_v9  ;;  %v917_v7 = vld [vmem:[#allocation5 + $0x778] sm:$0xff]  ;;  %v756_v8 = vld [vmem:[#allocation5 + $0x550] sm:$0xff] }
  0xe8   : > { %805 = vmatprep.subr.mxu0 %v721_v10  ;;  %957 = vmatprep.subr.mxu1 %v881_v11  ;;  %v916_v9 = vld [vmem:[#allocation5 + $0x770] sm:$0xff]  ;;  %v755_v10 = vld [vmem:[#allocation5 + $0x548] sm:$0xff] }
  0xe9   : > { %806 = vmatpush1.msra.mxu0 %v720_v12  ;;  %958 = vmatpush1.msra.mxu1 %v880_v13  ;;  %v915_v11 = vld [vmem:[#allocation5 + $0x768] sm:$0xff]  ;;  %v859_v12 = vpop.permute.xlu1 %858  ;;  %v754_v13 = vld [vmem:[#allocation5 + $0x540] sm:$0xff] }
  0xea   : > { %807 = vmatprep.subr.mxu0 %v719_v14  ;;  %959 = vmatprep.subr.mxu1 %v879_v15  ;;  %v914_v14 = vld [vmem:[#allocation5 + $0x760] sm:$0xff]  ;;  %v866_v15 = vrot.slane %v859_v12, %v5460_v18  ;;  %v1041_v12 = vld [vmem:[#allocation5 + $0x878] sm:$0xff] }
  0xeb   : > { %808 = vmatpush1.msra.mxu0 %v718_v16  ;;  %960 = vmatpush1.msra.mxu1 %v878_v19  ;;  %v753_v16 = vld [vmem:[#allocation5 + $0x538] sm:$0xff] }
  0xec   : > { %809 = vmatprep.subr.mxu0 %v717_v21  ;;  %961 = vmatprep.subr.mxu1 %v877_v22  ;;  %v913_v19 = vld [vmem:[#allocation5 + $0x758] sm:$0xff]  ;;  %v1015_v21 = vpop.permute.xlu0 %1014  ;;  %v752_v22 = vld [vmem:[#allocation5 + $0x530] sm:$0xff] }
  0xed   : > { %810 = vmatpush1.msra.mxu0 %v716_v23  ;;  %962 = vmatpush1.msra.mxu1 %v876_v24  ;;  %v912_v23 = vld [vmem:[#allocation5 + $0x750] sm:$0xff]  ;;  %v751_v24 = vld [vmem:[#allocation5 + $0x528] sm:$0xff] }
  0xee   : > { %811 = vmatprep.subr.mxu0 %v715_v25  ;;  %963 = vmatprep.subr.mxu1 %v875_v27  ;;  %v911_v25 = vld [vmem:[#allocation5 + $0x748] sm:$0xff]  ;;  %v750_v27 = vld [vmem:[#allocation5 + $0x520] sm:$0xff] }
  0xef   : > { %812 = vmatpush1.msra.mxu0 %v714_v28  ;;  %964 = vmatpush1.msra.mxu1 %v874_v29  ;;  %v910_v28 = vld [vmem:[#allocation5 + $0x740] sm:$0xff]  ;;  %v1022_v29 = vrot.slane %v1015_v21, %v5460_v18 }
  0xf0   : > { %813 = vmatprep.subr.mxu0 %v777_v30  ;;  %965 = vmatprep.subr.mxu1 %v873_v31  ;;  %v868_v30 = vmul.f32 %v866_v15, %v5463_v20  ;;  %v749_v31 = vld [vmem:[#allocation5 + $0x518] sm:$0xff]  ;;  %v1200_v15 = vld [vmem:[#allocation5 + $0xa90] sm:$0xff]  ;;  %v1038_v21 = vld [vmem:[#allocation5 + $0x860] sm:$0xff] }
  0xf1   : > { %814 = vmatpush2.msra.mxu0 %v776_v32  ;;  %966 = vmatpush1.msra.mxu1 %v872_v33  ;;  %v909_v32 = vld [vmem:[#allocation5 + $0x738] sm:$0xff]  ;;  %v748_v33 = vld [vmem:[#allocation5 + $0x510] sm:$0xff] }
  0xf2   : > { %815 = vmatprep.subr.mxu0 %v775_v34  ;;  %967 = vmatprep.subr.mxu1 %v871_v35  ;;  %v908_v34 = vld [vmem:[#allocation5 + $0x730] sm:$0xff]  ;;  %v747_v35 = vld [vmem:[#allocation5 + $0x508] sm:$0xff] }
  0xf3   : > { %816 = vmatpush2.msra.mxu0 %v774_v36  ;;  %968 = vmatpush1.msra.mxu1 %v870_v37  ;;  %v907_v36 = vld [vmem:[#allocation5 + $0x728] sm:$0xff]  ;;  %v746_v37 = vld [vmem:[#allocation5 + $0x500] sm:$0xff] }
  0xf4   : > { %817 = vmatprep.subr.mxu0 %v773_v38  ;;  %969 = vmatprep.subr.mxu1 %v933_v39  ;;  %v906_v38 = vld [vmem:[#allocation5 + $0x720] sm:$0xff]  ;;  %v5479_v39 = vmul.f32 %v1022_v29, %v5463_v20  ;;  %v1195_v29 = vld [vmem:[#allocation5 + $0xa68] sm:$0xff] }
  0xf5   : > { %818 = vmatpush2.msra.mxu0 %v772_v40  ;;  %970 = vmatpush2.msra.mxu1 %v932_v41  ;;  %v1171_v40 = vpop.permute.xlu1 %1170  ;;  %v905_v41 = vld [vmem:[#allocation5 + $0x718] sm:$0xff] }
  0xf6   : > { %819 = vmatprep.subr.mxu0 %v771_v42  ;;  %971 = vmatprep.subr.mxu1 %v931_v43  ;;  %v935_v42 = vcombine.high %v868_v30, %v868_v30  ;;  %v1178_v43 = vrot.slane %v1171_v40, %v5460_v18  ;;  %v1190_v40 = vld [vmem:[#allocation5 + $0xa40] sm:$0xff] }
  0xf7   : > { %820 = vmatpush2.msra.mxu0 %v770_v44  ;;  %972 = vmatpush2.msra.mxu1 %v930_v45  ;;  %v1057_v44 = vld [vmem:[#allocation5 + $0x8f8] sm:$0xff]  ;;  %v904_v45 = vld [vmem:[#allocation5 + $0x710] sm:$0xff] }
  0xf8   : > { %821 = vmatprep.subr.mxu0 %v769_v46  ;;  %973 = vmatprep.subr.mxu1 %v929_v47  ;;  %v1056_v46 = vld [vmem:[#allocation5 + $0x8f0] sm:$0xff]  ;;  %v903_v47 = vld [vmem:[#allocation5 + $0x708] sm:$0xff] }
  0xf9   : > { %822 = vmatpush2.msra.mxu0 %v768_v48  ;;  %974 = vmatpush2.msra.mxu1 %v928_v49  ;;  %v1091_v48 = vcombine.high %v5479_v39, %v5479_v39  ;;  %v1055_v49 = vld [vmem:[#allocation5 + $0x8e8] sm:$0xff] }
  0xfa   : > { %823 = vmatprep.subr.mxu0 %v767_v50  ;;  %975 = vmatprep.subr.mxu1 %v927_v51  ;;  %v902_v50 = vld [vmem:[#allocation5 + $0x700] sm:$0xff]  ;;  %v5486_v51 = vmul.f32 %v1178_v43, %v5463_v20  ;;  %v1028_v43 = vld [vmem:[#allocation5 + $0x810] sm:$0xff] }
  0xfb   : > { %824 = vmatpush2.msra.mxu0 %v766_v52  ;;  %976 = vmatpush2.msra.mxu1 %v926_v53  ;;  %v1054_v52 = vld [vmem:[#allocation5 + $0x8e0] sm:$0xff]  ;;  %v1053_v53 = vld [vmem:[#allocation5 + $0x8d8] sm:$0xff] }
  0xfc   : > { %825 = vmatprep.subr.mxu0 %v765_v54  ;;  %977 = vmatprep.subr.mxu1 %v925_v55  ;;  %v1213_v54 = vld [vmem:[#allocation5 + $0xaf8] sm:$0xff]  ;;  %v1212_v55 = vld [vmem:[#allocation5 + $0xaf0] sm:$0xff]  ;;  %v1247_v20 = vcombine.high %v5486_v51, %v5486_v51 }
  0xfd   : > { %826 = vmatpush2.msra.mxu0 %v764_v56  ;;  %978 = vmatpush2.msra.mxu1 %v924_v57  ;;  %v1051_v56 = vld [vmem:[#allocation5 + $0x8c8] sm:$0xff] }
  0xfe   : > { %827 = vmatprep.subr.mxu0 %v763_v58  ;;  %979 = vmatprep.subr.mxu1 %v923_v59  ;;  %v1211_v57 = vld [vmem:[#allocation5 + $0xae8] sm:$0xff]  ;;  %v1050_v58 = vld [vmem:[#allocation5 + $0x8c0] sm:$0xff] }
  0xff   : > { %828 = vmatpush2.msra.mxu0 %v762_v60  ;;  %980 = vmatpush2.msra.mxu1 %v922_v61  ;;  %v1210_v59 = vld [vmem:[#allocation5 + $0xae0] sm:$0xff]  ;;  %v1049_v60 = vld [vmem:[#allocation5 + $0x8b8] sm:$0xff] }
 0x100   : > { %829 = vmatprep.subr.mxu0 %v761_v62  ;;  %981 = vmatprep.subr.mxu1 %v921_v63  ;;  %v1209_v61 = vld [vmem:[#allocation5 + $0xad8] sm:$0xff]  ;;  %v1048_v62 = vld [vmem:[#allocation5 + $0x8b0] sm:$0xff] }
 0x101   : > { %830 = vmatpush2.msra.mxu0 %v760_v0  ;;  %982 = vmatpush2.msra.mxu1 %v920_v1  ;;  %v1208_v63 = vld [vmem:[#allocation5 + $0xad0] sm:$0xff]  ;;  %v1047_v0 = vld [vmem:[#allocation5 + $0x8a8] sm:$0xff] }
 0x102   : > { %831 = vmatprep.subr.mxu0 %v759_v2  ;;  %983 = vmatprep.subr.mxu1 %v919_v3  ;;  %v1207_v1 = vld [vmem:[#allocation5 + $0xac8] sm:$0xff]  ;;  %v1046_v2 = vld [vmem:[#allocation5 + $0x8a0] sm:$0xff] }
 0x103   : > { %832 = vmatpush2.msra.mxu0 %v758_v4  ;;  %984 = vmatpush2.msra.mxu1 %v918_v5  ;;  %v1206_v3 = vld [vmem:[#allocation5 + $0xac0] sm:$0xff]  ;;  %v1045_v4 = vld [vmem:[#allocation5 + $0x898] sm:$0xff] }
 0x104   : > { %833 = vmatprep.subr.mxu0 %v757_v6  ;;  %985 = vmatprep.subr.mxu1 %v917_v7  ;;  %v1205_v5 = vld [vmem:[#allocation5 + $0xab8] sm:$0xff]  ;;  %v1044_v6 = vld [vmem:[#allocation5 + $0x890] sm:$0xff] }
 0x105   : > { %834 = vmatpush2.msra.mxu0 %v756_v8  ;;  %986 = vmatpush2.msra.mxu1 %v916_v9  ;;  %v1204_v7 = vld [vmem:[#allocation5 + $0xab0] sm:$0xff]  ;;  %v1043_v8 = vld [vmem:[#allocation5 + $0x888] sm:$0xff] }
 0x106   : > { %835 = vmatprep.subr.mxu0 %v755_v10  ;;  %987 = vmatprep.subr.mxu1 %v915_v11  ;;  %v1203_v9 = vld [vmem:[#allocation5 + $0xaa8] sm:$0xff]  ;;  %v1042_v10 = vld [vmem:[#allocation5 + $0x880] sm:$0xff] }
 0x107   : > { %836 = vmatpush2.msra.mxu0 %v754_v13  ;;  %988 = vmatpush2.msra.mxu1 %v914_v14  ;;  %v1202_v11 = vld [vmem:[#allocation5 + $0xaa0] sm:$0xff]  ;;  %v1201_v13 = vld [vmem:[#allocation5 + $0xa98] sm:$0xff]  ;;  %v1040_v14 = vld [vmem:[#allocation5 + $0x870] sm:$0xff] }
 0x108   : > { %837 = vmatprep.subr.mxu0 %v753_v16  ;;  %989 = vmatprep.subr.mxu1 %v913_v19  ;;  %v1039_v16 = vld [vmem:[#allocation5 + $0x868] sm:$0xff] }
 0x109   : > { %838 = vmatpush2.msra.mxu0 %v752_v22  ;;  %990 = vmatpush2.msra.mxu1 %v912_v23  ;;  %v1199_v19 = vld [vmem:[#allocation5 + $0xa88] sm:$0xff]  ;;  %v1198_v22 = vld [vmem:[#allocation5 + $0xa80] sm:$0xff]  ;;  %v1037_v23 = vld [vmem:[#allocation5 + $0x858] sm:$0xff] }
 0x10a   : > { %839 = vmatprep.subr.mxu0 %v751_v24  ;;  %991 = vmatprep.subr.mxu1 %v911_v25  ;;  %v1197_v24 = vld [vmem:[#allocation5 + $0xa78] sm:$0xff]  ;;  %v1036_v25 = vld [vmem:[#allocation5 + $0x850] sm:$0xff] }
 0x10b   : > { %840 = vmatpush2.msra.mxu0 %v750_v27  ;;  %992 = vmatpush2.msra.mxu1 %v910_v28  ;;  %v1196_v27 = vld [vmem:[#allocation5 + $0xa70] sm:$0xff]  ;;  %v1035_v28 = vld [vmem:[#allocation5 + $0x848] sm:$0xff] }
 0x10c   : > { %841 = vmatprep.subr.mxu0 %v749_v31  ;;  %993 = vmatprep.subr.mxu1 %v909_v32  ;;  %v1194_v31 = vld [vmem:[#allocation5 + $0xa60] sm:$0xff]  ;;  %v1033_v32 = vld [vmem:[#allocation5 + $0x838] sm:$0xff] }
 0x10d   : > { %842 = vmatpush2.msra.mxu0 %v748_v33  ;;  %994 = vmatpush2.msra.mxu1 %v908_v34  ;;  %v1193_v33 = vld [vmem:[#allocation5 + $0xa58] sm:$0xff]  ;;  %v1032_v34 = vld [vmem:[#allocation5 + $0x830] sm:$0xff] }
 0x10e   : > { %843 = vmatprep.subr.mxu0 %v747_v35  ;;  %995 = vmatprep.subr.mxu1 %v907_v36  ;;  %v1192_v35 = vld [vmem:[#allocation5 + $0xa50] sm:$0xff]  ;;  %v1031_v36 = vld [vmem:[#allocation5 + $0x828] sm:$0xff] }
 0x10f   : > { %844 = vmatpush2.msra.mxu0 %v746_v37  ;;  %996 = vmatpush2.msra.mxu1 %v906_v38  ;;  %v1191_v37 = vld [vmem:[#allocation5 + $0xa48] sm:$0xff]  ;;  %v1030_v38 = vld [vmem:[#allocation5 + $0x820] sm:$0xff] }
 0x110   : > { %846 = vmatmul.mubr.f32.vlgmr.msra.gmra.mxu0 %v5469_v26  ;;  %997 = vmatprep.subr.mxu1 %v905_v41  ;;  %v1052_v26 = vld [vmem:[#allocation5 + $0x8d0] sm:$0xff]  ;;  %v1029_v41 = vld [vmem:[#allocation5 + $0x818] sm:$0xff] }
 0x111   : > { %1001 = vmatprep.mubr.f32.mxu1 %v935_v42  ;;  %1093 = vmatprep.subr.mxu0 %v1057_v44  ;;  %v1189_v42 = vld [vmem:[#allocation5 + $0xa38] sm:$0xff]  ;;  %v1188_v44 = vld [vmem:[#allocation5 + $0xa30] sm:$0xff] }
 0x112   : > { %998 = vmatpush2.msra.mxu1 %v904_v45  ;;  %1094 = vmatpush1.msra.mxu0 %v1056_v46  ;;  %v1027_v45 = vld [vmem:[#allocation5 + $0x808] sm:$0xff] }
 0x113   : > { %1157 = vmatprep.mubr.f32.mxu0 %v1091_v48  ;;  %999 = vmatprep.subr.mxu1 %v903_v47  ;;  %v1187_v46 = vld [vmem:[#allocation5 + $0xa28] sm:$0xff]  ;;  %v1026_v47 = vld [vmem:[#allocation5 + $0x800] sm:$0xff] }
 0x114   : > { %1095 = vmatprep.subr.mxu0 %v1055_v49  ;;  %1000 = vmatpush2.msra.mxu1 %v902_v50  ;;  %v1186_v48 = vld [vmem:[#allocation5 + $0xa20] sm:$0xff]  ;;  %v1089_v49 = vld [vmem:[#allocation5 + $0x9f8] sm:$0xff] }
 0x115   : > { %1096 = vmatpush1.msra.mxu0 %v1054_v52  ;;  %1002 = vmatmul.mubr.f32.vlgmr.msra.gmra.mxu1 %v868_v30  ;;  %v1034_v30 = vld [vmem:[#allocation5 + $0x840] sm:$0xff]  ;;  %v1185_v50 = vld [vmem:[#allocation5 + $0xa18] sm:$0xff]  ;;  %v1088_v52 = vld [vmem:[#allocation5 + $0x9f0] sm:$0xff] }
 0x116   : > { %1097 = vmatprep.subr.mxu0 %v1053_v53  ;;  %1249 = vmatprep.subr.mxu1 %v1213_v54  ;;  %v1184_v53 = vld [vmem:[#allocation5 + $0xa10] sm:$0xff]  ;;  %v1087_v54 = vld [vmem:[#allocation5 + $0x9e8] sm:$0xff] }
 0x117   : > { %1098 = vmatpush1.msra.mxu0 %v1052_v26  ;;  %1250 = vmatpush1.msra.mxu1 %v1212_v55  ;;  %v1183_v26 = vld [vmem:[#allocation5 + $0xa08] sm:$0xff]  ;;  %v1086_v55 = vld [vmem:[#allocation5 + $0x9e0] sm:$0xff] }
 0x118   : > { %1313 = vmatprep.mubr.f32.mxu1 %v1247_v20  ;;  %1099 = vmatprep.subr.mxu0 %v1051_v56  ;;  %v1182_v56 = vld [vmem:[#allocation5 + $0xa00] sm:$0xff]  ;;  %v1085_v20 = vld [vmem:[#allocation5 + $0x9d8] sm:$0xff] }
 0x119   : > { %1251 = vmatprep.subr.mxu1 %v1211_v57  ;;  %1100 = vmatpush1.msra.mxu0 %v1050_v58  ;;  %v1245_v57 = vld [vmem:[#allocation5 + $0xbf8] sm:$0xff]  ;;  %v1084_v58 = vld [vmem:[#allocation5 + $0x9d0] sm:$0xff] }
 0x11a   : > { %1252 = vmatpush1.msra.mxu1 %v1210_v59  ;;  %1101 = vmatprep.subr.mxu0 %v1049_v60  ;;  %v1244_v59 = vld [vmem:[#allocation5 + $0xbf0] sm:$0xff]  ;;  %v1083_v60 = vld [vmem:[#allocation5 + $0x9c8] sm:$0xff] }
 0x11b   : > { %1253 = vmatprep.subr.mxu1 %v1209_v61  ;;  %1102 = vmatpush1.msra.mxu0 %v1048_v62  ;;  %v1243_v61 = vld [vmem:[#allocation5 + $0xbe8] sm:$0xff]  ;;  %v1082_v62 = vld [vmem:[#allocation5 + $0x9c0] sm:$0xff] }
 0x11c   : > { %1254 = vmatpush1.msra.mxu1 %v1208_v63  ;;  %1103 = vmatprep.subr.mxu0 %v1047_v0  ;;  %v1242_v63 = vld [vmem:[#allocation5 + $0xbe0] sm:$0xff]  ;;  %v1081_v0 = vld [vmem:[#allocation5 + $0x9b8] sm:$0xff] }
 0x11d   : > { %1255 = vmatprep.subr.mxu1 %v1207_v1  ;;  %1104 = vmatpush1.msra.mxu0 %v1046_v2  ;;  %v1241_v1 = vld [vmem:[#allocation5 + $0xbd8] sm:$0xff]  ;;  %v1080_v2 = vld [vmem:[#allocation5 + $0x9b0] sm:$0xff] }
 0x11e   : > { %1256 = vmatpush1.msra.mxu1 %v1206_v3  ;;  %1105 = vmatprep.subr.mxu0 %v1045_v4  ;;  %v1240_v3 = vld [vmem:[#allocation5 + $0xbd0] sm:$0xff]  ;;  %v1079_v4 = vld [vmem:[#allocation5 + $0x9a8] sm:$0xff] }
 0x11f   : > { %1257 = vmatprep.subr.mxu1 %v1205_v5  ;;  %1106 = vmatpush1.msra.mxu0 %v1044_v6  ;;  %v1239_v5 = vld [vmem:[#allocation5 + $0xbc8] sm:$0xff]  ;;  %v1078_v6 = vld [vmem:[#allocation5 + $0x9a0] sm:$0xff] }
 0x120   : > { %1258 = vmatpush1.msra.mxu1 %v1204_v7  ;;  %1107 = vmatprep.subr.mxu0 %v1043_v8  ;;  %v1238_v7 = vld [vmem:[#allocation5 + $0xbc0] sm:$0xff]  ;;  %v1077_v8 = vld [vmem:[#allocation5 + $0x998] sm:$0xff] }
 0x121   : > { %1259 = vmatprep.subr.mxu1 %v1203_v9  ;;  %1108 = vmatpush1.msra.mxu0 %v1042_v10  ;;  %v1237_v9 = vld [vmem:[#allocation5 + $0xbb8] sm:$0xff]  ;;  %v1076_v10 = vld [vmem:[#allocation5 + $0x990] sm:$0xff] }
 0x122   : > { %1260 = vmatpush1.msra.mxu1 %v1202_v11  ;;  %1109 = vmatprep.subr.mxu0 %v1041_v12  ;;  %v1236_v11 = vld [vmem:[#allocation5 + $0xbb0] sm:$0xff]  ;;  %v1075_v12 = vld [vmem:[#allocation5 + $0x988] sm:$0xff] }
 0x123   : > { %1261 = vmatprep.subr.mxu1 %v1201_v13  ;;  %1110 = vmatpush1.msra.mxu0 %v1040_v14  ;;  %v1235_v13 = vld [vmem:[#allocation5 + $0xba8] sm:$0xff]  ;;  %v1074_v14 = vld [vmem:[#allocation5 + $0x980] sm:$0xff] }
 0x124   : > { %1262 = vmatpush1.msra.mxu1 %v1200_v15  ;;  %1111 = vmatprep.subr.mxu0 %v1039_v16  ;;  %v1234_v15 = vld [vmem:[#allocation5 + $0xba0] sm:$0xff]  ;;  %v1073_v16 = vld [vmem:[#allocation5 + $0x978] sm:$0xff] }
 0x125   : > { %1263 = vmatprep.subr.mxu1 %v1199_v19  ;;  %1112 = vmatpush1.msra.mxu0 %v1038_v21  ;;  %v1233_v19 = vld [vmem:[#allocation5 + $0xb98] sm:$0xff]  ;;  %v1072_v21 = vld [vmem:[#allocation5 + $0x970] sm:$0xff] }
 0x126   : > { %1264 = vmatpush1.msra.mxu1 %v1198_v22  ;;  %1113 = vmatprep.subr.mxu0 %v1037_v23  ;;  %v1232_v22 = vld [vmem:[#allocation5 + $0xb90] sm:$0xff]  ;;  %v1071_v23 = vld [vmem:[#allocation5 + $0x968] sm:$0xff] }
 0x127   : > { %1265 = vmatprep.subr.mxu1 %v1197_v24  ;;  %1114 = vmatpush1.msra.mxu0 %v1036_v25  ;;  %v1231_v24 = vld [vmem:[#allocation5 + $0xb88] sm:$0xff]  ;;  %v1070_v25 = vld [vmem:[#allocation5 + $0x960] sm:$0xff] }
 0x128   : > { %1266 = vmatpush1.msra.mxu1 %v1196_v27  ;;  %1115 = vmatprep.subr.mxu0 %v1035_v28  ;;  %v1230_v27 = vld [vmem:[#allocation5 + $0xb80] sm:$0xff]  ;;  %v1069_v28 = vld [vmem:[#allocation5 + $0x958] sm:$0xff] }
 0x129   : > { %1267 = vmatprep.subr.mxu1 %v1195_v29  ;;  %1116 = vmatpush1.msra.mxu0 %v1034_v30  ;;  %v1229_v29 = vld [vmem:[#allocation5 + $0xb78] sm:$0xff]  ;;  %v1068_v30 = vld [vmem:[#allocation5 + $0x950] sm:$0xff] }
 0x12a   : > { %1268 = vmatpush1.msra.mxu1 %v1194_v31  ;;  %1117 = vmatprep.subr.mxu0 %v1033_v32  ;;  %v1228_v31 = vld [vmem:[#allocation5 + $0xb70] sm:$0xff]  ;;  %v1067_v32 = vld [vmem:[#allocation5 + $0x948] sm:$0xff] }
 0x12b   : > { %1269 = vmatprep.subr.mxu1 %v1193_v33  ;;  %1118 = vmatpush1.msra.mxu0 %v1032_v34  ;;  %v1227_v33 = vld [vmem:[#allocation5 + $0xb68] sm:$0xff]  ;;  %v1066_v34 = vld [vmem:[#allocation5 + $0x940] sm:$0xff] }
 0x12c   : > { %1270 = vmatpush1.msra.mxu1 %v1192_v35  ;;  %1119 = vmatprep.subr.mxu0 %v1031_v36  ;;  %v1226_v35 = vld [vmem:[#allocation5 + $0xb60] sm:$0xff]  ;;  %v1065_v36 = vld [vmem:[#allocation5 + $0x938] sm:$0xff] }
 0x12d   : > { %1271 = vmatprep.subr.mxu1 %v1191_v37  ;;  %1120 = vmatpush1.msra.mxu0 %v1030_v38  ;;  %v1327_v37 = vpop.permute.xlu0 %1326  ;;  %v1225_v38 = vld [vmem:[#allocation5 + $0xb58] sm:$0xff] }
 0x12e   : > { %1272 = vmatpush1.msra.mxu1 %v1190_v40  ;;  %1121 = vmatprep.subr.mxu0 %v1029_v41  ;;  %v1064_v40 = vld [vmem:[#allocation5 + $0x930] sm:$0xff] }
 0x12f   : > { %1273 = vmatprep.subr.mxu1 %v1189_v42  ;;  %1122 = vmatpush1.msra.mxu0 %v1028_v43  ;;  %v1224_v41 = vld [vmem:[#allocation5 + $0xb50] sm:$0xff]  ;;  %v1063_v42 = vld [vmem:[#allocation5 + $0x928] sm:$0xff] }
 0x130   : > { %1274 = vmatpush1.msra.mxu1 %v1188_v44  ;;  %1123 = vmatprep.subr.mxu0 %v1027_v45  ;;  %v1223_v43 = vld [vmem:[#allocation5 + $0xb48] sm:$0xff]  ;;  %v1062_v44 = vld [vmem:[#allocation5 + $0x920] sm:$0xff]  ;;  %v1334_v45 = vrot.slane %v1327_v37, %v5460_v18 }
 0x131   : > { %1275 = vmatprep.subr.mxu1 %v1187_v46  ;;  %1124 = vmatpush1.msra.mxu0 %v1026_v47  ;;  %v1222_v46 = vld [vmem:[#allocation5 + $0xb40] sm:$0xff]  ;;  %v1061_v47 = vld [vmem:[#allocation5 + $0x918] sm:$0xff] }
 0x132   : > { %1276 = vmatpush1.msra.mxu1 %v1186_v48  ;;  %1125 = vmatprep.subr.mxu0 %v1089_v49  ;;  %v1221_v48 = vld [vmem:[#allocation5 + $0xb38] sm:$0xff]  ;;  %v1060_v49 = vld [vmem:[#allocation5 + $0x910] sm:$0xff]  ;;  %v1350_v37 = vld [vmem:[#allocation5 + $0xc60] sm:$0xff] }
 0x133   : > { %1277 = vmatprep.subr.mxu1 %v1185_v50  ;;  %1126 = vmatpush2.msra.mxu0 %v1088_v52  ;;  %v1220_v50 = vld [vmem:[#allocation5 + $0xb30] sm:$0xff]  ;;  %v1059_v52 = vld [vmem:[#allocation5 + $0x908] sm:$0xff] }
 0x134   : > { %1278 = vmatpush1.msra.mxu1 %v1184_v53  ;;  %1127 = vmatprep.subr.mxu0 %v1087_v54  ;;  %v1219_v53 = vld [vmem:[#allocation5 + $0xb28] sm:$0xff]  ;;  %v1058_v54 = vld [vmem:[#allocation5 + $0x900] sm:$0xff] }
 0x135   : > { %1279 = vmatprep.subr.mxu1 %v1183_v26  ;;  %1128 = vmatpush2.msra.mxu0 %v1086_v55  ;;  %v5492_v26 = vld [vmem:[%s5417_s1] sm:$0xff] }
 0x136   : > { %1280 = vmatpush1.msra.mxu1 %v1182_v56  ;;  %1129 = vmatprep.subr.mxu0 %v1085_v20  ;;  %v5495_v55 = vmul.f32 %v5492_v26, %v1334_v45  ;;  %v1483_v56 = vpop.permute.xlu1 %1482  ;;  %v1218_v20 = vld [vmem:[#allocation5 + $0xb20] sm:$0xff]  ;;  %v1507_v45 = vld [vmem:[#allocation5 + $0xe68] sm:$0xff] }
 0x137   : > { %1281 = vmatprep.subr.mxu1 %v1245_v57  ;;  %1130 = vmatpush2.msra.mxu0 %v1084_v58  ;;  %v1490_v57 = vrot.slane %v1483_v56, %v5460_v18  ;;  %v1217_v58 = vld [vmem:[#allocation5 + $0xb18] sm:$0xff]  ;;  %v1342_v56 = vld [vmem:[#allocation5 + $0xc20] sm:$0xff] }
 0x138   : > { %1282 = vmatpush2.msra.mxu1 %v1244_v59  ;;  %1131 = vmatprep.subr.mxu0 %v1083_v60  ;;  %v1369_v59 = vld [vmem:[#allocation5 + $0xcf8] sm:$0xff]  ;;  %v1216_v60 = vld [vmem:[#allocation5 + $0xb10] sm:$0xff] }
 0x139   : > { %1283 = vmatprep.subr.mxu1 %v1243_v61  ;;  %1132 = vmatpush2.msra.mxu0 %v1082_v62  ;;  %v1368_v61 = vld [vmem:[#allocation5 + $0xcf0] sm:$0xff]  ;;  %v1215_v62 = vld [vmem:[#allocation5 + $0xb08] sm:$0xff] }
 0x13a   : > { %1284 = vmatpush2.msra.mxu1 %v1242_v63  ;;  %1133 = vmatprep.subr.mxu0 %v1081_v0  ;;  %v1403_v63 = vcombine.high %v5495_v55, %v5495_v55  ;;  %v1367_v0 = vld [vmem:[#allocation5 + $0xce8] sm:$0xff] }
 0x13b   : > { %1285 = vmatprep.subr.mxu1 %v1241_v1  ;;  %1134 = vmatpush2.msra.mxu0 %v1080_v2  ;;  %v1214_v1 = vld [vmem:[#allocation5 + $0xb00] sm:$0xff]  ;;  %v5502_v2 = vmul.f32 %v5492_v26, %v1490_v57  ;;  %v1341_v57 = vld [vmem:[#allocation5 + $0xc18] sm:$0xff] }
 0x13c   : > { %1286 = vmatpush2.msra.mxu1 %v1240_v3  ;;  %1135 = vmatprep.subr.mxu0 %v1079_v4  ;;  %v1366_v3 = vld [vmem:[#allocation5 + $0xce0] sm:$0xff]  ;;  %v1365_v4 = vld [vmem:[#allocation5 + $0xcd8] sm:$0xff] }
 0x13d   : > { %1287 = vmatprep.subr.mxu1 %v1239_v5  ;;  %1136 = vmatpush2.msra.mxu0 %v1078_v6  ;;  %v1525_v5 = vld [vmem:[#allocation5 + $0xef8] sm:$0xff]  ;;  %v1524_v6 = vld [vmem:[#allocation5 + $0xef0] sm:$0xff] }
 0x13e   : > { %1288 = vmatpush2.msra.mxu1 %v1238_v7  ;;  %1137 = vmatprep.subr.mxu0 %v1077_v8  ;;  %v1363_v7 = vld [vmem:[#allocation5 + $0xcc8] sm:$0xff]  ;;  %v1559_v8 = vcombine.high %v5502_v2, %v5502_v2 }
 0x13f   : > { %1289 = vmatprep.subr.mxu1 %v1237_v9  ;;  %1138 = vmatpush2.msra.mxu0 %v1076_v10  ;;  %v1523_v9 = vld [vmem:[#allocation5 + $0xee8] sm:$0xff]  ;;  %v1362_v10 = vld [vmem:[#allocation5 + $0xcc0] sm:$0xff] }
 0x140   : > { %1290 = vmatpush2.msra.mxu1 %v1236_v11  ;;  %1139 = vmatprep.subr.mxu0 %v1075_v12  ;;  %v1522_v11 = vld [vmem:[#allocation5 + $0xee0] sm:$0xff]  ;;  %v1361_v12 = vld [vmem:[#allocation5 + $0xcb8] sm:$0xff] }
 0x141   : > { %1291 = vmatprep.subr.mxu1 %v1235_v13  ;;  %1140 = vmatpush2.msra.mxu0 %v1074_v14  ;;  %v1521_v13 = vld [vmem:[#allocation5 + $0xed8] sm:$0xff]  ;;  %v1360_v14 = vld [vmem:[#allocation5 + $0xcb0] sm:$0xff] }
 0x142   : > { %1292 = vmatpush2.msra.mxu1 %v1234_v15  ;;  %1141 = vmatprep.subr.mxu0 %v1073_v16  ;;  %v1520_v15 = vld [vmem:[#allocation5 + $0xed0] sm:$0xff]  ;;  %v1519_v16 = vld [vmem:[#allocation5 + $0xec8] sm:$0xff] }
 0x143   : > { %1293 = vmatprep.subr.mxu1 %v1233_v19  ;;  %1142 = vmatpush2.msra.mxu0 %v1072_v21  ;;  %v1358_v19 = vld [vmem:[#allocation5 + $0xca0] sm:$0xff] }
 0x144   : > { %1294 = vmatpush2.msra.mxu1 %v1232_v22  ;;  %1143 = vmatprep.subr.mxu0 %v1071_v23  ;;  %v1518_v21 = vld [vmem:[#allocation5 + $0xec0] sm:$0xff]  ;;  %v1357_v22 = vld [vmem:[#allocation5 + $0xc98] sm:$0xff] }
 0x145   : > { %1295 = vmatprep.subr.mxu1 %v1231_v24  ;;  %1144 = vmatpush2.msra.mxu0 %v1070_v25  ;;  %v1517_v23 = vld [vmem:[#allocation5 + $0xeb8] sm:$0xff]  ;;  %v1356_v24 = vld [vmem:[#allocation5 + $0xc90] sm:$0xff] }
 0x146   : > { %1296 = vmatpush2.msra.mxu1 %v1230_v27  ;;  %1145 = vmatprep.subr.mxu0 %v1069_v28  ;;  %v1516_v25 = vld [vmem:[#allocation5 + $0xeb0] sm:$0xff]  ;;  %v1355_v27 = vld [vmem:[#allocation5 + $0xc88] sm:$0xff] }
 0x147   : > { %1297 = vmatprep.subr.mxu1 %v1229_v29  ;;  %1146 = vmatpush2.msra.mxu0 %v1068_v30  ;;  %v1515_v28 = vld [vmem:[#allocation5 + $0xea8] sm:$0xff]  ;;  %v1354_v29 = vld [vmem:[#allocation5 + $0xc80] sm:$0xff] }
 0x148   : > { %1298 = vmatpush2.msra.mxu1 %v1228_v31  ;;  %1147 = vmatprep.subr.mxu0 %v1067_v32  ;;  %v1514_v30 = vld [vmem:[#allocation5 + $0xea0] sm:$0xff]  ;;  %v1353_v31 = vld [vmem:[#allocation5 + $0xc78] sm:$0xff] }
 0x149   : > { %1299 = vmatprep.subr.mxu1 %v1227_v33  ;;  %1148 = vmatpush2.msra.mxu0 %v1066_v34  ;;  %v1513_v32 = vld [vmem:[#allocation5 + $0xe98] sm:$0xff]  ;;  %v1352_v33 = vld [vmem:[#allocation5 + $0xc70] sm:$0xff] }
 0x14a   : > { %1300 = vmatpush2.msra.mxu1 %v1226_v35  ;;  %1149 = vmatprep.subr.mxu0 %v1065_v36  ;;  %v1512_v34 = vld [vmem:[#allocation5 + $0xe90] sm:$0xff]  ;;  %v1351_v35 = vld [vmem:[#allocation5 + $0xc68] sm:$0xff] }
 0x14b   : > { %1301 = vmatprep.subr.mxu1 %v1225_v38  ;;  %1150 = vmatpush2.msra.mxu0 %v1064_v40  ;;  %v1511_v36 = vld [vmem:[#allocation5 + $0xe88] sm:$0xff]  ;;  %v1510_v38 = vld [vmem:[#allocation5 + $0xe80] sm:$0xff]  ;;  %v1349_v40 = vld [vmem:[#allocation5 + $0xc58] sm:$0xff] }
 0x14c   : > { %1302 = vmatpush2.msra.mxu1 %v1224_v41  ;;  %1151 = vmatprep.subr.mxu0 %v1063_v42  ;;  %v1509_v41 = vld [vmem:[#allocation5 + $0xe78] sm:$0xff]  ;;  %v1348_v42 = vld [vmem:[#allocation5 + $0xc50] sm:$0xff] }
 0x14d   : > { %1303 = vmatprep.subr.mxu1 %v1223_v43  ;;  %1152 = vmatpush2.msra.mxu0 %v1062_v44  ;;  %v1508_v43 = vld [vmem:[#allocation5 + $0xe70] sm:$0xff]  ;;  %v1347_v44 = vld [vmem:[#allocation5 + $0xc48] sm:$0xff] }
 0x14e   : > { %1304 = vmatpush2.msra.mxu1 %v1222_v46  ;;  %1153 = vmatprep.subr.mxu0 %v1061_v47  ;;  %v1346_v46 = vld [vmem:[#allocation5 + $0xc40] sm:$0xff] }
 0x14f   : > { %1305 = vmatprep.subr.mxu1 %v1221_v48  ;;  %1154 = vmatpush2.msra.mxu0 %v1060_v49  ;;  %v1506_v47 = vld [vmem:[#allocation5 + $0xe60] sm:$0xff]  ;;  %v1345_v48 = vld [vmem:[#allocation5 + $0xc38] sm:$0xff] }
 0x150   : > { %1306 = vmatpush2.msra.mxu1 %v1220_v50  ;;  %1155 = vmatprep.subr.mxu0 %v1059_v52  ;;  %v1505_v49 = vld [vmem:[#allocation5 + $0xe58] sm:$0xff]  ;;  %v1344_v50 = vld [vmem:[#allocation5 + $0xc30] sm:$0xff] }
 0x151   : > { %1307 = vmatprep.subr.mxu1 %v1219_v53  ;;  %1156 = vmatpush2.msra.mxu0 %v1058_v54  ;;  %v1504_v52 = vld [vmem:[#allocation5 + $0xe50] sm:$0xff]  ;;  %v1343_v53 = vld [vmem:[#allocation5 + $0xc28] sm:$0xff] }
 0x152   : > { %1308 = vmatpush2.msra.mxu1 %v1218_v20  ;;  %1158 = vmatmul.mubr.f32.vlgmr.msra.gmra.mxu0 %v5479_v39  ;;  %v1364_v39 = vld [vmem:[#allocation5 + $0xcd0] sm:$0xff]  ;;  %v1503_v54 = vld [vmem:[#allocation5 + $0xe48] sm:$0xff]  ;;  %v1502_v20 = vld [vmem:[#allocation5 + $0xe40] sm:$0xff] }
 0x153   : > { %1309 = vmatprep.subr.mxu1 %v1217_v58  ;;  %1405 = vmatprep.subr.mxu0 %v1369_v59  ;;  %v1501_v58 = vld [vmem:[#allocation5 + $0xe38] sm:$0xff]  ;;  %v1340_v59 = vld [vmem:[#allocation5 + $0xc10] sm:$0xff] }
 0x154   : > { %1310 = vmatpush2.msra.mxu1 %v1216_v60  ;;  %1406 = vmatpush1.msra.mxu0 %v1368_v61  ;;  %v1500_v60 = vld [vmem:[#allocation5 + $0xe30] sm:$0xff]  ;;  %v1339_v61 = vld [vmem:[#allocation5 + $0xc08] sm:$0xff] }
 0x155   : > { %1469 = vmatprep.mubr.f32.mxu0 %v1403_v63  ;;  %1311 = vmatprep.subr.mxu1 %v1215_v62  ;;  %v1499_v62 = vld [vmem:[#allocation5 + $0xe28] sm:$0xff]  ;;  %v1338_v63 = vld [vmem:[#allocation5 + $0xc00] sm:$0xff] }
 0x156   : > { %1407 = vmatprep.subr.mxu0 %v1367_v0  ;;  %1312 = vmatpush2.msra.mxu1 %v1214_v1  ;;  %v1498_v0 = vld [vmem:[#allocation5 + $0xe20] sm:$0xff]  ;;  %v1401_v1 = vld [vmem:[#allocation5 + $0xdf8] sm:$0xff] }
 0x157   : > { %1408 = vmatpush1.msra.mxu0 %v1366_v3  ;;  %1314 = vmatmul.mubr.f32.vlgmr.msra.gmra.mxu1 %v5486_v51  ;;  %v1359_v51 = vld [vmem:[#allocation5 + $0xca8] sm:$0xff]  ;;  %v1497_v3 = vld [vmem:[#allocation5 + $0xe18] sm:$0xff] }
 0x158   : > { %1409 = vmatprep.subr.mxu0 %v1365_v4  ;;  %1561 = vmatprep.subr.mxu1 %v1525_v5  ;;  %v1400_v4 = vld [vmem:[#allocation5 + $0xdf0] sm:$0xff] }
 0x159   : > { %1410 = vmatpush1.msra.mxu0 %v1364_v39  ;;  %1562 = vmatpush1.msra.mxu1 %v1524_v6  ;;  %v1496_v5 = vld [vmem:[#allocation5 + $0xe10] sm:$0xff]  ;;  %v1399_v39 = vld [vmem:[#allocation5 + $0xde8] sm:$0xff] }
 0x15a   : > { %1625 = vmatprep.mubr.f32.mxu1 %v1559_v8  ;;  %1411 = vmatprep.subr.mxu0 %v1363_v7  ;;  %v1495_v6 = vld [vmem:[#allocation5 + $0xe08] sm:$0xff]  ;;  %v1398_v7 = vld [vmem:[#allocation5 + $0xde0] sm:$0xff] }
 0x15b   : > { %1563 = vmatprep.subr.mxu1 %v1523_v9  ;;  %1412 = vmatpush1.msra.mxu0 %v1362_v10  ;;  %v1494_v8 = vld [vmem:[#allocation5 + $0xe00] sm:$0xff]  ;;  %v1397_v9 = vld [vmem:[#allocation5 + $0xdd8] sm:$0xff] }
 0x15c   : > { %1564 = vmatpush1.msra.mxu1 %v1522_v11  ;;  %1413 = vmatprep.subr.mxu0 %v1361_v12  ;;  %v1557_v10 = vld [vmem:[#allocation5 + $0xff8] sm:$0xff]  ;;  %v1396_v11 = vld [vmem:[#allocation5 + $0xdd0] sm:$0xff] }
 0x15d   : > { %1565 = vmatprep.subr.mxu1 %v1521_v13  ;;  %1414 = vmatpush1.msra.mxu0 %v1360_v14  ;;  %v1556_v12 = vld [vmem:[#allocation5 + $0xff0] sm:$0xff]  ;;  %v1395_v13 = vld [vmem:[#allocation5 + $0xdc8] sm:$0xff] }
 0x15e   : > { %1566 = vmatpush1.msra.mxu1 %v1520_v15  ;;  %1415 = vmatprep.subr.mxu0 %v1359_v51  ;;  %v1555_v14 = vld [vmem:[#allocation5 + $0xfe8] sm:$0xff]  ;;  %v1394_v15 = vld [vmem:[#allocation5 + $0xdc0] sm:$0xff] }
 0x15f   : > { %1567 = vmatprep.subr.mxu1 %v1519_v16  ;;  %1416 = vmatpush1.msra.mxu0 %v1358_v19  ;;  %v1554_v51 = vld [vmem:[#allocation5 + $0xfe0] sm:$0xff]  ;;  %v1393_v16 = vld [vmem:[#allocation5 + $0xdb8] sm:$0xff] }
 0x160   : > { %1568 = vmatpush1.msra.mxu1 %v1518_v21  ;;  %1417 = vmatprep.subr.mxu0 %v1357_v22  ;;  %v1553_v19 = vld [vmem:[#allocation5 + $0xfd8] sm:$0xff]  ;;  %v1392_v21 = vld [vmem:[#allocation5 + $0xdb0] sm:$0xff] }
 0x161   : > { %1569 = vmatprep.subr.mxu1 %v1517_v23  ;;  %1418 = vmatpush1.msra.mxu0 %v1356_v24  ;;  %v1552_v22 = vld [vmem:[#allocation5 + $0xfd0] sm:$0xff]  ;;  %v1391_v23 = vld [vmem:[#allocation5 + $0xda8] sm:$0xff] }
 0x162   : > { %1570 = vmatpush1.msra.mxu1 %v1516_v25  ;;  %1419 = vmatprep.subr.mxu0 %v1355_v27  ;;  %v1551_v24 = vld [vmem:[#allocation5 + $0xfc8] sm:$0xff]  ;;  %v1390_v25 = vld [vmem:[#allocation5 + $0xda0] sm:$0xff] }
 0x163   : > { %1571 = vmatprep.subr.mxu1 %v1515_v28  ;;  %1420 = vmatpush1.msra.mxu0 %v1354_v29  ;;  %v1550_v27 = vld [vmem:[#allocation5 + $0xfc0] sm:$0xff]  ;;  %v1389_v28 = vld [vmem:[#allocation5 + $0xd98] sm:$0xff] }
 0x164   : > { %1572 = vmatpush1.msra.mxu1 %v1514_v30  ;;  %1421 = vmatprep.subr.mxu0 %v1353_v31  ;;  %v1549_v29 = vld [vmem:[#allocation5 + $0xfb8] sm:$0xff]  ;;  %v1388_v30 = vld [vmem:[#allocation5 + $0xd90] sm:$0xff] }
 0x165   : > { %1573 = vmatprep.subr.mxu1 %v1513_v32  ;;  %1422 = vmatpush1.msra.mxu0 %v1352_v33  ;;  %v1548_v31 = vld [vmem:[#allocation5 + $0xfb0] sm:$0xff]  ;;  %v1387_v32 = vld [vmem:[#allocation5 + $0xd88] sm:$0xff] }
 0x166   : > { %1574 = vmatpush1.msra.mxu1 %v1512_v34  ;;  %1423 = vmatprep.subr.mxu0 %v1351_v35  ;;  %v1547_v33 = vld [vmem:[#allocation5 + $0xfa8] sm:$0xff]  ;;  %v1386_v34 = vld [vmem:[#allocation5 + $0xd80] sm:$0xff] }
 0x167   : > { %1575 = vmatprep.subr.mxu1 %v1511_v36  ;;  %1424 = vmatpush1.msra.mxu0 %v1350_v37  ;;  %v1546_v35 = vld [vmem:[#allocation5 + $0xfa0] sm:$0xff]  ;;  %v1385_v36 = vld [vmem:[#allocation5 + $0xd78] sm:$0xff] }
 0x168   : > { %1576 = vmatpush1.msra.mxu1 %v1510_v38  ;;  %1425 = vmatprep.subr.mxu0 %v1349_v40  ;;  %v1545_v37 = vld [vmem:[#allocation5 + $0xf98] sm:$0xff]  ;;  %v1384_v38 = vld [vmem:[#allocation5 + $0xd70] sm:$0xff] }
 0x169   : > { %1577 = vmatprep.subr.mxu1 %v1509_v41  ;;  %1426 = vmatpush1.msra.mxu0 %v1348_v42  ;;  %v1544_v40 = vld [vmem:[#allocation5 + $0xf90] sm:$0xff]  ;;  %v1383_v41 = vld [vmem:[#allocation5 + $0xd68] sm:$0xff] }
 0x16a   : > { %1578 = vmatpush1.msra.mxu1 %v1508_v43  ;;  %1427 = vmatprep.subr.mxu0 %v1347_v44  ;;  %v1543_v42 = vld [vmem:[#allocation5 + $0xf88] sm:$0xff]  ;;  %v1382_v43 = vld [vmem:[#allocation5 + $0xd60] sm:$0xff] }
 0x16b   : > { %1579 = vmatprep.subr.mxu1 %v1507_v45  ;;  %1428 = vmatpush1.msra.mxu0 %v1346_v46  ;;  %v1542_v44 = vld [vmem:[#allocation5 + $0xf80] sm:$0xff]  ;;  %v1381_v45 = vld [vmem:[#allocation5 + $0xd58] sm:$0xff] }
 0x16c   : > { %1580 = vmatpush1.msra.mxu1 %v1506_v47  ;;  %1429 = vmatprep.subr.mxu0 %v1345_v48  ;;  %v1541_v46 = vld [vmem:[#allocation5 + $0xf78] sm:$0xff]  ;;  %v1380_v47 = vld [vmem:[#allocation5 + $0xd50] sm:$0xff] }
 0x16d   : > { %1581 = vmatprep.subr.mxu1 %v1505_v49  ;;  %1430 = vmatpush1.msra.mxu0 %v1344_v50  ;;  %v1540_v48 = vld [vmem:[#allocation5 + $0xf70] sm:$0xff]  ;;  %v1379_v49 = vld [vmem:[#allocation5 + $0xd48] sm:$0xff] }
 0x16e   : > { %1582 = vmatpush1.msra.mxu1 %v1504_v52  ;;  %1431 = vmatprep.subr.mxu0 %v1343_v53  ;;  %v1539_v50 = vld [vmem:[#allocation5 + $0xf68] sm:$0xff]  ;;  %v1378_v52 = vld [vmem:[#allocation5 + $0xd40] sm:$0xff] }
 0x16f   : > { %1583 = vmatprep.subr.mxu1 %v1503_v54  ;;  %1432 = vmatpush1.msra.mxu0 %v1342_v56  ;;  %v1538_v53 = vld [vmem:[#allocation5 + $0xf60] sm:$0xff]  ;;  %v1377_v54 = vld [vmem:[#allocation5 + $0xd38] sm:$0xff]  ;;  %v1639_v56 = vpop.permute.xlu0 %1638 }
 0x170   : > { %1584 = vmatpush1.msra.mxu1 %v1502_v20  ;;  %1433 = vmatprep.subr.mxu0 %v1341_v57  ;;  %v1537_v20 = vld [vmem:[#allocation5 + $0xf58] sm:$0xff]  ;;  %v1376_v57 = vld [vmem:[#allocation5 + $0xd30] sm:$0xff] }
 0x171   : > { %1585 = vmatprep.subr.mxu1 %v1501_v58  ;;  %1434 = vmatpush1.msra.mxu0 %v1340_v59  ;;  %v1536_v58 = vld [vmem:[#allocation5 + $0xf50] sm:$0xff]  ;;  %v1375_v59 = vld [vmem:[#allocation5 + $0xd28] sm:$0xff] }
 0x172   : > { %1586 = vmatpush1.msra.mxu1 %v1500_v60  ;;  %1435 = vmatprep.subr.mxu0 %v1339_v61  ;;  %v1535_v60 = vld [vmem:[#allocation5 + $0xf48] sm:$0xff]  ;;  %v1374_v61 = vld [vmem:[#allocation5 + $0xd20] sm:$0xff] }
 0x173   : > { %1587 = vmatprep.subr.mxu1 %v1499_v62  ;;  %1436 = vmatpush1.msra.mxu0 %v1338_v63  ;;  %v1646_v62 = vrot.slane %v1639_v56, %v5460_v18  ;;  %v1534_v63 = vld [vmem:[#allocation5 + $0xf40] sm:$0xff]  ;;  %v1705_v56 = vld [vmem:[#allocation5 + $0x11b8] sm:$0xff] }
 0x174   : > { %1588 = vmatpush1.msra.mxu1 %v1498_v0  ;;  %1437 = vmatprep.subr.mxu0 %v1401_v1  ;;  %v1373_v0 = vld [vmem:[#allocation5 + $0xd18] sm:$0xff]  ;;  %v1530_v18 = vld [vmem:[#allocation5 + $0xf20] sm:$0xff] }
 0x175   : > { %1589 = vmatprep.subr.mxu1 %v1497_v3  ;;  %1438 = vmatpush2.msra.mxu0 %v1400_v4  ;;  %v1533_v1 = vld [vmem:[#allocation5 + $0xf38] sm:$0xff]  ;;  %v1372_v3 = vld [vmem:[#allocation5 + $0xd10] sm:$0xff] }
 0x176   : > { %1590 = vmatpush1.msra.mxu1 %v1496_v5  ;;  %1439 = vmatprep.subr.mxu0 %v1399_v39  ;;  %v1532_v4 = vld [vmem:[#allocation5 + $0xf30] sm:$0xff]  ;;  %v1371_v5 = vld [vmem:[#allocation5 + $0xd08] sm:$0xff] }
 0x177   : > { %1591 = vmatprep.subr.mxu1 %v1495_v6  ;;  %1440 = vmatpush2.msra.mxu0 %v1398_v7  ;;  %v1531_v39 = vld [vmem:[#allocation5 + $0xf28] sm:$0xff]  ;;  %v1370_v6 = vld [vmem:[#allocation5 + $0xd00] sm:$0xff]  ;;  %v5509_v7 = vmul.f32 %v5492_v26, %v1646_v62 }
 0x178   : > { %1592 = vmatpush1.msra.mxu1 %v1494_v8  ;;  %1441 = vmatprep.subr.mxu0 %v1397_v9  ;;  %v1529_v8 = vld [vmem:[#allocation5 + $0xf18] sm:$0xff]  ;;  %v1698_v62 = vld [vmem:[#allocation5 + $0x1180] sm:$0xff] }
 0x179   : > { %1593 = vmatprep.subr.mxu1 %v1557_v10  ;;  %1442 = vmatpush2.msra.mxu0 %v1396_v11  ;;  %v1681_v9 = vld [vmem:[#allocation5 + $0x10f8] sm:$0xff]  ;;  %v1528_v10 = vld [vmem:[#allocation5 + $0xf10] sm:$0xff]  ;;  %v1715_v26 = vcombine.high %v5509_v7, %v5509_v7 }
 0x17a   : > { %1594 = vmatpush2.msra.mxu1 %v1556_v12  ;;  %1443 = vmatprep.subr.mxu0 %v1395_v13  ;;  %v1680_v11 = vld [vmem:[#allocation5 + $0x10f0] sm:$0xff]  ;;  %v1527_v12 = vld [vmem:[#allocation5 + $0xf08] sm:$0xff] }
 0x17b   : > { %1595 = vmatprep.subr.mxu1 %v1555_v14  ;;  %1444 = vmatpush2.msra.mxu0 %v1394_v15  ;;  %v1679_v13 = vld [vmem:[#allocation5 + $0x10e8] sm:$0xff]  ;;  %v1526_v14 = vld [vmem:[#allocation5 + $0xf00] sm:$0xff] }
 0x17c   : > { %1596 = vmatpush2.msra.mxu1 %v1554_v51  ;;  %1445 = vmatprep.subr.mxu0 %v1393_v16  ;;  %v1678_v15 = vld [vmem:[#allocation5 + $0x10e0] sm:$0xff]  ;;  %v1677_v51 = vld [vmem:[#allocation5 + $0x10d8] sm:$0xff]  ;;  %v1676_v16 = vld [vmem:[#allocation5 + $0x10d0] sm:$0xff] }
 0x17d   : > { %1597 = vmatprep.subr.mxu1 %v1553_v19  ;;  %1446 = vmatpush2.msra.mxu0 %v1392_v21  ;;  %v1674_v19 = vld [vmem:[#allocation5 + $0x10c0] sm:$0xff]  ;;  %v1673_v21 = vld [vmem:[#allocation5 + $0x10b8] sm:$0xff] }
 0x17e   : > { %1598 = vmatpush2.msra.mxu1 %v1552_v22  ;;  %1447 = vmatprep.subr.mxu0 %v1391_v23  ;;  %v1672_v22 = vld [vmem:[#allocation5 + $0x10b0] sm:$0xff]  ;;  %v1671_v23 = vld [vmem:[#allocation5 + $0x10a8] sm:$0xff] }
 0x17f   : > { %1599 = vmatprep.subr.mxu1 %v1551_v24  ;;  %1448 = vmatpush2.msra.mxu0 %v1390_v25  ;;  %v1670_v24 = vld [vmem:[#allocation5 + $0x10a0] sm:$0xff]  ;;  %v1669_v25 = vld [vmem:[#allocation5 + $0x1098] sm:$0xff] }
 0x180   : > { %1600 = vmatpush2.msra.mxu1 %v1550_v27  ;;  %1449 = vmatprep.subr.mxu0 %v1389_v28  ;;  %v1668_v27 = vld [vmem:[#allocation5 + $0x1090] sm:$0xff]  ;;  %v1667_v28 = vld [vmem:[#allocation5 + $0x1088] sm:$0xff] }
 0x181   : > { %1601 = vmatprep.subr.mxu1 %v1549_v29  ;;  %1450 = vmatpush2.msra.mxu0 %v1388_v30  ;;  %v1666_v29 = vld [vmem:[#allocation5 + $0x1080] sm:$0xff]  ;;  %v1664_v30 = vld [vmem:[#allocation5 + $0x1070] sm:$0xff] }
 0x182   : > { %1602 = vmatpush2.msra.mxu1 %v1548_v31  ;;  %1451 = vmatprep.subr.mxu0 %v1387_v32  ;;  %v1663_v31 = vld [vmem:[#allocation5 + $0x1068] sm:$0xff]  ;;  %v1662_v32 = vld [vmem:[#allocation5 + $0x1060] sm:$0xff] }
 0x183   : > { %1603 = vmatprep.subr.mxu1 %v1547_v33  ;;  %1452 = vmatpush2.msra.mxu0 %v1386_v34  ;;  %v1661_v33 = vld [vmem:[#allocation5 + $0x1058] sm:$0xff]  ;;  %v1660_v34 = vld [vmem:[#allocation5 + $0x1050] sm:$0xff] }
 0x184   : > { %1604 = vmatpush2.msra.mxu1 %v1546_v35  ;;  %1453 = vmatprep.subr.mxu0 %v1385_v36  ;;  %v1659_v35 = vld [vmem:[#allocation5 + $0x1048] sm:$0xff]  ;;  %v1658_v36 = vld [vmem:[#allocation5 + $0x1040] sm:$0xff] }
 0x185   : > { %1605 = vmatprep.subr.mxu1 %v1545_v37  ;;  %1454 = vmatpush2.msra.mxu0 %v1384_v38  ;;  %v1657_v37 = vld [vmem:[#allocation5 + $0x1038] sm:$0xff]  ;;  %v1656_v38 = vld [vmem:[#allocation5 + $0x1030] sm:$0xff] }
 0x186   : > { %1606 = vmatpush2.msra.mxu1 %v1544_v40  ;;  %1455 = vmatprep.subr.mxu0 %v1383_v41  ;;  %v1655_v40 = vld [vmem:[#allocation5 + $0x1028] sm:$0xff]  ;;  %v1654_v41 = vld [vmem:[#allocation5 + $0x1020] sm:$0xff] }
 0x187   : > { %1607 = vmatprep.subr.mxu1 %v1543_v42  ;;  %1456 = vmatpush2.msra.mxu0 %v1382_v43  ;;  %v1653_v42 = vld [vmem:[#allocation5 + $0x1018] sm:$0xff]  ;;  %v1652_v43 = vld [vmem:[#allocation5 + $0x1010] sm:$0xff] }
 0x188   : > { %1608 = vmatpush2.msra.mxu1 %v1542_v44  ;;  %1457 = vmatprep.subr.mxu0 %v1381_v45  ;;  %v1651_v44 = vld [vmem:[#allocation5 + $0x1008] sm:$0xff]  ;;  %v1650_v45 = vld [vmem:[#allocation5 + $0x1000] sm:$0xff] }
 0x189   : > { %1609 = vmatprep.subr.mxu1 %v1541_v46  ;;  %1458 = vmatpush2.msra.mxu0 %v1380_v47  ;;  %v1713_v46 = vld [vmem:[#allocation5 + $0x11f8] sm:$0xff]  ;;  %v1712_v47 = vld [vmem:[#allocation5 + $0x11f0] sm:$0xff] }
 0x18a   : > { %1610 = vmatpush2.msra.mxu1 %v1540_v48  ;;  %1459 = vmatprep.subr.mxu0 %v1379_v49  ;;  %v1711_v48 = vld [vmem:[#allocation5 + $0x11e8] sm:$0xff]  ;;  %v1710_v49 = vld [vmem:[#allocation5 + $0x11e0] sm:$0xff] }
 0x18b   : > { %1611 = vmatprep.subr.mxu1 %v1539_v50  ;;  %1460 = vmatpush2.msra.mxu0 %v1378_v52  ;;  %v1709_v50 = vld [vmem:[#allocation5 + $0x11d8] sm:$0xff]  ;;  %v1708_v52 = vld [vmem:[#allocation5 + $0x11d0] sm:$0xff] }
 0x18c   : > { %1612 = vmatpush2.msra.mxu1 %v1538_v53  ;;  %1461 = vmatprep.subr.mxu0 %v1377_v54  ;;  %v1707_v53 = vld [vmem:[#allocation5 + $0x11c8] sm:$0xff]  ;;  %v1706_v54 = vld [vmem:[#allocation5 + $0x11c0] sm:$0xff] }
 0x18d   : > { %1613 = vmatprep.subr.mxu1 %v1537_v20  ;;  %1462 = vmatpush2.msra.mxu0 %v1376_v57  ;;  %v1704_v20 = vld [vmem:[#allocation5 + $0x11b0] sm:$0xff]  ;;  %v1703_v57 = vld [vmem:[#allocation5 + $0x11a8] sm:$0xff] }
 0x18e   : > { %1614 = vmatpush2.msra.mxu1 %v1536_v58  ;;  %1463 = vmatprep.subr.mxu0 %v1375_v59  ;;  %v1702_v58 = vld [vmem:[#allocation5 + $0x11a0] sm:$0xff]  ;;  %v1701_v59 = vld [vmem:[#allocation5 + $0x1198] sm:$0xff] }
 0x18f   : > { %1615 = vmatprep.subr.mxu1 %v1535_v60  ;;  %1464 = vmatpush2.msra.mxu0 %v1374_v61  ;;  %v1700_v60 = vld [vmem:[#allocation5 + $0x1190] sm:$0xff]  ;;  %v1699_v61 = vld [vmem:[#allocation5 + $0x1188] sm:$0xff] }
 0x190   : > { %1616 = vmatpush2.msra.mxu1 %v1534_v63  ;;  %1465 = vmatprep.subr.mxu0 %v1373_v0  ;;  %v1697_v63 = vld [vmem:[#allocation5 + $0x1178] sm:$0xff]  ;;  %v1696_v0 = vld [vmem:[#allocation5 + $0x1170] sm:$0xff] }
 0x191   : > { %1617 = vmatprep.subr.mxu1 %v1533_v1  ;;  %1466 = vmatpush2.msra.mxu0 %v1372_v3  ;;  %v1695_v1 = vld [vmem:[#allocation5 + $0x1168] sm:$0xff]  ;;  %v1694_v3 = vld [vmem:[#allocation5 + $0x1160] sm:$0xff] }
 0x192   : > { %1618 = vmatpush2.msra.mxu1 %v1532_v4  ;;  %1467 = vmatprep.subr.mxu0 %v1371_v5  ;;  %v1693_v4 = vld [vmem:[#allocation5 + $0x1158] sm:$0xff]  ;;  %v1692_v5 = vld [vmem:[#allocation5 + $0x1150] sm:$0xff] }
 0x193   : > { %1619 = vmatprep.subr.mxu1 %v1531_v39  ;;  %1468 = vmatpush2.msra.mxu0 %v1370_v6  ;;  %v1691_v39 = vld [vmem:[#allocation5 + $0x1148] sm:$0xff]  ;;  %v1690_v6 = vld [vmem:[#allocation5 + $0x1140] sm:$0xff] }
 0x194   : > { %1620 = vmatpush2.msra.mxu1 %v1530_v18  ;;  %1470 = vmatmul.mubr.f32.vlgmr.msra.gmra.mxu0 %v5495_v55  ;;  %v1675_v55 = vld [vmem:[#allocation5 + $0x10c8] sm:$0xff]  ;;  %v1689_v18 = vld [vmem:[#allocation5 + $0x1138] sm:$0xff] }
 0x195   : > { %1621 = vmatprep.subr.mxu1 %v1529_v8  ;;  %1717 = vmatprep.subr.mxu0 %v1681_v9  ;;  %v1688_v8 = vld [vmem:[#allocation5 + $0x1130] sm:$0xff]  ;;  %v1687_v9 = vld [vmem:[#allocation5 + $0x1128] sm:$0xff] }
 0x196   : > { %1622 = vmatpush2.msra.mxu1 %v1528_v10  ;;  %1718 = vmatpush1.msra.mxu0 %v1680_v11  ;;  %v1686_v10 = vld [vmem:[#allocation5 + $0x1120] sm:$0xff]  ;;  %v1685_v11 = vld [vmem:[#allocation5 + $0x1118] sm:$0xff] }
 0x197   : > { %1781 = vmatprep.mubr.f32.mxu0 %v1715_v26  ;;  %1623 = vmatprep.subr.mxu1 %v1527_v12  ;;  %v1684_v12 = vld [vmem:[#allocation5 + $0x1110] sm:$0xff]  ;;  %v1683_v26 = vld [vmem:[#allocation5 + $0x1108] sm:$0xff] }
 0x198   : > { %1719 = vmatprep.subr.mxu0 %v1679_v13  ;;  %1624 = vmatpush2.msra.mxu1 %v1526_v14  ;;  %v1682_v13 = vld [vmem:[#allocation5 + $0x1100] sm:$0xff]  ;;  %v3978_v14 = vld [vmem:[#allocation5 + $0xf8] sm:$0xff] }
 0x199   : > { %1720 = vmatpush1.msra.mxu0 %v1678_v15  ;;  %1626 = vmatmul.mubr.f32.vlgmr.msra.gmra.mxu1 %v5502_v2  ;;  %v1665_v2 = vld [vmem:[#allocation5 + $0x1078] sm:$0xff]  ;;  %v3979_v15 = vld [vmem:[#allocation5 + $0xf0] sm:$0xff] }
 0x19a   : > { %1721 = vmatprep.subr.mxu0 %v1677_v51  ;;  %v3980_v51 = vld [vmem:[#allocation5 + $0xe8] sm:$0xff] }
 0x19b   : > { %1722 = vmatpush1.msra.mxu0 %v1676_v16  ;;  %v3981_v16 = vld [vmem:[#allocation5 + $0xe0] sm:$0xff] }
 0x19c   : > { %1723 = vmatprep.subr.mxu0 %v1675_v55  ;;  %v3982_v55 = vld [vmem:[#allocation5 + $0xd8] sm:$0xff] }
 0x19d   : > { %1724 = vmatpush1.msra.mxu0 %v1674_v19  ;;  %v3983_v19 = vld [vmem:[#allocation5 + $0xd0] sm:$0xff] }
 0x19e   : > { %1725 = vmatprep.subr.mxu0 %v1673_v21  ;;  %v3984_v21 = vld [vmem:[#allocation5 + $0xc8] sm:$0xff] }
 0x19f   : > { %1726 = vmatpush1.msra.mxu0 %v1672_v22  ;;  %v3985_v22 = vld [vmem:[#allocation5 + $0xc0] sm:$0xff] }
 0x1a0   : > { %1727 = vmatprep.subr.mxu0 %v1671_v23  ;;  %v3986_v23 = vld [vmem:[#allocation5 + $0xb8] sm:$0xff] }
 0x1a1   : > { %1728 = vmatpush1.msra.mxu0 %v1670_v24  ;;  %v3987_v24 = vld [vmem:[#allocation5 + $0xb0] sm:$0xff] }
 0x1a2   : > { %1729 = vmatprep.subr.mxu0 %v1669_v25  ;;  %v3989_v25 = vld [vmem:[#allocation5 + $0xa0] sm:$0xff] }
 0x1a3   : > { %1730 = vmatpush1.msra.mxu0 %v1668_v27  ;;  %v3990_v27 = vld [vmem:[#allocation5 + $0x98] sm:$0xff] }
 0x1a4   : > { %1731 = vmatprep.subr.mxu0 %v1667_v28  ;;  %v3991_v28 = vld [vmem:[#allocation5 + $0x90] sm:$0xff] }
 0x1a5   : > { %1732 = vmatpush1.msra.mxu0 %v1666_v29  ;;  %v3992_v29 = vld [vmem:[#allocation5 + $0x88] sm:$0xff] }
 0x1a6   : > { %1733 = vmatprep.subr.mxu0 %v1665_v2  ;;  %v3993_v2 = vld [vmem:[#allocation5 + $0x80] sm:$0xff] }
 0x1a7   : > { %1734 = vmatpush1.msra.mxu0 %v1664_v30  ;;  %v3994_v30 = vld [vmem:[#allocation5 + $0x78] sm:$0xff] }
 0x1a8   : > { %1735 = vmatprep.subr.mxu0 %v1663_v31  ;;  %v3995_v31 = vld [vmem:[#allocation5 + $0x70] sm:$0xff] }
 0x1a9   : > { %1736 = vmatpush1.msra.mxu0 %v1662_v32  ;;  %v3996_v32 = vld [vmem:[#allocation5 + $0x68] sm:$0xff] }
 0x1aa   : > { %1737 = vmatprep.subr.mxu0 %v1661_v33  ;;  %v3997_v33 = vld [vmem:[#allocation5 + $0x60] sm:$0xff] }
 0x1ab   : > { %1738 = vmatpush1.msra.mxu0 %v1660_v34  ;;  %v3998_v34 = vld [vmem:[#allocation5 + $0x58] sm:$0xff] }
 0x1ac   : > { %1739 = vmatprep.subr.mxu0 %v1659_v35  ;;  %v3999_v35 = vld [vmem:[#allocation5 + $0x50] sm:$0xff] }
 0x1ad   : > { %1740 = vmatpush1.msra.mxu0 %v1658_v36  ;;  %v4000_v36 = vld [vmem:[#allocation5 + $0x48] sm:$0xff] }
 0x1ae   : > { %1741 = vmatprep.subr.mxu0 %v1657_v37  ;;  %v4001_v37 = vld [vmem:[#allocation5 + $0x40] sm:$0xff] }
 0x1af   : > { %1742 = vmatpush1.msra.mxu0 %v1656_v38  ;;  %v4002_v38 = vld [vmem:[#allocation5 + $0x38] sm:$0xff] }
 0x1b0   : > { %1743 = vmatprep.subr.mxu0 %v1655_v40  ;;  %v4003_v40 = vld [vmem:[#allocation5 + $0x30] sm:$0xff] }
 0x1b1   : > { %1744 = vmatpush1.msra.mxu0 %v1654_v41  ;;  %v4004_v41 = vld [vmem:[#allocation5 + $0x28] sm:$0xff] }
 0x1b2   : > { %1745 = vmatprep.subr.mxu0 %v1653_v42  ;;  %v4005_v42 = vld [vmem:[#allocation5 + $0x20] sm:$0xff] }
 0x1b3   : > { %1746 = vmatpush1.msra.mxu0 %v1652_v43  ;;  %v4006_v43 = vld [vmem:[#allocation5 + $0x18] sm:$0xff] }
 0x1b4   : > { %1747 = vmatprep.subr.mxu0 %v1651_v44  ;;  %v4007_v44 = vld [vmem:[#allocation5 + $0x10] sm:$0xff] }
 0x1b5   : > { %1748 = vmatpush1.msra.mxu0 %v1650_v45  ;;  %v4008_v45 = vld [vmem:[#allocation5 + $0x8] sm:$0xff] }
 0x1b6   : > { %1749 = vmatprep.subr.mxu0 %v1713_v46  ;;  %v4009_v46 = vld [vmem:[#allocation5] sm:$0xff] }
 0x1b7   : > { %1750 = vmatpush2.msra.mxu0 %v1712_v47  ;;  %v4010_v47 = vld [vmem:[#allocation5 + $0x1f8] sm:$0xff] }
 0x1b8   : > { %1751 = vmatprep.subr.mxu0 %v1711_v48  ;;  %v4011_v48 = vld [vmem:[#allocation5 + $0x1f0] sm:$0xff] }
 0x1b9   : > { %1752 = vmatpush2.msra.mxu0 %v1710_v49  ;;  %v4012_v49 = vld [vmem:[#allocation5 + $0x1e8] sm:$0xff] }
 0x1ba   : > { %1753 = vmatprep.subr.mxu0 %v1709_v50  ;;  %v4013_v50 = vld [vmem:[#allocation5 + $0x1e0] sm:$0xff] }
 0x1bb   : > { %1754 = vmatpush2.msra.mxu0 %v1708_v52  ;;  %v4014_v52 = vld [vmem:[#allocation5 + $0x1d8] sm:$0xff] }
 0x1bc   : > { %1755 = vmatprep.subr.mxu0 %v1707_v53  ;;  %v4015_v53 = vld [vmem:[#allocation5 + $0x1d0] sm:$0xff] }
 0x1bd   : > { %1756 = vmatpush2.msra.mxu0 %v1706_v54  ;;  %v4016_v54 = vld [vmem:[#allocation5 + $0x1c8] sm:$0xff] }
 0x1be   : > { %1757 = vmatprep.subr.mxu0 %v1705_v56  ;;  %v4017_v56 = vld [vmem:[#allocation5 + $0x1c0] sm:$0xff] }
 0x1bf   : > { %1758 = vmatpush2.msra.mxu0 %v1704_v20  ;;  %v4018_v20 = vld [vmem:[#allocation5 + $0x1b8] sm:$0xff] }
 0x1c0   : > { %1759 = vmatprep.subr.mxu0 %v1703_v57  ;;  %v4019_v57 = vld [vmem:[#allocation5 + $0x1b0] sm:$0xff] }
 0x1c1   : > { %1760 = vmatpush2.msra.mxu0 %v1702_v58  ;;  %v4020_v58 = vld [vmem:[#allocation5 + $0x1a8] sm:$0xff] }
 0x1c2   : > { %1761 = vmatprep.subr.mxu0 %v1701_v59  ;;  %v4021_v59 = vld [vmem:[#allocation5 + $0x1a0] sm:$0xff] }
 0x1c3   : > { %1762 = vmatpush2.msra.mxu0 %v1700_v60  ;;  %v4022_v60 = vld [vmem:[#allocation5 + $0x198] sm:$0xff] }
 0x1c4   : > { %1763 = vmatprep.subr.mxu0 %v1699_v61  ;;  %v4023_v61 = vld [vmem:[#allocation5 + $0x190] sm:$0xff] }
 0x1c5   : > { %1764 = vmatpush2.msra.mxu0 %v1698_v62  ;;  %v4024_v62 = vld [vmem:[#allocation5 + $0x188] sm:$0xff] }
 0x1c6   : > { %1765 = vmatprep.subr.mxu0 %v1697_v63  ;;  %v4025_v63 = vld [vmem:[#allocation5 + $0x180] sm:$0xff] }
 0x1c7   : > { %1766 = vmatpush2.msra.mxu0 %v1696_v0  ;;  %v4026_v0 = vld [vmem:[#allocation5 + $0x178] sm:$0xff] }
 0x1c8   : > { %1767 = vmatprep.subr.mxu0 %v1695_v1  ;;  %v4027_v1 = vld [vmem:[#allocation5 + $0x170] sm:$0xff] }
 0x1c9   : > { %1768 = vmatpush2.msra.mxu0 %v1694_v3  ;;  %v4028_v3 = vld [vmem:[#allocation5 + $0x168] sm:$0xff] }
 0x1ca   : > { %1769 = vmatprep.subr.mxu0 %v1693_v4  ;;  %v4029_v4 = vld [vmem:[#allocation5 + $0x160] sm:$0xff] }
 0x1cb   : > { %1770 = vmatpush2.msra.mxu0 %v1692_v5  ;;  %v4030_v5 = vld [vmem:[#allocation5 + $0x158] sm:$0xff] }
 0x1cc   : > { %1771 = vmatprep.subr.mxu0 %v1691_v39  ;;  %v4031_v39 = vld [vmem:[#allocation5 + $0x150] sm:$0xff] }
 0x1cd   : > { %1772 = vmatpush2.msra.mxu0 %v1690_v6  ;;  %v4032_v6 = vld [vmem:[#allocation5 + $0x148] sm:$0xff] }
 0x1ce   : > { %1773 = vmatprep.subr.mxu0 %v1689_v18  ;;  %v4033_v18 = vld [vmem:[#allocation5 + $0x140] sm:$0xff] }
 0x1cf   : > { %1774 = vmatpush2.msra.mxu0 %v1688_v8  ;;  %v4034_v8 = vld [vmem:[#allocation5 + $0x138] sm:$0xff] }
 0x1d0   : > { %1775 = vmatprep.subr.mxu0 %v1687_v9  ;;  %v4035_v9 = vld [vmem:[#allocation5 + $0x130] sm:$0xff] }
 0x1d1   : > { %1776 = vmatpush2.msra.mxu0 %v1686_v10  ;;  %v4036_v10 = vld [vmem:[#allocation5 + $0x128] sm:$0xff] }
 0x1d2   : > { %1777 = vmatprep.subr.mxu0 %v1685_v11  ;;  %v4037_v11 = vld [vmem:[#allocation5 + $0x120] sm:$0xff] }
 0x1d3   : > { %1778 = vmatpush2.msra.mxu0 %v1684_v12  ;;  %v4038_v12 = vld [vmem:[#allocation5 + $0x118] sm:$0xff] }
 0x1d4   : > { %1779 = vmatprep.subr.mxu0 %v1683_v26  ;;  %v4039_v26 = vld [vmem:[#allocation5 + $0x110] sm:$0xff] }
 0x1d5   : > { %1780 = vmatpush2.msra.mxu0 %v1682_v13  ;;  %v4040_v13 = vld [vmem:[#allocation5 + $0x108] sm:$0xff] }
 0x1d6   : > { %1782 = vmatmul.mubr.f32.vlgmr.msra.gmra.mxu0 %v5509_v7  ;;  %2035 = vmatprep.subr.mxu0 %v3978_v14  ;;  %v3988_v7 = vld [vmem:[#allocation5 + $0xa8] sm:$0xff]  ;;  %v4041_v14 = vld [vmem:[#allocation5 + $0x100] sm:$0xff] }
 0x1d7   : > { %2036 = vmatpush1.msra.mxu0 %v3979_v15  ;;  %v4042_v15 = vld [vmem:[#allocation5 + $0x6f8] sm:$0xff] }
 0x1d8   : > { %2037 = vmatprep.subr.mxu0 %v3980_v51  ;;  %v619_v51 = vpop.f32.mrf.mxu0 }
 0x1d9   : > { %2038 = vmatpush1.msra.mxu0 %v3981_v16  ;;  %v693_v16 = vpop.f32.mrf.mxu1 }
 0x1da   : > { %2039 = vmatprep.subr.mxu0 %v3982_v55  ;;  %v621_v55 = vpop.f32.mrf.mxu0 }
 0x1db   : > { %2040 = vmatpush1.msra.mxu0 %v3983_v19  ;;  %v695_v19 = vpop.f32.mrf.mxu1 }
 0x1dc   : > { %2041 = vmatprep.subr.mxu0 %v3984_v21  ;;  %v847_v21 = vpop.f32.mrf.mxu0 }
 0x1dd   : > { %2042 = vmatpush1.msra.mxu0 %v3985_v22  ;;  %v1003_v22 = vpop.f32.mrf.mxu1 }
 0x1de   : > { %2043 = vmatprep.subr.mxu0 %v3986_v23  ;;  %v849_v23 = vpop.f32.mrf.mxu0 }
 0x1df   : > { %2044 = vmatpush1.msra.mxu0 %v3987_v24  ;;  %v1005_v24 = vpop.f32.mrf.mxu1 }
 0x1e0   : > { %2045 = vmatprep.subr.mxu0 %v3988_v7 }
 0x1e1   : > { %2046 = vmatpush1.msra.mxu0 %v3989_v25  ;;  %v694_v25 = vadd.f32 %v693_v16, %v619_v51 }
 0x1e2   : > { %2047 = vmatprep.subr.mxu0 %v3990_v27 }
 0x1e3   : > { %2048 = vmatpush1.msra.mxu0 %v3991_v28  ;;  %v696_v28 = vadd.f32 %v695_v19, %v621_v55 }
 0x1e4   : > { %2049 = vmatprep.subr.mxu0 %v3992_v29  ;;  %v852_v29 = vadd.f32 %v847_v21, %v694_v25  ;;  %v1840_v25 = vld [vmem:[%s5864_s7] sm:$0xf] }
 0x1e5   : > { %2050 = vmatpush1.msra.mxu0 %v3993_v2 }
 0x1e6   : > { %2051 = vmatprep.subr.mxu0 %v3994_v30  ;;  %v853_v30 = vadd.f32 %v849_v23, %v696_v28 }
 0x1e7   : > { %2052 = vmatpush1.msra.mxu0 %v3995_v31  ;;  %v1008_v31 = vadd.f32 %v1003_v22, %v852_v29  ;;  %v5535_v22 = vsub.s32 0, %v5457_v17  ;;  %v5249_v17 = vmov 0.0  }
 0x1e8   : > { %2053 = vmatprep.subr.mxu0 %v3996_v32  ;;  %1934 = vmatprep.mubr.f32.mxu1 %v5249_v17 }
 0x1e9   : > { %2054 = vmatpush1.msra.mxu0 %v3997_v33 }
 0x1ea   : > { %2055 = vmatprep.subr.mxu0 %v3998_v34  ;;  %v1009_v34 = vadd.f32 %v1005_v24, %v853_v30  ;;  %v1833_v24 = vld [vmem:[%s5863_s6] sm:$0xf] }
 0x1eb   : > { %2056 = vmatpush1.msra.mxu0 %v3999_v35 }
 0x1ec   : > { %2057 = vmatprep.subr.mxu0 %v4000_v36 }
 0x1ed   : > { %2058 = vmatpush1.msra.mxu0 %v4001_v37 }
 0x1ee   : > { %2059 = vmatprep.subr.mxu0 %v4002_v38 }
 0x1ef   : > { %2060 = vmatpush1.msra.mxu0 %v4003_v40 }
 0x1f0   : > { %2061 = vmatprep.subr.mxu0 %v4004_v41 }
 0x1f1   : > { %2062 = vmatpush1.msra.mxu0 %v4005_v42 }
 0x1f2   : > { %2063 = vmatprep.subr.mxu0 %v4006_v43 }
 0x1f3   : > { %2064 = vmatpush1.msra.mxu0 %v4007_v44 }
 0x1f4   : > { %2065 = vmatprep.subr.mxu0 %v4008_v45 }
 0x1f5   : > { %2066 = vmatpush1.msra.mxu0 %v4009_v46 }
 0x1f6   : > { %2067 = vmatprep.subr.mxu0 %v4010_v47 }
 0x1f7   : > { %2068 = vmatpush2.msra.mxu0 %v4011_v48 }
 0x1f8   : > { %2069 = vmatprep.subr.mxu0 %v4012_v49  ;;  %v1794_v49 = vpop.permute.xlu1 %1793 }
 0x1f9   : > { %2070 = vmatpush2.msra.mxu0 %v4013_v50 }
 0x1fa   : > { %2071 = vmatprep.subr.mxu0 %v4014_v52 }
 0x1fb   : > { %2072 = vmatpush2.msra.mxu0 %v4015_v53 }
 0x1fc   : > { %2073 = vmatprep.subr.mxu0 %v4016_v54 }
 0x1fd   : > { %2074 = vmatpush2.msra.mxu0 %v4017_v56 }
 0x1fe   : > { %2075 = vmatprep.subr.mxu0 %v4018_v20 }
 0x1ff   : > { %2076 = vmatpush2.msra.mxu0 %v4019_v57 }
 0x200   : > { %2077 = vmatprep.subr.mxu0 %v4020_v58 }
 0x201   : > { %2078 = vmatpush2.msra.mxu0 %v4021_v59 }
 0x202   : > { %2079 = vmatprep.subr.mxu0 %v4022_v60 }
 0x203   : > { %2080 = vmatpush2.msra.mxu0 %v4023_v61 }
 0x204   : > { %2081 = vmatprep.subr.mxu0 %v4024_v62 }
 0x205   : > { %2082 = vmatpush2.msra.mxu0 %v4025_v63 }
 0x206   : > { %2083 = vmatprep.subr.mxu0 %v4026_v0 }
 0x207   : > { %2084 = vmatpush2.msra.mxu0 %v4027_v1 }
 0x208   : > { %2085 = vmatprep.subr.mxu0 %v4028_v3 }
 0x209   : > { %2086 = vmatpush2.msra.mxu0 %v4029_v4 }
 0x20a   : > { %2087 = vmatprep.subr.mxu0 %v4030_v5  ;;  %v3849_v5 = vld [vmem:[%s5859_s2 + $0x3c] sm:$0xf] }
 0x20b   : > { %2088 = vmatpush2.msra.mxu0 %v4031_v39  ;;  %v1816_v39 = vld [vmem:[%s5861_s4] sm:$0xf] }
 0x20c   : > { %2089 = vmatprep.subr.mxu0 %v4032_v6 }
 0x20d   : > { %2090 = vmatpush2.msra.mxu0 %v4033_v18 }
 0x20e   : > { %2091 = vmatprep.subr.mxu0 %v4034_v8 }
 0x20f   : > { %2092 = vmatpush2.msra.mxu0 %v4035_v9 }
 0x210   : > { %2093 = vmatprep.subr.mxu0 %v4036_v10 }
 0x211   : > { %2094 = vmatpush2.msra.mxu0 %v4037_v11 }
 0x212   : > { %2095 = vmatprep.subr.mxu0 %v4038_v12  ;;  %v1159_v7 = vpop.f32.mrf.mxu0 }
 0x213   : > { %2096 = vmatpush2.msra.mxu0 %v4039_v26  ;;  %v1164_v35 = vadd.f32 %v1159_v7, %v1008_v31 }
 0x214   : > { %2097 = vmatprep.subr.mxu0 %v4040_v13  ;;  %v1161_v2 = vpop.f32.mrf.mxu0 }
 0x215   : > { %2098 = vmatpush2.msra.mxu0 %v4041_v14  ;;  %v1165_v37 = vadd.f32 %v1161_v2, %v1009_v34  ;;  %v1826_v14 = vld [vmem:[%s5862_s5] sm:$0x1]  ;;  %v3843_v34 = vld [vmem:[%s5859_s2 + $0x24] sm:$0xf] }
 0x216   : > { %2197 = vmatprep.subr.mxu0 %v4042_v15 }
 0x217   : > { %v1315_v27 = vpop.f32.mrf.mxu1 }
 0x218   : > { %v1320_v38 = vadd.f32 %v1315_v27, %v1164_v35  ;;  %v3845_v35 = vld [vmem:[%s5859_s2 + $0x2c] sm:$0xf] }
 0x219   : > { %v1317_v32 = vpop.f32.mrf.mxu1 }
 0x21a   : > { %v1321_v41 = vadd.f32 %v1317_v32, %v1165_v37  ;;  %v1854_v32 = vld [vmem:[%s5866_s9] sm:$0xf]  ;;  %v3847_v37 = vld [vmem:[%s5859_s2 + $0x34] sm:$0xf] }
 0x254   : > { %v1471_v33 = vpop.f32.mrf.mxu0 }
 0x255   : > { %v1476_v42 = vadd.f32 %v1471_v33, %v1320_v38  ;;  %v3844_v33 = vld [vmem:[%s5859_s2 + $0x28] sm:$0xf]  ;;  %v3848_v38 = vld [vmem:[%s5859_s2 + $0x38] sm:$0xf] }
 0x256   : > { %v1473_v40 = vpop.f32.mrf.mxu0 }
 0x257   : > { %v1477_v44 = vadd.f32 %v1473_v40, %v1321_v41  ;;  %v3850_v40 = vld [vmem:[%s5859_s2 + $0x40] sm:$0xf]  ;;  %v3851_v41 = vld [vmem:[%s5859_s2 + $0x44] sm:$0xf] }
 0x259   : > { %v1627_v36 = vpop.f32.mrf.mxu1 }
 0x25a   : > { %v1632_v45 = vadd.f32 %v1627_v36, %v1476_v42  ;;  %v3846_v36 = vld [vmem:[%s5859_s2 + $0x30] sm:$0xf]  ;;  %v3852_v42 = vld [vmem:[%s5860_s3 + $0x4] sm:$0xf] }
 0x25b   : > { %v1629_v43 = vpop.f32.mrf.mxu1 }
 0x25c   : > { %v1633_v47 = vadd.f32 %v1629_v43, %v1477_v44 }
 0x296   : > { %v1783_v46 = vpop.f32.mrf.mxu0 }
 0x297   : > { %v1788_v48 = vadd.f32 %v1783_v46, %v1632_v45  ;;  %v1853_v46 = vld [vmem:[%s5865_s8] sm:$0xf] }
 0x298   : > { %v1785_v50 = vpop.f32.mrf.mxu0 }
 0x299   : > { %v1796_v52 = vadd.f32 %v1794_v49, %v1788_v48  ;;  %v1789_v53 = vadd.f32 %v1785_v50, %v1633_v47  ;;  %v5583_v47 = vld [vmem:[#allocation5 + $0x2f8] sm:$0xff]  ;;  %v5586_v48 = vld [vmem:[#allocation5 + $0x2f0] sm:$0xff]  ;;  %v5592_v50 = vld [vmem:[#allocation5 + $0x2e0] sm:$0xff] }
 0x29b   : > { %v1798_v54 = vmul.f32 0.5, %v1796_v52  ;;  %v1797_v56 = vadd.f32 %v1794_v49, %v1789_v53  ;;  %v5589_v49 = vld [vmem:[#allocation5 + $0x2e8] sm:$0xff]  ;;  %v5598_v53 = vld [vmem:[#allocation5 + $0x2d0] sm:$0xff] }
 0x29d   : > { %3953 = vtanh.f32 %v1798_v54  ;;  %v1799_v20 = vmul.f32 0.5, %v1797_v56  ;;  %v5601_v54 = vld [vmem:[#allocation5 + $0x2c8] sm:$0xff] }
 0x29f   : > { %3955 = vtanh.f32 %v1799_v20  ;;  %v5607_v20 = vld [vmem:[#allocation5 + $0x2b8] sm:$0xff] }
 0x2aa   : > { %v3954_v57 = vpop.eup %3953 }
 0x2ab   : > { %v1802_v58 = vadd.f32 1.0, %v3954_v57  ;;  %v5610_v57 = vld [vmem:[#allocation5 + $0x2b0] sm:$0xff] }
 0x2ac   : > { %v3956_v59 = vpop.eup %3955 }
 0x2ad   : > { %v1803_v60 = vadd.f32 1.0, %v3956_v59  ;;  %v1804_v61 = vmul.f32 0.5, %v1802_v58  ;;  %v5613_v58 = vld [vmem:[#allocation5 + $0x2a8] sm:$0xff]  ;;  %v5616_v59 = vld [vmem:[#allocation5 + $0x2a0] sm:$0xff] }
 0x2af   : > { %v1805_v62 = vmul.f32 0.5, %v1803_v60  ;;  %v5516_v63 = vmul.f32 %v1804_v61, %v1796_v52  ;;  %v5595_v52 = vld [vmem:[#allocation5 + $0x2d8] sm:$0xff]  ;;  %v4056_v61 = vld [vmem:[#allocation5 + $0x290] sm:$0xff] }
 0x2b0   : > { %v4055_v60 = vld [vmem:[#allocation5 + $0x298] sm:$0xff] }
 0x2b1   : > { %v5518_v0 = vmul.f32 %v1805_v62, %v1797_v56  ;;  %v1809_v1 = vsel %vm1808_vm0, %v5516_v63, 0.0  ;;  %v5604_v56 = vld [vmem:[#allocation5 + $0x2c0] sm:$0xff]  ;;  %v4057_v62 = vld [vmem:[#allocation5 + $0x288] sm:$0xff] }
 0x2b3   : > { %v1810_v3 = vsel %vm1808_vm0, %v5518_v0, 0.0 }
 0x2b4   : > { %v1811_v4 = vadd.f32 %v1810_v3, %v1809_v1  ;;  %v4060_v1 = vld [vmem:[#allocation5 + $0x270] sm:$0xff]  ;;  %v4061_v3 = vld [vmem:[#allocation5 + $0x268] sm:$0xff] }
 0x2b6   : > { %1812 = vadd.xlane.f32.xlu0 %v1811_v4  ;;  %v4062_v4 = vld [vmem:[#allocation5 + $0x260] sm:$0xff] }
 0x2cc   : > { %2438 = vperm.xlu0 %3950, %v3849_v5   ;;  %v4063_v5 = vld [vmem:[#allocation5 + $0x258] sm:$0xff] }
 0x33f   : > { %v1813_v6 = vpop.xlane.xlu0 %1812 }
 0x340   : > { %v1815_v18 = vmul.f32 0.00390625, %v1813_v6  ;;  %v4065_v6 = vld [vmem:[#allocation5 + $0x248] sm:$0xff] }
 0x342   : > { %v1817_v8 = vmul.f32 %v1816_v39, %v1815_v18  ;;  %v4064_v39 = vld [vmem:[#allocation5 + $0x250] sm:$0xff]  ;;  %v4066_v18 = vld [vmem:[#allocation5 + $0x240] sm:$0xff] }
 0x344   : > { %v1819_v9 = vsel %vm1818_vm1, %v1817_v8, 0.0  ;;  %v4067_v8 = vld [vmem:[#allocation5 + $0x238] sm:$0xff] }
 0x345   : > { %v1820_v10 = vrot.slane %v1819_v9, 4 }
 0x347   : > { %v1821_v11 = vadd.f32 %v1820_v10, %v1819_v9  ;;  %v4068_v9 = vld [vmem:[#allocation5 + $0x230] sm:$0xff]  ;;  %v4069_v10 = vld [vmem:[#allocation5 + $0x228] sm:$0xff] }
 0x349   : > { %v1822_v12 = vrot.slane %v1821_v11, 2 }
 0x34b   : > { %v1823_v26 = vadd.f32 %v1822_v12, %v1821_v11  ;;  %v4070_v11 = vld [vmem:[#allocation5 + $0x220] sm:$0xff]  ;;  %v4071_v12 = vld [vmem:[#allocation5 + $0x218] sm:$0xff] }
 0x34d   : > { %v1824_v13 = vrot.slane %v1823_v26, 1 }
 0x34f   : > { %v1825_v15 = vadd.f32 %v1824_v13, %v1823_v26  ;;  %v4072_v26 = vld [vmem:[#allocation5 + $0x210] sm:$0xff]  ;;  %v4073_v13 = vld [vmem:[#allocation5 + $0x208] sm:$0xff] }
 0x351   : > { %v1827_v51 = vadd.f32 %v1826_v14, %v1825_v15  ;;  %v4074_v14 = vld [vmem:[#allocation5 + $0x200] sm:$0xff]  ;;  %v4075_v15 = vld [vmem:[#allocation5 + $0x3f8] sm:$0xff] }
 0x353   : > { %v1828_v16 = vmul.f32 0.5, %v1827_v51 }
 0x355   : > { %3957 = vtanh.f32 %v1828_v16  ;;  %v4077_v16 = vld [vmem:[#allocation5 + $0x3e8] sm:$0xff] }
 0x362   : > { %v3958_v55 = vpop.eup %3957 }
 0x363   : > { %v1830_v19 = vadd.f32 1.0, %v3958_v55  ;;  %v4078_v55 = vld [vmem:[#allocation5 + $0x3e0] sm:$0xff] }
 0x365   : > { %v1831_v21 = vmul.f32 0.5, %v1830_v19  ;;  %v4079_v19 = vld [vmem:[#allocation5 + $0x3d8] sm:$0xff] }
 0x367   : > { %v1832_v23 = vmul.f32 %v1831_v21, %v1827_v51  ;;  %v4076_v51 = vld [vmem:[#allocation5 + $0x3f0] sm:$0xff] }
 0x368   : > { %v4080_v21 = vld [vmem:[#allocation5 + $0x3d0] sm:$0xff] }
 0x369   : > { %v1837_v7 = vrot.slane %v1832_v23, %v5535_v22  ;;  %v4081_v23 = vld [vmem:[#allocation5 + $0x3c8] sm:$0xff] }
 0x36b   : > { %v1838_v27 = vmul.f32 %v1837_v7, %v1833_v24  ;;  %v4082_v24 = vld [vmem:[#allocation5 + $0x3c0] sm:$0xff]  ;;  %v4083_v7 = vld [vmem:[#allocation5 + $0x3b8] sm:$0xff] }
 0x36d   : > { %v1841_v28 = vadd.f32 %v1840_v25, %v1838_v27  ;;  %v4084_v25 = vld [vmem:[#allocation5 + $0x3b0] sm:$0xff]  ;;  %v4085_v27 = vld [vmem:[#allocation5 + $0x3a8] sm:$0xff] }
 0x36f   : > { %v1842_v29 = vmul.f32 0.5, %v1841_v28  ;;  %v4086_v28 = vld [vmem:[#allocation5 + $0x3a0] sm:$0xff] }
 0x371   : > { %3959 = vtanh.f32 %v1842_v29  ;;  %v4087_v29 = vld [vmem:[#allocation5 + $0x398] sm:$0xff] }
 0x37e   : > { %v3960_v2 = vpop.eup %3959 }
 0x37f   : > { %v1844_v30 = vadd.f32 1.0, %v3960_v2  ;;  %v4088_v2 = vld [vmem:[#allocation5 + $0x390] sm:$0xff] }
 0x381   : > { %v1845_v31 = vmul.f32 0.5, %v1844_v30  ;;  %v4089_v30 = vld [vmem:[#allocation5 + $0x388] sm:$0xff] }
 0x383   : > { %1848 = vperm.xlu1 %3951, %v1845_v31   ;;  %v4090_v31 = vld [vmem:[#allocation5 + $0x380] sm:$0xff] }
 0x387   : > { %1857 = vperm.xlu1 %3951, %v1854_v32   ;;  %v4091_v32 = vld [vmem:[#allocation5 + $0x378] sm:$0xff] }
 0x38b   : > { %1959 = vperm.xlu1 %3951, %v3844_v33   ;;  %v4092_v33 = vld [vmem:[#allocation5 + $0x370] sm:$0xff] }
 0x38f   : > { %1950 = vperm.xlu1 %3951, %v3843_v34   ;;  %v4093_v34 = vld [vmem:[#allocation5 + $0x368] sm:$0xff] }
 0x393   : > { %2110 = vperm.xlu1 %3951, %v3845_v35   ;;  %v4094_v35 = vld [vmem:[#allocation5 + $0x360] sm:$0xff] }
 0x397   : > { %2192 = vperm.xlu1 %3951, %v3846_v36   ;;  %v4095_v36 = vld [vmem:[#allocation5 + $0x358] sm:$0xff] }
 0x39b   : > { %2274 = vperm.xlu1 %3951, %v3847_v37   ;;  %v4096_v37 = vld [vmem:[#allocation5 + $0x350] sm:$0xff] }
 0x39f   : > { %2356 = vperm.xlu1 %3951, %v3848_v38   ;;  %v4097_v38 = vld [vmem:[#allocation5 + $0x348] sm:$0xff] }
 0x3a3   : > { %2520 = vperm.xlu1 %3951, %v3850_v40   ;;  %v4098_v40 = vld [vmem:[#allocation5 + $0x340] sm:$0xff] }
 0x3a7   : > { %2602 = vperm.xlu1 %3951, %v3851_v41   ;;  %v4099_v41 = vld [vmem:[#allocation5 + $0x338] sm:$0xff] }
 0x3ab   : > { %2684 = vperm.xlu1 %3951, %v3852_v42   ;;  %v4100_v42 = vld [vmem:[#allocation5 + $0x330] sm:$0xff] }
 0x3fe   : > { %v1849_v43 = vpop.permute.xlu1 %1848 }
 0x3ff   : > { %v1851_v44 = vmul.f32 %v1849_v43, %v5516_v63  ;;  %v1852_v45 = vmul.f32 %v1849_v43, %v5518_v0  ;;  %v4058_v63 = vld [vmem:[#allocation5 + $0x280] sm:$0xff]  ;;  %v4059_v0 = vld [vmem:[#allocation5 + $0x278] sm:$0xff]  ;;  %v4101_v43 = vld [vmem:[#allocation5 + $0x328] sm:$0xff] }
 0x401   : > { %3840 = vmatprep.subr.msk.mxu1 %vm1808_vm0, %v1852_v45  ;;  %v4103_v45 = vld [vmem:[#allocation5 + $0x318] sm:$0xff] }
 0x402   : > { %3841 = vmatpush1.msk.msra.mxu1 %vm1808_vm0, %v1851_v44  ;;  %v4102_v44 = vld [vmem:[#allocation5 + $0x320] sm:$0xff] }
 0x403   : > { %3842 = vmatmul.mubr.msk.f32.vlgmr.msra.gmra.mxu1 %vm1860_vm2, %v1853_v46  ;;  %1964 = vmatprep.subr.mxu1 %v5583_v47  ;;  %v4104_v46 = vld [vmem:[#allocation5 + $0x310] sm:$0xff] }
 0x404   : > { %1965 = vmatpush1.msra.mxu1 %v5586_v48 }
 0x405   : > { %1966 = vmatprep.subr.mxu1 %v5589_v49 }
 0x406   : > { %1967 = vmatpush1.msra.mxu1 %v5592_v50 }
 0x407   : > { %1968 = vmatprep.subr.mxu1 %v5595_v52 }
 0x408   : > { %1969 = vmatpush1.msra.mxu1 %v5598_v53 }
 0x409   : > { %1970 = vmatprep.subr.mxu1 %v5601_v54 }
 0x40a   : > { %1971 = vmatpush1.msra.mxu1 %v5604_v56 }
 0x40b   : > { %1972 = vmatprep.subr.mxu1 %v5607_v20 }
 0x40c   : > { %1973 = vmatpush1.msra.mxu1 %v5610_v57 }
 0x40d   : > { %1974 = vmatprep.subr.mxu1 %v5613_v58 }
 0x40e   : > { %1975 = vmatpush1.msra.mxu1 %v5616_v59 }
 0x40f   : > { %1976 = vmatprep.subr.mxu1 %v4055_v60  ;;  %v4105_v60 = vld [vmem:[#allocation5 + $0x308] sm:$0xff] }
 0x410   : > { %1977 = vmatpush1.msra.mxu1 %v4056_v61  ;;  %v4106_v61 = vld [vmem:[#allocation5 + $0x300] sm:$0xff] }
 0x411   : > { %1978 = vmatprep.subr.mxu1 %v4057_v62  ;;  %v4107_v62 = vld [vmem:[#allocation5 + $0x4f8] sm:$0xff] }
 0x412   : > { %1979 = vmatpush1.msra.mxu1 %v4058_v63  ;;  %v1858_v63 = vpop.permute.xlu1 %1857 }
 0x413   : > { %1980 = vmatprep.subr.mxu1 %v4059_v0 }
 0x414   : > { %1981 = vmatpush1.msra.mxu1 %v4060_v1 }
 0x415   : > { %1982 = vmatprep.subr.mxu1 %v4061_v3 }
 0x416   : > { %1983 = vmatpush1.msra.mxu1 %v4062_v4  ;;  %v1960_v0 = vpop.permute.xlu1 %1959 }
 0x417   : > { %1984 = vmatprep.subr.mxu1 %v4063_v5  ;;  %v4108_v5 = vld [vmem:[%s5417_s1] sm:$0xff]  ;;  %s3887_s1 = sshll.u32 %s5327_s17, 8  ;;  %s5177_s17 = sshll.u32 %s5250_s26, 4  ;;  %s5178_s17 = int_to_ptr.vmem [resolvable:$false] %s5177_s17 }
 0x418   : > { %1985 = vmatpush1.msra.mxu1 %v4064_v39  ;;  %v1942_v39 = vcombine.high %v4108_v5, %v4108_v5  ;;  %s3739_s21 = scalar_lea.hbm %s5867_s10, %s3887_s1  ;;  %s5179_s19 = scalar_lea.vmem %s5178_s17, 512 }
 0x419   : > { %1986 = vmatprep.subr.mxu1 %v4065_v6  ;;  %p5180_p10 = scmp.lt.s32.totalorder %s3742_s28, %s5178_s17  ;;  %p5181_p2 = scmp.lt.s32.totalorder %s5179_s19, %s5173_s11 }
 0x41a   : > { %1987 = vmatpush1.msra.mxu1 %v4066_v18  ;;  %v1951_v1 = vpop.permute.xlu1 %1950 }
 0x41b   : > { %1988 = vmatprep.subr.mxu1 %v4067_v8  ;;  %p5182_p13 = por %p5181_p2, %p5180_p10 }
 0x41c   : > { %1989 = vmatpush1.msra.mxu1 %v4068_v9 }
 0x41d   : > { %1990 = vmatprep.subr.mxu1 %v4069_v10  ;;  %p5183_p0 = pnand %p5182_p13, %p5176_p7 }
 0x41e   : > { %1991 = vmatpush1.msra.mxu1 %v4070_v11  ;;  %v5620_v8 = vpop.permute.xlu1 %2110 }
 0x41f   : > { %1992 = vmatprep.subr.mxu1 %v4071_v12 }
 0x420   : > { %1993 = vmatpush1.msra.mxu1 %v4072_v26 }
 0x421   : > { %1994 = vmatprep.subr.mxu1 %v4073_v13 }
 0x422   : > { %1995 = vmatpush1.msra.mxu1 %v4074_v14  ;;  %v5630_v14 = vpop.permute.xlu1 %2192 }
 0x423   : > { %1996 = vmatprep.subr.mxu1 %v4075_v15 }
 0x424   : > { %1997 = vmatpush2.msra.mxu1 %v4076_v51  ;;  %v4109_v51 = vld [vmem:[#allocation5 + $0x4f0] sm:$0xff] }
 0x425   : > { %1998 = vmatprep.subr.mxu1 %v4077_v16  ;;  %v4110_v16 = vld [vmem:[#allocation5 + $0x6f0] sm:$0xff] }
 0x426   : > { %1999 = vmatpush2.msra.mxu1 %v4078_v55 }
 0x427   : > { %2000 = vmatprep.subr.mxu1 %v4079_v19  ;;  %v4111_v19 = vld [vmem:[#allocation5 + $0x4e8] sm:$0xff] }
 0x428   : > { %2001 = vmatpush2.msra.mxu1 %v4080_v21  ;;  %v4112_v21 = vld [vmem:[#allocation5 + $0x6e8] sm:$0xff] }
 0x429   : > { %2002 = vmatprep.subr.mxu1 %v4081_v23  ;;  %v4113_v23 = vld [vmem:[#allocation5 + $0x4e0] sm:$0xff] }
 0x42a   : > { %2003 = vmatpush2.msra.mxu1 %v4082_v24  ;;  %v4114_v24 = vld [vmem:[#allocation5 + $0x6e0] sm:$0xff] }
 0x42b   : > { %2004 = vmatprep.subr.mxu1 %v4083_v7  ;;  %v4115_v7 = vld [vmem:[#allocation5 + $0x4d8] sm:$0xff] }
 0x42c   : > { %2005 = vmatpush2.msra.mxu1 %v4084_v25  ;;  %v4116_v25 = vld [vmem:[#allocation5 + $0x6d8] sm:$0xff] }
 0x42d   : > { %2006 = vmatprep.subr.mxu1 %v4085_v27  ;;  %v4117_v27 = vld [vmem:[#allocation5 + $0x4d0] sm:$0xff] }
 0x42e   : > { %2007 = vmatpush2.msra.mxu1 %v4086_v28  ;;  %v4118_v28 = vld [vmem:[#allocation5 + $0x6d0] sm:$0xff] }
 0x42f   : > { %2008 = vmatprep.subr.mxu1 %v4087_v29  ;;  %v4119_v29 = vld [vmem:[#allocation5 + $0x4c8] sm:$0xff] }
 0x430   : > { %2009 = vmatpush2.msra.mxu1 %v4088_v2  ;;  %v4120_v2 = vld [vmem:[#allocation5 + $0x6c8] sm:$0xff] }
 0x431   : > { %2010 = vmatprep.subr.mxu1 %v4089_v30  ;;  %v4121_v30 = vld [vmem:[#allocation5 + $0x4c0] sm:$0xff] }
 0x432   : > { %2011 = vmatpush2.msra.mxu1 %v4090_v31  ;;  %v4122_v31 = vld [vmem:[#allocation5 + $0x6c0] sm:$0xff] }
 0x433   : > { %2012 = vmatprep.subr.mxu1 %v4091_v32  ;;  %v4123_v32 = vld [vmem:[#allocation5 + $0x4b8] sm:$0xff] }
 0x434   : > { %2013 = vmatpush2.msra.mxu1 %v4092_v33  ;;  %v4124_v33 = vld [vmem:[#allocation5 + $0x6b8] sm:$0xff] }
 0x435   : > { %2014 = vmatprep.subr.mxu1 %v4093_v34  ;;  %v4125_v34 = vld [vmem:[#allocation5 + $0x4b0] sm:$0xff] }
 0x436   : > { %2015 = vmatpush2.msra.mxu1 %v4094_v35  ;;  %v4126_v35 = vld [vmem:[#allocation5 + $0x6b0] sm:$0xff] }
 0x437   : > { %2016 = vmatprep.subr.mxu1 %v4095_v36  ;;  %v4127_v36 = vld [vmem:[#allocation5 + $0x4a8] sm:$0xff] }
 0x438   : > { %2017 = vmatpush2.msra.mxu1 %v4096_v37  ;;  %v4128_v37 = vld [vmem:[#allocation5 + $0x6a8] sm:$0xff] }
 0x439   : > { %2018 = vmatprep.subr.mxu1 %v4097_v38  ;;  %v4129_v38 = vld [vmem:[#allocation5 + $0x4a0] sm:$0xff] }
 0x43a   : > { %2019 = vmatpush2.msra.mxu1 %v4098_v40  ;;  %v4130_v40 = vld [vmem:[#allocation5 + $0x6a0] sm:$0xff] }
 0x43b   : > { %2020 = vmatprep.subr.mxu1 %v4099_v41  ;;  %v4131_v41 = vld [vmem:[#allocation5 + $0x498] sm:$0xff] }
 0x43c   : > { %2021 = vmatpush2.msra.mxu1 %v4100_v42  ;;  %v4132_v42 = vld [vmem:[#allocation5 + $0x698] sm:$0xff] }
 0x43d   : > { %2022 = vmatprep.subr.mxu1 %v4101_v43  ;;  %v4133_v43 = vld [vmem:[#allocation5 + $0x490] sm:$0xff] }
 0x43e   : > { %2023 = vmatpush2.msra.mxu1 %v4102_v44  ;;  %v4134_v44 = vld [vmem:[#allocation5 + $0x690] sm:$0xff] }
 0x43f   : > { %2024 = vmatprep.subr.mxu1 %v4103_v45  ;;  %v4135_v45 = vld [vmem:[#allocation5 + $0x488] sm:$0xff] }
 0x440   : > { %2025 = vmatpush2.msra.mxu1 %v4104_v46  ;;  %v4136_v46 = vld [vmem:[#allocation5 + $0x688] sm:$0xff] }
 0x441   : > { %2026 = vmatprep.subr.mxu1 %v4105_v60  ;;  %v4137_v60 = vld [vmem:[#allocation5 + $0x480] sm:$0xff] }
 0x442   : > { %2027 = vmatpush2.msra.mxu1 %v4106_v61  ;;  %v4138_v61 = vld [vmem:[#allocation5 + $0x680] sm:$0xff] }
 0x443   : > { %2115 = vmatprep.subr.mxu1 %v4107_v62  ;;  %v4139_v62 = vld [vmem:[#allocation5 + $0x478] sm:$0xff] }
 0x4c3   : > { %v1936_v3 = vpop.f32.mrf.mxu1 }
 0x4c4   : > { %v1937_v4 = vadd.f32 %v1936_v3, %v1858_v63  ;;  %v4143_v3 = vld [vmem:[#allocation5 + $0x468] sm:$0xff] }
 0x4c5   : > { %v1938_v6 = vpop.f32.mrf.mxu1 }
 0x4c6   : > { %v1939_v18 = vadd.f32 %v1938_v6, %v1858_v63  ;;  %v5622_v9 = vadd.f32 %v4108_v5, %v1937_v4  ;;  %v4140_v63 = vld [vmem:[#allocation5 + $0x678] sm:$0xff]  ;;  %v4144_v4 = vld [vmem:[#allocation5 + $0x668] sm:$0xff]  ;;  %v4145_v5 = vld [vmem:[#allocation5 + $0x460] sm:$0xff] }
 0x4c7   : > { %v4147_v6 = vld [vmem:[#allocation5 + $0x458] sm:$0xff] }
 0x4c8   : > { %v5624_v10 = vadd.f32 %v1942_v39, %v1939_v18  ;;  %v1962_v26 = vmul.f32 %v1960_v0, %v5622_v9  ;;  %v1953_v13 = vmul.f32 %v1951_v1, %v5622_v9  ;;  %v4146_v39 = vld [vmem:[#allocation5 + $0x660] sm:$0xff]  ;;  %v4148_v18 = vld [vmem:[#allocation5 + $0x658] sm:$0xff] }
 0x4ca   : > { %v1963_v11 = vmul.f32 %v1960_v0, %v5624_v10  ;;  %v1954_v12 = vmul.f32 %v1951_v1, %v5624_v10  ;;  %v2114_v15 = vmul.f32 %v5620_v8, %v5624_v10  ;;  %v2196_v55 = vmul.f32 %v5630_v14, %v5624_v10  ;;  %v4141_v0 = vld [vmem:[#allocation5 + $0x470] sm:$0xff] }
 0x4cb   : > { %v4142_v1 = vld [vmem:[#allocation5 + $0x670] sm:$0xff] }
 0x4cc   : > { %2028 = vmatprep.mubr.f32.mxu1 %v1963_v11  ;;  %2099 = vmatprep.mubr.f32.mxu0 %v1954_v12  ;;  %v4149_v11 = vld [vmem:[#allocation5 + $0x450] sm:$0xff] }
 0x4cd   : > { %2029 = vmatmul.mubr.f32.vlgmr.msra.gmra.mxu1 %v1962_v26  ;;  %2100 = vmatmul.mubr.f32.vlgmr.msra.gmra.mxu0 %v1953_v13  ;;  %v4150_v12 = vld [vmem:[#allocation5 + $0x650] sm:$0xff]  ;;  %v4151_v26 = vld [vmem:[#allocation5 + $0x448] sm:$0xff] }
 0x4ce   : > { %2116 = vmatpush1.msra.mxu1 %v4109_v51  ;;  %2198 = vmatpush1.msra.mxu0 %v4110_v16  ;;  %v4152_v13 = vld [vmem:[#allocation5 + $0x648] sm:$0xff]  ;;  %v4154_v51 = vld [vmem:[#allocation5 + $0x640] sm:$0xff]  ;;  %v4155_v16 = vld [vmem:[#allocation5 + $0x438] sm:$0xff] }
 0x4cf   : > { %2117 = vmatprep.subr.mxu1 %v4111_v19  ;;  %2179 = vmatprep.mubr.f32.mxu1 %v2114_v15  ;;  %v4153_v15 = vld [vmem:[#allocation5 + $0x440] sm:$0xff]  ;;  %v4157_v19 = vld [vmem:[#allocation5 + $0x430] sm:$0xff] }
 0x4d0   : > { %2199 = vmatprep.subr.mxu0 %v4112_v21  ;;  %2261 = vmatprep.mubr.f32.mxu0 %v2196_v55  ;;  %v4156_v55 = vld [vmem:[#allocation5 + $0x638] sm:$0xff]  ;;  %v4158_v21 = vld [vmem:[#allocation5 + $0x630] sm:$0xff] }
 0x4d1   : > { %2118 = vmatpush1.msra.mxu1 %v4113_v23  ;;  %2200 = vmatpush1.msra.mxu0 %v4114_v24  ;;  %v4159_v23 = vld [vmem:[#allocation5 + $0x428] sm:$0xff] }
 0x4d2   : > { %2119 = vmatprep.subr.mxu1 %v4115_v7  ;;  %2201 = vmatprep.subr.mxu0 %v4116_v25  ;;  %v4160_v24 = vld [vmem:[#allocation5 + $0x628] sm:$0xff]  ;;  %v4161_v7 = vld [vmem:[#allocation5 + $0x420] sm:$0xff] }
 0x4d3   : > { %2120 = vmatpush1.msra.mxu1 %v4117_v27  ;;  %2202 = vmatpush1.msra.mxu0 %v4118_v28  ;;  %v4162_v25 = vld [vmem:[#allocation5 + $0x620] sm:$0xff]  ;;  %v4163_v27 = vld [vmem:[#allocation5 + $0x418] sm:$0xff] }
 0x4d4   : > { %2121 = vmatprep.subr.mxu1 %v4119_v29  ;;  %2203 = vmatprep.subr.mxu0 %v4120_v2  ;;  %v4164_v28 = vld [vmem:[#allocation5 + $0x618] sm:$0xff]  ;;  %v4165_v29 = vld [vmem:[#allocation5 + $0x410] sm:$0xff] }
 0x4d5   : > { %2122 = vmatpush1.msra.mxu1 %v4121_v30  ;;  %2204 = vmatpush1.msra.mxu0 %v4122_v31  ;;  %v4166_v2 = vld [vmem:[#allocation5 + $0x610] sm:$0xff]  ;;  %v4167_v30 = vld [vmem:[#allocation5 + $0x408] sm:$0xff] }
 0x4d6   : > { %2123 = vmatprep.subr.mxu1 %v4123_v32  ;;  %2205 = vmatprep.subr.mxu0 %v4124_v33  ;;  %v4168_v31 = vld [vmem:[#allocation5 + $0x608] sm:$0xff]  ;;  %v4169_v32 = vld [vmem:[#allocation5 + $0x400] sm:$0xff] }
 0x4d7   : > { %2124 = vmatpush1.msra.mxu1 %v4125_v34  ;;  %2206 = vmatpush1.msra.mxu0 %v4126_v35  ;;  %v4170_v33 = vld [vmem:[#allocation5 + $0x600] sm:$0xff]  ;;  %v4171_v34 = vld [vmem:[#allocation5 + $0x5f8] sm:$0xff] }
 0x4d8   : > { %2125 = vmatprep.subr.mxu1 %v4127_v36  ;;  %2207 = vmatprep.subr.mxu0 %v4128_v37  ;;  %v4172_v35 = vld [vmem:[#allocation5 + $0x7f8] sm:$0xff]  ;;  %v4173_v36 = vld [vmem:[#allocation5 + $0x5f0] sm:$0xff] }
 0x4d9   : > { %2126 = vmatpush1.msra.mxu1 %v4129_v38  ;;  %2208 = vmatpush1.msra.mxu0 %v4130_v40  ;;  %v4174_v37 = vld [vmem:[#allocation5 + $0x7f0] sm:$0xff]  ;;  %v4175_v38 = vld [vmem:[#allocation5 + $0x5e8] sm:$0xff] }
 0x4da   : > { %2127 = vmatprep.subr.mxu1 %v4131_v41  ;;  %2209 = vmatprep.subr.mxu0 %v4132_v42  ;;  %v4176_v40 = vld [vmem:[#allocation5 + $0x7e8] sm:$0xff]  ;;  %v4177_v41 = vld [vmem:[#allocation5 + $0x5e0] sm:$0xff] }
 0x4db   : > { %2128 = vmatpush1.msra.mxu1 %v4133_v43  ;;  %2210 = vmatpush1.msra.mxu0 %v4134_v44  ;;  %v4178_v42 = vld [vmem:[#allocation5 + $0x7e0] sm:$0xff]  ;;  %v4179_v43 = vld [vmem:[#allocation5 + $0x5d8] sm:$0xff] }
 0x4dc   : > { %2129 = vmatprep.subr.mxu1 %v4135_v45  ;;  %2211 = vmatprep.subr.mxu0 %v4136_v46  ;;  %v4180_v44 = vld [vmem:[#allocation5 + $0x7d8] sm:$0xff]  ;;  %v4181_v45 = vld [vmem:[#allocation5 + $0x5d0] sm:$0xff] }
 0x4dd   : > { %2130 = vmatpush1.msra.mxu1 %v4137_v60  ;;  %2212 = vmatpush1.msra.mxu0 %v4138_v61  ;;  %v4182_v46 = vld [vmem:[#allocation5 + $0x7d0] sm:$0xff]  ;;  %v4183_v60 = vld [vmem:[#allocation5 + $0x5c8] sm:$0xff] }
 0x4de   : > { %2131 = vmatprep.subr.mxu1 %v4139_v62  ;;  %2213 = vmatprep.subr.mxu0 %v4140_v63  ;;  %v4184_v61 = vld [vmem:[#allocation5 + $0x7c8] sm:$0xff]  ;;  %v4185_v62 = vld [vmem:[#allocation5 + $0x5c0] sm:$0xff] }
 0x4df   : > { %2132 = vmatpush1.msra.mxu1 %v4141_v0  ;;  %2214 = vmatpush1.msra.mxu0 %v4142_v1  ;;  %v4186_v63 = vld [vmem:[#allocation5 + $0x7c0] sm:$0xff]  ;;  %v4187_v0 = vld [vmem:[#allocation5 + $0x5b8] sm:$0xff] }
 0x4e0   : > { %2133 = vmatprep.subr.mxu1 %v4143_v3  ;;  %2215 = vmatprep.subr.mxu0 %v4144_v4  ;;  %v4188_v1 = vld [vmem:[#allocation5 + $0x7b8] sm:$0xff]  ;;  %v4189_v3 = vld [vmem:[#allocation5 + $0x5b0] sm:$0xff] }
 0x4e1   : > { %2134 = vmatpush1.msra.mxu1 %v4145_v5  ;;  %2216 = vmatpush1.msra.mxu0 %v4146_v39  ;;  %v4190_v4 = vld [vmem:[#allocation5 + $0x7b0] sm:$0xff]  ;;  %v4191_v5 = vld [vmem:[#allocation5 + $0x5a8] sm:$0xff] }
 0x4e2   : > { %2135 = vmatprep.subr.mxu1 %v4147_v6  ;;  %2217 = vmatprep.subr.mxu0 %v4148_v18  ;;  %v4192_v39 = vld [vmem:[#allocation5 + $0x7a8] sm:$0xff]  ;;  %v4193_v6 = vld [vmem:[#allocation5 + $0x5a0] sm:$0xff] }
 0x4e3   : > { %2136 = vmatpush1.msra.mxu1 %v4149_v11  ;;  %2218 = vmatpush1.msra.mxu0 %v4150_v12  ;;  %v4194_v18 = vld [vmem:[#allocation5 + $0x7a0] sm:$0xff]  ;;  %v4195_v11 = vld [vmem:[#allocation5 + $0x598] sm:$0xff] }
 0x4e4   : > { %2137 = vmatprep.subr.mxu1 %v4151_v26  ;;  %2219 = vmatprep.subr.mxu0 %v4152_v13  ;;  %v4196_v12 = vld [vmem:[#allocation5 + $0x798] sm:$0xff]  ;;  %v4197_v26 = vld [vmem:[#allocation5 + $0x590] sm:$0xff] }
 0x4e5   : > { %2138 = vmatpush1.msra.mxu1 %v4153_v15  ;;  %2220 = vmatpush1.msra.mxu0 %v4154_v51  ;;  %v4198_v13 = vld [vmem:[#allocation5 + $0x790] sm:$0xff]  ;;  %v4199_v15 = vld [vmem:[#allocation5 + $0x588] sm:$0xff] }
 0x4e6   : > { %2139 = vmatprep.subr.mxu1 %v4155_v16  ;;  %2221 = vmatprep.subr.mxu0 %v4156_v55  ;;  %v4200_v51 = vld [vmem:[#allocation5 + $0x788] sm:$0xff]  ;;  %v4201_v16 = vld [vmem:[#allocation5 + $0x580] sm:$0xff] }
 0x4e7   : > { %2140 = vmatpush1.msra.mxu1 %v4157_v19  ;;  %2222 = vmatpush1.msra.mxu0 %v4158_v21  ;;  %v4202_v55 = vld [vmem:[#allocation5 + $0x780] sm:$0xff]  ;;  %v4203_v19 = vld [vmem:[#allocation5 + $0x578] sm:$0xff] }
 0x4e8   : > { %2141 = vmatprep.subr.mxu1 %v4159_v23  ;;  %2223 = vmatprep.subr.mxu0 %v4160_v24  ;;  %v4204_v21 = vld [vmem:[#allocation5 + $0x778] sm:$0xff]  ;;  %v4205_v23 = vld [vmem:[#allocation5 + $0x570] sm:$0xff] }
 0x4e9   : > { %2142 = vmatpush1.msra.mxu1 %v4161_v7  ;;  %2224 = vmatpush1.msra.mxu0 %v4162_v25  ;;  %v4206_v24 = vld [vmem:[#allocation5 + $0x770] sm:$0xff]  ;;  %v4207_v7 = vld [vmem:[#allocation5 + $0x568] sm:$0xff] }
 0x4ea   : > { %2143 = vmatprep.subr.mxu1 %v4163_v27  ;;  %2225 = vmatprep.subr.mxu0 %v4164_v28  ;;  %v4208_v25 = vld [vmem:[#allocation5 + $0x768] sm:$0xff]  ;;  %v4209_v27 = vld [vmem:[#allocation5 + $0x560] sm:$0xff] }
 0x4eb   : > { %2144 = vmatpush1.msra.mxu1 %v4165_v29  ;;  %2226 = vmatpush1.msra.mxu0 %v4166_v2  ;;  %v4210_v28 = vld [vmem:[#allocation5 + $0x760] sm:$0xff]  ;;  %v4211_v29 = vld [vmem:[#allocation5 + $0x558] sm:$0xff] }
 0x4ec   : > { %2145 = vmatprep.subr.mxu1 %v4167_v30  ;;  %2227 = vmatprep.subr.mxu0 %v4168_v31  ;;  %v4212_v2 = vld [vmem:[#allocation5 + $0x758] sm:$0xff]  ;;  %v4213_v30 = vld [vmem:[#allocation5 + $0x550] sm:$0xff] }
 0x4ed   : > { %2146 = vmatpush1.msra.mxu1 %v4169_v32  ;;  %2228 = vmatpush1.msra.mxu0 %v4170_v33  ;;  %v4214_v31 = vld [vmem:[#allocation5 + $0x750] sm:$0xff]  ;;  %v4215_v32 = vld [vmem:[#allocation5 + $0x548] sm:$0xff] }
 0x4ee   : > { %2147 = vmatprep.subr.mxu1 %v4171_v34  ;;  %2229 = vmatprep.subr.mxu0 %v4172_v35  ;;  %v4216_v33 = vld [vmem:[#allocation5 + $0x748] sm:$0xff]  ;;  %v4217_v34 = vld [vmem:[#allocation5 + $0x540] sm:$0xff] }
 0x4ef   : > { %2148 = vmatpush2.msra.mxu1 %v4173_v36  ;;  %2230 = vmatpush2.msra.mxu0 %v4174_v37  ;;  %v4218_v35 = vld [vmem:[#allocation5 + $0x740] sm:$0xff]  ;;  %v4219_v36 = vld [vmem:[#allocation5 + $0x538] sm:$0xff] }
 0x4f0   : > { %2149 = vmatprep.subr.mxu1 %v4175_v38  ;;  %2231 = vmatprep.subr.mxu0 %v4176_v40  ;;  %v4220_v37 = vld [vmem:[#allocation5 + $0x738] sm:$0xff]  ;;  %v4221_v38 = vld [vmem:[#allocation5 + $0x530] sm:$0xff] }
 0x4f1   : > { %2150 = vmatpush2.msra.mxu1 %v4177_v41  ;;  %2232 = vmatpush2.msra.mxu0 %v4178_v42  ;;  %v4222_v40 = vld [vmem:[#allocation5 + $0x730] sm:$0xff]  ;;  %v5636_v41 = vpop.permute.xlu1 %2274  ;;  %v4223_v42 = vld [vmem:[#allocation5 + $0x528] sm:$0xff] }
 0x4f2   : > { %2151 = vmatprep.subr.mxu1 %v4179_v43  ;;  %2233 = vmatprep.subr.mxu0 %v4180_v44  ;;  %v4224_v43 = vld [vmem:[#allocation5 + $0x728] sm:$0xff]  ;;  %v4225_v44 = vld [vmem:[#allocation5 + $0x520] sm:$0xff] }
 0x4f3   : > { %2152 = vmatpush2.msra.mxu1 %v4181_v45  ;;  %2234 = vmatpush2.msra.mxu0 %v4182_v46  ;;  %v4226_v45 = vld [vmem:[#allocation5 + $0x720] sm:$0xff]  ;;  %v4227_v46 = vld [vmem:[#allocation5 + $0x518] sm:$0xff] }
 0x4f4   : > { %2153 = vmatprep.subr.mxu1 %v4183_v60  ;;  %2235 = vmatprep.subr.mxu0 %v4184_v61  ;;  %v4228_v60 = vld [vmem:[#allocation5 + $0x718] sm:$0xff]  ;;  %v4229_v61 = vld [vmem:[#allocation5 + $0x510] sm:$0xff] }
 0x4f5   : > { %2154 = vmatpush2.msra.mxu1 %v4185_v62  ;;  %2236 = vmatpush2.msra.mxu0 %v4186_v63  ;;  %v4230_v62 = vld [vmem:[#allocation5 + $0x710] sm:$0xff]  ;;  %v4231_v63 = vld [vmem:[#allocation5 + $0x508] sm:$0xff] }
 0x4f6   : > { %2155 = vmatprep.subr.mxu1 %v4187_v0  ;;  %2237 = vmatprep.subr.mxu0 %v4188_v1  ;;  %v4232_v0 = vld [vmem:[#allocation5 + $0x708] sm:$0xff]  ;;  %v2113_v1 = vmul.f32 %v5620_v8, %v5622_v9 }
 0x4f7   : > { %2156 = vmatpush2.msra.mxu1 %v4189_v3  ;;  %2238 = vmatpush2.msra.mxu0 %v4190_v4  ;;  %v2195_v3 = vmul.f32 %v5630_v14, %v5622_v9  ;;  %v4233_v4 = vld [vmem:[#allocation5 + $0x500] sm:$0xff]  ;;  %v4238_v14 = vld [vmem:[#allocation5 + $0xaf0] sm:$0xff] }
 0x4f8   : > { %2157 = vmatprep.subr.mxu1 %v4191_v5  ;;  %2239 = vmatprep.subr.mxu0 %v4192_v39  ;;  %v4234_v5 = vld [vmem:[#allocation5 + $0x700] sm:$0xff]  ;;  %v5642_v39 = vpop.permute.xlu1 %2356 }
 0x4f9   : > { %2158 = vmatpush2.msra.mxu1 %v4193_v6  ;;  %2240 = vmatpush2.msra.mxu0 %v4194_v18  ;;  %v2278_v6 = vmul.f32 %v5636_v41, %v5624_v10  ;;  %v4235_v18 = vld [vmem:[#allocation5 + $0x8f8] sm:$0xff]  ;;  %v2360_v8 = vmul.f32 %v5642_v39, %v5624_v10 }
 0x4fa   : > { %2159 = vmatprep.subr.mxu1 %v4195_v11  ;;  %2241 = vmatprep.subr.mxu0 %v4196_v12  ;;  %v4236_v11 = vld [vmem:[#allocation5 + $0xaf8] sm:$0xff]  ;;  %v4237_v12 = vld [vmem:[#allocation5 + $0x8f0] sm:$0xff] }
 0x4fb   : > { %2160 = vmatpush2.msra.mxu1 %v4197_v26  ;;  %2242 = vmatpush2.msra.mxu0 %v4198_v13  ;;  %v4239_v26 = vld [vmem:[#allocation5 + $0x8e8] sm:$0xff] }
 0x4fc   : > { %2161 = vmatprep.subr.mxu1 %v4199_v15  ;;  %2243 = vmatprep.subr.mxu0 %v4200_v51  ;;  %v4240_v13 = vld [vmem:[#allocation5 + $0xae8] sm:$0xff]  ;;  %v4241_v15 = vld [vmem:[#allocation5 + $0x8e0] sm:$0xff] }
 0x4fd   : > { %2162 = vmatpush2.msra.mxu1 %v4201_v16  ;;  %2244 = vmatpush2.msra.mxu0 %v4202_v55  ;;  %v4242_v51 = vld [vmem:[#allocation5 + $0xae0] sm:$0xff]  ;;  %v4243_v16 = vld [vmem:[#allocation5 + $0x8d8] sm:$0xff] }
 0x4fe   : > { %2163 = vmatprep.subr.mxu1 %v4203_v19  ;;  %2245 = vmatprep.subr.mxu0 %v4204_v21  ;;  %v4244_v55 = vld [vmem:[#allocation5 + $0xad8] sm:$0xff]  ;;  %v4245_v19 = vld [vmem:[#allocation5 + $0x8d0] sm:$0xff] }
 0x4ff   : > { %2164 = vmatpush2.msra.mxu1 %v4205_v23  ;;  %2246 = vmatpush2.msra.mxu0 %v4206_v24  ;;  %v4246_v21 = vld [vmem:[#allocation5 + $0xad0] sm:$0xff]  ;;  %v4247_v23 = vld [vmem:[#allocation5 + $0x8c8] sm:$0xff] }
 0x500   : > { %2165 = vmatprep.subr.mxu1 %v4207_v7  ;;  %2247 = vmatprep.subr.mxu0 %v4208_v25  ;;  %v4248_v24 = vld [vmem:[#allocation5 + $0xac8] sm:$0xff]  ;;  %v4249_v7 = vld [vmem:[#allocation5 + $0x8c0] sm:$0xff] }
 0x501   : > { %2166 = vmatpush2.msra.mxu1 %v4209_v27  ;;  %2248 = vmatpush2.msra.mxu0 %v4210_v28  ;;  %v4250_v25 = vld [vmem:[#allocation5 + $0xac0] sm:$0xff]  ;;  %v4251_v27 = vld [vmem:[#allocation5 + $0x8b8] sm:$0xff] }
 0x502   : > { %2167 = vmatprep.subr.mxu1 %v4211_v29  ;;  %2249 = vmatprep.subr.mxu0 %v4212_v2  ;;  %v4252_v28 = vld [vmem:[#allocation5 + $0xab8] sm:$0xff]  ;;  %v4253_v29 = vld [vmem:[#allocation5 + $0x8b0] sm:$0xff] }
 0x503   : > { %2168 = vmatpush2.msra.mxu1 %v4213_v30  ;;  %2250 = vmatpush2.msra.mxu0 %v4214_v31  ;;  %v4254_v2 = vld [vmem:[#allocation5 + $0xab0] sm:$0xff]  ;;  %v4255_v30 = vld [vmem:[#allocation5 + $0x8a8] sm:$0xff] }
 0x504   : > { %2169 = vmatprep.subr.mxu1 %v4215_v32  ;;  %2251 = vmatprep.subr.mxu0 %v4216_v33  ;;  %v4256_v31 = vld [vmem:[#allocation5 + $0xaa8] sm:$0xff]  ;;  %v4257_v32 = vld [vmem:[#allocation5 + $0x8a0] sm:$0xff] }
 0x505   : > { %2170 = vmatpush2.msra.mxu1 %v4217_v34  ;;  %2252 = vmatpush2.msra.mxu0 %v4218_v35  ;;  %v4258_v33 = vld [vmem:[#allocation5 + $0xaa0] sm:$0xff]  ;;  %v4259_v34 = vld [vmem:[#allocation5 + $0x898] sm:$0xff] }
 0x506   : > { %2171 = vmatprep.subr.mxu1 %v4219_v36  ;;  %2253 = vmatprep.subr.mxu0 %v4220_v37  ;;  %v4260_v35 = vld [vmem:[#allocation5 + $0xa98] sm:$0xff]  ;;  %v4261_v36 = vld [vmem:[#allocation5 + $0x890] sm:$0xff] }
 0x507   : > { %2172 = vmatpush2.msra.mxu1 %v4221_v38  ;;  %2254 = vmatpush2.msra.mxu0 %v4222_v40  ;;  %v4262_v37 = vld [vmem:[#allocation5 + $0xa90] sm:$0xff]  ;;  %v4263_v38 = vld [vmem:[#allocation5 + $0x888] sm:$0xff] }
 0x508   : > { %2173 = vmatprep.subr.mxu1 %v4223_v42  ;;  %2255 = vmatprep.subr.mxu0 %v4224_v43  ;;  %v4264_v40 = vld [vmem:[#allocation5 + $0xa88] sm:$0xff]  ;;  %v4265_v42 = vld [vmem:[#allocation5 + $0x880] sm:$0xff] }
 0x509   : > { %2174 = vmatpush2.msra.mxu1 %v4225_v44  ;;  %2256 = vmatpush2.msra.mxu0 %v4226_v45  ;;  %v4266_v43 = vld [vmem:[#allocation5 + $0xa80] sm:$0xff]  ;;  %v4267_v44 = vld [vmem:[#allocation5 + $0x878] sm:$0xff] }
 0x50a   : > { %2175 = vmatprep.subr.mxu1 %v4227_v46  ;;  %2257 = vmatprep.subr.mxu0 %v4228_v60  ;;  %v4268_v45 = vld [vmem:[#allocation5 + $0xa78] sm:$0xff]  ;;  %v4269_v46 = vld [vmem:[#allocation5 + $0x870] sm:$0xff] }
 0x50b   : > { %2176 = vmatpush2.msra.mxu1 %v4229_v61  ;;  %2258 = vmatpush2.msra.mxu0 %v4230_v62  ;;  %v4270_v60 = vld [vmem:[#allocation5 + $0xa70] sm:$0xff]  ;;  %v4271_v61 = vld [vmem:[#allocation5 + $0x868] sm:$0xff] }
 0x50c   : > { %2177 = vmatprep.subr.mxu1 %v4231_v63  ;;  %2259 = vmatprep.subr.mxu0 %v4232_v0  ;;  %v4272_v62 = vld [vmem:[#allocation5 + $0xa68] sm:$0xff]  ;;  %v4273_v63 = vld [vmem:[#allocation5 + $0x860] sm:$0xff] }
 0x50d   : > { %2178 = vmatpush2.msra.mxu1 %v4233_v4  ;;  %2260 = vmatpush2.msra.mxu0 %v4234_v5  ;;  %v4274_v0 = vld [vmem:[#allocation5 + $0xa60] sm:$0xff]  ;;  %v4277_v4 = vld [vmem:[#allocation5 + $0x850] sm:$0xff] }
 0x50e   : > { %2180 = vmatmul.mubr.f32.vlgmr.msra.gmra.mxu1 %v2113_v1  ;;  %2262 = vmatmul.mubr.f32.vlgmr.msra.gmra.mxu0 %v2195_v3  ;;  %v4275_v1 = vld [vmem:[#allocation5 + $0x858] sm:$0xff]  ;;  %v4278_v5 = vld [vmem:[#allocation5 + $0xa50] sm:$0xff] }
 0x50f   : > { %2279 = vmatprep.subr.mxu1 %v4235_v18  ;;  %2361 = vmatprep.subr.mxu0 %v4236_v11  ;;  %v4276_v3 = vld [vmem:[#allocation5 + $0xa58] sm:$0xff]  ;;  %v4280_v18 = vld [vmem:[#allocation5 + $0xa48] sm:$0xff]  ;;  %v4281_v11 = vld [vmem:[#allocation5 + $0x840] sm:$0xff] }
 0x510   : > { %2280 = vmatpush1.msra.mxu1 %v4237_v12  ;;  %2343 = vmatprep.mubr.f32.mxu1 %v2278_v6  ;;  %v4279_v6 = vld [vmem:[#allocation5 + $0x848] sm:$0xff]  ;;  %v4283_v12 = vld [vmem:[#allocation5 + $0x838] sm:$0xff] }
 0x511   : > { %2362 = vmatpush1.msra.mxu0 %v4238_v14  ;;  %2425 = vmatprep.mubr.f32.mxu0 %v2360_v8  ;;  %v4282_v8 = vld [vmem:[#allocation5 + $0xa40] sm:$0xff]  ;;  %v4284_v14 = vld [vmem:[#allocation5 + $0xa38] sm:$0xff] }
 0x512   : > { %2281 = vmatprep.subr.mxu1 %v4239_v26  ;;  %2363 = vmatprep.subr.mxu0 %v4240_v13  ;;  %v4285_v26 = vld [vmem:[#allocation5 + $0x830] sm:$0xff] }
 0x513   : > { %2282 = vmatpush1.msra.mxu1 %v4241_v15  ;;  %2364 = vmatpush1.msra.mxu0 %v4242_v51  ;;  %v4286_v13 = vld [vmem:[#allocation5 + $0xa30] sm:$0xff]  ;;  %v4287_v15 = vld [vmem:[#allocation5 + $0x828] sm:$0xff] }
 0x514   : > { %2283 = vmatprep.subr.mxu1 %v4243_v16  ;;  %2365 = vmatprep.subr.mxu0 %v4244_v55  ;;  %v4288_v51 = vld [vmem:[#allocation5 + $0xa28] sm:$0xff]  ;;  %v4289_v16 = vld [vmem:[#allocation5 + $0x820] sm:$0xff] }
 0x515   : > { %2284 = vmatpush1.msra.mxu1 %v4245_v19  ;;  %2366 = vmatpush1.msra.mxu0 %v4246_v21  ;;  %v4290_v55 = vld [vmem:[#allocation5 + $0xa20] sm:$0xff]  ;;  %v4291_v19 = vld [vmem:[#allocation5 + $0x818] sm:$0xff] }
 0x516   : > { %2285 = vmatprep.subr.mxu1 %v4247_v23  ;;  %2367 = vmatprep.subr.mxu0 %v4248_v24  ;;  %v4292_v21 = vld [vmem:[#allocation5 + $0xa18] sm:$0xff]  ;;  %v4293_v23 = vld [vmem:[#allocation5 + $0x810] sm:$0xff] }
 0x517   : > { %2286 = vmatpush1.msra.mxu1 %v4249_v7  ;;  %2368 = vmatpush1.msra.mxu0 %v4250_v25  ;;  %v4294_v24 = vld [vmem:[#allocation5 + $0xa10] sm:$0xff]  ;;  %v4295_v7 = vld [vmem:[#allocation5 + $0x808] sm:$0xff] }
 0x518   : > { %2287 = vmatprep.subr.mxu1 %v4251_v27  ;;  %2369 = vmatprep.subr.mxu0 %v4252_v28  ;;  %v4296_v25 = vld [vmem:[#allocation5 + $0xa08] sm:$0xff]  ;;  %v4297_v27 = vld [vmem:[#allocation5 + $0x800] sm:$0xff] }
 0x519   : > { %2288 = vmatpush1.msra.mxu1 %v4253_v29  ;;  %2370 = vmatpush1.msra.mxu0 %v4254_v2  ;;  %v4298_v28 = vld [vmem:[#allocation5 + $0xa00] sm:$0xff]  ;;  %v4299_v29 = vld [vmem:[#allocation5 + $0x9f8] sm:$0xff] }
 0x51a   : > { %2289 = vmatprep.subr.mxu1 %v4255_v30  ;;  %2371 = vmatprep.subr.mxu0 %v4256_v31  ;;  %v4300_v2 = vld [vmem:[#allocation5 + $0xbf8] sm:$0xff]  ;;  %v4301_v30 = vld [vmem:[#allocation5 + $0x9f0] sm:$0xff] }
 0x51b   : > { %2290 = vmatpush1.msra.mxu1 %v4257_v32  ;;  %2372 = vmatpush1.msra.mxu0 %v4258_v33  ;;  %v4302_v31 = vld [vmem:[#allocation5 + $0xbf0] sm:$0xff]  ;;  %v4303_v32 = vld [vmem:[#allocation5 + $0x9e8] sm:$0xff] }
 0x51c   : > { %2291 = vmatprep.subr.mxu1 %v4259_v34  ;;  %2373 = vmatprep.subr.mxu0 %v4260_v35  ;;  %v4304_v33 = vld [vmem:[#allocation5 + $0xbe8] sm:$0xff]  ;;  %v4305_v34 = vld [vmem:[#allocation5 + $0x9e0] sm:$0xff] }
 0x51d   : > { %2292 = vmatpush1.msra.mxu1 %v4261_v36  ;;  %2374 = vmatpush1.msra.mxu0 %v4262_v37  ;;  %v4306_v35 = vld [vmem:[#allocation5 + $0xbe0] sm:$0xff]  ;;  %v4307_v36 = vld [vmem:[#allocation5 + $0x9d8] sm:$0xff] }
 0x51e   : > { %2293 = vmatprep.subr.mxu1 %v4263_v38  ;;  %2375 = vmatprep.subr.mxu0 %v4264_v40  ;;  %v4308_v37 = vld [vmem:[#allocation5 + $0xbd8] sm:$0xff]  ;;  %v4309_v38 = vld [vmem:[#allocation5 + $0x9d0] sm:$0xff] }
 0x51f   : > { %2294 = vmatpush1.msra.mxu1 %v4265_v42  ;;  %2376 = vmatpush1.msra.mxu0 %v4266_v43  ;;  %v4310_v40 = vld [vmem:[#allocation5 + $0xbd0] sm:$0xff]  ;;  %v4311_v42 = vld [vmem:[#allocation5 + $0x9c8] sm:$0xff] }
 0x520   : > { %2295 = vmatprep.subr.mxu1 %v4267_v44  ;;  %2377 = vmatprep.subr.mxu0 %v4268_v45  ;;  %v4312_v43 = vld [vmem:[#allocation5 + $0xbc8] sm:$0xff]  ;;  %v4313_v44 = vld [vmem:[#allocation5 + $0x9c0] sm:$0xff] }
 0x521   : > { %2296 = vmatpush1.msra.mxu1 %v4269_v46  ;;  %2378 = vmatpush1.msra.mxu0 %v4270_v60  ;;  %v4314_v45 = vld [vmem:[#allocation5 + $0xbc0] sm:$0xff]  ;;  %v4315_v46 = vld [vmem:[#allocation5 + $0x9b8] sm:$0xff] }
 0x522   : > { %2297 = vmatprep.subr.mxu1 %v4271_v61  ;;  %2379 = vmatprep.subr.mxu0 %v4272_v62  ;;  %v4316_v60 = vld [vmem:[#allocation5 + $0xbb8] sm:$0xff]  ;;  %v4317_v61 = vld [vmem:[#allocation5 + $0x9b0] sm:$0xff] }
 0x523   : > { %2298 = vmatpush1.msra.mxu1 %v4273_v63  ;;  %2380 = vmatpush1.msra.mxu0 %v4274_v0  ;;  %v4318_v62 = vld [vmem:[#allocation5 + $0xbb0] sm:$0xff]  ;;  %v4319_v63 = vld [vmem:[#allocation5 + $0x9a8] sm:$0xff] }
 0x524   : > { %2299 = vmatprep.subr.mxu1 %v4275_v1  ;;  %2381 = vmatprep.subr.mxu0 %v4276_v3  ;;  %v4320_v0 = vld [vmem:[#allocation5 + $0xba8] sm:$0xff]  ;;  %v4321_v1 = vld [vmem:[#allocation5 + $0x9a0] sm:$0xff] }
 0x525   : > { %2300 = vmatpush1.msra.mxu1 %v4277_v4  ;;  %2382 = vmatpush1.msra.mxu0 %v4278_v5  ;;  %v4322_v3 = vld [vmem:[#allocation5 + $0xba0] sm:$0xff]  ;;  %v4323_v4 = vld [vmem:[#allocation5 + $0x998] sm:$0xff] }
 0x526   : > { %2301 = vmatprep.subr.mxu1 %v4279_v6  ;;  %2383 = vmatprep.subr.mxu0 %v4280_v18  ;;  %v4324_v5 = vld [vmem:[#allocation5 + $0xb98] sm:$0xff]  ;;  %v4325_v6 = vld [vmem:[#allocation5 + $0x990] sm:$0xff] }
 0x527   : > { %2302 = vmatpush1.msra.mxu1 %v4281_v11  ;;  %2384 = vmatpush1.msra.mxu0 %v4282_v8  ;;  %v4326_v18 = vld [vmem:[#allocation5 + $0xb90] sm:$0xff]  ;;  %v4327_v11 = vld [vmem:[#allocation5 + $0x988] sm:$0xff] }
 0x528   : > { %2303 = vmatprep.subr.mxu1 %v4283_v12  ;;  %2385 = vmatprep.subr.mxu0 %v4284_v14  ;;  %v4328_v8 = vld [vmem:[#allocation5 + $0xb88] sm:$0xff]  ;;  %v4329_v12 = vld [vmem:[#allocation5 + $0x980] sm:$0xff] }
 0x529   : > { %2304 = vmatpush1.msra.mxu1 %v4285_v26  ;;  %2386 = vmatpush1.msra.mxu0 %v4286_v13  ;;  %v4330_v14 = vld [vmem:[#allocation5 + $0xb80] sm:$0xff]  ;;  %v4331_v26 = vld [vmem:[#allocation5 + $0x978] sm:$0xff] }
 0x52a   : > { %2305 = vmatprep.subr.mxu1 %v4287_v15  ;;  %2387 = vmatprep.subr.mxu0 %v4288_v51  ;;  %v4332_v13 = vld [vmem:[#allocation5 + $0xb78] sm:$0xff]  ;;  %v4333_v15 = vld [vmem:[#allocation5 + $0x970] sm:$0xff] }
 0x52b   : > { %2306 = vmatpush1.msra.mxu1 %v4289_v16  ;;  %2388 = vmatpush1.msra.mxu0 %v4290_v55  ;;  %v4334_v51 = vld [vmem:[#allocation5 + $0xb70] sm:$0xff]  ;;  %v4335_v16 = vld [vmem:[#allocation5 + $0x968] sm:$0xff] }
 0x52c   : > { %2307 = vmatprep.subr.mxu1 %v4291_v19  ;;  %2389 = vmatprep.subr.mxu0 %v4292_v21  ;;  %v4336_v55 = vld [vmem:[#allocation5 + $0xb68] sm:$0xff]  ;;  %v4337_v19 = vld [vmem:[#allocation5 + $0x960] sm:$0xff] }
 0x52d   : > { %2308 = vmatpush1.msra.mxu1 %v4293_v23  ;;  %2390 = vmatpush1.msra.mxu0 %v4294_v24  ;;  %v4338_v21 = vld [vmem:[#allocation5 + $0xb60] sm:$0xff]  ;;  %v4339_v23 = vld [vmem:[#allocation5 + $0x958] sm:$0xff] }
 0x52e   : > { %2309 = vmatprep.subr.mxu1 %v4295_v7  ;;  %2391 = vmatprep.subr.mxu0 %v4296_v25  ;;  %v4340_v24 = vld [vmem:[#allocation5 + $0xb58] sm:$0xff]  ;;  %v4341_v7 = vld [vmem:[#allocation5 + $0x950] sm:$0xff] }
 0x52f   : > { %2310 = vmatpush1.msra.mxu1 %v4297_v27  ;;  %2392 = vmatpush1.msra.mxu0 %v4298_v28  ;;  %v4342_v25 = vld [vmem:[#allocation5 + $0xb50] sm:$0xff]  ;;  %v4343_v27 = vld [vmem:[#allocation5 + $0x948] sm:$0xff] }
 0x530   : > { %2311 = vmatprep.subr.mxu1 %v4299_v29  ;;  %2393 = vmatprep.subr.mxu0 %v4300_v2  ;;  %v4344_v28 = vld [vmem:[#allocation5 + $0xb48] sm:$0xff]  ;;  %v4345_v29 = vld [vmem:[#allocation5 + $0x940] sm:$0xff] }
 0x531   : > { %2312 = vmatpush2.msra.mxu1 %v4301_v30  ;;  %2394 = vmatpush2.msra.mxu0 %v4302_v31  ;;  %v4346_v2 = vld [vmem:[#allocation5 + $0xb40] sm:$0xff]  ;;  %v4347_v30 = vld [vmem:[#allocation5 + $0x938] sm:$0xff] }
 0x532   : > { %2313 = vmatprep.subr.mxu1 %v4303_v32  ;;  %2395 = vmatprep.subr.mxu0 %v4304_v33  ;;  %v4348_v31 = vld [vmem:[#allocation5 + $0xb38] sm:$0xff]  ;;  %v4349_v32 = vld [vmem:[#allocation5 + $0x930] sm:$0xff] }
 0x533   : > { %2314 = vmatpush2.msra.mxu1 %v4305_v34  ;;  %2396 = vmatpush2.msra.mxu0 %v4306_v35  ;;  %v4350_v33 = vld [vmem:[#allocation5 + $0xb30] sm:$0xff]  ;;  %v4351_v34 = vld [vmem:[#allocation5 + $0x928] sm:$0xff] }
 0x534   : > { %2315 = vmatprep.subr.mxu1 %v4307_v36  ;;  %2397 = vmatprep.subr.mxu0 %v4308_v37  ;;  %v4352_v35 = vld [vmem:[#allocation5 + $0xb28] sm:$0xff]  ;;  %v4353_v36 = vld [vmem:[#allocation5 + $0x920] sm:$0xff] }
 0x535   : > { %2316 = vmatpush2.msra.mxu1 %v4309_v38  ;;  %2398 = vmatpush2.msra.mxu0 %v4310_v40  ;;  %v4354_v37 = vld [vmem:[#allocation5 + $0xb20] sm:$0xff]  ;;  %v4355_v38 = vld [vmem:[#allocation5 + $0x918] sm:$0xff] }
 0x536   : > { %2317 = vmatprep.subr.mxu1 %v4311_v42  ;;  %2399 = vmatprep.subr.mxu0 %v4312_v43  ;;  %v4356_v40 = vld [vmem:[#allocation5 + $0xb18] sm:$0xff]  ;;  %v4357_v42 = vld [vmem:[#allocation5 + $0x910] sm:$0xff] }
 0x537   : > { %2318 = vmatpush2.msra.mxu1 %v4313_v44  ;;  %2400 = vmatpush2.msra.mxu0 %v4314_v45  ;;  %v4358_v43 = vld [vmem:[#allocation5 + $0xb10] sm:$0xff]  ;;  %v4359_v44 = vld [vmem:[#allocation5 + $0x908] sm:$0xff] }
 0x538   : > { %2319 = vmatprep.subr.mxu1 %v4315_v46  ;;  %2401 = vmatprep.subr.mxu0 %v4316_v60  ;;  %v4360_v45 = vld [vmem:[#allocation5 + $0xb08] sm:$0xff]  ;;  %v2277_v46 = vmul.f32 %v5636_v41, %v5622_v9  ;;  %v2359_v60 = vmul.f32 %v5642_v39, %v5622_v9  ;;  %v4365_v39 = vld [vmem:[#allocation5 + $0xcf0] sm:$0xff] }
 0x539   : > { %2320 = vmatpush2.msra.mxu1 %v4317_v61  ;;  %2402 = vmatpush2.msra.mxu0 %v4318_v62  ;;  %v5652_v61 = vpop.permute.xlu0 %2438  ;;  %v4361_v62 = vld [vmem:[#allocation5 + $0x900] sm:$0xff] }
 0x53a   : > { %2321 = vmatprep.subr.mxu1 %v4319_v63  ;;  %2403 = vmatprep.subr.mxu0 %v4320_v0  ;;  %v4362_v63 = vld [vmem:[#allocation5 + $0xb00] sm:$0xff]  ;;  %v5654_v0 = vpop.permute.xlu1 %2520 }
 0x53b   : > { %2322 = vmatpush2.msra.mxu1 %v4321_v1  ;;  %2404 = vmatpush2.msra.mxu0 %v4322_v3  ;;  %v2442_v1 = vmul.f32 %v5652_v61, %v5624_v10  ;;  %v4363_v3 = vld [vmem:[#allocation5 + $0xcf8] sm:$0xff]  ;;  %v2524_v41 = vmul.f32 %v5654_v0, %v5624_v10 }
 0x53c   : > { %2323 = vmatprep.subr.mxu1 %v4323_v4  ;;  %2405 = vmatprep.subr.mxu0 %v4324_v5  ;;  %v4364_v4 = vld [vmem:[#allocation5 + $0xef8] sm:$0xff]  ;;  %v4366_v5 = vld [vmem:[#allocation5 + $0xef0] sm:$0xff] }
 0x53d   : > { %2324 = vmatpush2.msra.mxu1 %v4325_v6  ;;  %2406 = vmatpush2.msra.mxu0 %v4326_v18  ;;  %v4367_v6 = vld [vmem:[#allocation5 + $0xce8] sm:$0xff] }
 0x53e   : > { %2325 = vmatprep.subr.mxu1 %v4327_v11  ;;  %2407 = vmatprep.subr.mxu0 %v4328_v8  ;;  %v4368_v18 = vld [vmem:[#allocation5 + $0xee8] sm:$0xff]  ;;  %v4369_v11 = vld [vmem:[#allocation5 + $0xce0] sm:$0xff] }
 0x53f   : > { %2326 = vmatpush2.msra.mxu1 %v4329_v12  ;;  %2408 = vmatpush2.msra.mxu0 %v4330_v14  ;;  %v4370_v8 = vld [vmem:[#allocation5 + $0xee0] sm:$0xff]  ;;  %v4371_v12 = vld [vmem:[#allocation5 + $0xcd8] sm:$0xff] }
 0x540   : > { %2327 = vmatprep.subr.mxu1 %v4331_v26  ;;  %2409 = vmatprep.subr.mxu0 %v4332_v13  ;;  %v4372_v14 = vld [vmem:[#allocation5 + $0xed8] sm:$0xff]  ;;  %v4373_v26 = vld [vmem:[#allocation5 + $0xcd0] sm:$0xff] }
 0x541   : > { %2328 = vmatpush2.msra.mxu1 %v4333_v15  ;;  %2410 = vmatpush2.msra.mxu0 %v4334_v51  ;;  %v4374_v13 = vld [vmem:[#allocation5 + $0xed0] sm:$0xff]  ;;  %v4375_v15 = vld [vmem:[#allocation5 + $0xcc8] sm:$0xff] }
 0x542   : > { %2329 = vmatprep.subr.mxu1 %v4335_v16  ;;  %2411 = vmatprep.subr.mxu0 %v4336_v55  ;;  %v4376_v51 = vld [vmem:[#allocation5 + $0xec8] sm:$0xff]  ;;  %v4377_v16 = vld [vmem:[#allocation5 + $0xcc0] sm:$0xff] }
 0x543   : > { %2330 = vmatpush2.msra.mxu1 %v4337_v19  ;;  %2412 = vmatpush2.msra.mxu0 %v4338_v21  ;;  %v4378_v55 = vld [vmem:[#allocation5 + $0xec0] sm:$0xff]  ;;  %v4379_v19 = vld [vmem:[#allocation5 + $0xcb8] sm:$0xff] }
 0x544   : > { %2331 = vmatprep.subr.mxu1 %v4339_v23  ;;  %2413 = vmatprep.subr.mxu0 %v4340_v24  ;;  %v4380_v21 = vld [vmem:[#allocation5 + $0xeb8] sm:$0xff]  ;;  %v4381_v23 = vld [vmem:[#allocation5 + $0xcb0] sm:$0xff] }
 0x545   : > { %2332 = vmatpush2.msra.mxu1 %v4341_v7  ;;  %2414 = vmatpush2.msra.mxu0 %v4342_v25  ;;  %v4382_v24 = vld [vmem:[#allocation5 + $0xeb0] sm:$0xff]  ;;  %v4383_v7 = vld [vmem:[#allocation5 + $0xca8] sm:$0xff] }
 0x546   : > { %2333 = vmatprep.subr.mxu1 %v4343_v27  ;;  %2415 = vmatprep.subr.mxu0 %v4344_v28  ;;  %v4384_v25 = vld [vmem:[#allocation5 + $0xea8] sm:$0xff]  ;;  %v4385_v27 = vld [vmem:[#allocation5 + $0xca0] sm:$0xff] }
 0x547   : > { %2334 = vmatpush2.msra.mxu1 %v4345_v29  ;;  %2416 = vmatpush2.msra.mxu0 %v4346_v2  ;;  %v4386_v28 = vld [vmem:[#allocation5 + $0xea0] sm:$0xff]  ;;  %v4387_v29 = vld [vmem:[#allocation5 + $0xc98] sm:$0xff] }
 0x548   : > { %2335 = vmatprep.subr.mxu1 %v4347_v30  ;;  %2417 = vmatprep.subr.mxu0 %v4348_v31  ;;  %v4388_v2 = vld [vmem:[#allocation5 + $0xe98] sm:$0xff]  ;;  %v4389_v30 = vld [vmem:[#allocation5 + $0xc90] sm:$0xff] }
 0x549   : > { %2336 = vmatpush2.msra.mxu1 %v4349_v32  ;;  %2418 = vmatpush2.msra.mxu0 %v4350_v33  ;;  %v4390_v31 = vld [vmem:[#allocation5 + $0xe90] sm:$0xff]  ;;  %v4391_v32 = vld [vmem:[#allocation5 + $0xc88] sm:$0xff] }
 0x54a   : > { %2337 = vmatprep.subr.mxu1 %v4351_v34  ;;  %2419 = vmatprep.subr.mxu0 %v4352_v35  ;;  %v4392_v33 = vld [vmem:[#allocation5 + $0xe88] sm:$0xff]  ;;  %v4393_v34 = vld [vmem:[#allocation5 + $0xc80] sm:$0xff] }
 0x54b   : > { %2338 = vmatpush2.msra.mxu1 %v4353_v36  ;;  %2420 = vmatpush2.msra.mxu0 %v4354_v37  ;;  %v4394_v35 = vld [vmem:[#allocation5 + $0xe80] sm:$0xff]  ;;  %v4395_v36 = vld [vmem:[#allocation5 + $0xc78] sm:$0xff] }
 0x54c   : > { %2339 = vmatprep.subr.mxu1 %v4355_v38  ;;  %2421 = vmatprep.subr.mxu0 %v4356_v40  ;;  %v4396_v37 = vld [vmem:[#allocation5 + $0xe78] sm:$0xff]  ;;  %v4397_v38 = vld [vmem:[#allocation5 + $0xc70] sm:$0xff] }
 0x54d   : > { %2340 = vmatpush2.msra.mxu1 %v4357_v42  ;;  %2422 = vmatpush2.msra.mxu0 %v4358_v43  ;;  %v4398_v40 = vld [vmem:[#allocation5 + $0xe70] sm:$0xff]  ;;  %v4399_v42 = vld [vmem:[#allocation5 + $0xc68] sm:$0xff] }
 0x54e   : > { %2341 = vmatprep.subr.mxu1 %v4359_v44  ;;  %2423 = vmatprep.subr.mxu0 %v4360_v45  ;;  %v4400_v43 = vld [vmem:[#allocation5 + $0xe68] sm:$0xff]  ;;  %v4401_v44 = vld [vmem:[#allocation5 + $0xc60] sm:$0xff] }
 0x54f   : > { %2342 = vmatpush2.msra.mxu1 %v4361_v62  ;;  %2424 = vmatpush2.msra.mxu0 %v4362_v63  ;;  %v4402_v45 = vld [vmem:[#allocation5 + $0xe60] sm:$0xff]  ;;  %v4405_v62 = vld [vmem:[#allocation5 + $0xc50] sm:$0xff] }
 0x550   : > { %2344 = vmatmul.mubr.f32.vlgmr.msra.gmra.mxu1 %v2277_v46  ;;  %2426 = vmatmul.mubr.f32.vlgmr.msra.gmra.mxu0 %v2359_v60  ;;  %v4403_v46 = vld [vmem:[#allocation5 + $0xc58] sm:$0xff]  ;;  %v4406_v63 = vld [vmem:[#allocation5 + $0xe50] sm:$0xff] }
 0x551   : > { %2443 = vmatprep.subr.mxu1 %v4363_v3  ;;  %2525 = vmatprep.subr.mxu0 %v4364_v4  ;;  %v4404_v60 = vld [vmem:[#allocation5 + $0xe58] sm:$0xff]  ;;  %v4408_v3 = vld [vmem:[#allocation5 + $0xe48] sm:$0xff]  ;;  %v4409_v4 = vld [vmem:[#allocation5 + $0xc40] sm:$0xff] }
 0x552   : > { %2444 = vmatpush1.msra.mxu1 %v4365_v39  ;;  %2507 = vmatprep.mubr.f32.mxu1 %v2442_v1  ;;  %v4407_v1 = vld [vmem:[#allocation5 + $0xc48] sm:$0xff]  ;;  %v4411_v39 = vld [vmem:[#allocation5 + $0xc38] sm:$0xff] }
 0x553   : > { %2526 = vmatpush1.msra.mxu0 %v4366_v5  ;;  %2589 = vmatprep.mubr.f32.mxu0 %v2524_v41  ;;  %v4410_v41 = vld [vmem:[#allocation5 + $0xe40] sm:$0xff]  ;;  %v4412_v5 = vld [vmem:[#allocation5 + $0xe38] sm:$0xff] }
 0x554   : > { %2445 = vmatprep.subr.mxu1 %v4367_v6  ;;  %2527 = vmatprep.subr.mxu0 %v4368_v18  ;;  %v4413_v6 = vld [vmem:[#allocation5 + $0xc30] sm:$0xff] }
 0x555   : > { %2446 = vmatpush1.msra.mxu1 %v4369_v11  ;;  %2528 = vmatpush1.msra.mxu0 %v4370_v8  ;;  %v4414_v18 = vld [vmem:[#allocation5 + $0xe30] sm:$0xff]  ;;  %v4415_v11 = vld [vmem:[#allocation5 + $0xc28] sm:$0xff] }
 0x556   : > { %2447 = vmatprep.subr.mxu1 %v4371_v12  ;;  %2529 = vmatprep.subr.mxu0 %v4372_v14  ;;  %v4416_v8 = vld [vmem:[#allocation5 + $0xe28] sm:$0xff]  ;;  %v4417_v12 = vld [vmem:[#allocation5 + $0xc20] sm:$0xff] }
 0x557   : > { %2448 = vmatpush1.msra.mxu1 %v4373_v26  ;;  %2530 = vmatpush1.msra.mxu0 %v4374_v13  ;;  %v4418_v14 = vld [vmem:[#allocation5 + $0xe20] sm:$0xff]  ;;  %v4419_v26 = vld [vmem:[#allocation5 + $0xc18] sm:$0xff] }
 0x558   : > { %2449 = vmatprep.subr.mxu1 %v4375_v15  ;;  %2531 = vmatprep.subr.mxu0 %v4376_v51  ;;  %v4420_v13 = vld [vmem:[#allocation5 + $0xe18] sm:$0xff]  ;;  %v4421_v15 = vld [vmem:[#allocation5 + $0xc10] sm:$0xff] }
 0x559   : > { %2450 = vmatpush1.msra.mxu1 %v4377_v16  ;;  %2532 = vmatpush1.msra.mxu0 %v4378_v55  ;;  %v4422_v51 = vld [vmem:[#allocation5 + $0xe10] sm:$0xff]  ;;  %v4423_v16 = vld [vmem:[#allocation5 + $0xc08] sm:$0xff] }
 0x55a   : > { %2451 = vmatprep.subr.mxu1 %v4379_v19  ;;  %2533 = vmatprep.subr.mxu0 %v4380_v21  ;;  %v4424_v55 = vld [vmem:[#allocation5 + $0xe08] sm:$0xff]  ;;  %v4425_v19 = vld [vmem:[#allocation5 + $0xc00] sm:$0xff] }
 0x55b   : > { %2452 = vmatpush1.msra.mxu1 %v4381_v23  ;;  %2534 = vmatpush1.msra.mxu0 %v4382_v24  ;;  %v4426_v21 = vld [vmem:[#allocation5 + $0xe00] sm:$0xff]  ;;  %v4427_v23 = vld [vmem:[#allocation5 + $0xdf8] sm:$0xff] }
 0x55c   : > { %2453 = vmatprep.subr.mxu1 %v4383_v7  ;;  %2535 = vmatprep.subr.mxu0 %v4384_v25  ;;  %v4428_v24 = vld [vmem:[#allocation5 + $0xff8] sm:$0xff]  ;;  %v4429_v7 = vld [vmem:[#allocation5 + $0xdf0] sm:$0xff] }
 0x55d   : > { %2454 = vmatpush1.msra.mxu1 %v4385_v27  ;;  %2536 = vmatpush1.msra.mxu0 %v4386_v28  ;;  %v4430_v25 = vld [vmem:[#allocation5 + $0xff0] sm:$0xff]  ;;  %v4431_v27 = vld [vmem:[#allocation5 + $0xde8] sm:$0xff] }
 0x55e   : > { %2455 = vmatprep.subr.mxu1 %v4387_v29  ;;  %2537 = vmatprep.subr.mxu0 %v4388_v2  ;;  %v4432_v28 = vld [vmem:[#allocation5 + $0xfe8] sm:$0xff]  ;;  %v4433_v29 = vld [vmem:[#allocation5 + $0xde0] sm:$0xff] }
 0x55f   : > { %2456 = vmatpush1.msra.mxu1 %v4389_v30  ;;  %2538 = vmatpush1.msra.mxu0 %v4390_v31  ;;  %v4434_v2 = vld [vmem:[#allocation5 + $0xfe0] sm:$0xff]  ;;  %v4435_v30 = vld [vmem:[#allocation5 + $0xdd8] sm:$0xff] }
 0x560   : > { %2457 = vmatprep.subr.mxu1 %v4391_v32  ;;  %2539 = vmatprep.subr.mxu0 %v4392_v33  ;;  %v4436_v31 = vld [vmem:[#allocation5 + $0xfd8] sm:$0xff]  ;;  %v4437_v32 = vld [vmem:[#allocation5 + $0xdd0] sm:$0xff] }
 0x561   : > { %2458 = vmatpush1.msra.mxu1 %v4393_v34  ;;  %2540 = vmatpush1.msra.mxu0 %v4394_v35  ;;  %v4438_v33 = vld [vmem:[#allocation5 + $0xfd0] sm:$0xff]  ;;  %v4439_v34 = vld [vmem:[#allocation5 + $0xdc8] sm:$0xff] }
 0x562   : > { %2459 = vmatprep.subr.mxu1 %v4395_v36  ;;  %2541 = vmatprep.subr.mxu0 %v4396_v37  ;;  %v4440_v35 = vld [vmem:[#allocation5 + $0xfc8] sm:$0xff]  ;;  %v4441_v36 = vld [vmem:[#allocation5 + $0xdc0] sm:$0xff] }
 0x563   : > { %2460 = vmatpush1.msra.mxu1 %v4397_v38  ;;  %2542 = vmatpush1.msra.mxu0 %v4398_v40  ;;  %v4442_v37 = vld [vmem:[#allocation5 + $0xfc0] sm:$0xff]  ;;  %v4443_v38 = vld [vmem:[#allocation5 + $0xdb8] sm:$0xff] }
 0x564   : > { %2461 = vmatprep.subr.mxu1 %v4399_v42  ;;  %2543 = vmatprep.subr.mxu0 %v4400_v43  ;;  %v4444_v40 = vld [vmem:[#allocation5 + $0xfb8] sm:$0xff]  ;;  %v4445_v42 = vld [vmem:[#allocation5 + $0xdb0] sm:$0xff] }
 0x565   : > { %2462 = vmatpush1.msra.mxu1 %v4401_v44  ;;  %2544 = vmatpush1.msra.mxu0 %v4402_v45  ;;  %v4446_v43 = vld [vmem:[#allocation5 + $0xfb0] sm:$0xff]  ;;  %v4447_v44 = vld [vmem:[#allocation5 + $0xda8] sm:$0xff] }
 0x566   : > { %2463 = vmatprep.subr.mxu1 %v4403_v46  ;;  %2545 = vmatprep.subr.mxu0 %v4404_v60  ;;  %v4448_v45 = vld [vmem:[#allocation5 + $0xfa8] sm:$0xff]  ;;  %v4449_v46 = vld [vmem:[#allocation5 + $0xda0] sm:$0xff] }
 0x567   : > { %2464 = vmatpush1.msra.mxu1 %v4405_v62  ;;  %2546 = vmatpush1.msra.mxu0 %v4406_v63  ;;  %v4450_v60 = vld [vmem:[#allocation5 + $0xfa0] sm:$0xff]  ;;  %v4451_v62 = vld [vmem:[#allocation5 + $0xd98] sm:$0xff] }
 0x568   : > { %2465 = vmatprep.subr.mxu1 %v4407_v1  ;;  %2547 = vmatprep.subr.mxu0 %v4408_v3  ;;  %v4452_v63 = vld [vmem:[#allocation5 + $0xf98] sm:$0xff]  ;;  %v4453_v1 = vld [vmem:[#allocation5 + $0xd90] sm:$0xff] }
 0x569   : > { %2466 = vmatpush1.msra.mxu1 %v4409_v4  ;;  %2548 = vmatpush1.msra.mxu0 %v4410_v41  ;;  %v4454_v3 = vld [vmem:[#allocation5 + $0xf90] sm:$0xff]  ;;  %v4455_v4 = vld [vmem:[#allocation5 + $0xd88] sm:$0xff] }
 0x56a   : > { %2467 = vmatprep.subr.mxu1 %v4411_v39  ;;  %2549 = vmatprep.subr.mxu0 %v4412_v5  ;;  %v4456_v41 = vld [vmem:[#allocation5 + $0xf88] sm:$0xff]  ;;  %v4457_v39 = vld [vmem:[#allocation5 + $0xd80] sm:$0xff] }
 0x56b   : > { %2468 = vmatpush1.msra.mxu1 %v4413_v6  ;;  %2550 = vmatpush1.msra.mxu0 %v4414_v18  ;;  %v4458_v5 = vld [vmem:[#allocation5 + $0xf80] sm:$0xff]  ;;  %v4459_v6 = vld [vmem:[#allocation5 + $0xd78] sm:$0xff] }
 0x56c   : > { %2469 = vmatprep.subr.mxu1 %v4415_v11  ;;  %2551 = vmatprep.subr.mxu0 %v4416_v8  ;;  %v4460_v18 = vld [vmem:[#allocation5 + $0xf78] sm:$0xff]  ;;  %v4461_v11 = vld [vmem:[#allocation5 + $0xd70] sm:$0xff] }
 0x56d   : > { %2470 = vmatpush1.msra.mxu1 %v4417_v12  ;;  %2552 = vmatpush1.msra.mxu0 %v4418_v14  ;;  %v4462_v8 = vld [vmem:[#allocation5 + $0xf70] sm:$0xff]  ;;  %v4463_v12 = vld [vmem:[#allocation5 + $0xd68] sm:$0xff] }
 0x56e   : > { %2471 = vmatprep.subr.mxu1 %v4419_v26  ;;  %2553 = vmatprep.subr.mxu0 %v4420_v13  ;;  %v4464_v14 = vld [vmem:[#allocation5 + $0xf68] sm:$0xff]  ;;  %v4465_v26 = vld [vmem:[#allocation5 + $0xd60] sm:$0xff] }
 0x56f   : > { %2472 = vmatpush1.msra.mxu1 %v4421_v15  ;;  %2554 = vmatpush1.msra.mxu0 %v4422_v51  ;;  %v4466_v13 = vld [vmem:[#allocation5 + $0xf60] sm:$0xff]  ;;  %v4467_v15 = vld [vmem:[#allocation5 + $0xd58] sm:$0xff] }
 0x570   : > { %2473 = vmatprep.subr.mxu1 %v4423_v16  ;;  %2555 = vmatprep.subr.mxu0 %v4424_v55  ;;  %v4468_v51 = vld [vmem:[#allocation5 + $0xf58] sm:$0xff]  ;;  %v4469_v16 = vld [vmem:[#allocation5 + $0xd50] sm:$0xff] }
 0x571   : > { %2474 = vmatpush1.msra.mxu1 %v4425_v19  ;;  %2556 = vmatpush1.msra.mxu0 %v4426_v21  ;;  %v4470_v55 = vld [vmem:[#allocation5 + $0xf50] sm:$0xff]  ;;  %v4471_v19 = vld [vmem:[#allocation5 + $0xd48] sm:$0xff] }
 0x572   : > { %2475 = vmatprep.subr.mxu1 %v4427_v23  ;;  %2557 = vmatprep.subr.mxu0 %v4428_v24  ;;  %v4472_v21 = vld [vmem:[#allocation5 + $0xf48] sm:$0xff]  ;;  %v4473_v23 = vld [vmem:[#allocation5 + $0xd40] sm:$0xff] }
 0x573   : > { %2476 = vmatpush2.msra.mxu1 %v4429_v7  ;;  %2558 = vmatpush2.msra.mxu0 %v4430_v25  ;;  %v4474_v24 = vld [vmem:[#allocation5 + $0xf40] sm:$0xff]  ;;  %v4475_v7 = vld [vmem:[#allocation5 + $0xd38] sm:$0xff] }
 0x574   : > { %2477 = vmatprep.subr.mxu1 %v4431_v27  ;;  %2559 = vmatprep.subr.mxu0 %v4432_v28  ;;  %v4476_v25 = vld [vmem:[#allocation5 + $0xf38] sm:$0xff]  ;;  %v4477_v27 = vld [vmem:[#allocation5 + $0xd30] sm:$0xff] }
 0x575   : > { %2478 = vmatpush2.msra.mxu1 %v4433_v29  ;;  %2560 = vmatpush2.msra.mxu0 %v4434_v2  ;;  %v4478_v28 = vld [vmem:[#allocation5 + $0xf30] sm:$0xff]  ;;  %v4479_v29 = vld [vmem:[#allocation5 + $0xd28] sm:$0xff] }
 0x576   : > { %2479 = vmatprep.subr.mxu1 %v4435_v30  ;;  %2561 = vmatprep.subr.mxu0 %v4436_v31  ;;  %v4480_v2 = vld [vmem:[#allocation5 + $0xf28] sm:$0xff]  ;;  %v4481_v30 = vld [vmem:[#allocation5 + $0xd20] sm:$0xff] }
 0x577   : > { %2480 = vmatpush2.msra.mxu1 %v4437_v32  ;;  %2562 = vmatpush2.msra.mxu0 %v4438_v33  ;;  %v4482_v31 = vld [vmem:[#allocation5 + $0xf20] sm:$0xff]  ;;  %v4483_v32 = vld [vmem:[#allocation5 + $0xd18] sm:$0xff] }
 0x578   : > { %2481 = vmatprep.subr.mxu1 %v4439_v34  ;;  %2563 = vmatprep.subr.mxu0 %v4440_v35  ;;  %v4484_v33 = vld [vmem:[#allocation5 + $0xf18] sm:$0xff]  ;;  %v4485_v34 = vld [vmem:[#allocation5 + $0xd10] sm:$0xff] }
 0x579   : > { %2482 = vmatpush2.msra.mxu1 %v4441_v36  ;;  %2564 = vmatpush2.msra.mxu0 %v4442_v37  ;;  %v4486_v35 = vld [vmem:[#allocation5 + $0xf10] sm:$0xff]  ;;  %v5660_v36 = vpop.permute.xlu1 %2602  ;;  %v4487_v37 = vld [vmem:[#allocation5 + $0xd08] sm:$0xff] }
 0x57a   : > { %2483 = vmatprep.subr.mxu1 %v4443_v38  ;;  %2565 = vmatprep.subr.mxu0 %v4444_v40  ;;  %v4488_v38 = vld [vmem:[#allocation5 + $0xf08] sm:$0xff]  ;;  %v2441_v40 = vmul.f32 %v5652_v61, %v5622_v9 }
 0x57b   : > { %2484 = vmatpush2.msra.mxu1 %v4445_v42  ;;  %2566 = vmatpush2.msra.mxu0 %v4446_v43  ;;  %v2523_v42 = vmul.f32 %v5654_v0, %v5622_v9  ;;  %v4489_v43 = vld [vmem:[#allocation5 + $0xd00] sm:$0xff]  ;;  %v4493_v61 = vld [vmem:[#allocation5 + $0x10e8] sm:$0xff] }
 0x57c   : > { %2485 = vmatprep.subr.mxu1 %v4447_v44  ;;  %2567 = vmatprep.subr.mxu0 %v4448_v45  ;;  %v4490_v44 = vld [vmem:[#allocation5 + $0xf00] sm:$0xff]  ;;  %v2606_v45 = vmul.f32 %v5660_v36, %v5624_v10 }
 0x57d   : > { %2486 = vmatpush2.msra.mxu1 %v4449_v46  ;;  %2568 = vmatpush2.msra.mxu0 %v4450_v60  ;;  %v4491_v46 = vld [vmem:[#allocation5 + $0x10f8] sm:$0xff]  ;;  %v4492_v60 = vld [vmem:[#allocation5 + $0x10f0] sm:$0xff]  ;;  %v4494_v0 = vld [vmem:[#allocation5 + $0x10e0] sm:$0xff] }
 0x57e   : > { %2487 = vmatprep.subr.mxu1 %v4451_v62  ;;  %2569 = vmatprep.subr.mxu0 %v4452_v63  ;;  %v4495_v62 = vld [vmem:[#allocation5 + $0x10d8] sm:$0xff]  ;;  %v4496_v63 = vld [vmem:[#allocation5 + $0x10d0] sm:$0xff] }
 0x57f   : > { %2488 = vmatpush2.msra.mxu1 %v4453_v1  ;;  %2570 = vmatpush2.msra.mxu0 %v4454_v3  ;;  %v4497_v1 = vld [vmem:[#allocation5 + $0x10c8] sm:$0xff]  ;;  %v4505_v3 = vld [vmem:[#allocation5 + $0x298] sm:$0xff] }
 0x580   : > { %2489 = vmatprep.subr.mxu1 %v4455_v4  ;;  %2571 = vmatprep.subr.mxu0 %v4456_v41  ;;  %v4507_v4 = vld [vmem:[#allocation5 + $0x290] sm:$0xff]  ;;  %v4509_v41 = vld [vmem:[#allocation5 + $0x288] sm:$0xff] }
 0x581   : > { %2490 = vmatpush2.msra.mxu1 %v4457_v39  ;;  %2572 = vmatpush2.msra.mxu0 %v4458_v5  ;;  %v4511_v39 = vld [vmem:[#allocation5 + $0x280] sm:$0xff]  ;;  %v4513_v5 = vld [vmem:[#allocation5 + $0x278] sm:$0xff] }
 0x582   : > { %2491 = vmatprep.subr.mxu1 %v4459_v6  ;;  %2573 = vmatprep.subr.mxu0 %v4460_v18  ;;  %v4515_v6 = vld [vmem:[#allocation5 + $0x270] sm:$0xff]  ;;  %v4516_v18 = vld [vmem:[#allocation5 + $0x1060] sm:$0xff] }
 0x583   : > { %2492 = vmatpush2.msra.mxu1 %v4461_v11  ;;  %2574 = vmatpush2.msra.mxu0 %v4462_v8  ;;  %v4517_v11 = vld [vmem:[#allocation5 + $0x268] sm:$0xff]  ;;  %v4518_v8 = vld [vmem:[#allocation5 + $0x1058] sm:$0xff] }
 0x584   : > { %2493 = vmatprep.subr.mxu1 %v4463_v12  ;;  %2575 = vmatprep.subr.mxu0 %v4464_v14  ;;  %v4519_v12 = vld [vmem:[#allocation5 + $0x260] sm:$0xff]  ;;  %v4520_v14 = vld [vmem:[#allocation5 + $0x1050] sm:$0xff] }
 0x585   : > { %2494 = vmatpush2.msra.mxu1 %v4465_v26  ;;  %2576 = vmatpush2.msra.mxu0 %v4466_v13  ;;  %v4521_v26 = vld [vmem:[#allocation5 + $0x258] sm:$0xff]  ;;  %v4522_v13 = vld [vmem:[#allocation5 + $0x1048] sm:$0xff] }
 0x586   : > { %2495 = vmatprep.subr.mxu1 %v4467_v15  ;;  %2577 = vmatprep.subr.mxu0 %v4468_v51  ;;  %v4523_v15 = vld [vmem:[#allocation5 + $0x250] sm:$0xff]  ;;  %v4524_v51 = vld [vmem:[#allocation5 + $0x1040] sm:$0xff] }
 0x587   : > { %2496 = vmatpush2.msra.mxu1 %v4469_v16  ;;  %2578 = vmatpush2.msra.mxu0 %v4470_v55  ;;  %v4525_v16 = vld [vmem:[#allocation5 + $0x248] sm:$0xff]  ;;  %v4526_v55 = vld [vmem:[#allocation5 + $0x1038] sm:$0xff] }
 0x588   : > { %2497 = vmatprep.subr.mxu1 %v4471_v19  ;;  %2579 = vmatprep.subr.mxu0 %v4472_v21  ;;  %v4527_v19 = vld [vmem:[#allocation5 + $0x240] sm:$0xff]  ;;  %v4528_v21 = vld [vmem:[#allocation5 + $0x1030] sm:$0xff] }
 0x589   : > { %2498 = vmatpush2.msra.mxu1 %v4473_v23  ;;  %2580 = vmatpush2.msra.mxu0 %v4474_v24  ;;  %v4529_v23 = vld [vmem:[#allocation5 + $0x238] sm:$0xff]  ;;  %v4530_v24 = vld [vmem:[#allocation5 + $0x1028] sm:$0xff] }
 0x58a   : > { %2499 = vmatprep.subr.mxu1 %v4475_v7  ;;  %2581 = vmatprep.subr.mxu0 %v4476_v25  ;;  %v4531_v7 = vld [vmem:[#allocation5 + $0x230] sm:$0xff]  ;;  %v4532_v25 = vld [vmem:[#allocation5 + $0x1020] sm:$0xff] }
 0x58b   : > { %2500 = vmatpush2.msra.mxu1 %v4477_v27  ;;  %2582 = vmatpush2.msra.mxu0 %v4478_v28  ;;  %v4533_v27 = vld [vmem:[#allocation5 + $0x228] sm:$0xff]  ;;  %v4534_v28 = vld [vmem:[#allocation5 + $0x1018] sm:$0xff] }
 0x58c   : > { %2501 = vmatprep.subr.mxu1 %v4479_v29  ;;  %2583 = vmatprep.subr.mxu0 %v4480_v2  ;;  %v4535_v29 = vld [vmem:[#allocation5 + $0x220] sm:$0xff]  ;;  %v4536_v2 = vld [vmem:[#allocation5 + $0x1010] sm:$0xff] }
 0x58d   : > { %2502 = vmatpush2.msra.mxu1 %v4481_v30  ;;  %2584 = vmatpush2.msra.mxu0 %v4482_v31  ;;  %v4537_v30 = vld [vmem:[#allocation5 + $0x218] sm:$0xff]  ;;  %v4538_v31 = vld [vmem:[#allocation5 + $0x1008] sm:$0xff] }
 0x58e   : > { %2503 = vmatprep.subr.mxu1 %v4483_v32  ;;  %2585 = vmatprep.subr.mxu0 %v4484_v33  ;;  %v4539_v32 = vld [vmem:[#allocation5 + $0x210] sm:$0xff]  ;;  %v4540_v33 = vld [vmem:[#allocation5 + $0x1000] sm:$0xff] }
 0x58f   : > { %2504 = vmatpush2.msra.mxu1 %v4485_v34  ;;  %2586 = vmatpush2.msra.mxu0 %v4486_v35  ;;  %v4541_v34 = vld [vmem:[#allocation5 + $0x208] sm:$0xff]  ;;  %v4542_v35 = vld [vmem:[#allocation5 + $0x11f8] sm:$0xff] }
 0x590   : > { %2505 = vmatprep.subr.mxu1 %v4487_v37  ;;  %2587 = vmatprep.subr.mxu0 %v4488_v38  ;;  %v4543_v37 = vld [vmem:[#allocation5 + $0x200] sm:$0xff]  ;;  %v4544_v38 = vld [vmem:[#allocation5 + $0x11f0] sm:$0xff] }
 0x591   : > { %2506 = vmatpush2.msra.mxu1 %v4489_v43  ;;  %2588 = vmatpush2.msra.mxu0 %v4490_v44  ;;  %v4547_v43 = vld [vmem:[#allocation5 + $0x3f0] sm:$0xff]  ;;  %v4548_v44 = vld [vmem:[#allocation5 + $0x11e0] sm:$0xff] }
 0x592   : > { %2508 = vmatmul.mubr.f32.vlgmr.msra.gmra.mxu1 %v2441_v40  ;;  %2590 = vmatmul.mubr.f32.vlgmr.msra.gmra.mxu0 %v2523_v42  ;;  %v4545_v40 = vld [vmem:[#allocation5 + $0x3f8] sm:$0xff]  ;;  %v4546_v42 = vld [vmem:[#allocation5 + $0x11e8] sm:$0xff] }
 0x593   : > { %2607 = vmatprep.subr.mxu1 %v4491_v46  ;;  %2671 = vmatprep.mubr.f32.mxu1 %v2606_v45  ;;  %v4549_v45 = vld [vmem:[#allocation5 + $0x3e8] sm:$0xff]  ;;  %v4550_v46 = vld [vmem:[#allocation5 + $0x11d8] sm:$0xff] }
 0x594   : > { %2608 = vmatpush1.msra.mxu1 %v4492_v60  ;;  %2854 = vmatprep.subr.mxu0 %v5583_v47  ;;  %v4498_v47 = vld [vmem:[#allocation5 + $0x10c0] sm:$0xff] }
 0x595   : > { %2609 = vmatprep.subr.mxu1 %v4493_v61  ;;  %2855 = vmatpush1.msra.mxu0 %v5586_v48  ;;  %v4499_v48 = vld [vmem:[#allocation5 + $0x10b8] sm:$0xff]  ;;  %v4551_v60 = vld [vmem:[#allocation5 + $0x3e0] sm:$0xff]  ;;  %v4552_v61 = vld [vmem:[#allocation5 + $0x11d0] sm:$0xff] }
 0x596   : > { %2610 = vmatpush1.msra.mxu1 %v4494_v0  ;;  %2856 = vmatprep.subr.mxu0 %v5589_v49  ;;  %v4500_v49 = vld [vmem:[#allocation5 + $0x10b0] sm:$0xff]  ;;  %v4553_v0 = vld [vmem:[#allocation5 + $0x3d8] sm:$0xff] }
 0x597   : > { %2611 = vmatprep.subr.mxu1 %v4495_v62  ;;  %2857 = vmatpush1.msra.mxu0 %v5592_v50  ;;  %v4501_v50 = vld [vmem:[#allocation5 + $0x10a8] sm:$0xff] }
 0x598   : > { %2612 = vmatpush1.msra.mxu1 %v4496_v63  ;;  %2858 = vmatprep.subr.mxu0 %v5595_v52  ;;  %v4502_v52 = vld [vmem:[#allocation5 + $0x10a0] sm:$0xff]  ;;  %v4554_v62 = vld [vmem:[#allocation5 + $0x11c8] sm:$0xff]  ;;  %v4555_v63 = vld [vmem:[#allocation5 + $0x3d0] sm:$0xff] }
 0x599   : > { %2613 = vmatprep.subr.mxu1 %v4497_v1  ;;  %2859 = vmatpush1.msra.mxu0 %v5598_v53  ;;  %v4503_v53 = vld [vmem:[#allocation5 + $0x1098] sm:$0xff]  ;;  %v4556_v1 = vld [vmem:[#allocation5 + $0x11c0] sm:$0xff] }
 0x59a   : > { %2614 = vmatpush1.msra.mxu1 %v4498_v47  ;;  %2860 = vmatprep.subr.mxu0 %v5601_v54  ;;  %v4504_v54 = vld [vmem:[#allocation5 + $0x1090] sm:$0xff]  ;;  %v4557_v47 = vld [vmem:[#allocation5 + $0x3c8] sm:$0xff] }
 0x59b   : > { %2615 = vmatprep.subr.mxu1 %v4499_v48  ;;  %2861 = vmatpush1.msra.mxu0 %v5604_v56  ;;  %v4506_v56 = vld [vmem:[#allocation5 + $0x1088] sm:$0xff]  ;;  %v4558_v48 = vld [vmem:[#allocation5 + $0x11b8] sm:$0xff] }
 0x59c   : > { %2616 = vmatpush1.msra.mxu1 %v4500_v49  ;;  %2862 = vmatprep.subr.mxu0 %v5607_v20  ;;  %v4508_v20 = vld [vmem:[#allocation5 + $0x1080] sm:$0xff] }
 0x59d   : > { %2617 = vmatprep.subr.mxu1 %v4501_v50  ;;  %2863 = vmatpush1.msra.mxu0 %v5610_v57  ;;  %v4510_v57 = vld [vmem:[#allocation5 + $0x1078] sm:$0xff]  ;;  %v4559_v49 = vld [vmem:[#allocation5 + $0x3c0] sm:$0xff]  ;;  %v4560_v50 = vld [vmem:[#allocation5 + $0x11b0] sm:$0xff] }
 0x59e   : > { %2618 = vmatpush1.msra.mxu1 %v4502_v52  ;;  %2864 = vmatprep.subr.mxu0 %v5613_v58  ;;  %v4512_v58 = vld [vmem:[#allocation5 + $0x1070] sm:$0xff]  ;;  %v4561_v52 = vld [vmem:[#allocation5 + $0x3b8] sm:$0xff] }
 0x59f   : > { %2619 = vmatprep.subr.mxu1 %v4503_v53  ;;  %2865 = vmatpush1.msra.mxu0 %v5616_v59  ;;  %v4514_v59 = vld [vmem:[#allocation5 + $0x1068] sm:$0xff] }
 0x5a0   : > { %2620 = vmatpush1.msra.mxu1 %v4504_v54  ;;  %2866 = vmatprep.subr.mxu0 %v4505_v3  ;;  %v4562_v53 = vld [vmem:[#allocation5 + $0x11a8] sm:$0xff]  ;;  %v4563_v54 = vld [vmem:[#allocation5 + $0x3b0] sm:$0xff]  ;;  %v4564_v3 = vld [vmem:[#allocation5 + $0x11a0] sm:$0xff] }
 0x5a1   : > { %2621 = vmatprep.subr.mxu1 %v4506_v56  ;;  %2867 = vmatpush1.msra.mxu0 %v4507_v4  ;;  %v4565_v56 = vld [vmem:[#allocation5 + $0x3a8] sm:$0xff]  ;;  %v4566_v4 = vld [vmem:[#allocation5 + $0x1198] sm:$0xff] }
 0x5a2   : > { %2622 = vmatpush1.msra.mxu1 %v4508_v20  ;;  %2868 = vmatprep.subr.mxu0 %v4509_v41  ;;  %v4567_v20 = vld [vmem:[#allocation5 + $0x3a0] sm:$0xff]  ;;  %v4568_v41 = vld [vmem:[#allocation5 + $0x1190] sm:$0xff] }
 0x5a3   : > { %2623 = vmatprep.subr.mxu1 %v4510_v57  ;;  %2869 = vmatpush1.msra.mxu0 %v4511_v39  ;;  %v4569_v57 = vld [vmem:[#allocation5 + $0x398] sm:$0xff]  ;;  %v4570_v39 = vld [vmem:[#allocation5 + $0x1188] sm:$0xff] }
 0x5a4   : > { %2624 = vmatpush1.msra.mxu1 %v4512_v58  ;;  %2870 = vmatprep.subr.mxu0 %v4513_v5  ;;  %v4571_v58 = vld [vmem:[#allocation5 + $0x390] sm:$0xff]  ;;  %v4572_v5 = vld [vmem:[#allocation5 + $0x1180] sm:$0xff] }
 0x5a5   : > { %2625 = vmatprep.subr.mxu1 %v4514_v59  ;;  %2871 = vmatpush1.msra.mxu0 %v4515_v6  ;;  %v4573_v59 = vld [vmem:[#allocation5 + $0x388] sm:$0xff]  ;;  %v4574_v6 = vld [vmem:[#allocation5 + $0x1178] sm:$0xff] }
 0x5a6   : > { %2626 = vmatpush1.msra.mxu1 %v4516_v18  ;;  %2872 = vmatprep.subr.mxu0 %v4517_v11  ;;  %v4575_v18 = vld [vmem:[#allocation5 + $0x380] sm:$0xff]  ;;  %v4576_v11 = vld [vmem:[#allocation5 + $0x1170] sm:$0xff] }
 0x5a7   : > { %2627 = vmatprep.subr.mxu1 %v4518_v8  ;;  %2873 = vmatpush1.msra.mxu0 %v4519_v12  ;;  %v4577_v8 = vld [vmem:[#allocation5 + $0x378] sm:$0xff]  ;;  %v4578_v12 = vld [vmem:[#allocation5 + $0x1168] sm:$0xff] }
 0x5a8   : > { %2628 = vmatpush1.msra.mxu1 %v4520_v14  ;;  %2874 = vmatprep.subr.mxu0 %v4521_v26  ;;  %v4579_v14 = vld [vmem:[#allocation5 + $0x370] sm:$0xff]  ;;  %v4580_v26 = vld [vmem:[#allocation5 + $0x1160] sm:$0xff] }
 0x5a9   : > { %2629 = vmatprep.subr.mxu1 %v4522_v13  ;;  %2875 = vmatpush1.msra.mxu0 %v4523_v15  ;;  %v4581_v13 = vld [vmem:[#allocation5 + $0x368] sm:$0xff]  ;;  %v4582_v15 = vld [vmem:[#allocation5 + $0x1158] sm:$0xff] }
 0x5aa   : > { %2630 = vmatpush1.msra.mxu1 %v4524_v51  ;;  %2876 = vmatprep.subr.mxu0 %v4525_v16  ;;  %v4583_v51 = vld [vmem:[#allocation5 + $0x360] sm:$0xff]  ;;  %v4584_v16 = vld [vmem:[#allocation5 + $0x1150] sm:$0xff] }
 0x5ab   : > { %2631 = vmatprep.subr.mxu1 %v4526_v55  ;;  %2877 = vmatpush1.msra.mxu0 %v4527_v19  ;;  %v4585_v55 = vld [vmem:[#allocation5 + $0x358] sm:$0xff]  ;;  %v4586_v19 = vld [vmem:[#allocation5 + $0x1148] sm:$0xff] }
 0x5ac   : > { %2632 = vmatpush1.msra.mxu1 %v4528_v21  ;;  %2878 = vmatprep.subr.mxu0 %v4529_v23  ;;  %v4587_v21 = vld [vmem:[#allocation5 + $0x350] sm:$0xff]  ;;  %v4588_v23 = vld [vmem:[#allocation5 + $0x1140] sm:$0xff] }
 0x5ad   : > { %2633 = vmatprep.subr.mxu1 %v4530_v24  ;;  %2879 = vmatpush1.msra.mxu0 %v4531_v7  ;;  %v4589_v24 = vld [vmem:[#allocation5 + $0x348] sm:$0xff]  ;;  %v4590_v7 = vld [vmem:[#allocation5 + $0x1138] sm:$0xff] }
 0x5ae   : > { %2634 = vmatpush1.msra.mxu1 %v4532_v25  ;;  %2880 = vmatprep.subr.mxu0 %v4533_v27  ;;  %v4591_v25 = vld [vmem:[#allocation5 + $0x340] sm:$0xff]  ;;  %v4592_v27 = vld [vmem:[#allocation5 + $0x1130] sm:$0xff] }
 0x5af   : > { %2635 = vmatprep.subr.mxu1 %v4534_v28  ;;  %2881 = vmatpush1.msra.mxu0 %v4535_v29  ;;  %v4593_v28 = vld [vmem:[#allocation5 + $0x338] sm:$0xff]  ;;  %v4594_v29 = vld [vmem:[#allocation5 + $0x1128] sm:$0xff] }
 0x5b0   : > { %2636 = vmatpush1.msra.mxu1 %v4536_v2  ;;  %2882 = vmatprep.subr.mxu0 %v4537_v30  ;;  %v4595_v2 = vld [vmem:[#allocation5 + $0x330] sm:$0xff]  ;;  %v4596_v30 = vld [vmem:[#allocation5 + $0x1120] sm:$0xff] }
 0x5b1   : > { %2637 = vmatprep.subr.mxu1 %v4538_v31  ;;  %2883 = vmatpush1.msra.mxu0 %v4539_v32  ;;  %v4597_v31 = vld [vmem:[#allocation5 + $0x328] sm:$0xff]  ;;  %v4598_v32 = vld [vmem:[#allocation5 + $0x1118] sm:$0xff] }
 0x5b2   : > { %2638 = vmatpush1.msra.mxu1 %v4540_v33  ;;  %2884 = vmatprep.subr.mxu0 %v4541_v34  ;;  %v4599_v33 = vld [vmem:[#allocation5 + $0x320] sm:$0xff]  ;;  %v4600_v34 = vld [vmem:[#allocation5 + $0x1110] sm:$0xff] }
 0x5b3   : > { %2639 = vmatprep.subr.mxu1 %v4542_v35  ;;  %2885 = vmatpush1.msra.mxu0 %v4543_v37  ;;  %v4601_v35 = vld [vmem:[#allocation5 + $0x318] sm:$0xff]  ;;  %v4602_v37 = vld [vmem:[#allocation5 + $0x1108] sm:$0xff] }
 0x5b4   : > { %2640 = vmatpush2.msra.mxu1 %v4544_v38  ;;  %2886 = vmatprep.subr.mxu0 %v4545_v40  ;;  %v2605_v38 = vmul.f32 %v5660_v36, %v5622_v9  ;;  %v4603_v40 = vld [vmem:[#allocation5 + $0x310] sm:$0xff] }
 0x5b5   : > { %2641 = vmatprep.subr.mxu1 %v4546_v42  ;;  %2887 = vmatpush2.msra.mxu0 %v4547_v43  ;;  %v4604_v42 = vld [vmem:[#allocation5 + $0x1100] sm:$0xff]  ;;  %v4605_v43 = vld [vmem:[#allocation5 + $0x308] sm:$0xff] }
 0x5b6   : > { %2642 = vmatpush2.msra.mxu1 %v4548_v44  ;;  %2888 = vmatprep.subr.mxu0 %v4549_v45  ;;  %v4606_v44 = vld [vmem:[#allocation5 + $0x300] sm:$0xff]  ;;  %v4607_v45 = vld [vmem:[#allocation5 + $0x4f8] sm:$0xff] }
 0x5b7   : > { %2643 = vmatprep.subr.mxu1 %v4550_v46  ;;  %2889 = vmatpush2.msra.mxu0 %v4551_v60  ;;  %v2030_v46 = vpop.f32.mrf.mxu1  ;;  %v2101_v60 = vpop.f32.mrf.mxu0 }
 0x5b8   : > { %2644 = vmatpush2.msra.mxu1 %v4552_v61  ;;  %2890 = vmatprep.subr.mxu0 %v4553_v0 }
 0x5b9   : > { %2645 = vmatprep.subr.mxu1 %v4554_v62  ;;  %2891 = vmatpush2.msra.mxu0 %v4555_v63  ;;  %v2032_v61 = vpop.f32.mrf.mxu1  ;;  %v2103_v62 = vpop.f32.mrf.mxu0  ;;  %v2102_v63 = vadd.f32 %v2101_v60, %v2030_v46  ;;  %v3854_v60 = vld [vmem:[%s5862_s5 + $0x1] sm:$0x1] }
 0x5ba   : > { %2646 = vmatpush2.msra.mxu1 %v4556_v1  ;;  %2892 = vmatprep.subr.mxu0 %v4557_v47  ;;  %v2104_v1 = vadd.f32 %v2103_v62, %v2032_v61 }
 0x5bb   : > { %2647 = vmatprep.subr.mxu1 %v4558_v48  ;;  %2893 = vmatpush2.msra.mxu0 %v4559_v49 }
 0x5bc   : > { %2648 = vmatpush2.msra.mxu1 %v4560_v50  ;;  %2894 = vmatprep.subr.mxu0 %v4561_v52 }
 0x5bd   : > { %2649 = vmatprep.subr.mxu1 %v4562_v53  ;;  %2895 = vmatpush2.msra.mxu0 %v4563_v54 }
 0x5be   : > { %2650 = vmatpush2.msra.mxu1 %v4564_v3  ;;  %2896 = vmatprep.subr.mxu0 %v4565_v56 }
 0x5bf   : > { %2651 = vmatprep.subr.mxu1 %v4566_v4  ;;  %2897 = vmatpush2.msra.mxu0 %v4567_v20 }
 0x5c0   : > { %2652 = vmatpush2.msra.mxu1 %v4568_v41  ;;  %2898 = vmatprep.subr.mxu0 %v4569_v57 }
 0x5c1   : > { %2653 = vmatprep.subr.mxu1 %v4570_v39  ;;  %2899 = vmatpush2.msra.mxu0 %v4571_v58 }
 0x5c2   : > { %2654 = vmatpush2.msra.mxu1 %v4572_v5  ;;  %2900 = vmatprep.subr.mxu0 %v4573_v59 }
 0x5c3   : > { %2655 = vmatprep.subr.mxu1 %v4574_v6  ;;  %2901 = vmatpush2.msra.mxu0 %v4575_v18 }
 0x5c4   : > { %2656 = vmatpush2.msra.mxu1 %v4576_v11  ;;  %2902 = vmatprep.subr.mxu0 %v4577_v8 }
 0x5c5   : > { %2657 = vmatprep.subr.mxu1 %v4578_v12  ;;  %2903 = vmatpush2.msra.mxu0 %v4579_v14 }
 0x5c6   : > { %2658 = vmatpush2.msra.mxu1 %v4580_v26  ;;  %2904 = vmatprep.subr.mxu0 %v4581_v13  ;;  %v2685_v13 = vpop.permute.xlu1 %2684 }
 0x5c7   : > { %2659 = vmatprep.subr.mxu1 %v4582_v15  ;;  %2905 = vmatpush2.msra.mxu0 %v4583_v51 }
 0x5c8   : > { %2660 = vmatpush2.msra.mxu1 %v4584_v16  ;;  %2906 = vmatprep.subr.mxu0 %v4585_v55 }
 0x5c9   : > { %2661 = vmatprep.subr.mxu1 %v4586_v19  ;;  %2907 = vmatpush2.msra.mxu0 %v4587_v21 }
 0x5ca   : > { %2662 = vmatpush2.msra.mxu1 %v4588_v23  ;;  %2908 = vmatprep.subr.mxu0 %v4589_v24 }
 0x5cb   : > { %2663 = vmatprep.subr.mxu1 %v4590_v7  ;;  %2909 = vmatpush2.msra.mxu0 %v4591_v25 }
 0x5cc   : > { %2664 = vmatpush2.msra.mxu1 %v4592_v27  ;;  %2910 = vmatprep.subr.mxu0 %v4593_v28 }
 0x5cd   : > { %2665 = vmatprep.subr.mxu1 %v4594_v29  ;;  %2911 = vmatpush2.msra.mxu0 %v4595_v2 }
 0x5ce   : > { %2666 = vmatpush2.msra.mxu1 %v4596_v30  ;;  %2912 = vmatprep.subr.mxu0 %v4597_v31  ;;  %v2181_v0 = vpop.f32.mrf.mxu1  ;;  %v2263_v48 = vpop.f32.mrf.mxu0 }
 0x5cf   : > { %2667 = vmatprep.subr.mxu1 %v4598_v32  ;;  %2913 = vmatpush2.msra.mxu0 %v4599_v33  ;;  %v2186_v47 = vadd.f32 %v2181_v0, %v2102_v63  ;;  %v3867_v33 = vld [vmem:[%s5859_s2 + $0x5c] sm:$0xf] }
 0x5d0   : > { %2668 = vmatpush2.msra.mxu1 %v4600_v34  ;;  %2914 = vmatprep.subr.mxu0 %v4601_v35  ;;  %v2183_v36 = vpop.f32.mrf.mxu1  ;;  %v2265_v53 = vpop.f32.mrf.mxu0  ;;  %v3853_v34 = vld [vmem:[%s5861_s4 + $0x4] sm:$0xf] }
 0x5d1   : > { %2669 = vmatprep.subr.mxu1 %v4602_v37  ;;  %2915 = vmatpush2.msra.mxu0 %v4603_v40  ;;  %v2187_v50 = vadd.f32 %v2183_v36, %v2104_v1  ;;  %v2268_v52 = vadd.f32 %v2263_v48, %v2186_v47  ;;  %v3855_v48 = vld [vmem:[%s5863_s6 + $0x4] sm:$0xf] }
 0x5d2   : > { %2670 = vmatpush2.msra.mxu1 %v4604_v42  ;;  %2916 = vmatprep.subr.mxu0 %v4605_v43 }
 0x5d3   : > { %2672 = vmatmul.mubr.f32.vlgmr.msra.gmra.mxu1 %v2605_v38  ;;  %2917 = vmatpush2.msra.mxu0 %v4606_v44  ;;  %v2269_v3 = vadd.f32 %v2265_v53, %v2187_v50  ;;  %v3856_v50 = vld [vmem:[%s5864_s7 + $0x4] sm:$0xf] }
 0x5d4   : > { %2827 = vmatprep.mubr.f32.mxu1 %v5249_v17  ;;  %3005 = vmatprep.subr.mxu0 %v4607_v45 }
 0x610   : > { %v2345_v49 = vpop.f32.mrf.mxu1  ;;  %v2427_v4 = vpop.f32.mrf.mxu0 }
 0x611   : > { %v2350_v56 = vadd.f32 %v2345_v49, %v2268_v52 }
 0x612   : > { %v2347_v54 = vpop.f32.mrf.mxu1  ;;  %v2429_v39 = vpop.f32.mrf.mxu0 }
 0x613   : > { %v2351_v41 = vadd.f32 %v2347_v54, %v2269_v3  ;;  %v2432_v57 = vadd.f32 %v2427_v4, %v2350_v56 }
 0x615   : > { %v2433_v5 = vadd.f32 %v2429_v39, %v2351_v41  ;;  %v3863_v41 = vld [vmem:[%s5859_s2 + $0x4c] sm:$0xf]  ;;  %v3864_v39 = vld [vmem:[%s5859_s2 + $0x50] sm:$0xf] }
 0x652   : > { %v2509_v20 = vpop.f32.mrf.mxu1  ;;  %v2591_v6 = vpop.f32.mrf.mxu0 }
 0x653   : > { %v2514_v59 = vadd.f32 %v2509_v20, %v2432_v57  ;;  %v3858_v20 = vld [vmem:[%s5866_s9 + $0x8] sm:$0xf] }
 0x654   : > { %v2511_v58 = vpop.f32.mrf.mxu1  ;;  %v2593_v8 = vpop.f32.mrf.mxu0  ;;  %v3862_v57 = vld [vmem:[%s5859_s2 + $0x48] sm:$0xf] }
 0x655   : > { %v2515_v18 = vadd.f32 %v2511_v58, %v2433_v5  ;;  %v2596_v11 = vadd.f32 %v2591_v6, %v2514_v59  ;;  %v3865_v58 = vld [vmem:[%s5859_s2 + $0x54] sm:$0xf]  ;;  %v3866_v5 = vld [vmem:[%s5859_s2 + $0x58] sm:$0xf]  ;;  %v3868_v59 = vld [vmem:[%s5859_s2 + $0x60] sm:$0xf] }
 0x656   : > { %v3869_v6 = vld [vmem:[%s5859_s2 + $0x64] sm:$0xf] }
 0x657   : > { %v2597_v14 = vadd.f32 %v2593_v8, %v2515_v18  ;;  %v3870_v18 = vld [vmem:[%s5859_s2 + $0x68] sm:$0xf] }
 0x693   : > { %v2673_v12 = vpop.f32.mrf.mxu1 }
 0x694   : > { %v2678_v26 = vadd.f32 %v2673_v12, %v2596_v11  ;;  %v3871_v11 = vld [vmem:[%s5860_s3 + $0x8] sm:$0xf] }
 0x695   : > { %v2675_v15 = vpop.f32.mrf.mxu1 }
 0x696   : > { %v2687_v51 = vadd.f32 %v2685_v13, %v2678_v26  ;;  %v2679_v16 = vadd.f32 %v2675_v15, %v2597_v14  ;;  %v3857_v26 = vld [vmem:[%s5865_s8 + $0x8] sm:$0xf]  ;;  %v4609_v15 = vld [vmem:[#allocation5 + $0xf0] sm:$0xff] }
 0x698   : > { %v2689_v55 = vmul.f32 0.5, %v2687_v51  ;;  %v2688_v19 = vadd.f32 %v2685_v13, %v2679_v16  ;;  %v4608_v13 = vld [vmem:[#allocation5 + $0xf8] sm:$0xff]  ;;  %v4611_v16 = vld [vmem:[#allocation5 + $0xe0] sm:$0xff] }
 0x69a   : > { %3961 = vtanh.f32 %v2689_v55  ;;  %v2690_v21 = vmul.f32 0.5, %v2688_v19  ;;  %v4612_v55 = vld [vmem:[#allocation5 + $0xd8] sm:$0xff] }
 0x69c   : > { %3963 = vtanh.f32 %v2690_v21  ;;  %v4614_v21 = vld [vmem:[#allocation5 + $0xc8] sm:$0xff] }
 0x6a7   : > { %v3962_v23 = vpop.eup %3961 }
 0x6a8   : > { %v2693_v24 = vadd.f32 1.0, %v3962_v23  ;;  %v4615_v23 = vld [vmem:[#allocation5 + $0xc0] sm:$0xff] }
 0x6a9   : > { %v3964_v7 = vpop.eup %3963 }
 0x6aa   : > { %v2694_v25 = vadd.f32 1.0, %v3964_v7  ;;  %v2695_v27 = vmul.f32 0.5, %v2693_v24  ;;  %v4616_v24 = vld [vmem:[#allocation5 + $0xb8] sm:$0xff]  ;;  %v4617_v7 = vld [vmem:[#allocation5 + $0xb0] sm:$0xff] }
 0x6ac   : > { %v2696_v28 = vmul.f32 0.5, %v2694_v25  ;;  %v2697_v29 = vmul.f32 %v2695_v27, %v2687_v51  ;;  %v4610_v51 = vld [vmem:[#allocation5 + $0xe8] sm:$0xff]  ;;  %v4619_v27 = vld [vmem:[#allocation5 + $0xa0] sm:$0xff] }
 0x6ad   : > { %v4618_v25 = vld [vmem:[#allocation5 + $0xa8] sm:$0xff] }
 0x6ae   : > { %v2698_v2 = vmul.f32 %v2696_v28, %v2688_v19  ;;  %v2699_v30 = vsel %vm1808_vm0, %v2697_v29, 0.0  ;;  %v4613_v19 = vld [vmem:[#allocation5 + $0xd0] sm:$0xff]  ;;  %v4620_v28 = vld [vmem:[#allocation5 + $0x98] sm:$0xff] }
 0x6b0   : > { %v2700_v31 = vsel %vm1808_vm0, %v2698_v2, 0.0 }
 0x6b1   : > { %v2701_v32 = vadd.f32 %v2700_v31, %v2699_v30  ;;  %v4623_v30 = vld [vmem:[#allocation5 + $0x80] sm:$0xff]  ;;  %v4624_v31 = vld [vmem:[#allocation5 + $0x78] sm:$0xff] }
 0x6b3   : > { %2702 = vadd.xlane.f32.xlu1 %v2701_v32  ;;  %v4625_v32 = vld [vmem:[#allocation5 + $0x70] sm:$0xff] }
 0x6c4   : > { %3246 = vperm.xlu1 %3951, %v3867_v33   ;;  %v4626_v33 = vld [vmem:[#allocation5 + $0x68] sm:$0xff] }
 0x73c   : > { %v2703_v35 = vpop.xlane.xlu1 %2702 }
 0x73d   : > { %v2704_v37 = vmul.f32 0.00390625, %v2703_v35  ;;  %v4628_v35 = vld [vmem:[#allocation5 + $0x58] sm:$0xff] }
 0x73f   : > { %v2707_v38 = vmul.f32 %v3853_v34, %v2704_v37  ;;  %v4627_v34 = vld [vmem:[#allocation5 + $0x60] sm:$0xff]  ;;  %v4629_v37 = vld [vmem:[#allocation5 + $0x50] sm:$0xff] }
 0x741   : > { %v2708_v40 = vsel %vm1818_vm1, %v2707_v38, 0.0  ;;  %v4630_v38 = vld [vmem:[#allocation5 + $0x48] sm:$0xff] }
 0x742   : > { %v2709_v42 = vrot.slane %v2708_v40, 4 }
 0x744   : > { %v2710_v43 = vadd.f32 %v2709_v42, %v2708_v40  ;;  %v4631_v40 = vld [vmem:[#allocation5 + $0x40] sm:$0xff]  ;;  %v4632_v42 = vld [vmem:[#allocation5 + $0x38] sm:$0xff] }
 0x746   : > { %v2711_v44 = vrot.slane %v2710_v43, 2 }
 0x748   : > { %v2712_v45 = vadd.f32 %v2711_v44, %v2710_v43  ;;  %v4633_v43 = vld [vmem:[#allocation5 + $0x30] sm:$0xff]  ;;  %v4634_v44 = vld [vmem:[#allocation5 + $0x28] sm:$0xff] }
 0x74a   : > { %v2713_v46 = vrot.slane %v2712_v45, 1 }
 0x74c   : > { %v2714_v61 = vadd.f32 %v2713_v46, %v2712_v45  ;;  %v4635_v45 = vld [vmem:[#allocation5 + $0x20] sm:$0xff]  ;;  %v4636_v46 = vld [vmem:[#allocation5 + $0x18] sm:$0xff] }
 0x74e   : > { %v2717_v0 = vadd.f32 %v3854_v60, %v2714_v61  ;;  %v4637_v60 = vld [vmem:[#allocation5 + $0x10] sm:$0xff]  ;;  %v4638_v61 = vld [vmem:[#allocation5 + $0x8] sm:$0xff] }
 0x750   : > { %v2718_v62 = vmul.f32 0.5, %v2717_v0 }
 0x752   : > { %3965 = vtanh.f32 %v2718_v62  ;;  %v4640_v62 = vld [vmem:[#allocation5 + $0x1f8] sm:$0xff] }
 0x75f   : > { %v3966_v63 = vpop.eup %3965 }
 0x760   : > { %v2720_v36 = vadd.f32 1.0, %v3966_v63  ;;  %v4641_v63 = vld [vmem:[#allocation5 + $0x1f0] sm:$0xff] }
 0x762   : > { %v2721_v1 = vmul.f32 0.5, %v2720_v36  ;;  %v4642_v36 = vld [vmem:[#allocation5 + $0x1e8] sm:$0xff] }
 0x764   : > { %v2722_v47 = vmul.f32 %v2721_v1, %v2717_v0  ;;  %v4639_v0 = vld [vmem:[#allocation5] sm:$0xff] }
 0x765   : > { %v4643_v1 = vld [vmem:[#allocation5 + $0x1e0] sm:$0xff] }
 0x766   : > { %v2728_v49 = vrot.slane %v2722_v47, %v5535_v22  ;;  %v4644_v47 = vld [vmem:[#allocation5 + $0x1d8] sm:$0xff] }
 0x768   : > { %v2729_v52 = vmul.f32 %v3855_v48, %v2728_v49  ;;  %v4645_v48 = vld [vmem:[#allocation5 + $0x1d0] sm:$0xff]  ;;  %v4646_v49 = vld [vmem:[#allocation5 + $0x1c8] sm:$0xff] }
 0x76a   : > { %v2733_v53 = vadd.f32 %v3856_v50, %v2729_v52  ;;  %v4647_v50 = vld [vmem:[#allocation5 + $0x1c0] sm:$0xff]  ;;  %v4648_v52 = vld [vmem:[#allocation5 + $0x1b8] sm:$0xff] }
 0x76c   : > { %v2734_v54 = vmul.f32 0.5, %v2733_v53  ;;  %v4649_v53 = vld [vmem:[#allocation5 + $0x1b0] sm:$0xff] }
 0x76e   : > { %3967 = vtanh.f32 %v2734_v54  ;;  %v4650_v54 = vld [vmem:[#allocation5 + $0x1a8] sm:$0xff] }
 0x77b   : > { %v3968_v3 = vpop.eup %3967 }
 0x77c   : > { %v2736_v56 = vadd.f32 1.0, %v3968_v3  ;;  %v4651_v3 = vld [vmem:[#allocation5 + $0x1a0] sm:$0xff] }
 0x77e   : > { %v2737_v4 = vmul.f32 0.5, %v2736_v56  ;;  %v4652_v56 = vld [vmem:[#allocation5 + $0x198] sm:$0xff] }
 0x780   : > { %2740 = vperm.xlu0 %3950, %v2737_v4   ;;  %v4653_v4 = vld [vmem:[#allocation5 + $0x190] sm:$0xff] }
 0x784   : > { %2751 = vperm.xlu0 %3950, %v3858_v20   ;;  %v4654_v20 = vld [vmem:[#allocation5 + $0x188] sm:$0xff] }
 0x788   : > { %2849 = vperm.xlu0 %3950, %v3863_v41   ;;  %v4655_v41 = vld [vmem:[#allocation5 + $0x180] sm:$0xff] }
 0x78c   : > { %2840 = vperm.xlu0 %3950, %v3862_v57   ;;  %v4656_v57 = vld [vmem:[#allocation5 + $0x178] sm:$0xff] }
 0x790   : > { %3000 = vperm.xlu0 %3950, %v3864_v39   ;;  %v4657_v39 = vld [vmem:[#allocation5 + $0x170] sm:$0xff] }
 0x794   : > { %3082 = vperm.xlu0 %3950, %v3865_v58   ;;  %v4658_v58 = vld [vmem:[#allocation5 + $0x168] sm:$0xff] }
 0x798   : > { %3164 = vperm.xlu0 %3950, %v3866_v5   ;;  %v4659_v5 = vld [vmem:[#allocation5 + $0x160] sm:$0xff] }
 0x79c   : > { %3328 = vperm.xlu0 %3950, %v3868_v59   ;;  %v4660_v59 = vld [vmem:[#allocation5 + $0x158] sm:$0xff] }
 0x7a0   : > { %3410 = vperm.xlu0 %3950, %v3869_v6   ;;  %v4661_v6 = vld [vmem:[#allocation5 + $0x150] sm:$0xff] }
 0x7a4   : > { %3492 = vperm.xlu0 %3950, %v3870_v18   ;;  %v4662_v18 = vld [vmem:[#allocation5 + $0x148] sm:$0xff] }
 0x7a8   : > { %3574 = vperm.xlu0 %3950, %v3871_v11   ;;  %v4663_v11 = vld [vmem:[#allocation5 + $0x140] sm:$0xff] }
 0x7fb   : > { %v2741_v8 = vpop.permute.xlu0 %2740 }
 0x7fc   : > { %v2743_v12 = vmul.f32 %v2741_v8, %v2697_v29  ;;  %v2744_v14 = vmul.f32 %v2741_v8, %v2698_v2  ;;  %v4621_v29 = vld [vmem:[#allocation5 + $0x90] sm:$0xff]  ;;  %v4622_v2 = vld [vmem:[#allocation5 + $0x88] sm:$0xff]  ;;  %v4664_v8 = vld [vmem:[#allocation5 + $0x138] sm:$0xff] }
 0x7fe   : > { %3859 = vmatprep.subr.msk.mxu1 %vm1808_vm0, %v2744_v14  ;;  %v4666_v14 = vld [vmem:[#allocation5 + $0x128] sm:$0xff] }
 0x7ff   : > { %3860 = vmatpush1.msk.msra.mxu1 %vm1808_vm0, %v2743_v12  ;;  %v4665_v12 = vld [vmem:[#allocation5 + $0x130] sm:$0xff] }
 0x800   : > { %3861 = vmatmul.mubr.msk.f32.vlgmr.msra.gmra.mxu1 %vm1860_vm2, %v3857_v26  ;;  %2925 = vmatprep.subr.mxu1 %v4608_v13  ;;  %v4667_v26 = vld [vmem:[#allocation5 + $0x120] sm:$0xff]  ;;  %v4668_v13 = vld [vmem:[#allocation5 + $0x118] sm:$0xff] }
 0x801   : > { %2926 = vmatpush1.msra.mxu1 %v4609_v15  ;;  %v4669_v15 = vld [vmem:[#allocation5 + $0x110] sm:$0xff] }
 0x802   : > { %2927 = vmatprep.subr.mxu1 %v4610_v51  ;;  %v4670_v51 = vld [vmem:[#allocation5 + $0x108] sm:$0xff] }
 0x803   : > { %2928 = vmatpush1.msra.mxu1 %v4611_v16  ;;  %v4671_v16 = vld [vmem:[#allocation5 + $0x100] sm:$0xff] }
 0x804   : > { %2929 = vmatprep.subr.mxu1 %v4612_v55  ;;  %v4672_v55 = vld [vmem:[#allocation5 + $0x6f8] sm:$0xff] }
 0x805   : > { %2930 = vmatpush1.msra.mxu1 %v4613_v19  ;;  %v2752_v19 = vpop.permute.xlu0 %2751 }
 0x806   : > { %2931 = vmatprep.subr.mxu1 %v4614_v21 }
 0x807   : > { %2932 = vmatpush1.msra.mxu1 %v4615_v23 }
 0x808   : > { %2933 = vmatprep.subr.mxu1 %v4616_v24 }
 0x809   : > { %2934 = vmatpush1.msra.mxu1 %v4617_v7  ;;  %v2850_v21 = vpop.permute.xlu0 %2849 }
 0x80a   : > { %2935 = vmatprep.subr.mxu1 %v4618_v25 }
 0x80b   : > { %2936 = vmatpush1.msra.mxu1 %v4619_v27 }
 0x80c   : > { %2937 = vmatprep.subr.mxu1 %v4620_v28 }
 0x80d   : > { %2938 = vmatpush1.msra.mxu1 %v4621_v29  ;;  %v2841_v23 = vpop.permute.xlu0 %2840 }
 0x80e   : > { %2939 = vmatprep.subr.mxu1 %v4622_v2 }
 0x80f   : > { %2940 = vmatpush1.msra.mxu1 %v4623_v30 }
 0x810   : > { %2941 = vmatprep.subr.mxu1 %v4624_v31 }
 0x811   : > { %2942 = vmatpush1.msra.mxu1 %v4625_v32  ;;  %v3001_v24 = vpop.permute.xlu0 %3000 }
 0x812   : > { %2943 = vmatprep.subr.mxu1 %v4626_v33 }
 0x813   : > { %2944 = vmatpush1.msra.mxu1 %v4627_v34 }
 0x814   : > { %2945 = vmatprep.subr.mxu1 %v4628_v35 }
 0x815   : > { %2946 = vmatpush1.msra.mxu1 %v4629_v37  ;;  %v5738_v7 = vpop.permute.xlu0 %3082 }
 0x816   : > { %2947 = vmatprep.subr.mxu1 %v4630_v38 }
 0x817   : > { %2948 = vmatpush1.msra.mxu1 %v4631_v40 }
 0x818   : > { %2949 = vmatprep.subr.mxu1 %v4632_v42  ;;  %v4673_v42 = vld [vmem:[#allocation5 + $0x4f0] sm:$0xff] }
 0x819   : > { %2950 = vmatpush1.msra.mxu1 %v4633_v43  ;;  %v5740_v25 = vpop.permute.xlu0 %3164  ;;  %v4674_v43 = vld [vmem:[#allocation5 + $0x6f0] sm:$0xff] }
 0x81a   : > { %2951 = vmatprep.subr.mxu1 %v4634_v44 }
 0x81b   : > { %2952 = vmatpush1.msra.mxu1 %v4635_v45  ;;  %v4675_v45 = vld [vmem:[#allocation5 + $0x4e8] sm:$0xff] }
 0x81c   : > { %2953 = vmatprep.subr.mxu1 %v4636_v46  ;;  %v4676_v46 = vld [vmem:[#allocation5 + $0x6e8] sm:$0xff] }
 0x81d   : > { %2954 = vmatpush1.msra.mxu1 %v4637_v60  ;;  %v5745_v31 = vpop.permute.xlu0 %3328  ;;  %v4677_v60 = vld [vmem:[#allocation5 + $0x4e0] sm:$0xff] }
 0x81e   : > { %2955 = vmatprep.subr.mxu1 %v4638_v61  ;;  %v4678_v61 = vld [vmem:[#allocation5 + $0x6e0] sm:$0xff] }
 0x81f   : > { %2956 = vmatpush1.msra.mxu1 %v4639_v0  ;;  %v4679_v0 = vld [vmem:[#allocation5 + $0x4d8] sm:$0xff] }
 0x820   : > { %2957 = vmatprep.subr.mxu1 %v4640_v62  ;;  %v4680_v62 = vld [vmem:[#allocation5 + $0x6d8] sm:$0xff] }
 0x821   : > { %2958 = vmatpush2.msra.mxu1 %v4641_v63  ;;  %v4681_v63 = vld [vmem:[#allocation5 + $0x4d0] sm:$0xff] }
 0x822   : > { %2959 = vmatprep.subr.mxu1 %v4642_v36  ;;  %v4682_v36 = vld [vmem:[#allocation5 + $0x6d0] sm:$0xff] }
 0x823   : > { %2960 = vmatpush2.msra.mxu1 %v4643_v1  ;;  %v4683_v1 = vld [vmem:[#allocation5 + $0x4c8] sm:$0xff] }
 0x824   : > { %2961 = vmatprep.subr.mxu1 %v4644_v47  ;;  %v4684_v47 = vld [vmem:[#allocation5 + $0x6c8] sm:$0xff] }
 0x825   : > { %2962 = vmatpush2.msra.mxu1 %v4645_v48  ;;  %v4685_v48 = vld [vmem:[#allocation5 + $0x4c0] sm:$0xff] }
 0x826   : > { %2963 = vmatprep.subr.mxu1 %v4646_v49  ;;  %v4686_v49 = vld [vmem:[#allocation5 + $0x6c0] sm:$0xff] }
 0x827   : > { %2964 = vmatpush2.msra.mxu1 %v4647_v50  ;;  %v4687_v50 = vld [vmem:[#allocation5 + $0x4b8] sm:$0xff] }
 0x828   : > { %2965 = vmatprep.subr.mxu1 %v4648_v52  ;;  %v4688_v52 = vld [vmem:[#allocation5 + $0x6b8] sm:$0xff] }
 0x829   : > { %2966 = vmatpush2.msra.mxu1 %v4649_v53  ;;  %v4689_v53 = vld [vmem:[#allocation5 + $0x4b0] sm:$0xff] }
 0x82a   : > { %2967 = vmatprep.subr.mxu1 %v4650_v54  ;;  %v4690_v54 = vld [vmem:[#allocation5 + $0x6b0] sm:$0xff] }
 0x82b   : > { %2968 = vmatpush2.msra.mxu1 %v4651_v3  ;;  %v4691_v3 = vld [vmem:[#allocation5 + $0x4a8] sm:$0xff] }
 0x82c   : > { %2969 = vmatprep.subr.mxu1 %v4652_v56  ;;  %v4692_v56 = vld [vmem:[#allocation5 + $0x6a8] sm:$0xff] }
 0x82d   : > { %2970 = vmatpush2.msra.mxu1 %v4653_v4  ;;  %v4693_v4 = vld [vmem:[#allocation5 + $0x4a0] sm:$0xff] }
 0x82e   : > { %2971 = vmatprep.subr.mxu1 %v4654_v20  ;;  %v4694_v20 = vld [vmem:[#allocation5 + $0x6a0] sm:$0xff] }
 0x82f   : > { %2972 = vmatpush2.msra.mxu1 %v4655_v41  ;;  %v4695_v41 = vld [vmem:[#allocation5 + $0x498] sm:$0xff] }
 0x830   : > { %2973 = vmatprep.subr.mxu1 %v4656_v57  ;;  %v4696_v57 = vld [vmem:[#allocation5 + $0x698] sm:$0xff] }
 0x831   : > { %2974 = vmatpush2.msra.mxu1 %v4657_v39  ;;  %v4697_v39 = vld [vmem:[#allocation5 + $0x490] sm:$0xff] }
 0x832   : > { %2975 = vmatprep.subr.mxu1 %v4658_v58  ;;  %v4698_v58 = vld [vmem:[#allocation5 + $0x690] sm:$0xff] }
 0x833   : > { %2976 = vmatpush2.msra.mxu1 %v4659_v5  ;;  %v4699_v5 = vld [vmem:[#allocation5 + $0x488] sm:$0xff] }
 0x834   : > { %2977 = vmatprep.subr.mxu1 %v4660_v59  ;;  %v4700_v59 = vld [vmem:[#allocation5 + $0x688] sm:$0xff] }
 0x835   : > { %2978 = vmatpush2.msra.mxu1 %v4661_v6  ;;  %v4701_v6 = vld [vmem:[#allocation5 + $0x480] sm:$0xff] }
 0x836   : > { %2979 = vmatprep.subr.mxu1 %v4662_v18  ;;  %v4702_v18 = vld [vmem:[#allocation5 + $0x680] sm:$0xff] }
 0x837   : > { %2980 = vmatpush2.msra.mxu1 %v4663_v11  ;;  %v4703_v11 = vld [vmem:[#allocation5 + $0x478] sm:$0xff] }
 0x838   : > { %2981 = vmatprep.subr.mxu1 %v4664_v8  ;;  %v4704_v8 = vld [vmem:[#allocation5 + $0x678] sm:$0xff] }
 0x839   : > { %2982 = vmatpush2.msra.mxu1 %v4665_v12  ;;  %v4705_v12 = vld [vmem:[#allocation5 + $0x470] sm:$0xff] }
 0x83a   : > { %2983 = vmatprep.subr.mxu1 %v4666_v14  ;;  %v4706_v14 = vld [vmem:[#allocation5 + $0x670] sm:$0xff] }
 0x83b   : > { %2984 = vmatpush2.msra.mxu1 %v4667_v26  ;;  %v4707_v26 = vld [vmem:[#allocation5 + $0x468] sm:$0xff] }
 0x83c   : > { %2985 = vmatprep.subr.mxu1 %v4668_v13  ;;  %v4708_v13 = vld [vmem:[#allocation5 + $0x668] sm:$0xff] }
 0x83d   : > { %2986 = vmatpush2.msra.mxu1 %v4669_v15  ;;  %v4709_v15 = vld [vmem:[#allocation5 + $0x460] sm:$0xff] }
 0x83e   : > { %2987 = vmatprep.subr.mxu1 %v4670_v51  ;;  %v4710_v51 = vld [vmem:[#allocation5 + $0x660] sm:$0xff] }
 0x83f   : > { %2988 = vmatpush2.msra.mxu1 %v4671_v16  ;;  %v4711_v16 = vld [vmem:[#allocation5 + $0x458] sm:$0xff] }
 0x840   : > { %3087 = vmatprep.subr.mxu1 %v4672_v55  ;;  %v4712_v55 = vld [vmem:[#allocation5 + $0x658] sm:$0xff] }
 0x8c0   : > { %v2829_v27 = vpop.f32.mrf.mxu1 }
 0x8c1   : > { %v2830_v28 = vadd.f32 %v2829_v27, %v2752_v19  ;;  %v4717_v27 = vld [vmem:[#allocation5 + $0x440] sm:$0xff] }
 0x8c2   : > { %v2831_v29 = vpop.f32.mrf.mxu1 }
 0x8c3   : > { %v5743_v2 = vadd.f32 %v2830_v28, %v5622_v9  ;;  %v2832_v30 = vadd.f32 %v2831_v29, %v2752_v19  ;;  %v4713_v19 = vld [vmem:[#allocation5 + $0x450] sm:$0xff]  ;;  %v4718_v28 = vld [vmem:[#allocation5 + $0x640] sm:$0xff]  ;;  %v4719_v29 = vld [vmem:[#allocation5 + $0x438] sm:$0xff] }
 0x8c5   : > { %v5748_v32 = vadd.f32 %v2832_v30, %v5624_v10  ;;  %v5751_v33 = vmul.f32 %v3001_v24, %v5743_v2  ;;  %v5755_v34 = vmul.f32 %v5740_v25, %v5743_v2  ;;  %v5759_v35 = vmul.f32 %v5745_v31, %v5743_v2  ;;  %v4720_v30 = vld [vmem:[#allocation5 + $0x638] sm:$0xff] }
 0x8c6   : > { %v2852_v38 = vmul.f32 %v2850_v21, %v5743_v2  ;;  %v2843_v10 = vmul.f32 %v2841_v23, %v5743_v2 }
 0x8c7   : > { %v2853_v9 = vmul.f32 %v2850_v21, %v5748_v32  ;;  %v2844_v37 = vmul.f32 %v2841_v23, %v5748_v32  ;;  %v3004_v40 = vmul.f32 %v3001_v24, %v5748_v32  ;;  %v3086_v44 = vmul.f32 %v5738_v7, %v5748_v32  ;;  %v4714_v21 = vld [vmem:[#allocation5 + $0x650] sm:$0xff]  ;;  %v4715_v23 = vld [vmem:[#allocation5 + $0x448] sm:$0xff] }
 0x8c8   : > { %v4716_v24 = vld [vmem:[#allocation5 + $0x648] sm:$0xff] }
 0x8c9   : > { %2918 = vmatprep.mubr.f32.mxu0 %v2853_v9  ;;  %2989 = vmatprep.mubr.f32.mxu1 %v2844_v37  ;;  %v4721_v9 = vld [vmem:[#allocation5 + $0x430] sm:$0xff] }
 0x8ca   : > { %2919 = vmatmul.mubr.f32.vlgmr.msra.gmra.mxu0 %v2852_v38  ;;  %2990 = vmatmul.mubr.f32.vlgmr.msra.gmra.mxu1 %v2843_v10  ;;  %v4722_v37 = vld [vmem:[#allocation5 + $0x630] sm:$0xff]  ;;  %v4723_v38 = vld [vmem:[#allocation5 + $0x428] sm:$0xff] }
 0x8cb   : > { %3006 = vmatpush1.msra.mxu0 %v4673_v42  ;;  %3088 = vmatpush1.msra.mxu1 %v4674_v43  ;;  %v4724_v10 = vld [vmem:[#allocation5 + $0x628] sm:$0xff]  ;;  %v4726_v42 = vld [vmem:[#allocation5 + $0x620] sm:$0xff]  ;;  %v4727_v43 = vld [vmem:[#allocation5 + $0x418] sm:$0xff] }
 0x8cc   : > { %3007 = vmatprep.subr.mxu0 %v4675_v45  ;;  %3069 = vmatprep.mubr.f32.mxu0 %v3004_v40  ;;  %v4725_v40 = vld [vmem:[#allocation5 + $0x420] sm:$0xff]  ;;  %v4729_v45 = vld [vmem:[#allocation5 + $0x410] sm:$0xff] }
 0x8cd   : > { %3089 = vmatprep.subr.mxu1 %v4676_v46  ;;  %3151 = vmatprep.mubr.f32.mxu1 %v3086_v44  ;;  %v4728_v44 = vld [vmem:[#allocation5 + $0x618] sm:$0xff]  ;;  %v4730_v46 = vld [vmem:[#allocation5 + $0x610] sm:$0xff] }
 0x8ce   : > { %3008 = vmatpush1.msra.mxu0 %v4677_v60  ;;  %3090 = vmatpush1.msra.mxu1 %v4678_v61  ;;  %v4731_v60 = vld [vmem:[#allocation5 + $0x408] sm:$0xff] }
 0x8cf   : > { %3009 = vmatprep.subr.mxu0 %v4679_v0  ;;  %3091 = vmatprep.subr.mxu1 %v4680_v62  ;;  %v4732_v61 = vld [vmem:[#allocation5 + $0x608] sm:$0xff]  ;;  %v4733_v0 = vld [vmem:[#allocation5 + $0x400] sm:$0xff] }
 0x8d0   : > { %3010 = vmatpush1.msra.mxu0 %v4681_v63  ;;  %3092 = vmatpush1.msra.mxu1 %v4682_v36  ;;  %v4734_v62 = vld [vmem:[#allocation5 + $0x600] sm:$0xff]  ;;  %v4735_v63 = vld [vmem:[#allocation5 + $0x5f8] sm:$0xff] }
 0x8d1   : > { %3011 = vmatprep.subr.mxu0 %v4683_v1  ;;  %3093 = vmatprep.subr.mxu1 %v4684_v47  ;;  %v4736_v36 = vld [vmem:[#allocation5 + $0x7f8] sm:$0xff]  ;;  %v4737_v1 = vld [vmem:[#allocation5 + $0x5f0] sm:$0xff] }
 0x8d2   : > { %3012 = vmatpush1.msra.mxu0 %v4685_v48  ;;  %3094 = vmatpush1.msra.mxu1 %v4686_v49  ;;  %v4738_v47 = vld [vmem:[#allocation5 + $0x7f0] sm:$0xff]  ;;  %v4739_v48 = vld [vmem:[#allocation5 + $0x5e8] sm:$0xff] }
 0x8d3   : > { %3013 = vmatprep.subr.mxu0 %v4687_v50  ;;  %3095 = vmatprep.subr.mxu1 %v4688_v52  ;;  %v4740_v49 = vld [vmem:[#allocation5 + $0x7e8] sm:$0xff]  ;;  %v4741_v50 = vld [vmem:[#allocation5 + $0x5e0] sm:$0xff] }
 0x8d4   : > { %3014 = vmatpush1.msra.mxu0 %v4689_v53  ;;  %3096 = vmatpush1.msra.mxu1 %v4690_v54  ;;  %v4742_v52 = vld [vmem:[#allocation5 + $0x7e0] sm:$0xff]  ;;  %v4743_v53 = vld [vmem:[#allocation5 + $0x5d8] sm:$0xff] }
 0x8d5   : > { %3015 = vmatprep.subr.mxu0 %v4691_v3  ;;  %3097 = vmatprep.subr.mxu1 %v4692_v56  ;;  %v4744_v54 = vld [vmem:[#allocation5 + $0x7d8] sm:$0xff]  ;;  %v4745_v3 = vld [vmem:[#allocation5 + $0x5d0] sm:$0xff] }
 0x8d6   : > { %3016 = vmatpush1.msra.mxu0 %v4693_v4  ;;  %3098 = vmatpush1.msra.mxu1 %v4694_v20  ;;  %v4746_v56 = vld [vmem:[#allocation5 + $0x7d0] sm:$0xff]  ;;  %v4747_v4 = vld [vmem:[#allocation5 + $0x5c8] sm:$0xff] }
 0x8d7   : > { %3017 = vmatprep.subr.mxu0 %v4695_v41  ;;  %3099 = vmatprep.subr.mxu1 %v4696_v57  ;;  %v4748_v20 = vld [vmem:[#allocation5 + $0x7c8] sm:$0xff]  ;;  %v4749_v41 = vld [vmem:[#allocation5 + $0x5c0] sm:$0xff] }
 0x8d8   : > { %3018 = vmatpush1.msra.mxu0 %v4697_v39  ;;  %3100 = vmatpush1.msra.mxu1 %v4698_v58  ;;  %v4750_v57 = vld [vmem:[#allocation5 + $0x7c0] sm:$0xff]  ;;  %v4751_v39 = vld [vmem:[#allocation5 + $0x5b8] sm:$0xff] }
 0x8d9   : > { %3019 = vmatprep.subr.mxu0 %v4699_v5  ;;  %3101 = vmatprep.subr.mxu1 %v4700_v59  ;;  %v4752_v58 = vld [vmem:[#allocation5 + $0x7b8] sm:$0xff]  ;;  %v4753_v5 = vld [vmem:[#allocation5 + $0x5b0] sm:$0xff] }
 0x8da   : > { %3020 = vmatpush1.msra.mxu0 %v4701_v6  ;;  %3102 = vmatpush1.msra.mxu1 %v4702_v18  ;;  %v4754_v59 = vld [vmem:[#allocation5 + $0x7b0] sm:$0xff]  ;;  %v4755_v6 = vld [vmem:[#allocation5 + $0x5a8] sm:$0xff] }
 0x8db   : > { %3021 = vmatprep.subr.mxu0 %v4703_v11  ;;  %3103 = vmatprep.subr.mxu1 %v4704_v8  ;;  %v4756_v18 = vld [vmem:[#allocation5 + $0x7a8] sm:$0xff]  ;;  %v4757_v11 = vld [vmem:[#allocation5 + $0x5a0] sm:$0xff] }
 0x8dc   : > { %3022 = vmatpush1.msra.mxu0 %v4705_v12  ;;  %3104 = vmatpush1.msra.mxu1 %v4706_v14  ;;  %v4758_v8 = vld [vmem:[#allocation5 + $0x7a0] sm:$0xff]  ;;  %v4759_v12 = vld [vmem:[#allocation5 + $0x598] sm:$0xff] }
 0x8dd   : > { %3023 = vmatprep.subr.mxu0 %v4707_v26  ;;  %3105 = vmatprep.subr.mxu1 %v4708_v13  ;;  %v4760_v14 = vld [vmem:[#allocation5 + $0x798] sm:$0xff]  ;;  %v4761_v26 = vld [vmem:[#allocation5 + $0x590] sm:$0xff] }
 0x8de   : > { %3024 = vmatpush1.msra.mxu0 %v4709_v15  ;;  %3106 = vmatpush1.msra.mxu1 %v4710_v51  ;;  %v4762_v13 = vld [vmem:[#allocation5 + $0x790] sm:$0xff]  ;;  %v4763_v15 = vld [vmem:[#allocation5 + $0x588] sm:$0xff] }
 0x8df   : > { %3025 = vmatprep.subr.mxu0 %v4711_v16  ;;  %3107 = vmatprep.subr.mxu1 %v4712_v55  ;;  %v4764_v51 = vld [vmem:[#allocation5 + $0x788] sm:$0xff]  ;;  %v4765_v16 = vld [vmem:[#allocation5 + $0x580] sm:$0xff] }
 0x8e0   : > { %3026 = vmatpush1.msra.mxu0 %v4713_v19  ;;  %3108 = vmatpush1.msra.mxu1 %v4714_v21  ;;  %v4766_v55 = vld [vmem:[#allocation5 + $0x780] sm:$0xff]  ;;  %v4767_v19 = vld [vmem:[#allocation5 + $0x578] sm:$0xff] }
 0x8e1   : > { %3027 = vmatprep.subr.mxu0 %v4715_v23  ;;  %3109 = vmatprep.subr.mxu1 %v4716_v24  ;;  %v4768_v21 = vld [vmem:[#allocation5 + $0x778] sm:$0xff]  ;;  %v4769_v23 = vld [vmem:[#allocation5 + $0x570] sm:$0xff] }
 0x8e2   : > { %3028 = vmatpush1.msra.mxu0 %v4717_v27  ;;  %3110 = vmatpush1.msra.mxu1 %v4718_v28  ;;  %v4770_v24 = vld [vmem:[#allocation5 + $0x770] sm:$0xff]  ;;  %v4771_v27 = vld [vmem:[#allocation5 + $0x568] sm:$0xff] }
 0x8e3   : > { %3029 = vmatprep.subr.mxu0 %v4719_v29  ;;  %3111 = vmatprep.subr.mxu1 %v4720_v30  ;;  %v4772_v28 = vld [vmem:[#allocation5 + $0x768] sm:$0xff]  ;;  %v4773_v29 = vld [vmem:[#allocation5 + $0x560] sm:$0xff] }
 0x8e4   : > { %3030 = vmatpush1.msra.mxu0 %v4721_v9  ;;  %3112 = vmatpush1.msra.mxu1 %v4722_v37  ;;  %v4774_v30 = vld [vmem:[#allocation5 + $0x760] sm:$0xff]  ;;  %v4775_v9 = vld [vmem:[#allocation5 + $0x558] sm:$0xff] }
 0x8e5   : > { %3031 = vmatprep.subr.mxu0 %v4723_v38  ;;  %3113 = vmatprep.subr.mxu1 %v4724_v10  ;;  %v4776_v37 = vld [vmem:[#allocation5 + $0x758] sm:$0xff]  ;;  %v4777_v38 = vld [vmem:[#allocation5 + $0x550] sm:$0xff] }
 0x8e6   : > { %3032 = vmatpush1.msra.mxu0 %v4725_v40  ;;  %3114 = vmatpush1.msra.mxu1 %v4726_v42  ;;  %v4778_v10 = vld [vmem:[#allocation5 + $0x750] sm:$0xff]  ;;  %v4779_v40 = vld [vmem:[#allocation5 + $0x548] sm:$0xff] }
 0x8e7   : > { %3033 = vmatprep.subr.mxu0 %v4727_v43  ;;  %3115 = vmatprep.subr.mxu1 %v4728_v44  ;;  %v4780_v42 = vld [vmem:[#allocation5 + $0x748] sm:$0xff]  ;;  %v4781_v43 = vld [vmem:[#allocation5 + $0x540] sm:$0xff] }
 0x8e8   : > { %3034 = vmatpush1.msra.mxu0 %v4729_v45  ;;  %3116 = vmatpush1.msra.mxu1 %v4730_v46  ;;  %v4782_v44 = vld [vmem:[#allocation5 + $0x740] sm:$0xff]  ;;  %v4783_v45 = vld [vmem:[#allocation5 + $0x538] sm:$0xff] }
 0x8e9   : > { %3035 = vmatprep.subr.mxu0 %v4731_v60  ;;  %3117 = vmatprep.subr.mxu1 %v4732_v61  ;;  %v4784_v46 = vld [vmem:[#allocation5 + $0x738] sm:$0xff]  ;;  %v4785_v60 = vld [vmem:[#allocation5 + $0x530] sm:$0xff] }
 0x8ea   : > { %3036 = vmatpush1.msra.mxu0 %v4733_v0  ;;  %3118 = vmatpush1.msra.mxu1 %v4734_v62  ;;  %v4786_v61 = vld [vmem:[#allocation5 + $0x730] sm:$0xff]  ;;  %v4787_v0 = vld [vmem:[#allocation5 + $0x528] sm:$0xff] }
 0x8eb   : > { %3037 = vmatprep.subr.mxu0 %v4735_v63  ;;  %3119 = vmatprep.subr.mxu1 %v4736_v36  ;;  %v4788_v62 = vld [vmem:[#allocation5 + $0x728] sm:$0xff]  ;;  %v4789_v63 = vld [vmem:[#allocation5 + $0x520] sm:$0xff] }
 0x8ec   : > { %3038 = vmatpush2.msra.mxu0 %v4737_v1  ;;  %3120 = vmatpush2.msra.mxu1 %v4738_v47  ;;  %v4790_v36 = vld [vmem:[#allocation5 + $0x720] sm:$0xff]  ;;  %v4791_v1 = vld [vmem:[#allocation5 + $0x518] sm:$0xff] }
 0x8ed   : > { %3039 = vmatprep.subr.mxu0 %v4739_v48  ;;  %3121 = vmatprep.subr.mxu1 %v4740_v49  ;;  %v4792_v47 = vld [vmem:[#allocation5 + $0x718] sm:$0xff]  ;;  %v4793_v48 = vld [vmem:[#allocation5 + $0x510] sm:$0xff] }
 0x8ee   : > { %3040 = vmatpush2.msra.mxu0 %v4741_v50  ;;  %3122 = vmatpush2.msra.mxu1 %v4742_v52  ;;  %v4794_v49 = vld [vmem:[#allocation5 + $0x710] sm:$0xff]  ;;  %v4795_v50 = vld [vmem:[#allocation5 + $0x508] sm:$0xff] }
 0x8ef   : > { %3041 = vmatprep.subr.mxu0 %v4743_v53  ;;  %3123 = vmatprep.subr.mxu1 %v4744_v54  ;;  %v4796_v52 = vld [vmem:[#allocation5 + $0x708] sm:$0xff]  ;;  %v3085_v53 = vmul.f32 %v5738_v7, %v5743_v2  ;;  %v4797_v54 = vld [vmem:[#allocation5 + $0x500] sm:$0xff]  ;;  %v4801_v7 = vld [vmem:[#allocation5 + $0x8f0] sm:$0xff] }
 0x8f0   : > { %3042 = vmatpush2.msra.mxu0 %v4745_v3  ;;  %3124 = vmatpush2.msra.mxu1 %v4746_v56  ;;  %v4798_v3 = vld [vmem:[#allocation5 + $0x700] sm:$0xff]  ;;  %v5770_v56 = vpop.permute.xlu1 %3246 }
 0x8f1   : > { %3043 = vmatprep.subr.mxu0 %v4747_v4  ;;  %3125 = vmatprep.subr.mxu1 %v4748_v20  ;;  %v3168_v4 = vmul.f32 %v5740_v25, %v5748_v32  ;;  %v4799_v20 = vld [vmem:[#allocation5 + $0x8f8] sm:$0xff]  ;;  %v4806_v25 = vld [vmem:[#allocation5 + $0xae0] sm:$0xff] }
 0x8f2   : > { %3044 = vmatpush2.msra.mxu0 %v4749_v41  ;;  %3126 = vmatpush2.msra.mxu1 %v4750_v57  ;;  %v4800_v41 = vld [vmem:[#allocation5 + $0xaf8] sm:$0xff]  ;;  %v3250_v57 = vmul.f32 %v5770_v56, %v5748_v32 }
 0x8f3   : > { %3045 = vmatprep.subr.mxu0 %v4751_v39  ;;  %3127 = vmatprep.subr.mxu1 %v4752_v58  ;;  %v4802_v39 = vld [vmem:[#allocation5 + $0xaf0] sm:$0xff]  ;;  %v4803_v58 = vld [vmem:[#allocation5 + $0x8e8] sm:$0xff] }
 0x8f4   : > { %3046 = vmatpush2.msra.mxu0 %v4753_v5  ;;  %3128 = vmatpush2.msra.mxu1 %v4754_v59  ;;  %v4805_v5 = vld [vmem:[#allocation5 + $0x8e0] sm:$0xff]  ;;  %v4807_v59 = vld [vmem:[#allocation5 + $0x8d8] sm:$0xff] }
 0x8f5   : > { %3047 = vmatprep.subr.mxu0 %v4755_v6  ;;  %3129 = vmatprep.subr.mxu1 %v4756_v18  ;;  %v4808_v6 = vld [vmem:[#allocation5 + $0xad8] sm:$0xff]  ;;  %v4809_v18 = vld [vmem:[#allocation5 + $0x8d0] sm:$0xff] }
 0x8f6   : > { %3048 = vmatpush2.msra.mxu0 %v4757_v11  ;;  %3130 = vmatpush2.msra.mxu1 %v4758_v8  ;;  %v4810_v11 = vld [vmem:[#allocation5 + $0xad0] sm:$0xff]  ;;  %v4811_v8 = vld [vmem:[#allocation5 + $0x8c8] sm:$0xff] }
 0x8f7   : > { %3049 = vmatprep.subr.mxu0 %v4759_v12  ;;  %3131 = vmatprep.subr.mxu1 %v4760_v14  ;;  %v4812_v12 = vld [vmem:[#allocation5 + $0xac8] sm:$0xff]  ;;  %v4813_v14 = vld [vmem:[#allocation5 + $0x8c0] sm:$0xff] }
 0x8f8   : > { %3050 = vmatpush2.msra.mxu0 %v4761_v26  ;;  %3132 = vmatpush2.msra.mxu1 %v4762_v13  ;;  %v4814_v26 = vld [vmem:[#allocation5 + $0xac0] sm:$0xff]  ;;  %v4815_v13 = vld [vmem:[#allocation5 + $0x8b8] sm:$0xff] }
 0x8f9   : > { %3051 = vmatprep.subr.mxu0 %v4763_v15  ;;  %3133 = vmatprep.subr.mxu1 %v4764_v51  ;;  %v4816_v15 = vld [vmem:[#allocation5 + $0xab8] sm:$0xff]  ;;  %v4817_v51 = vld [vmem:[#allocation5 + $0x8b0] sm:$0xff] }
 0x8fa   : > { %3052 = vmatpush2.msra.mxu0 %v4765_v16  ;;  %3134 = vmatpush2.msra.mxu1 %v4766_v55  ;;  %v4818_v16 = vld [vmem:[#allocation5 + $0xab0] sm:$0xff]  ;;  %v4819_v55 = vld [vmem:[#allocation5 + $0x8a8] sm:$0xff] }
 0x8fb   : > { %3053 = vmatprep.subr.mxu0 %v4767_v19  ;;  %3135 = vmatprep.subr.mxu1 %v4768_v21  ;;  %v4820_v19 = vld [vmem:[#allocation5 + $0xaa8] sm:$0xff]  ;;  %v4821_v21 = vld [vmem:[#allocation5 + $0x8a0] sm:$0xff] }
 0x8fc   : > { %3054 = vmatpush2.msra.mxu0 %v4769_v23  ;;  %3136 = vmatpush2.msra.mxu1 %v4770_v24  ;;  %v4822_v23 = vld [vmem:[#allocation5 + $0xaa0] sm:$0xff]  ;;  %v4823_v24 = vld [vmem:[#allocation5 + $0x898] sm:$0xff] }
 0x8fd   : > { %3055 = vmatprep.subr.mxu0 %v4771_v27  ;;  %3137 = vmatprep.subr.mxu1 %v4772_v28  ;;  %v4824_v27 = vld [vmem:[#allocation5 + $0xa98] sm:$0xff]  ;;  %v4825_v28 = vld [vmem:[#allocation5 + $0x890] sm:$0xff] }
 0x8fe   : > { %3056 = vmatpush2.msra.mxu0 %v4773_v29  ;;  %3138 = vmatpush2.msra.mxu1 %v4774_v30  ;;  %v4826_v29 = vld [vmem:[#allocation5 + $0xa90] sm:$0xff]  ;;  %v4827_v30 = vld [vmem:[#allocation5 + $0x888] sm:$0xff] }
 0x8ff   : > { %3057 = vmatprep.subr.mxu0 %v4775_v9  ;;  %3139 = vmatprep.subr.mxu1 %v4776_v37  ;;  %v4828_v9 = vld [vmem:[#allocation5 + $0xa88] sm:$0xff]  ;;  %v4829_v37 = vld [vmem:[#allocation5 + $0x880] sm:$0xff] }
 0x900   : > { %3058 = vmatpush2.msra.mxu0 %v4777_v38  ;;  %3140 = vmatpush2.msra.mxu1 %v4778_v10  ;;  %v4830_v38 = vld [vmem:[#allocation5 + $0xa80] sm:$0xff]  ;;  %v4831_v10 = vld [vmem:[#allocation5 + $0x878] sm:$0xff] }
 0x901   : > { %3059 = vmatprep.subr.mxu0 %v4779_v40  ;;  %3141 = vmatprep.subr.mxu1 %v4780_v42  ;;  %v4832_v40 = vld [vmem:[#allocation5 + $0xa78] sm:$0xff]  ;;  %v4833_v42 = vld [vmem:[#allocation5 + $0x870] sm:$0xff] }
 0x902   : > { %3060 = vmatpush2.msra.mxu0 %v4781_v43  ;;  %3142 = vmatpush2.msra.mxu1 %v4782_v44  ;;  %v4834_v43 = vld [vmem:[#allocation5 + $0xa70] sm:$0xff]  ;;  %v4835_v44 = vld [vmem:[#allocation5 + $0x868] sm:$0xff] }
 0x903   : > { %3061 = vmatprep.subr.mxu0 %v4783_v45  ;;  %3143 = vmatprep.subr.mxu1 %v4784_v46  ;;  %v4836_v45 = vld [vmem:[#allocation5 + $0xa68] sm:$0xff]  ;;  %v4837_v46 = vld [vmem:[#allocation5 + $0x860] sm:$0xff] }
 0x904   : > { %3062 = vmatpush2.msra.mxu0 %v4785_v60  ;;  %3144 = vmatpush2.msra.mxu1 %v4786_v61  ;;  %v4838_v60 = vld [vmem:[#allocation5 + $0xa60] sm:$0xff]  ;;  %v4839_v61 = vld [vmem:[#allocation5 + $0x858] sm:$0xff] }
 0x905   : > { %3063 = vmatprep.subr.mxu0 %v4787_v0  ;;  %3145 = vmatprep.subr.mxu1 %v4788_v62  ;;  %v4840_v0 = vld [vmem:[#allocation5 + $0xa58] sm:$0xff]  ;;  %v4841_v62 = vld [vmem:[#allocation5 + $0x850] sm:$0xff] }
 0x906   : > { %3064 = vmatpush2.msra.mxu0 %v4789_v63  ;;  %3146 = vmatpush2.msra.mxu1 %v4790_v36  ;;  %v4842_v63 = vld [vmem:[#allocation5 + $0xa50] sm:$0xff]  ;;  %v4843_v36 = vld [vmem:[#allocation5 + $0x848] sm:$0xff] }
 0x907   : > { %3065 = vmatprep.subr.mxu0 %v4791_v1  ;;  %3147 = vmatprep.subr.mxu1 %v4792_v47  ;;  %v4844_v1 = vld [vmem:[#allocation5 + $0xa48] sm:$0xff]  ;;  %v4845_v47 = vld [vmem:[#allocation5 + $0x840] sm:$0xff] }
 0x908   : > { %3066 = vmatpush2.msra.mxu0 %v4793_v48  ;;  %3148 = vmatpush2.msra.mxu1 %v4794_v49  ;;  %v4846_v48 = vld [vmem:[#allocation5 + $0xa40] sm:$0xff]  ;;  %v4847_v49 = vld [vmem:[#allocation5 + $0x838] sm:$0xff] }
 0x909   : > { %3067 = vmatprep.subr.mxu0 %v4795_v50  ;;  %3149 = vmatprep.subr.mxu1 %v4796_v52  ;;  %v4848_v50 = vld [vmem:[#allocation5 + $0xa38] sm:$0xff]  ;;  %v4849_v52 = vld [vmem:[#allocation5 + $0x830] sm:$0xff] }
 0x90a   : > { %3068 = vmatpush2.msra.mxu0 %v4797_v54  ;;  %3150 = vmatpush2.msra.mxu1 %v4798_v3  ;;  %v4851_v54 = vld [vmem:[#allocation5 + $0x828] sm:$0xff] }
 0x90b   : > { %3070 = vmatmul.mubr.f32.vlgmr.msra.gmra.mxu0 %v5751_v33  ;;  %3152 = vmatmul.mubr.f32.vlgmr.msra.gmra.mxu1 %v3085_v53  ;;  %v4804_v33 = vld [vmem:[#allocation5 + $0xae8] sm:$0xff]  ;;  %v4850_v53 = vld [vmem:[#allocation5 + $0xa30] sm:$0xff] }
 0x90c   : > { %3169 = vmatprep.subr.mxu0 %v4799_v20  ;;  %3251 = vmatprep.subr.mxu1 %v4800_v41  ;;  %v4852_v3 = vld [vmem:[#allocation5 + $0xa28] sm:$0xff]  ;;  %v4854_v20 = vld [vmem:[#allocation5 + $0xa20] sm:$0xff]  ;;  %v4855_v41 = vld [vmem:[#allocation5 + $0x818] sm:$0xff] }
 0x90d   : > { %3170 = vmatpush1.msra.mxu0 %v4801_v7  ;;  %3233 = vmatprep.mubr.f32.mxu0 %v3168_v4  ;;  %v4853_v4 = vld [vmem:[#allocation5 + $0x820] sm:$0xff]  ;;  %v4857_v7 = vld [vmem:[#allocation5 + $0x810] sm:$0xff] }
 0x90e   : > { %3252 = vmatpush1.msra.mxu1 %v4802_v39  ;;  %3315 = vmatprep.mubr.f32.mxu1 %v3250_v57  ;;  %v4856_v57 = vld [vmem:[#allocation5 + $0xa18] sm:$0xff]  ;;  %v4858_v39 = vld [vmem:[#allocation5 + $0xa10] sm:$0xff] }
 0x90f   : > { %3171 = vmatprep.subr.mxu0 %v4803_v58  ;;  %3253 = vmatprep.subr.mxu1 %v4804_v33  ;;  %v4859_v58 = vld [vmem:[#allocation5 + $0x808] sm:$0xff] }
 0x910   : > { %3172 = vmatpush1.msra.mxu0 %v4805_v5  ;;  %3254 = vmatpush1.msra.mxu1 %v4806_v25  ;;  %v4860_v33 = vld [vmem:[#allocation5 + $0xa08] sm:$0xff]  ;;  %v4861_v5 = vld [vmem:[#allocation5 + $0x800] sm:$0xff] }
 0x911   : > { %3173 = vmatprep.subr.mxu0 %v4807_v59  ;;  %3255 = vmatprep.subr.mxu1 %v4808_v6  ;;  %v4862_v25 = vld [vmem:[#allocation5 + $0xa00] sm:$0xff]  ;;  %v4863_v59 = vld [vmem:[#allocation5 + $0x9f8] sm:$0xff] }
 0x912   : > { %3174 = vmatpush1.msra.mxu0 %v4809_v18  ;;  %3256 = vmatpush1.msra.mxu1 %v4810_v11  ;;  %v4864_v6 = vld [vmem:[#allocation5 + $0xbf8] sm:$0xff]  ;;  %v4865_v18 = vld [vmem:[#allocation5 + $0x9f0] sm:$0xff] }
 0x913   : > { %3175 = vmatprep.subr.mxu0 %v4811_v8  ;;  %3257 = vmatprep.subr.mxu1 %v4812_v12  ;;  %v4866_v11 = vld [vmem:[#allocation5 + $0xbf0] sm:$0xff]  ;;  %v4867_v8 = vld [vmem:[#allocation5 + $0x9e8] sm:$0xff] }
 0x914   : > { %3176 = vmatpush1.msra.mxu0 %v4813_v14  ;;  %3258 = vmatpush1.msra.mxu1 %v4814_v26  ;;  %v4868_v12 = vld [vmem:[#allocation5 + $0xbe8] sm:$0xff]  ;;  %v4869_v14 = vld [vmem:[#allocation5 + $0x9e0] sm:$0xff] }
 0x915   : > { %3177 = vmatprep.subr.mxu0 %v4815_v13  ;;  %3259 = vmatprep.subr.mxu1 %v4816_v15  ;;  %v4870_v26 = vld [vmem:[#allocation5 + $0xbe0] sm:$0xff]  ;;  %v4871_v13 = vld [vmem:[#allocation5 + $0x9d8] sm:$0xff] }
 0x916   : > { %3178 = vmatpush1.msra.mxu0 %v4817_v51  ;;  %3260 = vmatpush1.msra.mxu1 %v4818_v16  ;;  %v4872_v15 = vld [vmem:[#allocation5 + $0xbd8] sm:$0xff]  ;;  %v4873_v51 = vld [vmem:[#allocation5 + $0x9d0] sm:$0xff] }
 0x917   : > { %3179 = vmatprep.subr.mxu0 %v4819_v55  ;;  %3261 = vmatprep.subr.mxu1 %v4820_v19  ;;  %v4874_v16 = vld [vmem:[#allocation5 + $0xbd0] sm:$0xff]  ;;  %v4875_v55 = vld [vmem:[#allocation5 + $0x9c8] sm:$0xff] }
 0x918   : > { %3180 = vmatpush1.msra.mxu0 %v4821_v21  ;;  %3262 = vmatpush1.msra.mxu1 %v4822_v23  ;;  %v4876_v19 = vld [vmem:[#allocation5 + $0xbc8] sm:$0xff]  ;;  %v4877_v21 = vld [vmem:[#allocation5 + $0x9c0] sm:$0xff] }
 0x919   : > { %3181 = vmatprep.subr.mxu0 %v4823_v24  ;;  %3263 = vmatprep.subr.mxu1 %v4824_v27  ;;  %v4878_v23 = vld [vmem:[#allocation5 + $0xbc0] sm:$0xff]  ;;  %v4879_v24 = vld [vmem:[#allocation5 + $0x9b8] sm:$0xff] }
 0x91a   : > { %3182 = vmatpush1.msra.mxu0 %v4825_v28  ;;  %3264 = vmatpush1.msra.mxu1 %v4826_v29  ;;  %v4880_v27 = vld [vmem:[#allocation5 + $0xbb8] sm:$0xff]  ;;  %v4881_v28 = vld [vmem:[#allocation5 + $0x9b0] sm:$0xff] }
 0x91b   : > { %3183 = vmatprep.subr.mxu0 %v4827_v30  ;;  %3265 = vmatprep.subr.mxu1 %v4828_v9  ;;  %v4882_v29 = vld [vmem:[#allocation5 + $0xbb0] sm:$0xff]  ;;  %v4883_v30 = vld [vmem:[#allocation5 + $0x9a8] sm:$0xff] }
 0x91c   : > { %3184 = vmatpush1.msra.mxu0 %v4829_v37  ;;  %3266 = vmatpush1.msra.mxu1 %v4830_v38  ;;  %v4884_v9 = vld [vmem:[#allocation5 + $0xba8] sm:$0xff]  ;;  %v4885_v37 = vld [vmem:[#allocation5 + $0x9a0] sm:$0xff] }
 0x91d   : > { %3185 = vmatprep.subr.mxu0 %v4831_v10  ;;  %3267 = vmatprep.subr.mxu1 %v4832_v40  ;;  %v4886_v38 = vld [vmem:[#allocation5 + $0xba0] sm:$0xff]  ;;  %v4887_v10 = vld [vmem:[#allocation5 + $0x998] sm:$0xff] }
 0x91e   : > { %3186 = vmatpush1.msra.mxu0 %v4833_v42  ;;  %3268 = vmatpush1.msra.mxu1 %v4834_v43  ;;  %v4888_v40 = vld [vmem:[#allocation5 + $0xb98] sm:$0xff]  ;;  %v4889_v42 = vld [vmem:[#allocation5 + $0x990] sm:$0xff] }
 0x91f   : > { %3187 = vmatprep.subr.mxu0 %v4835_v44  ;;  %3269 = vmatprep.subr.mxu1 %v4836_v45  ;;  %v4890_v43 = vld [vmem:[#allocation5 + $0xb90] sm:$0xff]  ;;  %v4891_v44 = vld [vmem:[#allocation5 + $0x988] sm:$0xff] }
 0x920   : > { %3188 = vmatpush1.msra.mxu0 %v4837_v46  ;;  %3270 = vmatpush1.msra.mxu1 %v4838_v60  ;;  %v4892_v45 = vld [vmem:[#allocation5 + $0xb88] sm:$0xff]  ;;  %v4893_v46 = vld [vmem:[#allocation5 + $0x980] sm:$0xff] }
 0x921   : > { %3189 = vmatprep.subr.mxu0 %v4839_v61  ;;  %3271 = vmatprep.subr.mxu1 %v4840_v0  ;;  %v4894_v60 = vld [vmem:[#allocation5 + $0xb80] sm:$0xff]  ;;  %v4895_v61 = vld [vmem:[#allocation5 + $0x978] sm:$0xff] }
 0x922   : > { %3190 = vmatpush1.msra.mxu0 %v4841_v62  ;;  %3272 = vmatpush1.msra.mxu1 %v4842_v63  ;;  %v4896_v0 = vld [vmem:[#allocation5 + $0xb78] sm:$0xff]  ;;  %v4897_v62 = vld [vmem:[#allocation5 + $0x970] sm:$0xff] }
 0x923   : > { %3191 = vmatprep.subr.mxu0 %v4843_v36  ;;  %3273 = vmatprep.subr.mxu1 %v4844_v1  ;;  %v4898_v63 = vld [vmem:[#allocation5 + $0xb70] sm:$0xff]  ;;  %v4899_v36 = vld [vmem:[#allocation5 + $0x968] sm:$0xff] }
 0x924   : > { %3192 = vmatpush1.msra.mxu0 %v4845_v47  ;;  %3274 = vmatpush1.msra.mxu1 %v4846_v48  ;;  %v4900_v1 = vld [vmem:[#allocation5 + $0xb68] sm:$0xff]  ;;  %v4901_v47 = vld [vmem:[#allocation5 + $0x960] sm:$0xff] }
 0x925   : > { %3193 = vmatprep.subr.mxu0 %v4847_v49  ;;  %3275 = vmatprep.subr.mxu1 %v4848_v50  ;;  %v4902_v48 = vld [vmem:[#allocation5 + $0xb60] sm:$0xff]  ;;  %v4903_v49 = vld [vmem:[#allocation5 + $0x958] sm:$0xff] }
 0x926   : > { %3194 = vmatpush1.msra.mxu0 %v4849_v52  ;;  %3276 = vmatpush1.msra.mxu1 %v4850_v53  ;;  %v4904_v50 = vld [vmem:[#allocation5 + $0xb58] sm:$0xff]  ;;  %v4905_v52 = vld [vmem:[#allocation5 + $0x950] sm:$0xff] }
 0x927   : > { %3195 = vmatprep.subr.mxu0 %v4851_v54  ;;  %3277 = vmatprep.subr.mxu1 %v4852_v3  ;;  %v4906_v53 = vld [vmem:[#allocation5 + $0xb50] sm:$0xff]  ;;  %v4907_v54 = vld [vmem:[#allocation5 + $0x948] sm:$0xff] }
 0x928   : > { %3196 = vmatpush1.msra.mxu0 %v4853_v4  ;;  %3278 = vmatpush1.msra.mxu1 %v4854_v20  ;;  %v4908_v3 = vld [vmem:[#allocation5 + $0xb48] sm:$0xff]  ;;  %v4909_v4 = vld [vmem:[#allocation5 + $0x940] sm:$0xff] }
 0x929   : > { %3197 = vmatprep.subr.mxu0 %v4855_v41  ;;  %3279 = vmatprep.subr.mxu1 %v4856_v57  ;;  %v4910_v20 = vld [vmem:[#allocation5 + $0xb40] sm:$0xff]  ;;  %v4911_v41 = vld [vmem:[#allocation5 + $0x938] sm:$0xff] }
 0x92a   : > { %3198 = vmatpush1.msra.mxu0 %v4857_v7  ;;  %3280 = vmatpush1.msra.mxu1 %v4858_v39  ;;  %v4912_v57 = vld [vmem:[#allocation5 + $0xb38] sm:$0xff]  ;;  %v4913_v7 = vld [vmem:[#allocation5 + $0x930] sm:$0xff] }
 0x92b   : > { %3199 = vmatprep.subr.mxu0 %v4859_v58  ;;  %3281 = vmatprep.subr.mxu1 %v4860_v33  ;;  %v4914_v39 = vld [vmem:[#allocation5 + $0xb30] sm:$0xff]  ;;  %v4915_v58 = vld [vmem:[#allocation5 + $0x928] sm:$0xff] }
 0x92c   : > { %3200 = vmatpush1.msra.mxu0 %v4861_v5  ;;  %3282 = vmatpush1.msra.mxu1 %v4862_v25  ;;  %v4916_v33 = vld [vmem:[#allocation5 + $0xb28] sm:$0xff]  ;;  %v4917_v5 = vld [vmem:[#allocation5 + $0x920] sm:$0xff] }
 0x92d   : > { %3201 = vmatprep.subr.mxu0 %v4863_v59  ;;  %3283 = vmatprep.subr.mxu1 %v4864_v6  ;;  %v4918_v25 = vld [vmem:[#allocation5 + $0xb20] sm:$0xff]  ;;  %v4919_v59 = vld [vmem:[#allocation5 + $0x918] sm:$0xff] }
 0x92e   : > { %3202 = vmatpush2.msra.mxu0 %v4865_v18  ;;  %3284 = vmatpush2.msra.mxu1 %v4866_v11  ;;  %v4920_v6 = vld [vmem:[#allocation5 + $0xb18] sm:$0xff]  ;;  %v4921_v18 = vld [vmem:[#allocation5 + $0x910] sm:$0xff] }
 0x92f   : > { %3203 = vmatprep.subr.mxu0 %v4867_v8  ;;  %3285 = vmatprep.subr.mxu1 %v4868_v12  ;;  %v4922_v11 = vld [vmem:[#allocation5 + $0xb10] sm:$0xff]  ;;  %v4923_v8 = vld [vmem:[#allocation5 + $0x908] sm:$0xff] }
 0x930   : > { %3204 = vmatpush2.msra.mxu0 %v4869_v14  ;;  %3286 = vmatpush2.msra.mxu1 %v4870_v26  ;;  %v4924_v12 = vld [vmem:[#allocation5 + $0xb08] sm:$0xff]  ;;  %v3249_v14 = vmul.f32 %v5770_v56, %v5743_v2  ;;  %v4925_v26 = vld [vmem:[#allocation5 + $0x900] sm:$0xff]  ;;  %v4929_v56 = vld [vmem:[#allocation5 + $0xcf0] sm:$0xff] }
 0x931   : > { %3205 = vmatprep.subr.mxu0 %v4871_v13  ;;  %3287 = vmatprep.subr.mxu1 %v4872_v15  ;;  %v4926_v13 = vld [vmem:[#allocation5 + $0xb00] sm:$0xff]  ;;  %v5779_v15 = vpop.permute.xlu0 %3410 }
 0x932   : > { %3206 = vmatpush2.msra.mxu0 %v4873_v51  ;;  %3288 = vmatpush2.msra.mxu1 %v4874_v16  ;;  %v3332_v51 = vmul.f32 %v5745_v31, %v5748_v32  ;;  %v4927_v16 = vld [vmem:[#allocation5 + $0xcf8] sm:$0xff]  ;;  %v4934_v31 = vld [vmem:[#allocation5 + $0xee0] sm:$0xff] }
 0x933   : > { %3207 = vmatprep.subr.mxu0 %v4875_v55  ;;  %3289 = vmatprep.subr.mxu1 %v4876_v19  ;;  %v4928_v55 = vld [vmem:[#allocation5 + $0xef8] sm:$0xff]  ;;  %v3414_v19 = vmul.f32 %v5779_v15, %v5748_v32 }
 0x934   : > { %3208 = vmatpush2.msra.mxu0 %v4877_v21  ;;  %3290 = vmatpush2.msra.mxu1 %v4878_v23  ;;  %v4930_v21 = vld [vmem:[#allocation5 + $0xef0] sm:$0xff]  ;;  %v4931_v23 = vld [vmem:[#allocation5 + $0xce8] sm:$0xff] }
 0x935   : > { %3209 = vmatprep.subr.mxu0 %v4879_v24  ;;  %3291 = vmatprep.subr.mxu1 %v4880_v27  ;;  %v4933_v24 = vld [vmem:[#allocation5 + $0xce0] sm:$0xff]  ;;  %v4935_v27 = vld [vmem:[#allocation5 + $0xcd8] sm:$0xff] }
 0x936   : > { %3210 = vmatpush2.msra.mxu0 %v4881_v28  ;;  %3292 = vmatpush2.msra.mxu1 %v4882_v29  ;;  %v4936_v28 = vld [vmem:[#allocation5 + $0xed8] sm:$0xff]  ;;  %v4937_v29 = vld [vmem:[#allocation5 + $0xcd0] sm:$0xff] }
 0x937   : > { %3211 = vmatprep.subr.mxu0 %v4883_v30  ;;  %3293 = vmatprep.subr.mxu1 %v4884_v9  ;;  %v4938_v30 = vld [vmem:[#allocation5 + $0xed0] sm:$0xff]  ;;  %v4939_v9 = vld [vmem:[#allocation5 + $0xcc8] sm:$0xff] }
 0x938   : > { %3212 = vmatpush2.msra.mxu0 %v4885_v37  ;;  %3294 = vmatpush2.msra.mxu1 %v4886_v38  ;;  %v4940_v37 = vld [vmem:[#allocation5 + $0xec8] sm:$0xff]  ;;  %v4941_v38 = vld [vmem:[#allocation5 + $0xcc0] sm:$0xff] }
 0x939   : > { %3213 = vmatprep.subr.mxu0 %v4887_v10  ;;  %3295 = vmatprep.subr.mxu1 %v4888_v40  ;;  %v4942_v10 = vld [vmem:[#allocation5 + $0xec0] sm:$0xff]  ;;  %v4943_v40 = vld [vmem:[#allocation5 + $0xcb8] sm:$0xff] }
 0x93a   : > { %3214 = vmatpush2.msra.mxu0 %v4889_v42  ;;  %3296 = vmatpush2.msra.mxu1 %v4890_v43  ;;  %v4944_v42 = vld [vmem:[#allocation5 + $0xeb8] sm:$0xff]  ;;  %v4945_v43 = vld [vmem:[#allocation5 + $0xcb0] sm:$0xff] }
 0x93b   : > { %3215 = vmatprep.subr.mxu0 %v4891_v44  ;;  %3297 = vmatprep.subr.mxu1 %v4892_v45  ;;  %v4946_v44 = vld [vmem:[#allocation5 + $0xeb0] sm:$0xff]  ;;  %v4947_v45 = vld [vmem:[#allocation5 + $0xca8] sm:$0xff] }
 0x93c   : > { %3216 = vmatpush2.msra.mxu0 %v4893_v46  ;;  %3298 = vmatpush2.msra.mxu1 %v4894_v60  ;;  %v4948_v46 = vld [vmem:[#allocation5 + $0xea8] sm:$0xff]  ;;  %v4949_v60 = vld [vmem:[#allocation5 + $0xca0] sm:$0xff] }
 0x93d   : > { %3217 = vmatprep.subr.mxu0 %v4895_v61  ;;  %3299 = vmatprep.subr.mxu1 %v4896_v0  ;;  %v4950_v61 = vld [vmem:[#allocation5 + $0xea0] sm:$0xff]  ;;  %v4951_v0 = vld [vmem:[#allocation5 + $0xc98] sm:$0xff] }
 0x93e   : > { %3218 = vmatpush2.msra.mxu0 %v4897_v62  ;;  %3300 = vmatpush2.msra.mxu1 %v4898_v63  ;;  %v4952_v62 = vld [vmem:[#allocation5 + $0xe98] sm:$0xff]  ;;  %v4953_v63 = vld [vmem:[#allocation5 + $0xc90] sm:$0xff] }
 0x93f   : > { %3219 = vmatprep.subr.mxu0 %v4899_v36  ;;  %3301 = vmatprep.subr.mxu1 %v4900_v1  ;;  %v4954_v36 = vld [vmem:[#allocation5 + $0xe90] sm:$0xff]  ;;  %v4955_v1 = vld [vmem:[#allocation5 + $0xc88] sm:$0xff] }
 0x940   : > { %3220 = vmatpush2.msra.mxu0 %v4901_v47  ;;  %3302 = vmatpush2.msra.mxu1 %v4902_v48  ;;  %v4956_v47 = vld [vmem:[#allocation5 + $0xe88] sm:$0xff]  ;;  %v4957_v48 = vld [vmem:[#allocation5 + $0xc80] sm:$0xff] }
 0x941   : > { %3221 = vmatprep.subr.mxu0 %v4903_v49  ;;  %3303 = vmatprep.subr.mxu1 %v4904_v50  ;;  %v4958_v49 = vld [vmem:[#allocation5 + $0xe80] sm:$0xff]  ;;  %v4959_v50 = vld [vmem:[#allocation5 + $0xc78] sm:$0xff] }
 0x942   : > { %3222 = vmatpush2.msra.mxu0 %v4905_v52  ;;  %3304 = vmatpush2.msra.mxu1 %v4906_v53  ;;  %v4960_v52 = vld [vmem:[#allocation5 + $0xe78] sm:$0xff]  ;;  %v4961_v53 = vld [vmem:[#allocation5 + $0xc70] sm:$0xff] }
 0x943   : > { %3223 = vmatprep.subr.mxu0 %v4907_v54  ;;  %3305 = vmatprep.subr.mxu1 %v4908_v3  ;;  %v4962_v54 = vld [vmem:[#allocation5 + $0xe70] sm:$0xff]  ;;  %v4963_v3 = vld [vmem:[#allocation5 + $0xc68] sm:$0xff] }
 0x944   : > { %3224 = vmatpush2.msra.mxu0 %v4909_v4  ;;  %3306 = vmatpush2.msra.mxu1 %v4910_v20  ;;  %v4964_v4 = vld [vmem:[#allocation5 + $0xe68] sm:$0xff]  ;;  %v4965_v20 = vld [vmem:[#allocation5 + $0xc60] sm:$0xff] }
 0x945   : > { %3225 = vmatprep.subr.mxu0 %v4911_v41  ;;  %3307 = vmatprep.subr.mxu1 %v4912_v57  ;;  %v4966_v41 = vld [vmem:[#allocation5 + $0xe60] sm:$0xff]  ;;  %v4967_v57 = vld [vmem:[#allocation5 + $0xc58] sm:$0xff] }
 0x946   : > { %3226 = vmatpush2.msra.mxu0 %v4913_v7  ;;  %3308 = vmatpush2.msra.mxu1 %v4914_v39  ;;  %v4968_v7 = vld [vmem:[#allocation5 + $0xe58] sm:$0xff]  ;;  %v4969_v39 = vld [vmem:[#allocation5 + $0xc50] sm:$0xff] }
 0x947   : > { %3227 = vmatprep.subr.mxu0 %v4915_v58  ;;  %3309 = vmatprep.subr.mxu1 %v4916_v33  ;;  %v4970_v58 = vld [vmem:[#allocation5 + $0xe50] sm:$0xff]  ;;  %v4971_v33 = vld [vmem:[#allocation5 + $0xc48] sm:$0xff] }
 0x948   : > { %3228 = vmatpush2.msra.mxu0 %v4917_v5  ;;  %3310 = vmatpush2.msra.mxu1 %v4918_v25  ;;  %v4972_v5 = vld [vmem:[#allocation5 + $0xe48] sm:$0xff]  ;;  %v4973_v25 = vld [vmem:[#allocation5 + $0xc40] sm:$0xff] }
 0x949   : > { %3229 = vmatprep.subr.mxu0 %v4919_v59  ;;  %3311 = vmatprep.subr.mxu1 %v4920_v6  ;;  %v4974_v59 = vld [vmem:[#allocation5 + $0xe40] sm:$0xff]  ;;  %v4975_v6 = vld [vmem:[#allocation5 + $0xc38] sm:$0xff] }
 0x94a   : > { %3230 = vmatpush2.msra.mxu0 %v4921_v18  ;;  %3312 = vmatpush2.msra.mxu1 %v4922_v11  ;;  %v4976_v18 = vld [vmem:[#allocation5 + $0xe38] sm:$0xff]  ;;  %v4977_v11 = vld [vmem:[#allocation5 + $0xc30] sm:$0xff] }
 0x94b   : > { %3231 = vmatprep.subr.mxu0 %v4923_v8  ;;  %3313 = vmatprep.subr.mxu1 %v4924_v12  ;;  %v4978_v8 = vld [vmem:[#allocation5 + $0xe30] sm:$0xff]  ;;  %v4979_v12 = vld [vmem:[#allocation5 + $0xc28] sm:$0xff] }
 0x94c   : > { %3232 = vmatpush2.msra.mxu0 %v4925_v26  ;;  %3314 = vmatpush2.msra.mxu1 %v4926_v13  ;;  %v4981_v26 = vld [vmem:[#allocation5 + $0xc20] sm:$0xff] }
 0x94d   : > { %3234 = vmatmul.mubr.f32.vlgmr.msra.gmra.mxu0 %v5755_v34  ;;  %3316 = vmatmul.mubr.f32.vlgmr.msra.gmra.mxu1 %v3249_v14  ;;  %v4932_v34 = vld [vmem:[#allocation5 + $0xee8] sm:$0xff]  ;;  %v4982_v13 = vld [vmem:[#allocation5 + $0xe20] sm:$0xff] }
 0x94e   : > { %3333 = vmatprep.subr.mxu0 %v4927_v16  ;;  %3415 = vmatprep.subr.mxu1 %v4928_v55  ;;  %v4980_v14 = vld [vmem:[#allocation5 + $0xe28] sm:$0xff]  ;;  %v4984_v16 = vld [vmem:[#allocation5 + $0xe18] sm:$0xff]  ;;  %v4985_v55 = vld [vmem:[#allocation5 + $0xc10] sm:$0xff] }
 0x94f   : > { %3334 = vmatpush1.msra.mxu0 %v4929_v56  ;;  %3397 = vmatprep.mubr.f32.mxu0 %v3332_v51  ;;  %v4983_v51 = vld [vmem:[#allocation5 + $0xc18] sm:$0xff]  ;;  %v4987_v56 = vld [vmem:[#allocation5 + $0xc08] sm:$0xff] }
 0x950   : > { %3416 = vmatpush1.msra.mxu1 %v4930_v21  ;;  %3479 = vmatprep.mubr.f32.mxu1 %v3414_v19  ;;  %v4986_v19 = vld [vmem:[#allocation5 + $0xe10] sm:$0xff]  ;;  %v4988_v21 = vld [vmem:[#allocation5 + $0xe08] sm:$0xff] }
 0x951   : > { %3335 = vmatprep.subr.mxu0 %v4931_v23  ;;  %3417 = vmatprep.subr.mxu1 %v4932_v34  ;;  %v4989_v23 = vld [vmem:[#allocation5 + $0xc00] sm:$0xff] }
 0x952   : > { %3336 = vmatpush1.msra.mxu0 %v4933_v24  ;;  %3418 = vmatpush1.msra.mxu1 %v4934_v31  ;;  %v4990_v34 = vld [vmem:[#allocation5 + $0xe00] sm:$0xff]  ;;  %v4991_v24 = vld [vmem:[#allocation5 + $0xdf8] sm:$0xff] }
 0x953   : > { %3337 = vmatprep.subr.mxu0 %v4935_v27  ;;  %3419 = vmatprep.subr.mxu1 %v4936_v28  ;;  %v4992_v31 = vld [vmem:[#allocation5 + $0xff8] sm:$0xff]  ;;  %v4993_v27 = vld [vmem:[#allocation5 + $0xdf0] sm:$0xff] }
 0x954   : > { %3338 = vmatpush1.msra.mxu0 %v4937_v29  ;;  %3420 = vmatpush1.msra.mxu1 %v4938_v30  ;;  %v4994_v28 = vld [vmem:[#allocation5 + $0xff0] sm:$0xff]  ;;  %v4995_v29 = vld [vmem:[#allocation5 + $0xde8] sm:$0xff] }
 0x955   : > { %3339 = vmatprep.subr.mxu0 %v4939_v9  ;;  %3421 = vmatprep.subr.mxu1 %v4940_v37  ;;  %v4996_v30 = vld [vmem:[#allocation5 + $0xfe8] sm:$0xff]  ;;  %v4997_v9 = vld [vmem:[#allocation5 + $0xde0] sm:$0xff] }
 0x956   : > { %3340 = vmatpush1.msra.mxu0 %v4941_v38  ;;  %3422 = vmatpush1.msra.mxu1 %v4942_v10  ;;  %v4998_v37 = vld [vmem:[#allocation5 + $0xfe0] sm:$0xff]  ;;  %v4999_v38 = vld [vmem:[#allocation5 + $0xdd8] sm:$0xff] }
 0x957   : > { %3341 = vmatprep.subr.mxu0 %v4943_v40  ;;  %3423 = vmatprep.subr.mxu1 %v4944_v42  ;;  %v5000_v10 = vld [vmem:[#allocation5 + $0xfd8] sm:$0xff]  ;;  %v5001_v40 = vld [vmem:[#allocation5 + $0xdd0] sm:$0xff] }
 0x958   : > { %3342 = vmatpush1.msra.mxu0 %v4945_v43  ;;  %3424 = vmatpush1.msra.mxu1 %v4946_v44  ;;  %v5002_v42 = vld [vmem:[#allocation5 + $0xfd0] sm:$0xff]  ;;  %v5003_v43 = vld [vmem:[#allocation5 + $0xdc8] sm:$0xff] }
 0x959   : > { %3343 = vmatprep.subr.mxu0 %v4947_v45  ;;  %3425 = vmatprep.subr.mxu1 %v4948_v46  ;;  %v5004_v44 = vld [vmem:[#allocation5 + $0xfc8] sm:$0xff]  ;;  %v5005_v45 = vld [vmem:[#allocation5 + $0xdc0] sm:$0xff] }
 0x95a   : > { %3344 = vmatpush1.msra.mxu0 %v4949_v60  ;;  %3426 = vmatpush1.msra.mxu1 %v4950_v61  ;;  %v5006_v46 = vld [vmem:[#allocation5 + $0xfc0] sm:$0xff]  ;;  %v5007_v60 = vld [vmem:[#allocation5 + $0xdb8] sm:$0xff] }
 0x95b   : > { %3345 = vmatprep.subr.mxu0 %v4951_v0  ;;  %3427 = vmatprep.subr.mxu1 %v4952_v62  ;;  %v5008_v61 = vld [vmem:[#allocation5 + $0xfb8] sm:$0xff]  ;;  %v5009_v0 = vld [vmem:[#allocation5 + $0xdb0] sm:$0xff] }
 0x95c   : > { %3346 = vmatpush1.msra.mxu0 %v4953_v63  ;;  %3428 = vmatpush1.msra.mxu1 %v4954_v36  ;;  %v5010_v62 = vld [vmem:[#allocation5 + $0xfb0] sm:$0xff]  ;;  %v5011_v63 = vld [vmem:[#allocation5 + $0xda8] sm:$0xff] }
 0x95d   : > { %3347 = vmatprep.subr.mxu0 %v4955_v1  ;;  %3429 = vmatprep.subr.mxu1 %v4956_v47  ;;  %v5012_v36 = vld [vmem:[#allocation5 + $0xfa8] sm:$0xff]  ;;  %v5013_v1 = vld [vmem:[#allocation5 + $0xda0] sm:$0xff] }
 0x95e   : > { %3348 = vmatpush1.msra.mxu0 %v4957_v48  ;;  %3430 = vmatpush1.msra.mxu1 %v4958_v49  ;;  %v5014_v47 = vld [vmem:[#allocation5 + $0xfa0] sm:$0xff]  ;;  %v5015_v48 = vld [vmem:[#allocation5 + $0xd98] sm:$0xff] }
 0x95f   : > { %3349 = vmatprep.subr.mxu0 %v4959_v50  ;;  %3431 = vmatprep.subr.mxu1 %v4960_v52  ;;  %v5016_v49 = vld [vmem:[#allocation5 + $0xf98] sm:$0xff]  ;;  %v5017_v50 = vld [vmem:[#allocation5 + $0xd90] sm:$0xff] }
 0x960   : > { %3350 = vmatpush1.msra.mxu0 %v4961_v53  ;;  %3432 = vmatpush1.msra.mxu1 %v4962_v54  ;;  %v5018_v52 = vld [vmem:[#allocation5 + $0xf90] sm:$0xff]  ;;  %v5019_v53 = vld [vmem:[#allocation5 + $0xd88] sm:$0xff] }
 0x961   : > { %3351 = vmatprep.subr.mxu0 %v4963_v3  ;;  %3433 = vmatprep.subr.mxu1 %v4964_v4  ;;  %v5020_v54 = vld [vmem:[#allocation5 + $0xf88] sm:$0xff]  ;;  %v5021_v3 = vld [vmem:[#allocation5 + $0xd80] sm:$0xff] }
 0x962   : > { %3352 = vmatpush1.msra.mxu0 %v4965_v20  ;;  %3434 = vmatpush1.msra.mxu1 %v4966_v41  ;;  %v5022_v4 = vld [vmem:[#allocation5 + $0xf80] sm:$0xff]  ;;  %v5023_v20 = vld [vmem:[#allocation5 + $0xd78] sm:$0xff] }
 0x963   : > { %3353 = vmatprep.subr.mxu0 %v4967_v57  ;;  %3435 = vmatprep.subr.mxu1 %v4968_v7  ;;  %v5024_v41 = vld [vmem:[#allocation5 + $0xf78] sm:$0xff]  ;;  %v5025_v57 = vld [vmem:[#allocation5 + $0xd70] sm:$0xff] }
 0x964   : > { %3354 = vmatpush1.msra.mxu0 %v4969_v39  ;;  %3436 = vmatpush1.msra.mxu1 %v4970_v58  ;;  %v5026_v7 = vld [vmem:[#allocation5 + $0xf70] sm:$0xff]  ;;  %v5027_v39 = vld [vmem:[#allocation5 + $0xd68] sm:$0xff] }
 0x965   : > { %3355 = vmatprep.subr.mxu0 %v4971_v33  ;;  %3437 = vmatprep.subr.mxu1 %v4972_v5  ;;  %v5028_v58 = vld [vmem:[#allocation5 + $0xf68] sm:$0xff]  ;;  %v5029_v33 = vld [vmem:[#allocation5 + $0xd60] sm:$0xff] }
 0x966   : > { %3356 = vmatpush1.msra.mxu0 %v4973_v25  ;;  %3438 = vmatpush1.msra.mxu1 %v4974_v59  ;;  %v5030_v5 = vld [vmem:[#allocation5 + $0xf60] sm:$0xff]  ;;  %v5031_v25 = vld [vmem:[#allocation5 + $0xd58] sm:$0xff] }
 0x967   : > { %3357 = vmatprep.subr.mxu0 %v4975_v6  ;;  %3439 = vmatprep.subr.mxu1 %v4976_v18  ;;  %v5032_v59 = vld [vmem:[#allocation5 + $0xf58] sm:$0xff]  ;;  %v5033_v6 = vld [vmem:[#allocation5 + $0xd50] sm:$0xff] }
 0x968   : > { %3358 = vmatpush1.msra.mxu0 %v4977_v11  ;;  %3440 = vmatpush1.msra.mxu1 %v4978_v8  ;;  %v5034_v18 = vld [vmem:[#allocation5 + $0xf50] sm:$0xff]  ;;  %v5035_v11 = vld [vmem:[#allocation5 + $0xd48] sm:$0xff] }
 0x969   : > { %3359 = vmatprep.subr.mxu0 %v4979_v12  ;;  %3441 = vmatprep.subr.mxu1 %v4980_v14  ;;  %v5036_v8 = vld [vmem:[#allocation5 + $0xf48] sm:$0xff]  ;;  %v5037_v12 = vld [vmem:[#allocation5 + $0xd40] sm:$0xff] }
 0x96a   : > { %3360 = vmatpush1.msra.mxu0 %v4981_v26  ;;  %3442 = vmatpush1.msra.mxu1 %v4982_v13  ;;  %v5038_v14 = vld [vmem:[#allocation5 + $0xf40] sm:$0xff]  ;;  %v5039_v26 = vld [vmem:[#allocation5 + $0xd38] sm:$0xff] }
 0x96b   : > { %3361 = vmatprep.subr.mxu0 %v4983_v51  ;;  %3443 = vmatprep.subr.mxu1 %v4984_v16  ;;  %v5040_v13 = vld [vmem:[#allocation5 + $0xf38] sm:$0xff]  ;;  %v5041_v51 = vld [vmem:[#allocation5 + $0xd30] sm:$0xff] }
 0x96c   : > { %3362 = vmatpush1.msra.mxu0 %v4985_v55  ;;  %3444 = vmatpush1.msra.mxu1 %v4986_v19  ;;  %v5042_v16 = vld [vmem:[#allocation5 + $0xf30] sm:$0xff]  ;;  %v5043_v55 = vld [vmem:[#allocation5 + $0xd28] sm:$0xff] }
 0x96d   : > { %3363 = vmatprep.subr.mxu0 %v4987_v56  ;;  %3445 = vmatprep.subr.mxu1 %v4988_v21  ;;  %v5044_v19 = vld [vmem:[#allocation5 + $0xf28] sm:$0xff]  ;;  %v5045_v56 = vld [vmem:[#allocation5 + $0xd20] sm:$0xff] }
 0x96e   : > { %3364 = vmatpush1.msra.mxu0 %v4989_v23  ;;  %3446 = vmatpush1.msra.mxu1 %v4990_v34  ;;  %v5046_v21 = vld [vmem:[#allocation5 + $0xf20] sm:$0xff]  ;;  %v5047_v23 = vld [vmem:[#allocation5 + $0xd18] sm:$0xff] }
 0x96f   : > { %3365 = vmatprep.subr.mxu0 %v4991_v24  ;;  %3447 = vmatprep.subr.mxu1 %v4992_v31  ;;  %v5048_v34 = vld [vmem:[#allocation5 + $0xf18] sm:$0xff]  ;;  %v5049_v24 = vld [vmem:[#allocation5 + $0xd10] sm:$0xff] }
 0x970   : > { %3366 = vmatpush2.msra.mxu0 %v4993_v27  ;;  %3448 = vmatpush2.msra.mxu1 %v4994_v28  ;;  %v5050_v31 = vld [vmem:[#allocation5 + $0xf10] sm:$0xff]  ;;  %v5786_v27 = vpop.permute.xlu0 %3492  ;;  %v5051_v28 = vld [vmem:[#allocation5 + $0xd08] sm:$0xff] }
 0x971   : > { %3367 = vmatprep.subr.mxu0 %v4995_v29  ;;  %3449 = vmatprep.subr.mxu1 %v4996_v30  ;;  %v5052_v29 = vld [vmem:[#allocation5 + $0xf08] sm:$0xff]  ;;  %v3413_v30 = vmul.f32 %v5779_v15, %v5743_v2  ;;  %v5058_v15 = vld [vmem:[#allocation5 + $0x10e0] sm:$0xff] }
 0x972   : > { %3368 = vmatpush2.msra.mxu0 %v4997_v9  ;;  %3450 = vmatpush2.msra.mxu1 %v4998_v37  ;;  %v5053_v9 = vld [vmem:[#allocation5 + $0xd00] sm:$0xff] }
 0x973   : > { %3369 = vmatprep.subr.mxu0 %v4999_v38  ;;  %3451 = vmatprep.subr.mxu1 %v5000_v10  ;;  %v5054_v37 = vld [vmem:[#allocation5 + $0xf00] sm:$0xff]  ;;  %v3496_v38 = vmul.f32 %v5786_v27, %v5748_v32  ;;  %v5055_v10 = vld [vmem:[#allocation5 + $0x10f8] sm:$0xff] }
 0x974   : > { %3370 = vmatpush2.msra.mxu0 %v5001_v40  ;;  %3452 = vmatpush2.msra.mxu1 %v5002_v42  ;;  %v5056_v40 = vld [vmem:[#allocation5 + $0x10f0] sm:$0xff]  ;;  %v5057_v42 = vld [vmem:[#allocation5 + $0x10e8] sm:$0xff]  ;;  %v5062_v32 = vld [vmem:[#allocation5 + $0x10c0] sm:$0xff] }
 0x975   : > { %3371 = vmatprep.subr.mxu0 %v5003_v43  ;;  %3453 = vmatprep.subr.mxu1 %v5004_v44  ;;  %v5059_v43 = vld [vmem:[#allocation5 + $0x10d8] sm:$0xff]  ;;  %v5060_v44 = vld [vmem:[#allocation5 + $0x10d0] sm:$0xff] }
 0x976   : > { %3372 = vmatpush2.msra.mxu0 %v5005_v45  ;;  %3454 = vmatpush2.msra.mxu1 %v5006_v46  ;;  %v5061_v45 = vld [vmem:[#allocation5 + $0x10c8] sm:$0xff]  ;;  %v5064_v46 = vld [vmem:[#allocation5 + $0x10b0] sm:$0xff] }
 0x977   : > { %3373 = vmatprep.subr.mxu0 %v5007_v60  ;;  %3455 = vmatprep.subr.mxu1 %v5008_v61  ;;  %v5065_v60 = vld [vmem:[#allocation5 + $0x10a8] sm:$0xff]  ;;  %v5066_v61 = vld [vmem:[#allocation5 + $0x10a0] sm:$0xff] }
 0x978   : > { %3374 = vmatpush2.msra.mxu0 %v5009_v0  ;;  %3456 = vmatpush2.msra.mxu1 %v5010_v62  ;;  %v5068_v0 = vld [vmem:[#allocation5 + $0x1090] sm:$0xff]  ;;  %v5069_v62 = vld [vmem:[#allocation5 + $0x1088] sm:$0xff] }
 0x979   : > { %3375 = vmatprep.subr.mxu0 %v5011_v63  ;;  %3457 = vmatprep.subr.mxu1 %v5012_v36  ;;  %v5070_v63 = vld [vmem:[#allocation5 + $0x1080] sm:$0xff]  ;;  %v5071_v36 = vld [vmem:[#allocation5 + $0x1078] sm:$0xff] }
 0x97a   : > { %3376 = vmatpush2.msra.mxu0 %v5013_v1  ;;  %3458 = vmatpush2.msra.mxu1 %v5014_v47  ;;  %v5072_v1 = vld [vmem:[#allocation5 + $0x1070] sm:$0xff]  ;;  %v5073_v47 = vld [vmem:[#allocation5 + $0x1068] sm:$0xff] }
 0x97b   : > { %3377 = vmatprep.subr.mxu0 %v5015_v48  ;;  %3459 = vmatprep.subr.mxu1 %v5016_v49  ;;  %v5074_v48 = vld [vmem:[#allocation5 + $0x1060] sm:$0xff]  ;;  %v5075_v49 = vld [vmem:[#allocation5 + $0x1058] sm:$0xff] }
 0x97c   : > { %3378 = vmatpush2.msra.mxu0 %v5017_v50  ;;  %3460 = vmatpush2.msra.mxu1 %v5018_v52  ;;  %v5076_v50 = vld [vmem:[#allocation5 + $0x1050] sm:$0xff]  ;;  %v5077_v52 = vld [vmem:[#allocation5 + $0x1048] sm:$0xff] }
 0x97d   : > { %3379 = vmatprep.subr.mxu0 %v5019_v53  ;;  %3461 = vmatprep.subr.mxu1 %v5020_v54  ;;  %v5078_v53 = vld [vmem:[#allocation5 + $0x1040] sm:$0xff]  ;;  %v5079_v54 = vld [vmem:[#allocation5 + $0x1038] sm:$0xff] }
 0x97e   : > { %3380 = vmatpush2.msra.mxu0 %v5021_v3  ;;  %3462 = vmatpush2.msra.mxu1 %v5022_v4  ;;  %v5080_v3 = vld [vmem:[#allocation5 + $0x1030] sm:$0xff]  ;;  %v5081_v4 = vld [vmem:[#allocation5 + $0x1028] sm:$0xff] }
 0x97f   : > { %3381 = vmatprep.subr.mxu0 %v5023_v20  ;;  %3463 = vmatprep.subr.mxu1 %v5024_v41  ;;  %v5082_v20 = vld [vmem:[#allocation5 + $0x1020] sm:$0xff]  ;;  %v5083_v41 = vld [vmem:[#allocation5 + $0x1018] sm:$0xff] }
 0x980   : > { %3382 = vmatpush2.msra.mxu0 %v5025_v57  ;;  %3464 = vmatpush2.msra.mxu1 %v5026_v7  ;;  %v5084_v57 = vld [vmem:[#allocation5 + $0x1010] sm:$0xff]  ;;  %v5085_v7 = vld [vmem:[#allocation5 + $0x1008] sm:$0xff] }
 0x981   : > { %3383 = vmatprep.subr.mxu0 %v5027_v39  ;;  %3465 = vmatprep.subr.mxu1 %v5028_v58  ;;  %v5086_v39 = vld [vmem:[#allocation5 + $0x1000] sm:$0xff]  ;;  %v5087_v58 = vld [vmem:[#allocation5 + $0x11f8] sm:$0xff] }
 0x982   : > { %3384 = vmatpush2.msra.mxu0 %v5029_v33  ;;  %3466 = vmatpush2.msra.mxu1 %v5030_v5  ;;  %v5088_v33 = vld [vmem:[#allocation5 + $0x11f0] sm:$0xff]  ;;  %v5089_v5 = vld [vmem:[#allocation5 + $0x11e8] sm:$0xff] }
 0x983   : > { %3385 = vmatprep.subr.mxu0 %v5031_v25  ;;  %3467 = vmatprep.subr.mxu1 %v5032_v59  ;;  %v5090_v25 = vld [vmem:[#allocation5 + $0x11e0] sm:$0xff]  ;;  %v5091_v59 = vld [vmem:[#allocation5 + $0x11d8] sm:$0xff] }
 0x984   : > { %3386 = vmatpush2.msra.mxu0 %v5033_v6  ;;  %3468 = vmatpush2.msra.mxu1 %v5034_v18  ;;  %v5092_v6 = vld [vmem:[#allocation5 + $0x11d0] sm:$0xff]  ;;  %v5093_v18 = vld [vmem:[#allocation5 + $0x11c8] sm:$0xff] }
 0x985   : > { %3387 = vmatprep.subr.mxu0 %v5035_v11  ;;  %3469 = vmatprep.subr.mxu1 %v5036_v8  ;;  %v5094_v11 = vld [vmem:[#allocation5 + $0x11c0] sm:$0xff]  ;;  %v5095_v8 = vld [vmem:[#allocation5 + $0x11b8] sm:$0xff] }
 0x986   : > { %3388 = vmatpush2.msra.mxu0 %v5037_v12  ;;  %3470 = vmatpush2.msra.mxu1 %v5038_v14  ;;  %v5096_v12 = vld [vmem:[#allocation5 + $0x11b0] sm:$0xff]  ;;  %v5097_v14 = vld [vmem:[#allocation5 + $0x11a8] sm:$0xff] }
 0x987   : > { %3389 = vmatprep.subr.mxu0 %v5039_v26  ;;  %3471 = vmatprep.subr.mxu1 %v5040_v13  ;;  %v5098_v26 = vld [vmem:[#allocation5 + $0x11a0] sm:$0xff]  ;;  %v5099_v13 = vld [vmem:[#allocation5 + $0x1198] sm:$0xff] }
 0x988   : > { %3390 = vmatpush2.msra.mxu0 %v5041_v51  ;;  %3472 = vmatpush2.msra.mxu1 %v5042_v16  ;;  %v5100_v51 = vld [vmem:[#allocation5 + $0x1190] sm:$0xff]  ;;  %v5101_v16 = vld [vmem:[#allocation5 + $0x1188] sm:$0xff] }
 0x989   : > { %3391 = vmatprep.subr.mxu0 %v5043_v55  ;;  %3473 = vmatprep.subr.mxu1 %v5044_v19  ;;  %v5102_v55 = vld [vmem:[#allocation5 + $0x1180] sm:$0xff]  ;;  %v5103_v19 = vld [vmem:[#allocation5 + $0x1178] sm:$0xff] }
 0x98a   : > { %3392 = vmatpush2.msra.mxu0 %v5045_v56  ;;  %3474 = vmatpush2.msra.mxu1 %v5046_v21  ;;  %v5104_v56 = vld [vmem:[#allocation5 + $0x1170] sm:$0xff]  ;;  %v5105_v21 = vld [vmem:[#allocation5 + $0x1168] sm:$0xff] }
 0x98b   : > { %3393 = vmatprep.subr.mxu0 %v5047_v23  ;;  %3475 = vmatprep.subr.mxu1 %v5048_v34  ;;  %v5106_v23 = vld [vmem:[#allocation5 + $0x1160] sm:$0xff]  ;;  %v5107_v34 = vld [vmem:[#allocation5 + $0x1158] sm:$0xff] }
 0x98c   : > { %3394 = vmatpush2.msra.mxu0 %v5049_v24  ;;  %3476 = vmatpush2.msra.mxu1 %v5050_v31  ;;  %v5108_v24 = vld [vmem:[#allocation5 + $0x1150] sm:$0xff]  ;;  %v5109_v31 = vld [vmem:[#allocation5 + $0x1148] sm:$0xff] }
 0x98d   : > { %3395 = vmatprep.subr.mxu0 %v5051_v28  ;;  %3477 = vmatprep.subr.mxu1 %v5052_v29  ;;  %v5110_v28 = vld [vmem:[#allocation5 + $0x1140] sm:$0xff]  ;;  %v5111_v29 = vld [vmem:[#allocation5 + $0x1138] sm:$0xff] }
 0x98e   : > { %3396 = vmatpush2.msra.mxu0 %v5053_v9  ;;  %3478 = vmatpush2.msra.mxu1 %v5054_v37  ;;  %v5113_v9 = vld [vmem:[#allocation5 + $0x1128] sm:$0xff]  ;;  %v5114_v37 = vld [vmem:[#allocation5 + $0x1120] sm:$0xff] }
 0x98f   : > { %3398 = vmatmul.mubr.f32.vlgmr.msra.gmra.mxu0 %v5759_v35  ;;  %3480 = vmatmul.mubr.f32.vlgmr.msra.gmra.mxu1 %v3413_v30  ;;  %v5063_v35 = vld [vmem:[#allocation5 + $0x10b8] sm:$0xff]  ;;  %v5112_v30 = vld [vmem:[#allocation5 + $0x1130] sm:$0xff] }
 0x990   : > { %3497 = vmatprep.subr.mxu0 %v5055_v10  ;;  %3561 = vmatprep.mubr.f32.mxu0 %v3496_v38  ;;  %v5115_v38 = vld [vmem:[#allocation5 + $0x1118] sm:$0xff]  ;;  %v5116_v10 = vld [vmem:[#allocation5 + $0x1110] sm:$0xff] }
 0x991   : > { %3498 = vmatpush1.msra.mxu0 %v5056_v40  ;;  %3717 = vmatprep.mubr.f32.mxu1 %v5249_v17  ;;  %v5067_v17 = vld [vmem:[#allocation5 + $0x1098] sm:$0xff]  ;;  %v5117_v40 = vld [vmem:[#allocation5 + $0x1108] sm:$0xff] }
 0x992   : > { %3499 = vmatprep.subr.mxu0 %v5057_v42  ;;  %v3495_v42 = vmul.f32 %v5786_v27, %v5743_v2 }
 0x993   : > { %3500 = vmatpush1.msra.mxu0 %v5058_v15  ;;  %v5118_v15 = vld [vmem:[#allocation5 + $0x1100] sm:$0xff] }
 0x994   : > { %3501 = vmatprep.subr.mxu0 %v5059_v43  ;;  %v2920_v43 = vpop.f32.mrf.mxu0 }
 0x995   : > { %3502 = vmatpush1.msra.mxu0 %v5060_v44  ;;  %v2991_v44 = vpop.f32.mrf.mxu1 }
 0x996   : > { %3503 = vmatprep.subr.mxu0 %v5061_v45  ;;  %v2922_v45 = vpop.f32.mrf.mxu0 }
 0x997   : > { %3504 = vmatpush1.msra.mxu0 %v5062_v32 }
 0x998   : > { %3505 = vmatprep.subr.mxu0 %v5063_v35  ;;  %v2993_v35 = vpop.f32.mrf.mxu1 }
 0x999   : > { %3506 = vmatpush1.msra.mxu0 %v5064_v46  ;;  %v2992_v46 = vadd.f32 %v2991_v44, %v2920_v43 }
 0x99a   : > { %3507 = vmatprep.subr.mxu0 %v5065_v60 }
 0x99b   : > { %3508 = vmatpush1.msra.mxu0 %v5066_v61  ;;  %v2994_v61 = vadd.f32 %v2993_v35, %v2922_v45 }
 0x99c   : > { %3509 = vmatprep.subr.mxu0 %v5067_v17 }
 0x99d   : > { %3510 = vmatpush1.msra.mxu0 %v5068_v0 }
 0x99e   : > { %3511 = vmatprep.subr.mxu0 %v5069_v62 }
 0x99f   : > { %3512 = vmatpush1.msra.mxu0 %v5070_v63 }
 0x9a0   : > { %3513 = vmatprep.subr.mxu0 %v5071_v36 }
 0x9a1   : > { %3514 = vmatpush1.msra.mxu0 %v5072_v1 }
 0x9a2   : > { %3515 = vmatprep.subr.mxu0 %v5073_v47 }
 0x9a3   : > { %3516 = vmatpush1.msra.mxu0 %v5074_v48 }
 0x9a4   : > { %3517 = vmatprep.subr.mxu0 %v5075_v49 }
 0x9a5   : > { %3518 = vmatpush1.msra.mxu0 %v5076_v50 }
 0x9a6   : > { %3519 = vmatprep.subr.mxu0 %v5077_v52 }
 0x9a7   : > { %3520 = vmatpush1.msra.mxu0 %v5078_v53 }
 0x9a8   : > { %3521 = vmatprep.subr.mxu0 %v5079_v54 }
 0x9a9   : > { %3522 = vmatpush1.msra.mxu0 %v5080_v3 }
 0x9aa   : > { %3523 = vmatprep.subr.mxu0 %v5081_v4 }
 0x9ab   : > { %3524 = vmatpush1.msra.mxu0 %v5082_v20 }
 0x9ac   : > { %3525 = vmatprep.subr.mxu0 %v5083_v41 }
 0x9ad   : > { %3526 = vmatpush1.msra.mxu0 %v5084_v57 }
 0x9ae   : > { %3527 = vmatprep.subr.mxu0 %v5085_v7 }
 0x9af   : > { %3528 = vmatpush1.msra.mxu0 %v5086_v39 }
 0x9b0   : > { %3529 = vmatprep.subr.mxu0 %v5087_v58 }
 0x9b1   : > { %3530 = vmatpush2.msra.mxu0 %v5088_v33 }
 0x9b2   : > { %3531 = vmatprep.subr.mxu0 %v5089_v5  ;;  %v3575_v5 = vpop.permute.xlu0 %3574 }
 0x9b3   : > { %3532 = vmatpush2.msra.mxu0 %v5090_v25 }
 0x9b4   : > { %3533 = vmatprep.subr.mxu0 %v5091_v59 }
 0x9b5   : > { %3534 = vmatpush2.msra.mxu0 %v5092_v6 }
 0x9b6   : > { %3535 = vmatprep.subr.mxu0 %v5093_v18 }
 0x9b7   : > { %3536 = vmatpush2.msra.mxu0 %v5094_v11 }
 0x9b8   : > { %3537 = vmatprep.subr.mxu0 %v5095_v8 }
 0x9b9   : > { %3538 = vmatpush2.msra.mxu0 %v5096_v12 }
 0x9ba   : > { %3539 = vmatprep.subr.mxu0 %v5097_v14 }
 0x9bb   : > { %3540 = vmatpush2.msra.mxu0 %v5098_v26 }
 0x9bc   : > { %3541 = vmatprep.subr.mxu0 %v5099_v13 }
 0x9bd   : > { %3542 = vmatpush2.msra.mxu0 %v5100_v51 }
 0x9be   : > { %3543 = vmatprep.subr.mxu0 %v5101_v16 }
 0x9bf   : > { %3544 = vmatpush2.msra.mxu0 %v5102_v55 }
 0x9c0   : > { %3545 = vmatprep.subr.mxu0 %v5103_v19 }
 0x9c1   : > { %3546 = vmatpush2.msra.mxu0 %v5104_v56 }
 0x9c2   : > { %3547 = vmatprep.subr.mxu0 %v5105_v21 }
 0x9c3   : > { %3548 = vmatpush2.msra.mxu0 %v5106_v23 }
 0x9c4   : > { %3549 = vmatprep.subr.mxu0 %v5107_v34  ;;  %v3872_v34 = vld [vmem:[%s5861_s4 + $0x8] sm:$0xf] }
 0x9c5   : > { %3550 = vmatpush2.msra.mxu0 %v5108_v24 }
 0x9c6   : > { %3551 = vmatprep.subr.mxu0 %v5109_v31 }
 0x9c7   : > { %3552 = vmatpush2.msra.mxu0 %v5110_v28 }
 0x9c8   : > { %3553 = vmatprep.subr.mxu0 %v5111_v29 }
 0x9c9   : > { %3554 = vmatpush2.msra.mxu0 %v5112_v30 }
 0x9ca   : > { %3555 = vmatprep.subr.mxu0 %v5113_v9 }
 0x9cb   : > { %3556 = vmatpush2.msra.mxu0 %v5114_v37  ;;  %v3071_v32 = vpop.f32.mrf.mxu0  ;;  %v3153_v0 = vpop.f32.mrf.mxu1 }
 0x9cc   : > { %3557 = vmatprep.subr.mxu0 %v5115_v38  ;;  %v3076_v17 = vadd.f32 %v3071_v32, %v2992_v46  ;;  %v3874_v46 = vld [vmem:[%s5863_s6 + $0x8] sm:$0xf] }
 0x9cd   : > { %3558 = vmatpush2.msra.mxu0 %v5116_v10  ;;  %v3073_v60 = vpop.f32.mrf.mxu0  ;;  %v3155_v1 = vpop.f32.mrf.mxu1 }
 0x9ce   : > { %3559 = vmatprep.subr.mxu0 %v5117_v40  ;;  %v3077_v63 = vadd.f32 %v3073_v60, %v2994_v61  ;;  %v3158_v36 = vadd.f32 %v3153_v0, %v3076_v17  ;;  %v3873_v40 = vld [vmem:[%s5862_s5 + $0x2] sm:$0x1]  ;;  %v3875_v61 = vld [vmem:[%s5864_s7 + $0x8] sm:$0xf] }
 0x9cf   : > { %3560 = vmatpush2.msra.mxu0 %v5118_v15 }
 0x9d0   : > { %3562 = vmatmul.mubr.f32.vlgmr.msra.gmra.mxu0 %v3495_v42  ;;  %v3159_v48 = vadd.f32 %v3155_v1, %v3077_v63 }
 0xa0d   : > { %v3235_v62 = vpop.f32.mrf.mxu0  ;;  %v3317_v27 = vpop.f32.mrf.mxu1 }
 0xa0e   : > { %v3240_v2 = vadd.f32 %v3235_v62, %v3158_v36 }
 0xa0f   : > { %v3237_v47 = vpop.f32.mrf.mxu0  ;;  %v3319_v53 = vpop.f32.mrf.mxu1 }
 0xa10   : > { %v3241_v50 = vadd.f32 %v3237_v47, %v3159_v48  ;;  %v3322_v52 = vadd.f32 %v3317_v27, %v3240_v2  ;;  %v3877_v47 = vld [vmem:[%s5866_s9 + $0x10] sm:$0xff] }
 0xa11   : > { %v3876_v27 = vld [vmem:[%s5865_s8 + $0x10] sm:$0xff] }
 0xa12   : > { %v3323_v3 = vadd.f32 %v3319_v53, %v3241_v50 }
 0xa4f   : > { %v3399_v49 = vpop.f32.mrf.mxu0  ;;  %v3481_v20 = vpop.f32.mrf.mxu1 }
 0xa50   : > { %v3404_v4 = vadd.f32 %v3399_v49, %v3322_v52 }
 0xa51   : > { %v3401_v54 = vpop.f32.mrf.mxu0  ;;  %v3483_v7 = vpop.f32.mrf.mxu1 }
 0xa52   : > { %v3405_v41 = vadd.f32 %v3401_v54, %v3323_v3  ;;  %v3486_v57 = vadd.f32 %v3481_v20, %v3404_v4 }
 0xa54   : > { %v3487_v58 = vadd.f32 %v3483_v7, %v3405_v41 }
 0xa90   : > { %v3563_v39 = vpop.f32.mrf.mxu0 }
 0xa91   : > { %v3568_v33 = vadd.f32 %v3563_v39, %v3486_v57 }
 0xa92   : > { %v3565_v25 = vpop.f32.mrf.mxu0 }
 0xa93   : > { %v3577_v59 = vadd.f32 %v3575_v5, %v3568_v33  ;;  %v3569_v6 = vadd.f32 %v3565_v25, %v3487_v58 }
 0xa95   : > { %v3579_v18 = vmul.f32 0.5, %v3577_v59  ;;  %v3578_v11 = vadd.f32 %v3575_v5, %v3569_v6 }
 0xa97   : > { %3969 = vtanh.f32 %v3579_v18  ;;  %v3580_v8 = vmul.f32 0.5, %v3578_v11 }
 0xa99   : > { %3971 = vtanh.f32 %v3580_v8 }
 0xaa4   : > { %v3970_v12 = vpop.eup %3969 }
 0xaa5   : > { %v3583_v14 = vadd.f32 1.0, %v3970_v12 }
 0xaa6   : > { %v3972_v26 = vpop.eup %3971 }
 0xaa7   : > { %v3584_v13 = vadd.f32 1.0, %v3972_v26  ;;  %v3585_v51 = vmul.f32 0.5, %v3583_v14 }
 0xaa9   : > { %v3586_v16 = vmul.f32 0.5, %v3584_v13  ;;  %v3587_v55 = vmul.f32 %v3585_v51, %v3577_v59 }
 0xaab   : > { %v3588_v19 = vmul.f32 %v3586_v16, %v3578_v11  ;;  %v3589_v56 = vsel %vm1808_vm0, %v3587_v55, 0.0 }
 0xaad   : > { %v3590_v21 = vsel %vm1808_vm0, %v3588_v19, 0.0 }
 0xaae   : > { %v3591_v23 = vadd.f32 %v3590_v21, %v3589_v56 }
 0xab0   : > { %3592 = vadd.xlane.f32.xlu0 %v3591_v23 }
 0xb39   : > { %v3593_v24 = vpop.xlane.xlu0 %3592 }
 0xb3a   : > { %v3594_v31 = vmul.f32 0.00390625, %v3593_v24 }
 0xb3c   : > { %v3597_v28 = vmul.f32 %v3872_v34, %v3594_v31 }
 0xb3e   : > { %v3598_v29 = vsel %vm1818_vm1, %v3597_v28, 0.0 }
 0xb3f   : > { %v3599_v30 = vrot.slane %v3598_v29, 4 }
 0xb41   : > { %v3600_v9 = vadd.f32 %v3599_v30, %v3598_v29 }
 0xb43   : > { %v3601_v37 = vrot.slane %v3600_v9, 2 }
 0xb45   : > { %v3602_v38 = vadd.f32 %v3601_v37, %v3600_v9 }
 0xb47   : > { %v3603_v10 = vrot.slane %v3602_v38, 1 }
 0xb49   : > { %v3604_v42 = vadd.f32 %v3603_v10, %v3602_v38 }
 0xb4b   : > { %v3607_v15 = vadd.f32 %v3873_v40, %v3604_v42 }
 0xb4d   : > { %v3608_v43 = vmul.f32 0.5, %v3607_v15 }
 0xb4f   : > { %3973 = vtanh.f32 %v3608_v43 }
 0xb5c   : > { %v3974_v44 = vpop.eup %3973 }
 0xb5d   : > { %v3610_v45 = vadd.f32 1.0, %v3974_v44 }
 0xb5f   : > { %v3611_v32 = vmul.f32 0.5, %v3610_v45 }
 0xb61   : > { %v3612_v35 = vmul.f32 %v3611_v32, %v3607_v15 }
 0xb63   : > { %v3618_v60 = vrot.slane %v3612_v35, %v5535_v22 }
 0xb65   : > { %v3619_v17 = vmul.f32 %v3874_v46, %v3618_v60 }
 0xb67   : > { %v3623_v0 = vadd.f32 %v3875_v61, %v3619_v17 }
 0xb69   : > { %v3624_v62 = vmul.f32 0.5, %v3623_v0 }
 0xb6b   : > { %3975 = vtanh.f32 %v3624_v62 }
 0xb78   : > { %v3976_v63 = vpop.eup %3975 }
 0xb79   : > { %v3626_v36 = vadd.f32 1.0, %v3976_v63 }
 0xb7b   : > { %v3627_v1 = vmul.f32 0.5, %v3626_v36 }
 0xb7d   : > { %3630 = vperm.xlu1 %3951, %v3627_v1  }
 0xb81   : > { %3641 = vperm.xlu1 %3951, %v3877_v47  }
 0xbf8   : > { %v3631_v22 = vpop.permute.xlu1 %3630 }
 0xbf9   : > { %v3633_v48 = vmul.f32 %v3631_v22, %v3587_v55  ;;  %v3634_v2 = vmul.f32 %v3631_v22, %v3588_v19 }
 0xbfb   : > { %3878 = vmatprep.subr.msk.mxu1 %vm1808_vm0, %v3634_v2 }
 0xbfc   : > { %3879 = vmatpush1.msk.msra.mxu1 %vm1808_vm0, %v3633_v48  ;;  %v3642_v49 = vpop.permute.xlu1 %3641 }
 0xbfd   : > { %3880 = vmatmul.mubr.msk.f32.vlgmr.msra.gmra.mxu1 %vm1860_vm2, %v3876_v27 }
 0xcbd   : > { %v3719_v50 = vpop.f32.mrf.mxu1 }
 0xcbe   : > { %v3720_v52 = vadd.f32 %v3719_v50, %v3642_v49 }
 0xcbf   : > { %v3721_v53 = vpop.f32.mrf.mxu1 }
 0xcc0   : > { %3724 = vst [vmem:[%s390_s23] sm:$0xff] %v3720_v52  ;;  %v3722_v54 = vadd.f32 %v3721_v53, %v3642_v49 }
 0xcc2   : > { %3725 = vst [vmem:[%s390_s23 + $0x8] sm:$0xff] %v3722_v54 }
 0xcc3   : > { %5186 = shalt.err (!%p5183_p0)
}
 0xcc4   : > { %s5187_s27 = scalar_lea.hbm %s3739_s21, 256  ;;  %s5191_s12 = scalar_lea.hbm %s5867_s10, 512 }
 0xcc5   : > { %p5188_p5 = scmp.ne.s32.totalorder %s3739_s21, %s5187_s27  ;;  %p5192_p1 = scmp.lt.s32.totalorder %s3739_s21, %s5867_s10 }
 0xcc6   : > { %p5193_p4 = scmp.lt.s32.totalorder %s5191_s12, %s5187_s27 }
 0xcc7   : > { %p5189_p9 = pnand %p5188_p5, %p5893_p3 }
 0xcc8   : > { %p5194_p6 = por %p5193_p4, %p5192_p1 }
 0xcc9   : > { %p5190_p12 = pneg %p5189_p9 }
 0xccb   : > { %p5195_p8 = pnand %p5194_p6, %p5190_p12 }
 0xccd   : > { %5198 = shalt.err (!%p5195_p8)
}
 0xcce   : > { %3894 = dma.vmem_to_hbm [thread:$0]  (%p5893_p3), %s3742_s28, 256, %s3739_s21, %s3727_s18  }
 0xccf PF: > { %s5894_s1 = sld [smem:[#allocation11_spill]]  ;;  %p5897_p7 = scmp.ge.s32.totalorder %s5241_s16, 2 }
 0xcd0   : > { %s5895_s23 = sld [smem:[#allocation12_spill]] }
 0xcd5   : > { %s3753_s13 = sand.u32 1, %s5894_s1  }
 0xcd6   : > { %p5896_p11 = scmp.ne.s32.totalorder %s5895_s23, 0  ;;  %s3754_s25 = scalar_lea.sflag [#allocation4], %s3753_s13 }
 0xcd8   : > { %p3905_p10 = pnand %p5897_p7, %p5896_p11 }
 0xcda   : > { %p3906_p2 = pneg %p3905_p10 }
 0xcdc   : > { %5224 = dma.done.wait (%p3906_p2), %s3754_s25, 256  }
 0xcdd   : > { %5226 = vsyncadd (%p3906_p2), %s3754_s25, 4294967040  ;;  %s5898_s16 = sld [smem:[#allocation13_spill]]  ;;  %s5900_s13 = smov %s5233_s14 }
 0xcde   : > { %s5899_s11 = sld [smem:[#allocation14_spill]]  ;;  %s5901_s14 = smov %s5237_s15 }
 0xce3   : > { %p24_p13 = scmp.ge.s32.totalorder %s5898_s16, 4  }
 0xce4   : > { %s5902_s15 = smov %s5899_s11 }
 0xce5   :  { %26 = sbr.rel (!%p24_p13) target bundleno = 8 (0x8), region = 157 }
 0xcea   :  { %3759 = vsyncpa [#allocation3], 1 }
 0xceb   :  { %3761 = vsyncpa [#allocation3 + $0x1], 1 }
 0xcec   :  { %3762 = vsyncpa [#allocation6], 1 }
 0xced   :  { %3763 = vsyncpa [#allocation4], 1 }
 0xcee   :  { %3765 = vsyncpa [#allocation4 + $0x1], 1 }

</bundles_post_ra>
